<compile_context>
chip_gen: v5e
topology: v5e:2x2
jax: 0.10.0
libtpu: 0.0.40
codegen_flags: <defaults>
</compile_context>

<pallas_src>
import functools
import math

import jax
import jax.numpy as jnp
from jax.experimental import pallas as pl
from jax.experimental.pallas import tpu as pltpu

BN_EPS = 1e-5
LANE = 128
VMEM_LIMIT = 64 * 1024 * 1024


def _pad_to_lane(c):
    return ((c + LANE - 1) // LANE) * LANE


# ----------------------------- Pallas kernels ------------------------------

def _bn_stats_kernel(x_ref, stats_ref):
    """Per-channel sum / sum-of-squares, accumulated across the row-tile grid."""
    @pl.when(pl.program_id(0) == 0)
    def _():
        stats_ref[...] = jnp.zeros_like(stats_ref)

    x = x_ref[...]                                              # (TM, C) f32
    stats_ref[0:1, :] += jnp.sum(x, axis=0, keepdims=True)
    stats_ref[1:2, :] += jnp.sum(x * x, axis=0, keepdims=True)


def _fused_conv_kernel(*refs, H, W, has_sc, has_res):
    """Fused (BN-affine + ReLU) -> 3x3 stride-1 'same' conv [-> +residual]
    [+ 1x1 shortcut on the pre-activation], one image per grid step.

    The padded pre-activation lives in a zero-framed VMEM scratch laid out as
    ((H+2)*W + 2, Cin) so that every 3x3 tap is a *contiguous* (H*W, Cin) slice;
    wrap-around columns (w==0 for left taps, w==W-1 for right taps) are masked
    to zero before the MXU matmul.
    """
    refs = list(refs)
    x_ref, scale_ref, shift_ref, w_ref = refs[0], refs[1], refs[2], refs[3]
    idx = 4
    wsc_ref = None
    if has_sc:
        wsc_ref = refs[idx]; idx += 1
    res_ref = None
    if has_res:
        res_ref = refs[idx]; idx += 1
    y_ref = refs[idx]; idx += 1
    sc_ref = None
    if has_sc:
        sc_ref = refs[idx]; idx += 1
    op_ref = refs[idx]                                          # VMEM scratch

    HW = H * W
    cin = op_ref.shape[-1]
    cout = y_ref.shape[-1]

    # ---- Prologue: folded BatchNorm affine + ReLU (f32), cast to bf16, write into the
    #      zero-framed scratch.  Borders are re-zeroed every step (megacore-safe).
    o = jnp.maximum(x_ref[...] * scale_ref[...] + shift_ref[...], 0.0)
    border = jnp.zeros((W + 1, cin), op_ref.dtype)
    op_ref[0:W + 1, :] = border
    op_ref[W + 1 + HW:HW + 2 * W + 2, :] = border
    op_ref[W + 1:W + 1 + HW, :] = o.astype(op_ref.dtype)

    # ---- Wrap-around masks for the left / right tap columns.
    col = jax.lax.broadcasted_iota(jnp.int32, (HW, cin), 0) % W
    not_left = col != 0
    not_right = col != (W - 1)

    # ---- 3x3 conv as 9 accumulated taps (no im2col), bf16 MXU, f32 accumulation.
    acc = jnp.zeros((HW, cout), jnp.float32)
    for kh in range(3):
        for kw in range(3):
            tap = op_ref[kh * W + kw:kh * W + kw + HW, :]       # contiguous (HW, cin)
            if kw == 0:
                tap = jnp.where(not_left, tap, 0)
            elif kw == 2:
                tap = jnp.where(not_right, tap, 0)
            acc += jnp.dot(tap, w_ref[kh * 3 + kw],
                           preferred_element_type=jnp.float32)

    # ---- Epilogue: fused residual add.
    if has_res:
        acc = acc + res_ref[...]
    y_ref[...] = acc

    # ---- Fused 1x1 convShortcut on the pre-activation (center tap already in VMEM).
    if has_sc:
        center = op_ref[W + 1:W + 1 + HW, :]
        sc_ref[...] = jnp.dot(center, wsc_ref[...],
                              preferred_element_type=jnp.float32)


# ------------------------------- wrappers -----------------------------------

def bn_stats(x_flat):
    """x_flat: (N, HW, C) f32 -> (2, C) f32 holding (sum, sum of squares)."""
    N, HW, C = x_flat.shape
    xm = x_flat.reshape(N * HW, C)
    return pl.pallas_call(
        _bn_stats_kernel,
        grid=(N,),
        in_specs=[pl.BlockSpec((HW, C), lambda i: (i, 0))],
        out_specs=pl.BlockSpec((2, C), lambda i: (0, 0)),
        out_shape=jax.ShapeDtypeStruct((2, C), jnp.float32),
        compiler_params=pltpu.CompilerParams(
            dimension_semantics=("arbitrary",),
            vmem_limit_bytes=VMEM_LIMIT),
        cost_estimate=pl.CostEstimate(flops=2 * N * HW * C, transcendentals=0,
                                      bytes_accessed=4 * (N * HW * C + 2 * C)),
    )(xm)


def _bn_affine(stats, gamma, beta, count):
    """Fold training-mode BatchNorm (biased variance) into per-channel (scale, shift)."""
    mean = stats[0] / count
    var = jnp.maximum(stats[1] / count - mean * mean, 0.0)
    scale = gamma * jax.lax.rsqrt(var + BN_EPS)
    shift = beta - mean * scale
    return scale.reshape(1, -1), shift.reshape(1, -1)


def fused_conv3x3(x_flat, scale, shift, w9, H, W, wsc=None, residual=None):
    """Fused BN+ReLU prologue -> 3x3 stride-1 'same' conv (+ residual / 1x1 shortcut)."""
    N, HW, Cpi = x_flat.shape
    Cpo = w9.shape[-1]
    has_sc = wsc is not None
    has_res = residual is not None

    in_specs = [
        pl.BlockSpec((None, HW, Cpi), lambda n: (n, 0, 0)),
        pl.BlockSpec((1, Cpi), lambda n: (0, 0)),
        pl.BlockSpec((1, Cpi), lambda n: (0, 0)),
        pl.BlockSpec((9, Cpi, Cpo), lambda n: (0, 0, 0)),
    ]
    inputs = [x_flat, scale, shift, w9]
    if has_sc:
        in_specs.append(pl.BlockSpec((Cpi, Cpo), lambda n: (0, 0)))
        inputs.append(wsc)
    if has_res:
        in_specs.append(pl.BlockSpec((None, HW, Cpo), lambda n: (n, 0, 0)))
        inputs.append(residual)

    out_specs = [pl.BlockSpec((None, HW, Cpo), lambda n: (n, 0, 0))]
    out_shape = [jax.ShapeDtypeStruct((N, HW, Cpo), jnp.float32)]
    if has_sc:
        out_specs.append(pl.BlockSpec((None, HW, Cpo), lambda n: (n, 0, 0)))
        out_shape.append(jax.ShapeDtypeStruct((N, HW, Cpo), jnp.float32))

    flops = 2 * N * HW * Cpi * Cpo * (9 + (1 if has_sc else 0))
    bytes_accessed = (4 * (x_flat.size + N * HW * Cpo * (1 + int(has_sc) + int(has_res)))
                      + 2 * (w9.size + (wsc.size if has_sc else 0)))

    kernel = functools.partial(_fused_conv_kernel, H=H, W=W,
                               has_sc=has_sc, has_res=has_res)
    outs = pl.pallas_call(
        kernel,
        grid=(N,),
        in_specs=in_specs,
        out_specs=out_specs,
        out_shape=out_shape,
        scratch_shapes=[pltpu.VMEM(((H + 2) * W + 2, Cpi), jnp.bfloat16)],
        compiler_params=pltpu.CompilerParams(
            dimension_semantics=("parallel",),
            vmem_limit_bytes=VMEM_LIMIT),
        cost_estimate=pl.CostEstimate(flops=int(flops), transcendentals=0,
                                      bytes_accessed=int(bytes_accessed)),
    )(*inputs)
    if has_sc:
        return outs[0], outs[1]
    return outs[0], None


# --------------------------- NetworkBlock forward ----------------------------

def basic_block_forward(x, p, stride):
    """x: (N, H, W, Cp_in) f32 with lane-padded channels."""
    N, H, W, Cpi = x.shape
    Cpo = p["w9_1"].shape[-1]
    equal = "wsc" not in p

    xf = x.reshape(N, H * W, Cpi)

    # BN1 batch statistics -> folded affine, applied inside the conv1 prologue.
    scale1, shift1 = _bn_affine(bn_stats(xf), p["gamma1"], p["beta1"], N * H * W)

    # conv1 (+ fused BN1/ReLU prologue, + fused 1x1 shortcut when in != out planes).
    h_f, sc_f = fused_conv3x3(xf, scale1, shift1, p["w9_1"], H, W,
                              wsc=None if equal else p["wsc"])

    # Stride handling: the kernel computes the stride-1 'same' conv; decimate outside.
    h = h_f.reshape(N, H, W, Cpo)
    if stride > 1:
        h = h[:, ::stride, ::stride, :]
        if sc_f is not None:
            sc_f = (sc_f.reshape(N, H, W, Cpo)[:, ::stride, ::stride, :]
                    .reshape(N, -1, Cpo))
    elif sc_f is not None:
        sc_f = sc_f.reshape(N, -1, Cpo)
    Ho, Wo = h.shape[1], h.shape[2]
    hf = h.reshape(N, Ho * Wo, Cpo)

    # BN2 batch statistics -> folded affine, applied inside the conv2 prologue.
    scale2, shift2 = _bn_affine(bn_stats(hf), p["gamma2"], p["beta2"], N * Ho * Wo)

    # Residual: identity when in==out (stride 1), else the fused 1x1 shortcut output.
    # dropRate == 0.0 (module default) -> F.dropout is a no-op.
    res = xf if equal else sc_f
    out_f, _ = fused_conv3x3(hf, scale2, shift2, p["w9_2"], Ho, Wo, residual=res)
    return out_f.reshape(N, Ho, Wo, Cpo)


def network_block_forward(x_nchw, kparams, stride, out_planes):
    N, Cin, H, W = x_nchw.shape
    cpi = _pad_to_lane(Cin)
    x = jnp.transpose(x_nchw, (0, 2, 3, 1)).astype(jnp.float32)        # NCHW -> NHWC
    x = jnp.pad(x, ((0, 0), (0, 0), (0, 0), (0, cpi - Cin)))           # lane-dense channels
    for i, p in enumerate(kparams):
        x = basic_block_forward(x, p, stride if i == 0 else 1)
    x = x[..., :out_planes]
    return jnp.transpose(x, (0, 3, 1, 2))                              # NHWC -> NCHW


# ------------------------------- parameters ----------------------------------

def init_network_block_params(key, nb_layers, in_planes, out_planes):
    """Random parameters mirroring the PyTorch BasicBlock stack (f32, unpadded)."""
    params = []
    for i in range(nb_layers):
        cin = in_planes if i == 0 else out_planes
        key, k1, k2, k3, k4, k5, k6, k7 = jax.random.split(key, 8)
        p = {
            "gamma1": 1.0 + 0.1 * jax.random.normal(k1, (cin,), jnp.float32),
            "beta1": 0.1 * jax.random.normal(k2, (cin,), jnp.float32),
            "w1": jax.random.normal(k3, (3, 3, cin, out_planes), jnp.float32)
                  / math.sqrt(9.0 * cin),
            "gamma2": 1.0 + 0.1 * jax.random.normal(k4, (out_planes,), jnp.float32),
            "beta2": 0.1 * jax.random.normal(k5, (out_planes,), jnp.float32),
            "w2": jax.random.normal(k6, (3, 3, out_planes, out_planes), jnp.float32)
                  / math.sqrt(9.0 * out_planes),
        }
        if cin != out_planes:
            p["wsc"] = (jax.random.normal(k7, (cin, out_planes), jnp.float32)
                        / math.sqrt(float(cin)))
        params.append(p)
    return params


def prepare_params(params, in_planes, out_planes):
    """Lane-pad channels to multiples of 128 and pre-cast conv weights to bf16."""
    cpo = _pad_to_lane(out_planes)
    prepped = []
    for i, p in enumerate(params):
        cin = in_planes if i == 0 else out_planes
        cpi = _pad_to_lane(cin)

        def pad_vec(v, cp):
            return jnp.pad(v, (0, cp - v.shape[0])).astype(jnp.float32)

        def pad_w9(w, ci, co):
            w = jnp.pad(w, ((0, 0), (0, 0),
                            (0, ci - w.shape[2]), (0, co - w.shape[3])))
            return w.reshape(9, ci, co).astype(jnp.bfloat16)

        q = {
            "gamma1": pad_vec(p["gamma1"], cpi),
            "beta1": pad_vec(p["beta1"], cpi),
            "w9_1": pad_w9(p["w1"], cpi, cpo),
            "gamma2": pad_vec(p["gamma2"], cpo),
            "beta2": pad_vec(p["beta2"], cpo),
            "w9_2": pad_w9(p["w2"], cpo, cpo),
        }
        if "wsc" in p:
            q["wsc"] = jnp.pad(p["wsc"], ((0, cpi - cin), (0, cpo - out_planes))
                               ).astype(jnp.bfloat16)
        prepped.append(q)
    return prepped


# ------------------------ pure-JAX reference (for check) ---------------------

def _ref_bn_relu(x, gamma, beta):
    mean = jnp.mean(x, axis=(0, 1, 2))
    var = jnp.mean((x - mean) ** 2, axis=(0, 1, 2))
    return jnp.maximum((x - mean) * jax.lax.rsqrt(var + BN_EPS) * gamma + beta, 0.0)


def _ref_conv(x, w, stride, padding):
    return jax.lax.conv_general_dilated(
        x, w, window_strides=(stride, stride), padding=padding,
        dimension_numbers=("NHWC", "HWIO", "NHWC"))


def _ref_basic_block(x, p, stride):
    equal = "wsc" not in p
    o = _ref_bn_relu(x, p["gamma1"], p["beta1"])
    h = _ref_conv(o, p["w1"], stride, ((1, 1), (1, 1)))
    h = _ref_bn_relu(h, p["gamma2"], p["beta2"])
    out = _ref_conv(h, p["w2"], 1, ((1, 1), (1, 1)))
    res = x if equal else _ref_conv(o, p["wsc"][None, None], stride, ((0, 0), (0, 0)))
    return out + res


def network_block_reference(x_nchw, params, stride):
    x = jnp.transpose(x_nchw, (0, 2, 3, 1)).astype(jnp.float32)
    for i, p in enumerate(params):
        x = _ref_basic_block(x, p, stride if i == 0 else 1)
    return jnp.transpose(x, (0, 3, 1, 2))


# ---------------------------------- main -------------------------------------

if __name__ == "__main__":
    nb_layers, in_planes, out_planes, stride = 2, 4, 8, 2
    N, H, W = 2, 16, 16

    key = jax.random.PRNGKey(0)
    kx, kp = jax.random.split(key)
    x = jax.random.normal(kx, (N, in_planes, H, W), jnp.float32)
    params = init_network_block_params(kp, nb_layers, in_planes, out_planes)
    kparams = prepare_params(params, in_planes, out_planes)

    fwd = jax.jit(functools.partial(network_block_forward,
                                    stride=stride, out_planes=out_planes))
    out = fwd(x, kparams)
    jax.block_until_ready(out)

    assert out.shape == (N, out_planes, H // stride, W // stride), out.shape
    assert out.dtype == jnp.float32

    # Numerical check against a pure-JAX (XLA) reference of the same module
    # (bf16 MXU inputs with f32 accumulation -> loose tolerance).
    ref = network_block_reference(x, params, stride)
    err = float(jnp.max(jnp.abs(out - ref)))
    assert err < 8e-2, f"max abs error vs reference: {err}"

    print("KERNEL_OK")
</pallas_src>

<mosaic_0001>
module attributes {stable_mosaic.version = 11 : i64} {
  func.func @_bn_stats_kernel(%arg0: i32, %arg1: memref<256x128xf32, #tpu.memory_space<vmem>>, %arg2: memref<2x128xf32, #tpu.memory_space<vmem>>) attributes {dimension_semantics = [#tpu.dimension_semantics<arbitrary>], iteration_bounds = array<i64: 2>, scalar_prefetch = 0 : i64, scratch_operands = 0 : i64, tpu.core_type = #tpu.core_type<tc>, window_params = [{transform_indices = @transform_0, window_bounds = array<i64: 256, 128>}, {pipeline_mode = #tpu.pipeline_mode<synchronous>, transform_indices = @transform_1, window_bounds = array<i64: 2, 128>}]} {
    %c0_i32 = arith.constant 0 : i32
    %0 = arith.cmpi eq, %arg0, %c0_i32 : i32
    %1 = arith.extui %0 : i1 to i32
    %c0_i32_0 = arith.constant 0 : i32
    %2 = arith.cmpi ne, %1, %c0_i32_0 : i32
    scf.if %2 {
      %cst_10 = arith.constant 0.000000e+00 : f32
      %15 = vector.broadcast %cst_10 : f32 to vector<2x128xf32>
      %c0_11 = arith.constant 0 : index
      %c0_12 = arith.constant 0 : index
      %16 = vector.load %arg2[%c0_11, %c0_12] : memref<2x128xf32, #tpu.memory_space<vmem>>, vector<2x128xf32>
      tpu.vector_store %arg2[%c0_11, %c0_12], %15 {strides = array<i32>} : memref<2x128xf32, #tpu.memory_space<vmem>>, vector<2x128xf32>,
    } else {
    }
    %c0 = arith.constant 0 : index
    %c0_1 = arith.constant 0 : index
    %3 = vector.load %arg1[%c0, %c0_1] : memref<256x128xf32, #tpu.memory_space<vmem>>, vector<256x128xf32>
    %c0_2 = arith.constant 0 : index
    %c0_3 = arith.constant 0 : index
    %4 = vector.load %arg2[%c0_2, %c0_3] : memref<2x128xf32, #tpu.memory_space<vmem>>, vector<1x128xf32>
    %cst = arith.constant dense<0.000000e+00> : vector<128xf32>
    %5 = vector.multi_reduction <add>, %3, %cst [0] : vector<256x128xf32> to vector<128xf32>
    %6 = vector.shape_cast %5 : vector<128xf32> to vector<1x128xf32>
    %7 = arith.addf %4, %6 : vector<1x128xf32>
    %c0_4 = arith.constant 0 : index
    %c0_5 = arith.constant 0 : index
    %8 = vector.load %arg2[%c0_4, %c0_5] : memref<2x128xf32, #tpu.memory_space<vmem>>, vector<1x128xf32>
    tpu.vector_store %arg2[%c0_4, %c0_5], %7 {strides = array<i32>} : memref<2x128xf32, #tpu.memory_space<vmem>>, vector<1x128xf32>,
    %c1 = arith.constant 1 : index
    %c0_6 = arith.constant 0 : index
    %9 = vector.load %arg2[%c1, %c0_6] : memref<2x128xf32, #tpu.memory_space<vmem>>, vector<1x128xf32>
    %10 = arith.mulf %3, %3 : vector<256x128xf32>
    %cst_7 = arith.constant dense<0.000000e+00> : vector<128xf32>
    %11 = vector.multi_reduction <add>, %10, %cst_7 [0] : vector<256x128xf32> to vector<128xf32>
    %12 = vector.shape_cast %11 : vector<128xf32> to vector<1x128xf32>
    %13 = arith.addf %9, %12 : vector<1x128xf32>
    %c1_8 = arith.constant 1 : index
    %c0_9 = arith.constant 0 : index
    %14 = vector.load %arg2[%c1_8, %c0_9] : memref<2x128xf32, #tpu.memory_space<vmem>>, vector<1x128xf32>
    tpu.vector_store %arg2[%c1_8, %c0_9], %13 {strides = array<i32>} : memref<2x128xf32, #tpu.memory_space<vmem>>, vector<1x128xf32>,
    return
  }
  func.func @transform_0(%arg0: i32) -> (i32, i32) {
    %c0_i32 = arith.constant 0 : i32
    %c0_i32_0 = arith.constant 0 : i32
    return %arg0, %c0_i32 : i32, i32
  }
  func.func @transform_1(%arg0: i32) -> (i32, i32) {
    %c0_i32 = arith.constant 0 : i32
    %c0_i32_0 = arith.constant 0 : i32
    %c0_i32_1 = arith.constant 0 : i32
    return %c0_i32, %c0_i32_0 : i32, i32
  }
}

module attributes {stable_mosaic.version = 11 : i64} {
  func.func @_fused_conv_kernel(%arg0: i32, %arg1: memref<1x256x128xf32, #tpu.memory_space<vmem>>, %arg2: memref<1x128xf32, #tpu.memory_space<vmem>>, %arg3: memref<1x128xf32, #tpu.memory_space<vmem>>, %arg4: memref<9x128x128xbf16, #tpu.memory_space<vmem>>, %arg5: memref<128x128xbf16, #tpu.memory_space<vmem>>, %arg6: memref<1x256x128xf32, #tpu.memory_space<vmem>>, %arg7: memref<1x256x128xf32, #tpu.memory_space<vmem>>, %arg8: memref<290x128xbf16, #tpu.memory_space<vmem>>) attributes {dimension_semantics = [#tpu.dimension_semantics<parallel>], iteration_bounds = array<i64: 2>, scalar_prefetch = 0 : i64, scratch_operands = 1 : i64, tpu.core_type = #tpu.core_type<tc>, window_params = [{transform_indices = @transform_0, window_bounds = array<i64: 1, 256, 128>}, {pipeline_mode = #tpu.pipeline_mode<synchronous>, transform_indices = @transform_1, window_bounds = array<i64: 1, 128>}, {pipeline_mode = #tpu.pipeline_mode<synchronous>, transform_indices = @transform_2, window_bounds = array<i64: 1, 128>}, {pipeline_mode = #tpu.pipeline_mode<synchronous>, transform_indices = @transform_3, window_bounds = array<i64: 9, 128, 128>}, {pipeline_mode = #tpu.pipeline_mode<synchronous>, transform_indices = @transform_4, window_bounds = array<i64: 128, 128>}, {transform_indices = @transform_5, window_bounds = array<i64: 1, 256, 128>}, {transform_indices = @transform_6, window_bounds = array<i64: 1, 256, 128>}]} {
    %c0 = arith.constant 0 : index
    %c0_0 = arith.constant 0 : index
    %c0_1 = arith.constant 0 : index
    %0 = vector.load %arg1[%c0, %c0_0, %c0_1] : memref<1x256x128xf32, #tpu.memory_space<vmem>>, vector<1x256x128xf32>
    %1 = vector.shape_cast %0 : vector<1x256x128xf32> to vector<256x128xf32>
    %c0_2 = arith.constant 0 : index
    %c0_3 = arith.constant 0 : index
    %2 = vector.load %arg2[%c0_2, %c0_3] : memref<1x128xf32, #tpu.memory_space<vmem>>, vector<1x128xf32>
    %3 = vector.broadcast %2 : vector<1x128xf32> to vector<256x128xf32>
    %4 = arith.mulf %1, %3 : vector<256x128xf32>
    %c0_4 = arith.constant 0 : index
    %c0_5 = arith.constant 0 : index
    %5 = vector.load %arg3[%c0_4, %c0_5] : memref<1x128xf32, #tpu.memory_space<vmem>>, vector<1x128xf32>
    %6 = vector.broadcast %5 : vector<1x128xf32> to vector<256x128xf32>
    %7 = arith.addf %4, %6 : vector<256x128xf32>
    %cst = arith.constant 0.000000e+00 : f32
    %8 = vector.broadcast %cst : f32 to vector<256x128xf32>
    %9 = arith.maximumf %7, %8 : vector<256x128xf32>
    %cst_6 = arith.constant 0.000000e+00 : bf16
    %10 = vector.broadcast %cst_6 : bf16 to vector<17x128xbf16>
    %c0_7 = arith.constant 0 : index
    %c0_8 = arith.constant 0 : index
    %11 = vector.load %arg8[%c0_7, %c0_8] : memref<290x128xbf16, #tpu.memory_space<vmem>>, vector<17x128xbf16>
    tpu.vector_store %arg8[%c0_7, %c0_8], %10 {strides = array<i32>} : memref<290x128xbf16, #tpu.memory_space<vmem>>, vector<17x128xbf16>,
    %c273 = arith.constant 273 : index
    %c0_9 = arith.constant 0 : index
    %12 = vector.load %arg8[%c273, %c0_9] : memref<290x128xbf16, #tpu.memory_space<vmem>>, vector<17x128xbf16>
    tpu.vector_store %arg8[%c273, %c0_9], %10 {strides = array<i32>} : memref<290x128xbf16, #tpu.memory_space<vmem>>, vector<17x128xbf16>,
    %13 = arith.truncf %9 : vector<256x128xf32> to vector<256x128xbf16>
    %c17 = arith.constant 17 : index
    %c0_10 = arith.constant 0 : index
    %14 = vector.load %arg8[%c17, %c0_10] : memref<290x128xbf16, #tpu.memory_space<vmem>>, vector<256x128xbf16>
    tpu.vector_store %arg8[%c17, %c0_10], %13 {strides = array<i32>} : memref<290x128xbf16, #tpu.memory_space<vmem>>, vector<256x128xbf16>,
    %15 = tpu.iota {dimensions = array<i32: 0>} : vector<256x128xi32>
    %c16_i32 = arith.constant 16 : i32
    %c0_i32 = arith.constant 0 : i32
    %16 = arith.cmpi eq, %c16_i32, %c0_i32 : i32
    %c1_i32 = arith.constant 1 : i32
    %17 = arith.select %16, %c1_i32, %c16_i32 : i32
    %18 = vector.broadcast %17 : i32 to vector<256x128xi32>
    %19 = arith.remsi %15, %18 : vector<256x128xi32>
    %c0_i32_11 = arith.constant 0 : i32
    %20 = vector.broadcast %c0_i32_11 : i32 to vector<256x128xi32>
    %21 = arith.cmpi ne, %19, %20 : vector<256x128xi32>
    %c0_i32_12 = arith.constant 0 : i32
    %22 = vector.broadcast %c0_i32_12 : i32 to vector<256x128xi32>
    %23 = arith.cmpi slt, %19, %22 : vector<256x128xi32>
    %c0_i32_13 = arith.constant 0 : i32
    %24 = arith.cmpi slt, %17, %c0_i32_13 : i32
    %25 = vector.broadcast %24 : i1 to vector<256x128xi1>
    %26 = vector.broadcast %25 : vector<256x128xi1> to vector<256x128xi1>
    %27 = arith.xori %23, %26 : vector<256x128xi1>
    %28 = arith.andi %27, %21 : vector<256x128xi1>
    %29 = vector.broadcast %17 : i32 to vector<256x128xi32>
    %30 = arith.addi %19, %29 : vector<256x128xi32>
    %31 = arith.select %28, %30, %19 : vector<256x128xi1>, vector<256x128xi32>
    %c0_i32_14 = arith.constant 0 : i32
    %32 = vector.broadcast %c0_i32_14 : i32 to vector<256x128xi32>
    %33 = arith.cmpi ne, %31, %32 : vector<256x128xi32>
    %c15_i32 = arith.constant 15 : i32
    %34 = vector.broadcast %c15_i32 : i32 to vector<256x128xi32>
    %35 = arith.cmpi ne, %31, %34 : vector<256x128xi32>
    %cst_15 = arith.constant 0.000000e+00 : f32
    %36 = vector.broadcast %cst_15 : f32 to vector<256x128xf32>
    %c0_16 = arith.constant 0 : index
    %c0_17 = arith.constant 0 : index
    %37 = vector.load %arg8[%c0_16, %c0_17] : memref<290x128xbf16, #tpu.memory_space<vmem>>, vector<256x128xbf16>
    %c0_i32_18 = arith.constant 0 : i32
    %38 = arith.sitofp %c0_i32_18 : i32 to bf16
    %39 = vector.broadcast %38 : bf16 to vector<256x128xbf16>
    %40 = arith.select %33, %37, %39 : vector<256x128xi1>, vector<256x128xbf16>
    %c0_19 = arith.constant 0 : index
    %c0_20 = arith.constant 0 : index
    %c0_21 = arith.constant 0 : index
    %41 = vector.load %arg4[%c0_19, %c0_20, %c0_21] : memref<9x128x128xbf16, #tpu.memory_space<vmem>>, vector<1x128x128xbf16>
    %42 = vector.shape_cast %41 : vector<1x128x128xbf16> to vector<128x128xbf16>
    %cst_22 = arith.constant dense<0.000000e+00> : vector<256x128xf32>
    %43 = tpu.matmul %40, %42, %cst_22 {dimension_numbers = #tpu.dot_dimension_numbers<[1], [0], [0], [1], [0, 0, 1, 1], [], []>} : vector<256x128xbf16>, vector<128x128xbf16>, vector<256x128xf32> -> vector<256x128xf32>
    %44 = arith.addf %36, %43 : vector<256x128xf32>
    %c1 = arith.constant 1 : index
    %c0_23 = arith.constant 0 : index
    %45 = vector.load %arg8[%c1, %c0_23] : memref<290x128xbf16, #tpu.memory_space<vmem>>, vector<256x128xbf16>
    %c1_24 = arith.constant 1 : index
    %c0_25 = arith.constant 0 : index
    %c0_26 = arith.constant 0 : index
    %46 = vector.load %arg4[%c1_24, %c0_25, %c0_26] : memref<9x128x128xbf16, #tpu.memory_space<vmem>>, vector<1x128x128xbf16>
    %47 = vector.shape_cast %46 : vector<1x128x128xbf16> to vector<128x128xbf16>
    %cst_27 = arith.constant dense<0.000000e+00> : vector<256x128xf32>
    %48 = tpu.matmul %45, %47, %cst_27 {dimension_numbers = #tpu.dot_dimension_numbers<[1], [0], [0], [1], [0, 0, 1, 1], [], []>} : vector<256x128xbf16>, vector<128x128xbf16>, vector<256x128xf32> -> vector<256x128xf32>
    %49 = arith.addf %44, %48 : vector<256x128xf32>
    %c2 = arith.constant 2 : index
    %c0_28 = arith.constant 0 : index
    %50 = vector.load %arg8[%c2, %c0_28] : memref<290x128xbf16, #tpu.memory_space<vmem>>, vector<256x128xbf16>
    %c0_i32_29 = arith.constant 0 : i32
    %51 = arith.sitofp %c0_i32_29 : i32 to bf16
    %52 = vector.broadcast %51 : bf16 to vector<256x128xbf16>
    %53 = arith.select %35, %50, %52 : vector<256x128xi1>, vector<256x128xbf16>
    %c2_30 = arith.constant 2 : index
    %c0_31 = arith.constant 0 : index
    %c0_32 = arith.constant 0 : index
    %54 = vector.load %arg4[%c2_30, %c0_31, %c0_32] : memref<9x128x128xbf16, #tpu.memory_space<vmem>>, vector<1x128x128xbf16>
    %55 = vector.shape_cast %54 : vector<1x128x128xbf16> to vector<128x128xbf16>
    %cst_33 = arith.constant dense<0.000000e+00> : vector<256x128xf32>
    %56 = tpu.matmul %53, %55, %cst_33 {dimension_numbers = #tpu.dot_dimension_numbers<[1], [0], [0], [1], [0, 0, 1, 1], [], []>} : vector<256x128xbf16>, vector<128x128xbf16>, vector<256x128xf32> -> vector<256x128xf32>
    %57 = arith.addf %49, %56 : vector<256x128xf32>
    %c16 = arith.constant 16 : index
    %c0_34 = arith.constant 0 : index
    %58 = vector.load %arg8[%c16, %c0_34] : memref<290x128xbf16, #tpu.memory_space<vmem>>, vector<256x128xbf16>
    %c0_i32_35 = arith.constant 0 : i32
    %59 = arith.sitofp %c0_i32_35 : i32 to bf16
    %60 = vector.broadcast %59 : bf16 to vector<256x128xbf16>
    %61 = arith.select %33, %58, %60 : vector<256x128xi1>, vector<256x128xbf16>
    %c3 = arith.constant 3 : index
    %c0_36 = arith.constant 0 : index
    %c0_37 = arith.constant 0 : index
    %62 = vector.load %arg4[%c3, %c0_36, %c0_37] : memref<9x128x128xbf16, #tpu.memory_space<vmem>>, vector<1x128x128xbf16>
    %63 = vector.shape_cast %62 : vector<1x128x128xbf16> to vector<128x128xbf16>
    %cst_38 = arith.constant dense<0.000000e+00> : vector<256x128xf32>
    %64 = tpu.matmul %61, %63, %cst_38 {dimension_numbers = #tpu.dot_dimension_numbers<[1], [0], [0], [1], [0, 0, 1, 1], [], []>} : vector<256x128xbf16>, vector<128x128xbf16>, vector<256x128xf32> -> vector<256x128xf32>
    %65 = arith.addf %57, %64 : vector<256x128xf32>
    %c17_39 = arith.constant 17 : index
    %c0_40 = arith.constant 0 : index
    %66 = vector.load %arg8[%c17_39, %c0_40] : memref<290x128xbf16, #tpu.memory_space<vmem>>, vector<256x128xbf16>
    %c4 = arith.constant 4 : index
    %c0_41 = arith.constant 0 : index
    %c0_42 = arith.constant 0 : index
    %67 = vector.load %arg4[%c4, %c0_41, %c0_42] : memref<9x128x128xbf16, #tpu.memory_space<vmem>>, vector<1x128x128xbf16>
    %68 = vector.shape_cast %67 : vector<1x128x128xbf16> to vector<128x128xbf16>
    %cst_43 = arith.constant dense<0.000000e+00> : vector<256x128xf32>
    %69 = tpu.matmul %66, %68, %cst_43 {dimension_numbers = #tpu.dot_dimension_numbers<[1], [0], [0], [1], [0, 0, 1, 1], [], []>} : vector<256x128xbf16>, vector<128x128xbf16>, vector<256x128xf32> -> vector<256x128xf32>
    %70 = arith.addf %65, %69 : vector<256x128xf32>
    %c18 = arith.constant 18 : index
    %c0_44 = arith.constant 0 : index
    %71 = vector.load %arg8[%c18, %c0_44] : memref<290x128xbf16, #tpu.memory_space<vmem>>, vector<256x128xbf16>
    %c0_i32_45 = arith.constant 0 : i32
    %72 = arith.sitofp %c0_i32_45 : i32 to bf16
    %73 = vector.broadcast %72 : bf16 to vector<256x128xbf16>
    %74 = arith.select %35, %71, %73 : vector<256x128xi1>, vector<256x128xbf16>
    %c5 = arith.constant 5 : index
    %c0_46 = arith.constant 0 : index
    %c0_47 = arith.constant 0 : index
    %75 = vector.load %arg4[%c5, %c0_46, %c0_47] : memref<9x128x128xbf16, #tpu.memory_space<vmem>>, vector<1x128x128xbf16>
    %76 = vector.shape_cast %75 : vector<1x128x128xbf16> to vector<128x128xbf16>
    %cst_48 = arith.constant dense<0.000000e+00> : vector<256x128xf32>
    %77 = tpu.matmul %74, %76, %cst_48 {dimension_numbers = #tpu.dot_dimension_numbers<[1], [0], [0], [1], [0, 0, 1, 1], [], []>} : vector<256x128xbf16>, vector<128x128xbf16>, vector<256x128xf32> -> vector<256x128xf32>
    %78 = arith.addf %70, %77 : vector<256x128xf32>
    %c32 = arith.constant 32 : index
    %c0_49 = arith.constant 0 : index
    %79 = vector.load %arg8[%c32, %c0_49] : memref<290x128xbf16, #tpu.memory_space<vmem>>, vector<256x128xbf16>
    %c0_i32_50 = arith.constant 0 : i32
    %80 = arith.sitofp %c0_i32_50 : i32 to bf16
    %81 = vector.broadcast %80 : bf16 to vector<256x128xbf16>
    %82 = arith.select %33, %79, %81 : vector<256x128xi1>, vector<256x128xbf16>
    %c6 = arith.constant 6 : index
    %c0_51 = arith.constant 0 : index
    %c0_52 = arith.constant 0 : index
    %83 = vector.load %arg4[%c6, %c0_51, %c0_52] : memref<9x128x128xbf16, #tpu.memory_space<vmem>>, vector<1x128x128xbf16>
    %84 = vector.shape_cast %83 : vector<1x128x128xbf16> to vector<128x128xbf16>
    %cst_53 = arith.constant dense<0.000000e+00> : vector<256x128xf32>
    %85 = tpu.matmul %82, %84, %cst_53 {dimension_numbers = #tpu.dot_dimension_numbers<[1], [0], [0], [1], [0, 0, 1, 1], [], []>} : vector<256x128xbf16>, vector<128x128xbf16>, vector<256x128xf32> -> vector<256x128xf32>
    %86 = arith.addf %78, %85 : vector<256x128xf32>
    %c33 = arith.constant 33 : index
    %c0_54 = arith.constant 0 : index
    %87 = vector.load %arg8[%c33, %c0_54] : memref<290x128xbf16, #tpu.memory_space<vmem>>, vector<256x128xbf16>
    %c7 = arith.constant 7 : index
    %c0_55 = arith.constant 0 : index
    %c0_56 = arith.constant 0 : index
    %88 = vector.load %arg4[%c7, %c0_55, %c0_56] : memref<9x128x128xbf16, #tpu.memory_space<vmem>>, vector<1x128x128xbf16>
    %89 = vector.shape_cast %88 : vector<1x128x128xbf16> to vector<128x128xbf16>
    %cst_57 = arith.constant dense<0.000000e+00> : vector<256x128xf32>
    %90 = tpu.matmul %87, %89, %cst_57 {dimension_numbers = #tpu.dot_dimension_numbers<[1], [0], [0], [1], [0, 0, 1, 1], [], []>} : vector<256x128xbf16>, vector<128x128xbf16>, vector<256x128xf32> -> vector<256x128xf32>
    %91 = arith.addf %86, %90 : vector<256x128xf32>
    %c34 = arith.constant 34 : index
    %c0_58 = arith.constant 0 : index
    %92 = vector.load %arg8[%c34, %c0_58] : memref<290x128xbf16, #tpu.memory_space<vmem>>, vector<256x128xbf16>
    %c0_i32_59 = arith.constant 0 : i32
    %93 = arith.sitofp %c0_i32_59 : i32 to bf16
    %94 = vector.broadcast %93 : bf16 to vector<256x128xbf16>
    %95 = arith.select %35, %92, %94 : vector<256x128xi1>, vector<256x128xbf16>
    %c8 = arith.constant 8 : index
    %c0_60 = arith.constant 0 : index
    %c0_61 = arith.constant 0 : index
    %96 = vector.load %arg4[%c8, %c0_60, %c0_61] : memref<9x128x128xbf16, #tpu.memory_space<vmem>>, vector<1x128x128xbf16>
    %97 = vector.shape_cast %96 : vector<1x128x128xbf16> to vector<128x128xbf16>
    %cst_62 = arith.constant dense<0.000000e+00> : vector<256x128xf32>
    %98 = tpu.matmul %95, %97, %cst_62 {dimension_numbers = #tpu.dot_dimension_numbers<[1], [0], [0], [1], [0, 0, 1, 1], [], []>} : vector<256x128xbf16>, vector<128x128xbf16>, vector<256x128xf32> -> vector<256x128xf32>
    %99 = arith.addf %91, %98 : vector<256x128xf32>
    %c0_63 = arith.constant 0 : index
    %c0_64 = arith.constant 0 : index
    %c0_65 = arith.constant 0 : index
    %100 = vector.load %arg6[%c0_63, %c0_64, %c0_65] : memref<1x256x128xf32, #tpu.memory_space<vmem>>, vector<1x256x128xf32>
    %101 = vector.shape_cast %100 : vector<1x256x128xf32> to vector<256x128xf32>
    %102 = vector.shape_cast %99 : vector<256x128xf32> to vector<1x256x128xf32>
    tpu.vector_store %arg6[%c0_63, %c0_64, %c0_65], %102 {strides = array<i32>} : memref<1x256x128xf32, #tpu.memory_space<vmem>>, vector<1x256x128xf32>,
    %c17_66 = arith.constant 17 : index
    %c0_67 = arith.constant 0 : index
    %103 = vector.load %arg8[%c17_66, %c0_67] : memref<290x128xbf16, #tpu.memory_space<vmem>>, vector<256x128xbf16>
    %c0_68 = arith.constant 0 : index
    %c0_69 = arith.constant 0 : index
    %104 = vector.load %arg5[%c0_68, %c0_69] : memref<128x128xbf16, #tpu.memory_space<vmem>>, vector<128x128xbf16>
    %cst_70 = arith.constant dense<0.000000e+00> : vector<256x128xf32>
    %105 = tpu.matmul %103, %104, %cst_70 {dimension_numbers = #tpu.dot_dimension_numbers<[1], [0], [0], [1], [0, 0, 1, 1], [], []>} : vector<256x128xbf16>, vector<128x128xbf16>, vector<256x128xf32> -> vector<256x128xf32>
    %c0_71 = arith.constant 0 : index
    %c0_72 = arith.constant 0 : index
    %c0_73 = arith.constant 0 : index
    %106 = vector.load %arg7[%c0_71, %c0_72, %c0_73] : memref<1x256x128xf32, #tpu.memory_space<vmem>>, vector<1x256x128xf32>
    %107 = vector.shape_cast %106 : vector<1x256x128xf32> to vector<256x128xf32>
    %108 = vector.shape_cast %105 : vector<256x128xf32> to vector<1x256x128xf32>
    tpu.vector_store %arg7[%c0_71, %c0_72, %c0_73], %108 {strides = array<i32>} : memref<1x256x128xf32, #tpu.memory_space<vmem>>, vector<1x256x128xf32>,
    return
  }
  func.func @transform_0(%arg0: i32) -> (i32, i32, i32) {
    %c0_i32 = arith.constant 0 : i32
    %c0_i32_0 = arith.constant 0 : i32
    %c0_i32_1 = arith.constant 0 : i32
    return %arg0, %c0_i32, %c0_i32_0 : i32, i32, i32
  }
  func.func @transform_1(%arg0: i32) -> (i32, i32) {
    %c0_i32 = arith.constant 0 : i32
    %c0_i32_0 = arith.constant 0 : i32
    %c0_i32_1 = arith.constant 0 : i32
    return %c0_i32, %c0_i32_0 : i32, i32
  }
  func.func @transform_2(%arg0: i32) -> (i32, i32) {
    %c0_i32 = arith.constant 0 : i32
    %c0_i32_0 = arith.constant 0 : i32
    %c0_i32_1 = arith.constant 0 : i32
    return %c0_i32, %c0_i32_0 : i32, i32
  }
  func.func @transform_3(%arg0: i32) -> (i32, i32, i32) {
    %c0_i32 = arith.constant 0 : i32
    %c0_i32_0 = arith.constant 0 : i32
    %c0_i32_1 = arith.constant 0 : i32
    %c0_i32_2 = arith.constant 0 : i32
    return %c0_i32, %c0_i32_0, %c0_i32_1 : i32, i32, i32
  }
  func.func @transform_4(%arg0: i32) -> (i32, i32) {
    %c0_i32 = arith.constant 0 : i32
    %c0_i32_0 = arith.constant 0 : i32
    %c0_i32_1 = arith.constant 0 : i32
    return %c0_i32, %c0_i32_0 : i32, i32
  }
  func.func @transform_5(%arg0: i32) -> (i32, i32, i32) {
    %c0_i32 = arith.constant 0 : i32
    %c0_i32_0 = arith.constant 0 : i32
    %c0_i32_1 = arith.constant 0 : i32
    return %arg0, %c0_i32, %c0_i32_0 : i32, i32, i32
  }
  func.func @transform_6(%arg0: i32) -> (i32, i32, i32) {
    %c0_i32 = arith.constant 0 : i32
    %c0_i32_0 = arith.constant 0 : i32
    %c0_i32_1 = arith.constant 0 : i32
    return %arg0, %c0_i32, %c0_i32_0 : i32, i32, i32
  }
}

module attributes {stable_mosaic.version = 11 : i64} {
  func.func @_bn_stats_kernel(%arg0: i32, %arg1: memref<64x128xf32, #tpu.memory_space<vmem>>, %arg2: memref<2x128xf32, #tpu.memory_space<vmem>>) attributes {dimension_semantics = [#tpu.dimension_semantics<arbitrary>], iteration_bounds = array<i64: 2>, scalar_prefetch = 0 : i64, scratch_operands = 0 : i64, tpu.core_type = #tpu.core_type<tc>, window_params = [{transform_indices = @transform_0, window_bounds = array<i64: 64, 128>}, {pipeline_mode = #tpu.pipeline_mode<synchronous>, transform_indices = @transform_1, window_bounds = array<i64: 2, 128>}]} {
    %c0_i32 = arith.constant 0 : i32
    %0 = arith.cmpi eq, %arg0, %c0_i32 : i32
    %1 = arith.extui %0 : i1 to i32
    %c0_i32_0 = arith.constant 0 : i32
    %2 = arith.cmpi ne, %1, %c0_i32_0 : i32
    scf.if %2 {
      %cst_10 = arith.constant 0.000000e+00 : f32
      %15 = vector.broadcast %cst_10 : f32 to vector<2x128xf32>
      %c0_11 = arith.constant 0 : index
      %c0_12 = arith.constant 0 : index
      %16 = vector.load %arg2[%c0_11, %c0_12] : memref<2x128xf32, #tpu.memory_space<vmem>>, vector<2x128xf32>
      tpu.vector_store %arg2[%c0_11, %c0_12], %15 {strides = array<i32>} : memref<2x128xf32, #tpu.memory_space<vmem>>, vector<2x128xf32>,
    } else {
    }
    %c0 = arith.constant 0 : index
    %c0_1 = arith.constant 0 : index
    %3 = vector.load %arg1[%c0, %c0_1] : memref<64x128xf32, #tpu.memory_space<vmem>>, vector<64x128xf32>
    %c0_2 = arith.constant 0 : index
    %c0_3 = arith.constant 0 : index
    %4 = vector.load %arg2[%c0_2, %c0_3] : memref<2x128xf32, #tpu.memory_space<vmem>>, vector<1x128xf32>
    %cst = arith.constant dense<0.000000e+00> : vector<128xf32>
    %5 = vector.multi_reduction <add>, %3, %cst [0] : vector<64x128xf32> to vector<128xf32>
    %6 = vector.shape_cast %5 : vector<128xf32> to vector<1x128xf32>
    %7 = arith.addf %4, %6 : vector<1x128xf32>
    %c0_4 = arith.constant 0 : index
    %c0_5 = arith.constant 0 : index
    %8 = vector.load %arg2[%c0_4, %c0_5] : memref<2x128xf32, #tpu.memory_space<vmem>>, vector<1x128xf32>
    tpu.vector_store %arg2[%c0_4, %c0_5], %7 {strides = array<i32>} : memref<2x128xf32, #tpu.memory_space<vmem>>, vector<1x128xf32>,
    %c1 = arith.constant 1 : index
    %c0_6 = arith.constant 0 : index
    %9 = vector.load %arg2[%c1, %c0_6] : memref<2x128xf32, #tpu.memory_space<vmem>>, vector<1x128xf32>
    %10 = arith.mulf %3, %3 : vector<64x128xf32>
    %cst_7 = arith.constant dense<0.000000e+00> : vector<128xf32>
    %11 = vector.multi_reduction <add>, %10, %cst_7 [0] : vector<64x128xf32> to vector<128xf32>
    %12 = vector.shape_cast %11 : vector<128xf32> to vector<1x128xf32>
    %13 = arith.addf %9, %12 : vector<1x128xf32>
    %c1_8 = arith.constant 1 : index
    %c0_9 = arith.constant 0 : index
    %14 = vector.load %arg2[%c1_8, %c0_9] : memref<2x128xf32, #tpu.memory_space<vmem>>, vector<1x128xf32>
    tpu.vector_store %arg2[%c1_8, %c0_9], %13 {strides = array<i32>} : memref<2x128xf32, #tpu.memory_space<vmem>>, vector<1x128xf32>,
    return
  }
  func.func @transform_0(%arg0: i32) -> (i32, i32) {
    %c0_i32 = arith.constant 0 : i32
    %c0_i32_0 = arith.constant 0 : i32
    return %arg0, %c0_i32 : i32, i32
  }
  func.func @transform_1(%arg0: i32) -> (i32, i32) {
    %c0_i32 = arith.constant 0 : i32
    %c0_i32_0 = arith.constant 0 : i32
    %c0_i32_1 = arith.constant 0 : i32
    return %c0_i32, %c0_i32_0 : i32, i32
  }
}

module attributes {stable_mosaic.version = 11 : i64} {
  func.func @_fused_conv_kernel(%arg0: i32, %arg1: memref<1x64x128xf32, #tpu.memory_space<vmem>>, %arg2: memref<1x128xf32, #tpu.memory_space<vmem>>, %arg3: memref<1x128xf32, #tpu.memory_space<vmem>>, %arg4: memref<9x128x128xbf16, #tpu.memory_space<vmem>>, %arg5: memref<1x64x128xf32, #tpu.memory_space<vmem>>, %arg6: memref<1x64x128xf32, #tpu.memory_space<vmem>>, %arg7: memref<82x128xbf16, #tpu.memory_space<vmem>>) attributes {dimension_semantics = [#tpu.dimension_semantics<parallel>], iteration_bounds = array<i64: 2>, scalar_prefetch = 0 : i64, scratch_operands = 1 : i64, tpu.core_type = #tpu.core_type<tc>, window_params = [{transform_indices = @transform_0, window_bounds = array<i64: 1, 64, 128>}, {pipeline_mode = #tpu.pipeline_mode<synchronous>, transform_indices = @transform_1, window_bounds = array<i64: 1, 128>}, {pipeline_mode = #tpu.pipeline_mode<synchronous>, transform_indices = @transform_2, window_bounds = array<i64: 1, 128>}, {pipeline_mode = #tpu.pipeline_mode<synchronous>, transform_indices = @transform_3, window_bounds = array<i64: 9, 128, 128>}, {transform_indices = @transform_4, window_bounds = array<i64: 1, 64, 128>}, {transform_indices = @transform_5, window_bounds = array<i64: 1, 64, 128>}]} {
    %c0 = arith.constant 0 : index
    %c0_0 = arith.constant 0 : index
    %c0_1 = arith.constant 0 : index
    %0 = vector.load %arg1[%c0, %c0_0, %c0_1] : memref<1x64x128xf32, #tpu.memory_space<vmem>>, vector<1x64x128xf32>
    %1 = vector.shape_cast %0 : vector<1x64x128xf32> to vector<64x128xf32>
    %c0_2 = arith.constant 0 : index
    %c0_3 = arith.constant 0 : index
    %2 = vector.load %arg2[%c0_2, %c0_3] : memref<1x128xf32, #tpu.memory_space<vmem>>, vector<1x128xf32>
    %3 = vector.broadcast %2 : vector<1x128xf32> to vector<64x128xf32>
    %4 = arith.mulf %1, %3 : vector<64x128xf32>
    %c0_4 = arith.constant 0 : index
    %c0_5 = arith.constant 0 : index
    %5 = vector.load %arg3[%c0_4, %c0_5] : memref<1x128xf32, #tpu.memory_space<vmem>>, vector<1x128xf32>
    %6 = vector.broadcast %5 : vector<1x128xf32> to vector<64x128xf32>
    %7 = arith.addf %4, %6 : vector<64x128xf32>
    %cst = arith.constant 0.000000e+00 : f32
    %8 = vector.broadcast %cst : f32 to vector<64x128xf32>
    %9 = arith.maximumf %7, %8 : vector<64x128xf32>
    %cst_6 = arith.constant 0.000000e+00 : bf16
    %10 = vector.broadcast %cst_6 : bf16 to vector<9x128xbf16>
    %c0_7 = arith.constant 0 : index
    %c0_8 = arith.constant 0 : index
    %11 = vector.load %arg7[%c0_7, %c0_8] : memref<82x128xbf16, #tpu.memory_space<vmem>>, vector<9x128xbf16>
    tpu.vector_store %arg7[%c0_7, %c0_8], %10 {strides = array<i32>} : memref<82x128xbf16, #tpu.memory_space<vmem>>, vector<9x128xbf16>,
    %c73 = arith.constant 73 : index
    %c0_9 = arith.constant 0 : index
    %12 = vector.load %arg7[%c73, %c0_9] : memref<82x128xbf16, #tpu.memory_space<vmem>>, vector<9x128xbf16>
    tpu.vector_store %arg7[%c73, %c0_9], %10 {strides = array<i32>} : memref<82x128xbf16, #tpu.memory_space<vmem>>, vector<9x128xbf16>,
    %13 = arith.truncf %9 : vector<64x128xf32> to vector<64x128xbf16>
    %c9 = arith.constant 9 : index
    %c0_10 = arith.constant 0 : index
    %14 = vector.load %arg7[%c9, %c0_10] : memref<82x128xbf16, #tpu.memory_space<vmem>>, vector<64x128xbf16>
    tpu.vector_store %arg7[%c9, %c0_10], %13 {strides = array<i32>} : memref<82x128xbf16, #tpu.memory_space<vmem>>, vector<64x128xbf16>,
    %15 = tpu.iota {dimensions = array<i32: 0>} : vector<64x128xi32>
    %c8_i32 = arith.constant 8 : i32
    %c0_i32 = arith.constant 0 : i32
    %16 = arith.cmpi eq, %c8_i32, %c0_i32 : i32
    %c1_i32 = arith.constant 1 : i32
    %17 = arith.select %16, %c1_i32, %c8_i32 : i32
    %18 = vector.broadcast %17 : i32 to vector<64x128xi32>
    %19 = arith.remsi %15, %18 : vector<64x128xi32>
    %c0_i32_11 = arith.constant 0 : i32
    %20 = vector.broadcast %c0_i32_11 : i32 to vector<64x128xi32>
    %21 = arith.cmpi ne, %19, %20 : vector<64x128xi32>
    %c0_i32_12 = arith.constant 0 : i32
    %22 = vector.broadcast %c0_i32_12 : i32 to vector<64x128xi32>
    %23 = arith.cmpi slt, %19, %22 : vector<64x128xi32>
    %c0_i32_13 = arith.constant 0 : i32
    %24 = arith.cmpi slt, %17, %c0_i32_13 : i32
    %25 = vector.broadcast %24 : i1 to vector<64x128xi1>
    %26 = vector.broadcast %25 : vector<64x128xi1> to vector<64x128xi1>
    %27 = arith.xori %23, %26 : vector<64x128xi1>
    %28 = arith.andi %27, %21 : vector<64x128xi1>
    %29 = vector.broadcast %17 : i32 to vector<64x128xi32>
    %30 = arith.addi %19, %29 : vector<64x128xi32>
    %31 = arith.select %28, %30, %19 : vector<64x128xi1>, vector<64x128xi32>
    %c0_i32_14 = arith.constant 0 : i32
    %32 = vector.broadcast %c0_i32_14 : i32 to vector<64x128xi32>
    %33 = arith.cmpi ne, %31, %32 : vector<64x128xi32>
    %c7_i32 = arith.constant 7 : i32
    %34 = vector.broadcast %c7_i32 : i32 to vector<64x128xi32>
    %35 = arith.cmpi ne, %31, %34 : vector<64x128xi32>
    %cst_15 = arith.constant 0.000000e+00 : f32
    %36 = vector.broadcast %cst_15 : f32 to vector<64x128xf32>
    %c0_16 = arith.constant 0 : index
    %c0_17 = arith.constant 0 : index
    %37 = vector.load %arg7[%c0_16, %c0_17] : memref<82x128xbf16, #tpu.memory_space<vmem>>, vector<64x128xbf16>
    %c0_i32_18 = arith.constant 0 : i32
    %38 = arith.sitofp %c0_i32_18 : i32 to bf16
    %39 = vector.broadcast %38 : bf16 to vector<64x128xbf16>
    %40 = arith.select %33, %37, %39 : vector<64x128xi1>, vector<64x128xbf16>
    %c0_19 = arith.constant 0 : index
    %c0_20 = arith.constant 0 : index
    %c0_21 = arith.constant 0 : index
    %41 = vector.load %arg4[%c0_19, %c0_20, %c0_21] : memref<9x128x128xbf16, #tpu.memory_space<vmem>>, vector<1x128x128xbf16>
    %42 = vector.shape_cast %41 : vector<1x128x128xbf16> to vector<128x128xbf16>
    %cst_22 = arith.constant dense<0.000000e+00> : vector<64x128xf32>
    %43 = tpu.matmul %40, %42, %cst_22 {dimension_numbers = #tpu.dot_dimension_numbers<[1], [0], [0], [1], [0, 0, 1, 1], [], []>} : vector<64x128xbf16>, vector<128x128xbf16>, vector<64x128xf32> -> vector<64x128xf32>
    %44 = arith.addf %36, %43 : vector<64x128xf32>
    %c1 = arith.constant 1 : index
    %c0_23 = arith.constant 0 : index
    %45 = vector.load %arg7[%c1, %c0_23] : memref<82x128xbf16, #tpu.memory_space<vmem>>, vector<64x128xbf16>
    %c1_24 = arith.constant 1 : index
    %c0_25 = arith.constant 0 : index
    %c0_26 = arith.constant 0 : index
    %46 = vector.load %arg4[%c1_24, %c0_25, %c0_26] : memref<9x128x128xbf16, #tpu.memory_space<vmem>>, vector<1x128x128xbf16>
    %47 = vector.shape_cast %46 : vector<1x128x128xbf16> to vector<128x128xbf16>
    %cst_27 = arith.constant dense<0.000000e+00> : vector<64x128xf32>
    %48 = tpu.matmul %45, %47, %cst_27 {dimension_numbers = #tpu.dot_dimension_numbers<[1], [0], [0], [1], [0, 0, 1, 1], [], []>} : vector<64x128xbf16>, vector<128x128xbf16>, vector<64x128xf32> -> vector<64x128xf32>
    %49 = arith.addf %44, %48 : vector<64x128xf32>
    %c2 = arith.constant 2 : index
    %c0_28 = arith.constant 0 : index
    %50 = vector.load %arg7[%c2, %c0_28] : memref<82x128xbf16, #tpu.memory_space<vmem>>, vector<64x128xbf16>
    %c0_i32_29 = arith.constant 0 : i32
    %51 = arith.sitofp %c0_i32_29 : i32 to bf16
    %52 = vector.broadcast %51 : bf16 to vector<64x128xbf16>
    %53 = arith.select %35, %50, %52 : vector<64x128xi1>, vector<64x128xbf16>
    %c2_30 = arith.constant 2 : index
    %c0_31 = arith.constant 0 : index
    %c0_32 = arith.constant 0 : index
    %54 = vector.load %arg4[%c2_30, %c0_31, %c0_32] : memref<9x128x128xbf16, #tpu.memory_space<vmem>>, vector<1x128x128xbf16>
    %55 = vector.shape_cast %54 : vector<1x128x128xbf16> to vector<128x128xbf16>
    %cst_33 = arith.constant dense<0.000000e+00> : vector<64x128xf32>
    %56 = tpu.matmul %53, %55, %cst_33 {dimension_numbers = #tpu.dot_dimension_numbers<[1], [0], [0], [1], [0, 0, 1, 1], [], []>} : vector<64x128xbf16>, vector<128x128xbf16>, vector<64x128xf32> -> vector<64x128xf32>
    %57 = arith.addf %49, %56 : vector<64x128xf32>
    %c8 = arith.constant 8 : index
    %c0_34 = arith.constant 0 : index
    %58 = vector.load %arg7[%c8, %c0_34] : memref<82x128xbf16, #tpu.memory_space<vmem>>, vector<64x128xbf16>
    %c0_i32_35 = arith.constant 0 : i32
    %59 = arith.sitofp %c0_i32_35 : i32 to bf16
    %60 = vector.broadcast %59 : bf16 to vector<64x128xbf16>
    %61 = arith.select %33, %58, %60 : vector<64x128xi1>, vector<64x128xbf16>
    %c3 = arith.constant 3 : index
    %c0_36 = arith.constant 0 : index
    %c0_37 = arith.constant 0 : index
    %62 = vector.load %arg4[%c3, %c0_36, %c0_37] : memref<9x128x128xbf16, #tpu.memory_space<vmem>>, vector<1x128x128xbf16>
    %63 = vector.shape_cast %62 : vector<1x128x128xbf16> to vector<128x128xbf16>
    %cst_38 = arith.constant dense<0.000000e+00> : vector<64x128xf32>
    %64 = tpu.matmul %61, %63, %cst_38 {dimension_numbers = #tpu.dot_dimension_numbers<[1], [0], [0], [1], [0, 0, 1, 1], [], []>} : vector<64x128xbf16>, vector<128x128xbf16>, vector<64x128xf32> -> vector<64x128xf32>
    %65 = arith.addf %57, %64 : vector<64x128xf32>
    %c9_39 = arith.constant 9 : index
    %c0_40 = arith.constant 0 : index
    %66 = vector.load %arg7[%c9_39, %c0_40] : memref<82x128xbf16, #tpu.memory_space<vmem>>, vector<64x128xbf16>
    %c4 = arith.constant 4 : index
    %c0_41 = arith.constant 0 : index
    %c0_42 = arith.constant 0 : index
    %67 = vector.load %arg4[%c4, %c0_41, %c0_42] : memref<9x128x128xbf16, #tpu.memory_space<vmem>>, vector<1x128x128xbf16>
    %68 = vector.shape_cast %67 : vector<1x128x128xbf16> to vector<128x128xbf16>
    %cst_43 = arith.constant dense<0.000000e+00> : vector<64x128xf32>
    %69 = tpu.matmul %66, %68, %cst_43 {dimension_numbers = #tpu.dot_dimension_numbers<[1], [0], [0], [1], [0, 0, 1, 1], [], []>} : vector<64x128xbf16>, vector<128x128xbf16>, vector<64x128xf32> -> vector<64x128xf32>
    %70 = arith.addf %65, %69 : vector<64x128xf32>
    %c10 = arith.constant 10 : index
    %c0_44 = arith.constant 0 : index
    %71 = vector.load %arg7[%c10, %c0_44] : memref<82x128xbf16, #tpu.memory_space<vmem>>, vector<64x128xbf16>
    %c0_i32_45 = arith.constant 0 : i32
    %72 = arith.sitofp %c0_i32_45 : i32 to bf16
    %73 = vector.broadcast %72 : bf16 to vector<64x128xbf16>
    %74 = arith.select %35, %71, %73 : vector<64x128xi1>, vector<64x128xbf16>
    %c5 = arith.constant 5 : index
    %c0_46 = arith.constant 0 : index
    %c0_47 = arith.constant 0 : index
    %75 = vector.load %arg4[%c5, %c0_46, %c0_47] : memref<9x128x128xbf16, #tpu.memory_space<vmem>>, vector<1x128x128xbf16>
    %76 = vector.shape_cast %75 : vector<1x128x128xbf16> to vector<128x128xbf16>
    %cst_48 = arith.constant dense<0.000000e+00> : vector<64x128xf32>
    %77 = tpu.matmul %74, %76, %cst_48 {dimension_numbers = #tpu.dot_dimension_numbers<[1], [0], [0], [1], [0, 0, 1, 1], [], []>} : vector<64x128xbf16>, vector<128x128xbf16>, vector<64x128xf32> -> vector<64x128xf32>
    %78 = arith.addf %70, %77 : vector<64x128xf32>
    %c16 = arith.constant 16 : index
    %c0_49 = arith.constant 0 : index
    %79 = vector.load %arg7[%c16, %c0_49] : memref<82x128xbf16, #tpu.memory_space<vmem>>, vector<64x128xbf16>
    %c0_i32_50 = arith.constant 0 : i32
    %80 = arith.sitofp %c0_i32_50 : i32 to bf16
    %81 = vector.broadcast %80 : bf16 to vector<64x128xbf16>
    %82 = arith.select %33, %79, %81 : vector<64x128xi1>, vector<64x128xbf16>
    %c6 = arith.constant 6 : index
    %c0_51 = arith.constant 0 : index
    %c0_52 = arith.constant 0 : index
    %83 = vector.load %arg4[%c6, %c0_51, %c0_52] : memref<9x128x128xbf16, #tpu.memory_space<vmem>>, vector<1x128x128xbf16>
    %84 = vector.shape_cast %83 : vector<1x128x128xbf16> to vector<128x128xbf16>
    %cst_53 = arith.constant dense<0.000000e+00> : vector<64x128xf32>
    %85 = tpu.matmul %82, %84, %cst_53 {dimension_numbers = #tpu.dot_dimension_numbers<[1], [0], [0], [1], [0, 0, 1, 1], [], []>} : vector<64x128xbf16>, vector<128x128xbf16>, vector<64x128xf32> -> vector<64x128xf32>
    %86 = arith.addf %78, %85 : vector<64x128xf32>
    %c17 = arith.constant 17 : index
    %c0_54 = arith.constant 0 : index
    %87 = vector.load %arg7[%c17, %c0_54] : memref<82x128xbf16, #tpu.memory_space<vmem>>, vector<64x128xbf16>
    %c7 = arith.constant 7 : index
    %c0_55 = arith.constant 0 : index
    %c0_56 = arith.constant 0 : index
    %88 = vector.load %arg4[%c7, %c0_55, %c0_56] : memref<9x128x128xbf16, #tpu.memory_space<vmem>>, vector<1x128x128xbf16>
    %89 = vector.shape_cast %88 : vector<1x128x128xbf16> to vector<128x128xbf16>
    %cst_57 = arith.constant dense<0.000000e+00> : vector<64x128xf32>
    %90 = tpu.matmul %87, %89, %cst_57 {dimension_numbers = #tpu.dot_dimension_numbers<[1], [0], [0], [1], [0, 0, 1, 1], [], []>} : vector<64x128xbf16>, vector<128x128xbf16>, vector<64x128xf32> -> vector<64x128xf32>
    %91 = arith.addf %86, %90 : vector<64x128xf32>
    %c18 = arith.constant 18 : index
    %c0_58 = arith.constant 0 : index
    %92 = vector.load %arg7[%c18, %c0_58] : memref<82x128xbf16, #tpu.memory_space<vmem>>, vector<64x128xbf16>
    %c0_i32_59 = arith.constant 0 : i32
    %93 = arith.sitofp %c0_i32_59 : i32 to bf16
    %94 = vector.broadcast %93 : bf16 to vector<64x128xbf16>
    %95 = arith.select %35, %92, %94 : vector<64x128xi1>, vector<64x128xbf16>
    %c8_60 = arith.constant 8 : index
    %c0_61 = arith.constant 0 : index
    %c0_62 = arith.constant 0 : index
    %96 = vector.load %arg4[%c8_60, %c0_61, %c0_62] : memref<9x128x128xbf16, #tpu.memory_space<vmem>>, vector<1x128x128xbf16>
    %97 = vector.shape_cast %96 : vector<1x128x128xbf16> to vector<128x128xbf16>
    %cst_63 = arith.constant dense<0.000000e+00> : vector<64x128xf32>
    %98 = tpu.matmul %95, %97, %cst_63 {dimension_numbers = #tpu.dot_dimension_numbers<[1], [0], [0], [1], [0, 0, 1, 1], [], []>} : vector<64x128xbf16>, vector<128x128xbf16>, vector<64x128xf32> -> vector<64x128xf32>
    %99 = arith.addf %91, %98 : vector<64x128xf32>
    %c0_64 = arith.constant 0 : index
    %c0_65 = arith.constant 0 : index
    %c0_66 = arith.constant 0 : index
    %100 = vector.load %arg5[%c0_64, %c0_65, %c0_66] : memref<1x64x128xf32, #tpu.memory_space<vmem>>, vector<1x64x128xf32>
    %101 = vector.shape_cast %100 : vector<1x64x128xf32> to vector<64x128xf32>
    %102 = arith.addf %99, %101 : vector<64x128xf32>
    %c0_67 = arith.constant 0 : index
    %c0_68 = arith.constant 0 : index
    %c0_69 = arith.constant 0 : index
    %103 = vector.load %arg6[%c0_67, %c0_68, %c0_69] : memref<1x64x128xf32, #tpu.memory_space<vmem>>, vector<1x64x128xf32>
    %104 = vector.shape_cast %103 : vector<1x64x128xf32> to vector<64x128xf32>
    %105 = vector.shape_cast %102 : vector<64x128xf32> to vector<1x64x128xf32>
    tpu.vector_store %arg6[%c0_67, %c0_68, %c0_69], %105 {strides = array<i32>} : memref<1x64x128xf32, #tpu.memory_space<vmem>>, vector<1x64x128xf32>,
    return
  }
  func.func @transform_0(%arg0: i32) -> (i32, i32, i32) {
    %c0_i32 = arith.constant 0 : i32
    %c0_i32_0 = arith.constant 0 : i32
    %c0_i32_1 = arith.constant 0 : i32
    return %arg0, %c0_i32, %c0_i32_0 : i32, i32, i32
  }
  func.func @transform_1(%arg0: i32) -> (i32, i32) {
    %c0_i32 = arith.constant 0 : i32
    %c0_i32_0 = arith.constant 0 : i32
    %c0_i32_1 = arith.constant 0 : i32
    return %c0_i32, %c0_i32_0 : i32, i32
  }
  func.func @transform_2(%arg0: i32) -> (i32, i32) {
    %c0_i32 = arith.constant 0 : i32
    %c0_i32_0 = arith.constant 0 : i32
    %c0_i32_1 = arith.constant 0 : i32
    return %c0_i32, %c0_i32_0 : i32, i32
  }
  func.func @transform_3(%arg0: i32) -> (i32, i32, i32) {
    %c0_i32 = arith.constant 0 : i32
    %c0_i32_0 = arith.constant 0 : i32
    %c0_i32_1 = arith.constant 0 : i32
    %c0_i32_2 = arith.constant 0 : i32
    return %c0_i32, %c0_i32_0, %c0_i32_1 : i32, i32, i32
  }
  func.func @transform_4(%arg0: i32) -> (i32, i32, i32) {
    %c0_i32 = arith.constant 0 : i32
    %c0_i32_0 = arith.constant 0 : i32
    %c0_i32_1 = arith.constant 0 : i32
    return %arg0, %c0_i32, %c0_i32_0 : i32, i32, i32
  }
  func.func @transform_5(%arg0: i32) -> (i32, i32, i32) {
    %c0_i32 = arith.constant 0 : i32
    %c0_i32_0 = arith.constant 0 : i32
    %c0_i32_1 = arith.constant 0 : i32
    return %arg0, %c0_i32, %c0_i32_0 : i32, i32, i32
  }
}

module attributes {stable_mosaic.version = 11 : i64} {
  func.func @_fused_conv_kernel(%arg0: i32, %arg1: memref<1x64x128xf32, #tpu.memory_space<vmem>>, %arg2: memref<1x128xf32, #tpu.memory_space<vmem>>, %arg3: memref<1x128xf32, #tpu.memory_space<vmem>>, %arg4: memref<9x128x128xbf16, #tpu.memory_space<vmem>>, %arg5: memref<1x64x128xf32, #tpu.memory_space<vmem>>, %arg6: memref<82x128xbf16, #tpu.memory_space<vmem>>) attributes {dimension_semantics = [#tpu.dimension_semantics<parallel>], iteration_bounds = array<i64: 2>, scalar_prefetch = 0 : i64, scratch_operands = 1 : i64, tpu.core_type = #tpu.core_type<tc>, window_params = [{transform_indices = @transform_0, window_bounds = array<i64: 1, 64, 128>}, {pipeline_mode = #tpu.pipeline_mode<synchronous>, transform_indices = @transform_1, window_bounds = array<i64: 1, 128>}, {pipeline_mode = #tpu.pipeline_mode<synchronous>, transform_indices = @transform_2, window_bounds = array<i64: 1, 128>}, {pipeline_mode = #tpu.pipeline_mode<synchronous>, transform_indices = @transform_3, window_bounds = array<i64: 9, 128, 128>}, {transform_indices = @transform_4, window_bounds = array<i64: 1, 64, 128>}]} {
    %c0 = arith.constant 0 : index
    %c0_0 = arith.constant 0 : index
    %c0_1 = arith.constant 0 : index
    %0 = vector.load %arg1[%c0, %c0_0, %c0_1] : memref<1x64x128xf32, #tpu.memory_space<vmem>>, vector<1x64x128xf32>
    %1 = vector.shape_cast %0 : vector<1x64x128xf32> to vector<64x128xf32>
    %c0_2 = arith.constant 0 : index
    %c0_3 = arith.constant 0 : index
    %2 = vector.load %arg2[%c0_2, %c0_3] : memref<1x128xf32, #tpu.memory_space<vmem>>, vector<1x128xf32>
    %3 = vector.broadcast %2 : vector<1x128xf32> to vector<64x128xf32>
    %4 = arith.mulf %1, %3 : vector<64x128xf32>
    %c0_4 = arith.constant 0 : index
    %c0_5 = arith.constant 0 : index
    %5 = vector.load %arg3[%c0_4, %c0_5] : memref<1x128xf32, #tpu.memory_space<vmem>>, vector<1x128xf32>
    %6 = vector.broadcast %5 : vector<1x128xf32> to vector<64x128xf32>
    %7 = arith.addf %4, %6 : vector<64x128xf32>
    %cst = arith.constant 0.000000e+00 : f32
    %8 = vector.broadcast %cst : f32 to vector<64x128xf32>
    %9 = arith.maximumf %7, %8 : vector<64x128xf32>
    %cst_6 = arith.constant 0.000000e+00 : bf16
    %10 = vector.broadcast %cst_6 : bf16 to vector<9x128xbf16>
    %c0_7 = arith.constant 0 : index
    %c0_8 = arith.constant 0 : index
    %11 = vector.load %arg6[%c0_7, %c0_8] : memref<82x128xbf16, #tpu.memory_space<vmem>>, vector<9x128xbf16>
    tpu.vector_store %arg6[%c0_7, %c0_8], %10 {strides = array<i32>} : memref<82x128xbf16, #tpu.memory_space<vmem>>, vector<9x128xbf16>,
    %c73 = arith.constant 73 : index
    %c0_9 = arith.constant 0 : index
    %12 = vector.load %arg6[%c73, %c0_9] : memref<82x128xbf16, #tpu.memory_space<vmem>>, vector<9x128xbf16>
    tpu.vector_store %arg6[%c73, %c0_9], %10 {strides = array<i32>} : memref<82x128xbf16, #tpu.memory_space<vmem>>, vector<9x128xbf16>,
    %13 = arith.truncf %9 : vector<64x128xf32> to vector<64x128xbf16>
    %c9 = arith.constant 9 : index
    %c0_10 = arith.constant 0 : index
    %14 = vector.load %arg6[%c9, %c0_10] : memref<82x128xbf16, #tpu.memory_space<vmem>>, vector<64x128xbf16>
    tpu.vector_store %arg6[%c9, %c0_10], %13 {strides = array<i32>} : memref<82x128xbf16, #tpu.memory_space<vmem>>, vector<64x128xbf16>,
    %15 = tpu.iota {dimensions = array<i32: 0>} : vector<64x128xi32>
    %c8_i32 = arith.constant 8 : i32
    %c0_i32 = arith.constant 0 : i32
    %16 = arith.cmpi eq, %c8_i32, %c0_i32 : i32
    %c1_i32 = arith.constant 1 : i32
    %17 = arith.select %16, %c1_i32, %c8_i32 : i32
    %18 = vector.broadcast %17 : i32 to vector<64x128xi32>
    %19 = arith.remsi %15, %18 : vector<64x128xi32>
    %c0_i32_11 = arith.constant 0 : i32
    %20 = vector.broadcast %c0_i32_11 : i32 to vector<64x128xi32>
    %21 = arith.cmpi ne, %19, %20 : vector<64x128xi32>
    %c0_i32_12 = arith.constant 0 : i32
    %22 = vector.broadcast %c0_i32_12 : i32 to vector<64x128xi32>
    %23 = arith.cmpi slt, %19, %22 : vector<64x128xi32>
    %c0_i32_13 = arith.constant 0 : i32
    %24 = arith.cmpi slt, %17, %c0_i32_13 : i32
    %25 = vector.broadcast %24 : i1 to vector<64x128xi1>
    %26 = vector.broadcast %25 : vector<64x128xi1> to vector<64x128xi1>
    %27 = arith.xori %23, %26 : vector<64x128xi1>
    %28 = arith.andi %27, %21 : vector<64x128xi1>
    %29 = vector.broadcast %17 : i32 to vector<64x128xi32>
    %30 = arith.addi %19, %29 : vector<64x128xi32>
    %31 = arith.select %28, %30, %19 : vector<64x128xi1>, vector<64x128xi32>
    %c0_i32_14 = arith.constant 0 : i32
    %32 = vector.broadcast %c0_i32_14 : i32 to vector<64x128xi32>
    %33 = arith.cmpi ne, %31, %32 : vector<64x128xi32>
    %c7_i32 = arith.constant 7 : i32
    %34 = vector.broadcast %c7_i32 : i32 to vector<64x128xi32>
    %35 = arith.cmpi ne, %31, %34 : vector<64x128xi32>
    %cst_15 = arith.constant 0.000000e+00 : f32
    %36 = vector.broadcast %cst_15 : f32 to vector<64x128xf32>
    %c0_16 = arith.constant 0 : index
    %c0_17 = arith.constant 0 : index
    %37 = vector.load %arg6[%c0_16, %c0_17] : memref<82x128xbf16, #tpu.memory_space<vmem>>, vector<64x128xbf16>
    %c0_i32_18 = arith.constant 0 : i32
    %38 = arith.sitofp %c0_i32_18 : i32 to bf16
    %39 = vector.broadcast %38 : bf16 to vector<64x128xbf16>
    %40 = arith.select %33, %37, %39 : vector<64x128xi1>, vector<64x128xbf16>
    %c0_19 = arith.constant 0 : index
    %c0_20 = arith.constant 0 : index
    %c0_21 = arith.constant 0 : index
    %41 = vector.load %arg4[%c0_19, %c0_20, %c0_21] : memref<9x128x128xbf16, #tpu.memory_space<vmem>>, vector<1x128x128xbf16>
    %42 = vector.shape_cast %41 : vector<1x128x128xbf16> to vector<128x128xbf16>
    %cst_22 = arith.constant dense<0.000000e+00> : vector<64x128xf32>
    %43 = tpu.matmul %40, %42, %cst_22 {dimension_numbers = #tpu.dot_dimension_numbers<[1], [0], [0], [1], [0, 0, 1, 1], [], []>} : vector<64x128xbf16>, vector<128x128xbf16>, vector<64x128xf32> -> vector<64x128xf32>
    %44 = arith.addf %36, %43 : vector<64x128xf32>
    %c1 = arith.constant 1 : index
    %c0_23 = arith.constant 0 : index
    %45 = vector.load %arg6[%c1, %c0_23] : memref<82x128xbf16, #tpu.memory_space<vmem>>, vector<64x128xbf16>
    %c1_24 = arith.constant 1 : index
    %c0_25 = arith.constant 0 : index
    %c0_26 = arith.constant 0 : index
    %46 = vector.load %arg4[%c1_24, %c0_25, %c0_26] : memref<9x128x128xbf16, #tpu.memory_space<vmem>>, vector<1x128x128xbf16>
    %47 = vector.shape_cast %46 : vector<1x128x128xbf16> to vector<128x128xbf16>
    %cst_27 = arith.constant dense<0.000000e+00> : vector<64x128xf32>
    %48 = tpu.matmul %45, %47, %cst_27 {dimension_numbers = #tpu.dot_dimension_numbers<[1], [0], [0], [1], [0, 0, 1, 1], [], []>} : vector<64x128xbf16>, vector<128x128xbf16>, vector<64x128xf32> -> vector<64x128xf32>
    %49 = arith.addf %44, %48 : vector<64x128xf32>
    %c2 = arith.constant 2 : index
    %c0_28 = arith.constant 0 : index
    %50 = vector.load %arg6[%c2, %c0_28] : memref<82x128xbf16, #tpu.memory_space<vmem>>, vector<64x128xbf16>
    %c0_i32_29 = arith.constant 0 : i32
    %51 = arith.sitofp %c0_i32_29 : i32 to bf16
    %52 = vector.broadcast %51 : bf16 to vector<64x128xbf16>
    %53 = arith.select %35, %50, %52 : vector<64x128xi1>, vector<64x128xbf16>
    %c2_30 = arith.constant 2 : index
    %c0_31 = arith.constant 0 : index
    %c0_32 = arith.constant 0 : index
    %54 = vector.load %arg4[%c2_30, %c0_31, %c0_32] : memref<9x128x128xbf16, #tpu.memory_space<vmem>>, vector<1x128x128xbf16>
    %55 = vector.shape_cast %54 : vector<1x128x128xbf16> to vector<128x128xbf16>
    %cst_33 = arith.constant dense<0.000000e+00> : vector<64x128xf32>
    %56 = tpu.matmul %53, %55, %cst_33 {dimension_numbers = #tpu.dot_dimension_numbers<[1], [0], [0], [1], [0, 0, 1, 1], [], []>} : vector<64x128xbf16>, vector<128x128xbf16>, vector<64x128xf32> -> vector<64x128xf32>
    %57 = arith.addf %49, %56 : vector<64x128xf32>
    %c8 = arith.constant 8 : index
    %c0_34 = arith.constant 0 : index
    %58 = vector.load %arg6[%c8, %c0_34] : memref<82x128xbf16, #tpu.memory_space<vmem>>, vector<64x128xbf16>
    %c0_i32_35 = arith.constant 0 : i32
    %59 = arith.sitofp %c0_i32_35 : i32 to bf16
    %60 = vector.broadcast %59 : bf16 to vector<64x128xbf16>
    %61 = arith.select %33, %58, %60 : vector<64x128xi1>, vector<64x128xbf16>
    %c3 = arith.constant 3 : index
    %c0_36 = arith.constant 0 : index
    %c0_37 = arith.constant 0 : index
    %62 = vector.load %arg4[%c3, %c0_36, %c0_37] : memref<9x128x128xbf16, #tpu.memory_space<vmem>>, vector<1x128x128xbf16>
    %63 = vector.shape_cast %62 : vector<1x128x128xbf16> to vector<128x128xbf16>
    %cst_38 = arith.constant dense<0.000000e+00> : vector<64x128xf32>
    %64 = tpu.matmul %61, %63, %cst_38 {dimension_numbers = #tpu.dot_dimension_numbers<[1], [0], [0], [1], [0, 0, 1, 1], [], []>} : vector<64x128xbf16>, vector<128x128xbf16>, vector<64x128xf32> -> vector<64x128xf32>
    %65 = arith.addf %57, %64 : vector<64x128xf32>
    %c9_39 = arith.constant 9 : index
    %c0_40 = arith.constant 0 : index
    %66 = vector.load %arg6[%c9_39, %c0_40] : memref<82x128xbf16, #tpu.memory_space<vmem>>, vector<64x128xbf16>
    %c4 = arith.constant 4 : index
    %c0_41 = arith.constant 0 : index
    %c0_42 = arith.constant 0 : index
    %67 = vector.load %arg4[%c4, %c0_41, %c0_42] : memref<9x128x128xbf16, #tpu.memory_space<vmem>>, vector<1x128x128xbf16>
    %68 = vector.shape_cast %67 : vector<1x128x128xbf16> to vector<128x128xbf16>
    %cst_43 = arith.constant dense<0.000000e+00> : vector<64x128xf32>
    %69 = tpu.matmul %66, %68, %cst_43 {dimension_numbers = #tpu.dot_dimension_numbers<[1], [0], [0], [1], [0, 0, 1, 1], [], []>} : vector<64x128xbf16>, vector<128x128xbf16>, vector<64x128xf32> -> vector<64x128xf32>
    %70 = arith.addf %65, %69 : vector<64x128xf32>
    %c10 = arith.constant 10 : index
    %c0_44 = arith.constant 0 : index
    %71 = vector.load %arg6[%c10, %c0_44] : memref<82x128xbf16, #tpu.memory_space<vmem>>, vector<64x128xbf16>
    %c0_i32_45 = arith.constant 0 : i32
    %72 = arith.sitofp %c0_i32_45 : i32 to bf16
    %73 = vector.broadcast %72 : bf16 to vector<64x128xbf16>
    %74 = arith.select %35, %71, %73 : vector<64x128xi1>, vector<64x128xbf16>
    %c5 = arith.constant 5 : index
    %c0_46 = arith.constant 0 : index
    %c0_47 = arith.constant 0 : index
    %75 = vector.load %arg4[%c5, %c0_46, %c0_47] : memref<9x128x128xbf16, #tpu.memory_space<vmem>>, vector<1x128x128xbf16>
    %76 = vector.shape_cast %75 : vector<1x128x128xbf16> to vector<128x128xbf16>
    %cst_48 = arith.constant dense<0.000000e+00> : vector<64x128xf32>
    %77 = tpu.matmul %74, %76, %cst_48 {dimension_numbers = #tpu.dot_dimension_numbers<[1], [0], [0], [1], [0, 0, 1, 1], [], []>} : vector<64x128xbf16>, vector<128x128xbf16>, vector<64x128xf32> -> vector<64x128xf32>
    %78 = arith.addf %70, %77 : vector<64x128xf32>
    %c16 = arith.constant 16 : index
    %c0_49 = arith.constant 0 : index
    %79 = vector.load %arg6[%c16, %c0_49] : memref<82x128xbf16, #tpu.memory_space<vmem>>, vector<64x128xbf16>
    %c0_i32_50 = arith.constant 0 : i32
    %80 = arith.sitofp %c0_i32_50 : i32 to bf16
    %81 = vector.broadcast %80 : bf16 to vector<64x128xbf16>
    %82 = arith.select %33, %79, %81 : vector<64x128xi1>, vector<64x128xbf16>
    %c6 = arith.constant 6 : index
    %c0_51 = arith.constant 0 : index
    %c0_52 = arith.constant 0 : index
    %83 = vector.load %arg4[%c6, %c0_51, %c0_52] : memref<9x128x128xbf16, #tpu.memory_space<vmem>>, vector<1x128x128xbf16>
    %84 = vector.shape_cast %83 : vector<1x128x128xbf16> to vector<128x128xbf16>
    %cst_53 = arith.constant dense<0.000000e+00> : vector<64x128xf32>
    %85 = tpu.matmul %82, %84, %cst_53 {dimension_numbers = #tpu.dot_dimension_numbers<[1], [0], [0], [1], [0, 0, 1, 1], [], []>} : vector<64x128xbf16>, vector<128x128xbf16>, vector<64x128xf32> -> vector<64x128xf32>
    %86 = arith.addf %78, %85 : vector<64x128xf32>
    %c17 = arith.constant 17 : index
    %c0_54 = arith.constant 0 : index
    %87 = vector.load %arg6[%c17, %c0_54] : memref<82x128xbf16, #tpu.memory_space<vmem>>, vector<64x128xbf16>
    %c7 = arith.constant 7 : index
    %c0_55 = arith.constant 0 : index
    %c0_56 = arith.constant 0 : index
    %88 = vector.load %arg4[%c7, %c0_55, %c0_56] : memref<9x128x128xbf16, #tpu.memory_space<vmem>>, vector<1x128x128xbf16>
    %89 = vector.shape_cast %88 : vector<1x128x128xbf16> to vector<128x128xbf16>
    %cst_57 = arith.constant dense<0.000000e+00> : vector<64x128xf32>
    %90 = tpu.matmul %87, %89, %cst_57 {dimension_numbers = #tpu.dot_dimension_numbers<[1], [0], [0], [1], [0, 0, 1, 1], [], []>} : vector<64x128xbf16>, vector<128x128xbf16>, vector<64x128xf32> -> vector<64x128xf32>
    %91 = arith.addf %86, %90 : vector<64x128xf32>
    %c18 = arith.constant 18 : index
    %c0_58 = arith.constant 0 : index
    %92 = vector.load %arg6[%c18, %c0_58] : memref<82x128xbf16, #tpu.memory_space<vmem>>, vector<64x128xbf16>
    %c0_i32_59 = arith.constant 0 : i32
    %93 = arith.sitofp %c0_i32_59 : i32 to bf16
    %94 = vector.broadcast %93 : bf16 to vector<64x128xbf16>
    %95 = arith.select %35, %92, %94 : vector<64x128xi1>, vector<64x128xbf16>
    %c8_60 = arith.constant 8 : index
    %c0_61 = arith.constant 0 : index
    %c0_62 = arith.constant 0 : index
    %96 = vector.load %arg4[%c8_60, %c0_61, %c0_62] : memref<9x128x128xbf16, #tpu.memory_space<vmem>>, vector<1x128x128xbf16>
    %97 = vector.shape_cast %96 : vector<1x128x128xbf16> to vector<128x128xbf16>
    %cst_63 = arith.constant dense<0.000000e+00> : vector<64x128xf32>
    %98 = tpu.matmul %95, %97, %cst_63 {dimension_numbers = #tpu.dot_dimension_numbers<[1], [0], [0], [1], [0, 0, 1, 1], [], []>} : vector<64x128xbf16>, vector<128x128xbf16>, vector<64x128xf32> -> vector<64x128xf32>
    %99 = arith.addf %91, %98 : vector<64x128xf32>
    %c0_64 = arith.constant 0 : index
    %c0_65 = arith.constant 0 : index
    %c0_66 = arith.constant 0 : index
    %100 = vector.load %arg5[%c0_64, %c0_65, %c0_66] : memref<1x64x128xf32, #tpu.memory_space<vmem>>, vector<1x64x128xf32>
    %101 = vector.shape_cast %100 : vector<1x64x128xf32> to vector<64x128xf32>
    %102 = vector.shape_cast %99 : vector<64x128xf32> to vector<1x64x128xf32>
    tpu.vector_store %arg5[%c0_64, %c0_65, %c0_66], %102 {strides = array<i32>} : memref<1x64x128xf32, #tpu.memory_space<vmem>>, vector<1x64x128xf32>,
    return
  }
  func.func @transform_0(%arg0: i32) -> (i32, i32, i32) {
    %c0_i32 = arith.constant 0 : i32
    %c0_i32_0 = arith.constant 0 : i32
    %c0_i32_1 = arith.constant 0 : i32
    return %arg0, %c0_i32, %c0_i32_0 : i32, i32, i32
  }
  func.func @transform_1(%arg0: i32) -> (i32, i32) {
    %c0_i32 = arith.constant 0 : i32
    %c0_i32_0 = arith.constant 0 : i32
    %c0_i32_1 = arith.constant 0 : i32
    return %c0_i32, %c0_i32_0 : i32, i32
  }
  func.func @transform_2(%arg0: i32) -> (i32, i32) {
    %c0_i32 = arith.constant 0 : i32
    %c0_i32_0 = arith.constant 0 : i32
    %c0_i32_1 = arith.constant 0 : i32
    return %c0_i32, %c0_i32_0 : i32, i32
  }
  func.func @transform_3(%arg0: i32) -> (i32, i32, i32) {
    %c0_i32 = arith.constant 0 : i32
    %c0_i32_0 = arith.constant 0 : i32
    %c0_i32_1 = arith.constant 0 : i32
    %c0_i32_2 = arith.constant 0 : i32
    return %c0_i32, %c0_i32_0, %c0_i32_1 : i32, i32, i32
  }
  func.func @transform_4(%arg0: i32) -> (i32, i32, i32) {
    %c0_i32 = arith.constant 0 : i32
    %c0_i32_0 = arith.constant 0 : i32
    %c0_i32_1 = arith.constant 0 : i32
    return %arg0, %c0_i32, %c0_i32_0 : i32, i32, i32
  }
}

</mosaic_0001>

<bundles_post_ra>
// kernel: network_block_forward.8
= control target key start
LH: loop header
LB: loop body
LE: loop exit
PB: predicated region body
PF: predicated region fallthrough
CT: control target
= control target key end

     0   :  { %s318_s6 = smov 0   ;;  %s381_s0 = inlined_call_operand.vmem [shape: f32[512,128], index: 0, kind: input, shape index: {}]   ;;  %s382_s1 = inlined_call_operand.vmem [shape: f32[2,128], index: 1, kind: output, shape index: {}]  }
   0x1 LB: > { %s281_s7 = sadd.s32 4294967295, %s305_s6   ;;  %p284_p0 = scmp.ge.s32.totalorder %s305_s6, 1  ;;  %s305_s6 = sphi %s318_s6, %s11_s6  }
   0x2   : > { %p83_p1 = scmp.lt.s32.totalorder %s305_s6, 3 }
   0x4   : > { %p84_p2 = pnand %p284_p0, %p83_p1 }
   0x5   : > { %s285_s8 = sshll.u32 (!%p84_p2), %s281_s7, 5  ;;  %p287_p4 = scmp.ne.s32.totalorder (!%p84_p2), %s281_s7, 0 }
   0x6   : > { %87 = sbr.rel (%p84_p2) target bundleno = 98 (0x62), region = 24  ;;  %p99_p3 = scmp.lt.s32.totalorder (!%p84_p2), %s285_s8, 63 }
   0xb   : > { %s384_s8 = smov (!%p99_p3, %s285_s8), 63  ;;  %107 = sbr.rel (%p287_p4) target bundleno = 18 (0x12), region = 28 }
   0xc   : > { %s286_s9 = sshll.u32 %s384_s8, 3 }
   0xd   : > { %s329_s12 = scalar_lea.vmem %s381_s0, %s286_s9 }
  0x10   : > { %v307_v0 = vmov 0.0  }
  0x11   : > { %108 = vst [vmem:[%s382_s1] sm:$0x3] %v307_v0 }
  0x12 PF: > { %v109_v1 = vld [vmem:[%s329_s12] sm:$0xff]  ;;  %v110_v2 = vld [vmem:[%s329_s12 + $0x8] sm:$0xff]  ;;  %v111_v3 = vld [vmem:[%s329_s12 + $0x10] sm:$0xff] }
  0x13   : > { %v112_v4 = vld [vmem:[%s329_s12 + $0x18] sm:$0xff]  ;;  %v142_v5 = vadd.f32 %v110_v2, %v109_v1  ;;  %v182_v6 = vmul.f32 %v109_v1, %v109_v1  ;;  %v183_v7 = vmul.f32 %v110_v2, %v110_v2  ;;  %v184_v8 = vmul.f32 %v111_v3, %v111_v3  ;;  %v113_v9 = vld [vmem:[%s329_s12 + $0x20] sm:$0xff]  ;;  %v114_v13 = vld [vmem:[%s329_s12 + $0x28] sm:$0xff] }
  0x14   : > { %v185_v11 = vmul.f32 %v112_v4, %v112_v4  ;;  %v186_v15 = vmul.f32 %v113_v9, %v113_v9  ;;  %v115_v17 = vld [vmem:[%s329_s12 + $0x30] sm:$0xff]  ;;  %v187_v19 = vmul.f32 %v114_v13, %v114_v13  ;;  %v116_v21 = vld [vmem:[%s329_s12 + $0x38] sm:$0xff]  ;;  %v117_v25 = vld [vmem:[%s329_s12 + $0x40] sm:$0xff] }
  0x15   : > { %v143_v10 = vadd.f32 %v142_v5, %v111_v3  ;;  %v214_v12 = vadd.f32 %v183_v7, %v182_v6  ;;  %v188_v23 = vmul.f32 %v115_v17, %v115_v17  ;;  %v189_v27 = vmul.f32 %v116_v21, %v116_v21  ;;  %v118_v29 = vld [vmem:[%s329_s12 + $0x48] sm:$0xff]  ;;  %v119_v33 = vld [vmem:[%s329_s12 + $0x50] sm:$0xff]  ;;  %v120_v37 = vld [vmem:[%s329_s12 + $0x58] sm:$0xff] }
  0x16   : > { %v190_v31 = vmul.f32 %v117_v25, %v117_v25  ;;  %v191_v35 = vmul.f32 %v118_v29, %v118_v29  ;;  %v192_v39 = vmul.f32 %v119_v33, %v119_v33  ;;  %v121_v41 = vld [vmem:[%s329_s12 + $0x60] sm:$0xff]  ;;  %v193_v43 = vmul.f32 %v120_v37, %v120_v37  ;;  %v122_v45 = vld [vmem:[%s329_s12 + $0x68] sm:$0xff]  ;;  %v123_v49 = vld [vmem:[%s329_s12 + $0x70] sm:$0xff] }
  0x17   : > { %v144_v14 = vadd.f32 %v143_v10, %v112_v4  ;;  %v215_v16 = vadd.f32 %v214_v12, %v184_v8  ;;  %v194_v47 = vmul.f32 %v121_v41, %v121_v41  ;;  %v195_v51 = vmul.f32 %v122_v45, %v122_v45  ;;  %v124_v53 = vld [vmem:[%s329_s12 + $0x78] sm:$0xff]  ;;  %v125_v57 = vld [vmem:[%s329_s12 + $0x80] sm:$0xff]  ;;  %v126_v61 = vld [vmem:[%s329_s12 + $0x88] sm:$0xff] }
  0x18   : > { %v196_v55 = vmul.f32 %v123_v49, %v123_v49  ;;  %v197_v59 = vmul.f32 %v124_v53, %v124_v53  ;;  %v198_v63 = vmul.f32 %v125_v57, %v125_v57  ;;  %v127_v1 = vld [vmem:[%s329_s12 + $0x90] sm:$0xff]  ;;  %v199_v3 = vmul.f32 %v126_v61, %v126_v61  ;;  %v128_v5 = vld [vmem:[%s329_s12 + $0x98] sm:$0xff] }
  0x19   : > { %v145_v18 = vadd.f32 %v144_v14, %v113_v9  ;;  %v216_v20 = vadd.f32 %v215_v16, %v185_v11  ;;  %v200_v7 = vmul.f32 %v127_v1, %v127_v1  ;;  %v129_v9 = vld [vmem:[%s329_s12 + $0xa0] sm:$0xff]  ;;  %v201_v11 = vmul.f32 %v128_v5, %v128_v5 }
  0x1b   : > { %v146_v22 = vadd.f32 %v145_v18, %v114_v13  ;;  %v217_v24 = vadd.f32 %v216_v20, %v186_v15  ;;  %v130_v13 = vld [vmem:[%s329_s12 + $0xa8] sm:$0xff]  ;;  %v202_v15 = vmul.f32 %v129_v9, %v129_v9 }
  0x1d   : > { %v147_v26 = vadd.f32 %v146_v22, %v115_v17  ;;  %v218_v28 = vadd.f32 %v217_v24, %v187_v19  ;;  %v131_v17 = vld [vmem:[%s329_s12 + $0xb0] sm:$0xff]  ;;  %v203_v19 = vmul.f32 %v130_v13, %v130_v13 }
  0x1f   : > { %v148_v30 = vadd.f32 %v147_v26, %v116_v21  ;;  %v219_v32 = vadd.f32 %v218_v28, %v188_v23  ;;  %v132_v21 = vld [vmem:[%s329_s12 + $0xb8] sm:$0xff]  ;;  %v204_v23 = vmul.f32 %v131_v17, %v131_v17 }
  0x21   : > { %v149_v34 = vadd.f32 %v148_v30, %v117_v25  ;;  %v220_v36 = vadd.f32 %v219_v32, %v189_v27  ;;  %v133_v25 = vld [vmem:[%s329_s12 + $0xc0] sm:$0xff]  ;;  %v205_v27 = vmul.f32 %v132_v21, %v132_v21 }
  0x23   : > { %v150_v38 = vadd.f32 %v149_v34, %v118_v29  ;;  %v221_v40 = vadd.f32 %v220_v36, %v190_v31  ;;  %v134_v29 = vld [vmem:[%s329_s12 + $0xc8] sm:$0xff]  ;;  %v206_v31 = vmul.f32 %v133_v25, %v133_v25 }
  0x25   : > { %v151_v42 = vadd.f32 %v150_v38, %v119_v33  ;;  %v222_v44 = vadd.f32 %v221_v40, %v191_v35  ;;  %v135_v33 = vld [vmem:[%s329_s12 + $0xd0] sm:$0xff]  ;;  %v207_v35 = vmul.f32 %v134_v29, %v134_v29 }
  0x27   : > { %v152_v46 = vadd.f32 %v151_v42, %v120_v37  ;;  %v223_v48 = vadd.f32 %v222_v44, %v192_v39  ;;  %v136_v37 = vld [vmem:[%s329_s12 + $0xd8] sm:$0xff]  ;;  %v208_v39 = vmul.f32 %v135_v33, %v135_v33 }
  0x29   : > { %v153_v50 = vadd.f32 %v152_v46, %v121_v41  ;;  %v224_v52 = vadd.f32 %v223_v48, %v193_v43  ;;  %v137_v41 = vld [vmem:[%s329_s12 + $0xe0] sm:$0xff]  ;;  %v209_v43 = vmul.f32 %v136_v37, %v136_v37 }
  0x2b   : > { %v154_v54 = vadd.f32 %v153_v50, %v122_v45  ;;  %v225_v56 = vadd.f32 %v224_v52, %v194_v47  ;;  %v138_v45 = vld [vmem:[%s329_s12 + $0xe8] sm:$0xff]  ;;  %v210_v47 = vmul.f32 %v137_v41, %v137_v41 }
  0x2d   : > { %v155_v58 = vadd.f32 %v154_v54, %v123_v49  ;;  %v226_v60 = vadd.f32 %v225_v56, %v195_v51  ;;  %v139_v49 = vld [vmem:[%s329_s12 + $0xf0] sm:$0xff]  ;;  %v211_v51 = vmul.f32 %v138_v45, %v138_v45 }
  0x2f   : > { %v156_v62 = vadd.f32 %v155_v58, %v124_v53  ;;  %v227_v0 = vadd.f32 %v226_v60, %v196_v55  ;;  %v140_v53 = vld [vmem:[%s329_s12 + $0xf8] sm:$0xff]  ;;  %v212_v55 = vmul.f32 %v139_v49, %v139_v49 }
  0x30   : > { %v213_v58 = vmul.f32 %v140_v53, %v140_v53 }
  0x31   : > { %v157_v2 = vadd.f32 %v156_v62, %v125_v57  ;;  %v228_v4 = vadd.f32 %v227_v0, %v197_v59 }
  0x33   : > { %v158_v6 = vadd.f32 %v157_v2, %v126_v61  ;;  %v229_v8 = vadd.f32 %v228_v4, %v198_v63 }
  0x35   : > { %v159_v10 = vadd.f32 %v158_v6, %v127_v1  ;;  %v230_v12 = vadd.f32 %v229_v8, %v199_v3 }
  0x37   : > { %v160_v14 = vadd.f32 %v159_v10, %v128_v5  ;;  %v231_v16 = vadd.f32 %v230_v12, %v200_v7  ;;  %v141_v7 = vld [vmem:[%s382_s1] sm:$0x1]  ;;  %v181_v12 = vld [vmem:[%s382_s1 + $0x1] sm:$0x1] }
  0x39   : > { %v161_v18 = vadd.f32 %v160_v14, %v129_v9  ;;  %v232_v20 = vadd.f32 %v231_v16, %v201_v11 }
  0x3b   : > { %v162_v22 = vadd.f32 %v161_v18, %v130_v13  ;;  %v233_v24 = vadd.f32 %v232_v20, %v202_v15 }
  0x3d   : > { %v163_v26 = vadd.f32 %v162_v22, %v131_v17  ;;  %v234_v28 = vadd.f32 %v233_v24, %v203_v19 }
  0x3f   : > { %v164_v30 = vadd.f32 %v163_v26, %v132_v21  ;;  %v235_v32 = vadd.f32 %v234_v28, %v204_v23 }
  0x41   : > { %v165_v34 = vadd.f32 %v164_v30, %v133_v25  ;;  %v236_v36 = vadd.f32 %v235_v32, %v205_v27 }
  0x43   : > { %v166_v38 = vadd.f32 %v165_v34, %v134_v29  ;;  %v237_v40 = vadd.f32 %v236_v36, %v206_v31 }
  0x45   : > { %v167_v42 = vadd.f32 %v166_v38, %v135_v33  ;;  %v238_v44 = vadd.f32 %v237_v40, %v207_v35 }
  0x47   : > { %v168_v46 = vadd.f32 %v167_v42, %v136_v37  ;;  %v239_v48 = vadd.f32 %v238_v44, %v208_v39 }
  0x49   : > { %v169_v50 = vadd.f32 %v168_v46, %v137_v41  ;;  %v240_v52 = vadd.f32 %v239_v48, %v209_v43 }
  0x4b   : > { %v170_v54 = vadd.f32 %v169_v50, %v138_v45  ;;  %v241_v56 = vadd.f32 %v240_v52, %v210_v47 }
  0x4d   : > { %v171_v57 = vadd.f32 %v170_v54, %v139_v49  ;;  %v242_v59 = vadd.f32 %v241_v56, %v211_v51 }
  0x4f   : > { %v172_v60 = vadd.f32 %v171_v57, %v140_v53  ;;  %v243_v61 = vadd.f32 %v242_v59, %v212_v55 }
  0x51   : > { %v173_v62 = vrot.slane %v172_v60, 4  ;;  %v244_v63 = vadd.f32 %v243_v61, %v213_v58 }
  0x53   : > { %v174_v0 = vadd.f32 %v173_v62, %v172_v60  ;;  %v245_v1 = vrot.slane %v244_v63, 4 }
  0x55   : > { %v175_v2 = vrot.slane %v174_v0, 2  ;;  %v246_v3 = vadd.f32 %v245_v1, %v244_v63 }
  0x57   : > { %v176_v4 = vadd.f32 %v175_v2, %v174_v0  ;;  %v247_v5 = vrot.slane %v246_v3, 2 }
  0x59   : > { %v177_v6 = vrot.slane %v176_v4, 1  ;;  %v248_v8 = vadd.f32 %v247_v5, %v246_v3 }
  0x5b   : > { %v178_v9 = vadd.f32 %v177_v6, %v176_v4  ;;  %v249_v10 = vrot.slane %v248_v8, 1 }
  0x5d   : > { %v179_v11 = vadd.f32 %v178_v9, %v141_v7  ;;  %v250_v13 = vadd.f32 %v249_v10, %v248_v8 }
  0x5f   : > { %180 = vst [vmem:[%s382_s1] sm:$0x1] %v179_v11  ;;  %v251_v14 = vadd.f32 %v250_v13, %v181_v12 }
  0x61   : > { %252 = vst [vmem:[%s382_s1 + $0x1] sm:$0x1] %v251_v14 }
  0x62 PF: > { %s11_s6 = sadd.s32 1, %s305_s6  }
  0x63   : > { %p8_p5 = scmp.ge.s32.totalorder %s11_s6, 4  }
  0x65   :  { %10 = sbr.rel (!%p8_p5) target bundleno = 1 (0x1), region = 54 }

// kernel: network_block_forward.10
= control target key start
LH: loop header
LB: loop body
LE: loop exit
PB: predicated region body
PF: predicated region fallthrough
CT: control target
= control target key end

     0   :  { %s222_s6 = smov 0   ;;  %s251_s0 = inlined_call_operand.vmem [shape: f32[128,128], index: 0, kind: input, shape index: {}]   ;;  %s252_s1 = inlined_call_operand.vmem [shape: f32[2,128], index: 1, kind: output, shape index: {}]  }
   0x1 LB: > { %s185_s7 = sadd.s32 4294967295, %s209_s6   ;;  %p188_p0 = scmp.ge.s32.totalorder %s209_s6, 1  ;;  %s209_s6 = sphi %s222_s6, %s11_s6  }
   0x2   : > { %p83_p1 = scmp.lt.s32.totalorder %s209_s6, 3 }
   0x4   : > { %p84_p2 = pnand %p188_p0, %p83_p1 }
   0x5   : > { %s189_s8 = sshll.u32 (!%p84_p2), %s185_s7, 3  ;;  %p191_p4 = scmp.ne.s32.totalorder (!%p84_p2), %s185_s7, 0 }
   0x6   : > { %87 = sbr.rel (%p84_p2) target bundleno = 50 (0x32), region = 24  ;;  %p99_p3 = scmp.lt.s32.totalorder (!%p84_p2), %s189_s8, 15 }
   0xb   : > { %s254_s8 = smov (!%p99_p3, %s189_s8), 15  ;;  %107 = sbr.rel (%p191_p4) target bundleno = 18 (0x12), region = 28 }
   0xc   : > { %s190_s9 = sshll.u32 %s254_s8, 3 }
   0xd   : > { %s102_s12 = scalar_lea.vmem %s251_s0, %s190_s9 }
  0x10   : > { %v211_v0 = vmov 0.0  }
  0x11   : > { %108 = vst [vmem:[%s252_s1] sm:$0x3] %v211_v0 }
  0x12 PF: > { %v109_v1 = vld [vmem:[%s102_s12] sm:$0xff]  ;;  %v110_v2 = vld [vmem:[%s102_s12 + $0x8] sm:$0xff]  ;;  %v111_v3 = vld [vmem:[%s102_s12 + $0x10] sm:$0xff] }
  0x13   : > { %v112_v4 = vld [vmem:[%s102_s12 + $0x18] sm:$0xff]  ;;  %v118_v5 = vadd.f32 %v110_v2, %v109_v1  ;;  %v134_v6 = vmul.f32 %v109_v1, %v109_v1  ;;  %v135_v7 = vmul.f32 %v110_v2, %v110_v2  ;;  %v136_v8 = vmul.f32 %v111_v3, %v111_v3  ;;  %v113_v9 = vld [vmem:[%s102_s12 + $0x20] sm:$0xff]  ;;  %v114_v13 = vld [vmem:[%s102_s12 + $0x28] sm:$0xff] }
  0x14   : > { %v137_v11 = vmul.f32 %v112_v4, %v112_v4  ;;  %v138_v15 = vmul.f32 %v113_v9, %v113_v9  ;;  %v115_v17 = vld [vmem:[%s102_s12 + $0x30] sm:$0xff]  ;;  %v139_v19 = vmul.f32 %v114_v13, %v114_v13  ;;  %v116_v21 = vld [vmem:[%s102_s12 + $0x38] sm:$0xff] }
  0x15   : > { %v119_v10 = vadd.f32 %v118_v5, %v111_v3  ;;  %v142_v12 = vadd.f32 %v135_v7, %v134_v6  ;;  %v140_v23 = vmul.f32 %v115_v17, %v115_v17  ;;  %v141_v26 = vmul.f32 %v116_v21, %v116_v21 }
  0x17   : > { %v120_v14 = vadd.f32 %v119_v10, %v112_v4  ;;  %v143_v16 = vadd.f32 %v142_v12, %v136_v8 }
  0x18   : > { %v117_v40 = vld [vmem:[%s252_s1] sm:$0x1]  ;;  %v133_v43 = vld [vmem:[%s252_s1 + $0x1] sm:$0x1] }
  0x19   : > { %v121_v18 = vadd.f32 %v120_v14, %v113_v9  ;;  %v144_v20 = vadd.f32 %v143_v16, %v137_v11 }
  0x1b   : > { %v122_v22 = vadd.f32 %v121_v18, %v114_v13  ;;  %v145_v24 = vadd.f32 %v144_v20, %v138_v15 }
  0x1d   : > { %v123_v25 = vadd.f32 %v122_v22, %v115_v17  ;;  %v146_v27 = vadd.f32 %v145_v24, %v139_v19 }
  0x1f   : > { %v124_v28 = vadd.f32 %v123_v25, %v116_v21  ;;  %v147_v29 = vadd.f32 %v146_v27, %v140_v23 }
  0x21   : > { %v125_v30 = vrot.slane %v124_v28, 4  ;;  %v148_v31 = vadd.f32 %v147_v29, %v141_v26 }
  0x23   : > { %v126_v32 = vadd.f32 %v125_v30, %v124_v28  ;;  %v149_v33 = vrot.slane %v148_v31, 4 }
  0x25   : > { %v127_v34 = vrot.slane %v126_v32, 2  ;;  %v150_v35 = vadd.f32 %v149_v33, %v148_v31 }
  0x27   : > { %v128_v36 = vadd.f32 %v127_v34, %v126_v32  ;;  %v151_v37 = vrot.slane %v150_v35, 2 }
  0x29   : > { %v129_v38 = vrot.slane %v128_v36, 1  ;;  %v152_v39 = vadd.f32 %v151_v37, %v150_v35 }
  0x2b   : > { %v130_v41 = vadd.f32 %v129_v38, %v128_v36  ;;  %v153_v42 = vrot.slane %v152_v39, 1 }
  0x2d   : > { %v131_v44 = vadd.f32 %v130_v41, %v117_v40  ;;  %v154_v45 = vadd.f32 %v153_v42, %v152_v39 }
  0x2f   : > { %132 = vst [vmem:[%s252_s1] sm:$0x1] %v131_v44  ;;  %v155_v46 = vadd.f32 %v154_v45, %v133_v43 }
  0x31   : > { %156 = vst [vmem:[%s252_s1 + $0x1] sm:$0x1] %v155_v46 }
  0x32 PF: > { %s11_s6 = sadd.s32 1, %s209_s6  }
  0x33   : > { %p8_p5 = scmp.ge.s32.totalorder %s11_s6, 4  }
  0x35   :  { %10 = sbr.rel (!%p8_p5) target bundleno = 1 (0x1), region = 54 }

// kernel: network_block_forward.11
= control target key start
LH: loop header
LB: loop body
LE: loop exit
PB: predicated region body
PF: predicated region fallthrough
CT: control target
= control target key end

     0   :  { %s2714_s18 = smov 0   ;;  %s3647_s0 = inlined_call_operand.vmem [shape: f32[2,64,128], index: 0, kind: input, shape index: {}]   ;;  %s3648_s1 = inlined_call_operand.vmem [shape: f32[1,128], index: 1, kind: input, shape index: {}]   ;;  %s3649_s2 = inlined_call_operand.vmem [shape: f32[1,128], index: 2, kind: input, shape index: {}]   ;;  %s3650_s3 = inlined_call_operand.vmem [shape: bf16[9,128,128], index: 3, kind: input, shape index: {}]   ;;  %s3651_s4 = inlined_call_operand.vmem [shape: f32[2,64,128], index: 4, kind: input, shape index: {}]   ;;  %s3652_s5 = inlined_call_operand.vmem [shape: f32[2,64,128], index: 5, kind: output, shape index: {}]  }
   0x1 LB: > { %s2084_s19 = sadd.s32 4294967295, %s2681_s18   ;;  %p2088_p0 = scmp.ge.s32.totalorder %s2681_s18, 1  ;;  %s2681_s18 = sphi %s2714_s18, %s15_s18  }
   0x2   : > { %p197_p1 = scmp.lt.s32.totalorder %s2681_s18, 3 }
   0x4   : > { %p198_p2 = pnand %p2088_p0, %p197_p1 }
   0x5   : > { %p230_p3 = scmp.lt.s32.totalorder (!%p198_p2), %s2084_s19, 1 }
   0x6   : > { %201 = sbr.rel (%p198_p2) target bundleno = 354 (0x162), region = 40 }
   0xb   : > { %v2583_v0 = vld [vmem:[%s3650_s3 + $0x78] sm:$0xff]  ;;  %v405_v1 = vlaneseq  ;;  %v2582_v3 = vld [vmem:[%s3650_s3 + $0x70] sm:$0xff]  ;;  %s3744_s19 = smov (!%p230_p3, %s2084_s19), 1  ;;  %v2683_v6 = vmov 0   ;;  %v2581_v7 = vld [vmem:[%s3650_s3 + $0x68] sm:$0xff]  ;;  %vm289_vm1 = vcmask 1040384  }
   0xc   : > { %v2591_v2 = vld [vmem:[%s3650_s3 + $0xb8] sm:$0xff]  ;;  %2648 = vmatpush.bf16.msra.mxu1 %v2583_v0  ;;  %696 = vmatpush.bf16.msra.mxu0 %v2583_v0  ;;  %v2590_v4 = vld [vmem:[%s3650_s3 + $0xb0] sm:$0xff]  ;;  %288 = vst [vmem:[#allocation2] sm:$0xf] %v2683_v6  ;;  %s2741_s7 = sshll.u32 %s3744_s19, 6  ;;  %v2589_v9 = vld [vmem:[%s3650_s3 + $0xa8] sm:$0xff]  ;;  %v2785_v23 = vunpack.c.l.b16 %v2683_v6 }
   0xd   : > { %1042 = vmatpush.bf16.msra.mxu2 %v2591_v2  ;;  %v2599_v5 = vld [vmem:[%s3650_s3 + $0xf8] sm:$0xff]  ;;  %vm290_vm0 = vsmask.f32 256  ;;  %v2743_v8 = vshrl.u32 %v405_v1, 7  ;;  %v2598_v10 = vld [vmem:[%s3650_s3 + $0xf0] sm:$0xff]  ;;  %s2755_s14 = scalar_lea.vmem %s3647_s0, %s2741_s7  ;;  %v2597_v24 = vld [vmem:[%s3650_s3 + $0xe8] sm:$0xff]  ;;  %s3604_s11 = scalar_lea.vmem %s3651_s4, %s2741_s7 }
   0xe   : > { %1177 = vmatpush.bf16.msra.mxu3 %v2599_v5  ;;  %v250_v11 = vld [vmem:[%s2755_s14 + $0x10] sm:$0xff]  ;;  %v251_v12 = vld [vmem:[%s2755_s14 + $0x18] sm:$0xff]  ;;  %v252_v13 = vld [vmem:[%s2755_s14 + $0x20] sm:$0xff]  ;;  %301 = vst [vmem:[#allocation2 + $0x28] sm:$0x1] %v2683_v6  ;;  %vm295_vm5 = vcmask 1043456   ;;  %s3611_s15 = scalar_lea.vmem %s3652_s5, %s2741_s7 }
   0xf   : > { %v2762_v14 = vadd.s32 8, %v2743_v8  ;;  %v253_v15 = vld [vmem:[%s2755_s14 + $0x28] sm:$0xff]  ;;  %v254_v16 = vld [vmem:[%s2755_s14 + $0x30] sm:$0xff]  ;;  %v2769_v17 = vld [vmem:[%s3648_s1] ss:$0 sm:$0xff]  ;;  %v2772_v18 = vadd.s32 16, %v2743_v8 }
  0x10   : > { %2649 = vmatpush.bf16.msra.mxu1 %v2582_v3  ;;  %697 = vmatpush.bf16.msra.mxu0 %v2582_v3  ;;  %v2775_v19 = vadd.s32 24, %v2743_v8  ;;  %v2780_v20 = vld [vmem:[%s3649_s2] ss:$0 sm:$0xff]  ;;  %v418_v21 = vand.u32 7, %v2743_v8  ;;  %v262_v25 = vmul.f32 %v2769_v17, %v250_v11  ;;  %v263_v26 = vmul.f32 %v2769_v17, %v251_v12  ;;  %v249_v40 = vld [vmem:[%s2755_s14 + $0x8] sm:$0xff]  ;;  %vm2817_vm4 = vmand %vm289_vm1, %vm290_vm0 }
  0x11   : > { %1043 = vmatpush.bf16.msra.mxu2 %v2590_v4  ;;  %v425_v22 = vand.u32 7, %v2762_v14  ;;  %v264_v27 = vmul.f32 %v2769_v17, %v252_v13  ;;  %v265_v28 = vmul.f32 %v2769_v17, %v253_v15  ;;  %vm310_vm2 = vsmask.f32 4368  ;;  %v2580_v29 = vld [vmem:[%s3650_s3 + $0x60] sm:$0xff]  ;;  %v2579_v52 = vld [vmem:[%s3650_s3 + $0x58] sm:$0xff]  ;;  %v2586_v15 = vld [vmem:[%s3650_s3 + $0x90] sm:$0xff] }
  0x12   : > { %1178 = vmatpush.bf16.msra.mxu3 %v2598_v10  ;;  %v2588_v30 = vld [vmem:[%s3650_s3 + $0xa0] sm:$0xff]  ;;  %v266_v31 = vmul.f32 %v2769_v17, %v254_v16  ;;  %v432_v33 = vand.u32 7, %v2772_v18  ;;  %v439_v34 = vand.u32 7, %v2775_v19  ;;  %vm2806_vm3 = vcmp.ne.s32.totalorder %v418_v21, 7  ;;  %v2587_v57 = vld [vmem:[%s3650_s3 + $0x98] sm:$0xff]  ;;  %vm2863_vm9 = vmor %vm290_vm0, %vm310_vm2 }
  0x13   : > { %v248_v32 = vld [vmem:[%s2755_s14] sm:$0xff]  ;;  %v274_v36 = vadd.f32 %v2780_v20, %v262_v25  ;;  %v275_v37 = vadd.f32 %v2780_v20, %v263_v26  ;;  %v276_v38 = vadd.f32 %v2780_v20, %v264_v27  ;;  %v277_v39 = vadd.f32 %v2780_v20, %v265_v28  ;;  %vm827_vm10 = vmpackc.low %vm2806_vm3, %vm2806_vm3 }
  0x14   : > { %2650 = vmatpush.bf16.msra.mxu1 %v2581_v7  ;;  %698 = vmatpush.bf16.msra.mxu0 %v2581_v7  ;;  %v292_v42 = vld [vmem:[#allocation2 + $0x4] sm:$0x1]  ;;  %v278_v43 = vadd.f32 %v2780_v20, %v266_v31  ;;  %v260_v45 = vmul.f32 %v2769_v17, %v248_v32  ;;  %v261_v46 = vmul.f32 %v2769_v17, %v249_v40  ;;  %vm296_vm6 = vsmask.f32 7938  ;;  %v2595_v7 = vld [vmem:[%s3650_s3 + $0xd8] sm:$0xff]  ;;  %v2577_v40 = vld [vmem:[%s3650_s3 + $0x48] sm:$0xff] }
  0x15   : > { %1044 = vmatpush.bf16.msra.mxu2 %v2589_v9  ;;  %v2596_v44 = vld [vmem:[%s3650_s3 + $0xe0] sm:$0xff]  ;;  %v293_v47 = vsel %vm2817_vm4, 0, %v292_v42  ;;  %v282_v48 = vmax.f32 %v274_v36, 0.0  ;;  %v283_v49 = vmax.f32 %v275_v37, 0.0  ;;  %v284_v50 = vmax.f32 %v276_v38, 0.0  ;;  %v2578_v9 = vld [vmem:[%s3650_s3 + $0x50] sm:$0xff]  ;;  %vm2904_vm13 = vmand %vm295_vm5, %vm296_vm6 }
  0x16   : > { %1179 = vmatpush.bf16.msra.mxu3 %v2597_v24  ;;  %v285_v51 = vmax.f32 %v277_v39, 0.0  ;;  %294 = vst [vmem:[#allocation2 + $0x4] sm:$0x1] %v293_v47  ;;  %v286_v53 = vmax.f32 %v278_v43, 0.0  ;;  %v272_v54 = vadd.f32 %v2780_v20, %v260_v45  ;;  %v273_v55 = vadd.f32 %v2780_v20, %v261_v46  ;;  %v2594_v39 = vld [vmem:[%s3650_s3 + $0xd0] sm:$0xff]  ;;  %v2584_v56 = vld [vmem:[%s3650_s3 + $0x80] sm:$0xff] }
  0x17   : > { %vm2836_vm7 = vcmp.ne.s32.totalorder %v425_v22, 7  ;;  %v2843_v58 = vpack.c.bf16 %v282_v48, %v282_v48  ;;  %v305_v59 = vpack.c.bf16 %v283_v49, %v283_v49  ;;  %v306_v60 = vpack.c.bf16 %v284_v50, %v284_v50  ;;  %v2585_v48 = vld [vmem:[%s3650_s3 + $0x88] sm:$0xff]  ;;  %v2568_v19 = vld [vmem:[%s3650_s3] sm:$0xff] }
  0x18   : > { %2651 = vmatpush.bf16.msra.mxu1 %v2580_v29  ;;  %699 = vmatpush.bf16.msra.mxu0 %v2580_v29  ;;  %v307_v61 = vpack.c.bf16 %v285_v51, %v285_v51  ;;  %v308_v62 = vpack.c.bf16 %v286_v53, %v286_v53  ;;  %v280_v63 = vmax.f32 %v272_v54, 0.0  ;;  %v281_v0 = vmax.f32 %v273_v55, 0.0  ;;  %vm828_vm11 = vmpackc.low %vm2836_vm7, %vm2836_vm7  ;;  %v2593_v51 = vld [vmem:[%s3650_s3 + $0xc8] sm:$0xff] }
  0x19   : > { %1045 = vmatpush.bf16.msra.mxu2 %v2588_v30  ;;  %vm2847_vm8 = vcmp.ne.s32.totalorder %v432_v33, 7  ;;  %v330_v2 = vshrl.u32 %v2843_v58, 16  ;;  %v339_v3 = vshrl.u32 %v305_v59, 16  ;;  %v342_v4 = vshll.u32 %v305_v59, 16 }
  0x1a   : > { %v348_v5 = vshrl.u32 %v306_v60, 16  ;;  %1180 = vmatpush.bf16.msra.mxu3 %v2596_v44  ;;  %v351_v10 = vshll.u32 %v306_v60, 16  ;;  %v357_v11 = vshrl.u32 %v307_v61, 16  ;;  %v360_v12 = vshll.u32 %v307_v61, 16  ;;  %vm829_vm12 = vmpackc.low %vm2847_vm8, %vm2847_vm8  ;;  %v2621_v60 = vld [vmem:[%s3650_s3 + $0x188] sm:$0xff] }
  0x1b   : > { %v366_v13 = vshrl.u32 %v308_v62, 16  ;;  %v332_v16 = vrot.slane %v330_v2, 7  ;;  %v341_v24 = vrot.slane %v339_v3, 7  ;;  %v369_v26 = vshll.u32 %v308_v62, 16  ;;  %v2575_v3 = vld [vmem:[%s3650_s3 + $0x38] sm:$0xff] }
  0x1c   : > { %2652 = vmatpush.bf16.msra.mxu1 %v2579_v52  ;;  %700 = vmatpush.bf16.msra.mxu0 %v2579_v52  ;;  %v350_v25 = vrot.slane %v348_v5, 7  ;;  %v359_v28 = vrot.slane %v357_v11, 7  ;;  %v302_v30 = vpack.c.bf16 %v280_v63, %v280_v63  ;;  %v303_v31 = vpack.c.bf16 %v281_v0, %v281_v0  ;;  %v2576_v52 = vld [vmem:[%s3650_s3 + $0x40] sm:$0xff]  ;;  %v2611_v11 = vld [vmem:[%s3650_s3 + $0x138] sm:$0xff] }
  0x1d   : > { %1046 = vmatpush.bf16.msra.mxu2 %v2587_v57  ;;  %v2867_v29 = vrot.slane %v366_v13, 7  ;;  %v337_v32 = vrot.slane %v332_v16, 4  ;;  %v344_v36 = vor.u32 %v342_v4, %v341_v24  ;;  %v346_v37 = vrot.slane %v341_v24, 4  ;;  %v392_v59 = vld [vmem:[#allocation2 + $0x4] sm:$0xf] }
  0x1e   : > { %v353_v38 = vor.u32 %v351_v10, %v350_v25  ;;  %1181 = vmatpush.bf16.msra.mxu3 %v2595_v7  ;;  %v355_v42 = vrot.slane %v350_v25, 4  ;;  %v362_v43 = vor.u32 %v360_v12, %v359_v28  ;;  %v364_v44 = vrot.slane %v359_v28, 4  ;;  %v255_v28 = vld [vmem:[%s2755_s14 + $0x38] sm:$0xff] }
  0x1f   : > { %v371_v45 = vor.u32 %v369_v26, %v2867_v29  ;;  %v345_v46 = vsel %vm2863_vm9, %v337_v32, %v344_v36  ;;  %v313_v49 = vshrl.u32 %v302_v30, 16  ;;  %v316_v50 = vshll.u32 %v302_v30, 16 }
  0x20   : > { %2653 = vmatpush.bf16.msra.mxu1 %v2578_v9  ;;  %701 = vmatpush.bf16.msra.mxu0 %v2578_v9  ;;  %v354_v47 = vsel %vm2863_vm9, %v346_v37, %v353_v38  ;;  %v363_v53 = vsel %vm2863_vm9, %v355_v42, %v362_v43  ;;  %397 = vst [vmem:[#allocation2 + $0x10] sm:$0xf] %v345_v46  ;;  %v321_v55 = vshrl.u32 %v303_v31, 16  ;;  %v324_v57 = vshll.u32 %v303_v31, 16  ;;  %v2574_v37 = vld [vmem:[%s3650_s3 + $0x30] sm:$0xff] }
  0x21   : > { %1047 = vmatpush.bf16.msra.mxu2 %v2586_v15  ;;  %v372_v54 = vsel %vm2863_vm9, %v364_v44, %v371_v45  ;;  %398 = vst [vmem:[#allocation2 + $0x14] sm:$0xf] %v354_v47  ;;  %v315_v61 = vrot.slane %v313_v49, 7  ;;  %v333_v62 = vshll.u32 %v2843_v58, 16  ;;  %vm2911_vm14 = vcmp.ne.s32.totalorder %v439_v34, 7  ;;  %v2610_v45 = vld [vmem:[%s3650_s3 + $0x130] sm:$0xff] }
  0x22   : > { %v835_v0 = vsel %vm827_vm10, 65537, %v2683_v6  ;;  %1182 = vmatpush.bf16.msra.mxu3 %v2594_v39  ;;  %399 = vst [vmem:[#allocation2 + $0x18] sm:$0xf] %v363_v53  ;;  %v323_v2 = vrot.slane %v321_v55, 7  ;;  %vm830_vm15 = vmpackc.low %vm2911_vm14, %vm2911_vm14  ;;  %v836_v58 = vsel %vm828_vm11, 65537, %v2683_v6  ;;  %v837_v35 = vsel %vm829_vm12, 65537, %v2683_v6 }
  0x23   : > { %vm843_vm0 = vcmask 1044484   ;;  %400 = vst [vmem:[#allocation2 + $0x1c] sm:$0xf] %v372_v54  ;;  %v318_v4 = vor.u32 %v316_v50, %v315_v61  ;;  %v319_v5 = vrot.slane %v315_v61, 4  ;;  %v335_v7 = vor.u32 %v333_v62, %v332_v16  ;;  %v2573_v55 = vld [vmem:[%s3650_s3 + $0x28] sm:$0xff] }
  0x24   : > { %2654 = vmatpush.bf16.msra.mxu1 %v2577_v40  ;;  %702 = vmatpush.bf16.msra.mxu0 %v2577_v40  ;;  %v2943_v9 = vsel %vm830_vm15, 65537, %v2683_v6  ;;  %v326_v1 = vor.u32 %v324_v57, %v323_v2  ;;  %v328_v10 = vrot.slane %v323_v2, 4  ;;  %v845_v12 = vrot.slane %v835_v0, 7  ;;  %vm2952_vm2 = vmor %vm289_vm1, %vm843_vm0  ;;  %v2609_v0 = vld [vmem:[%s3650_s3 + $0x128] sm:$0xff] }
  0x25   : > { %1048 = vmatpush.bf16.msra.mxu2 %v2585_v48  ;;  %v847_v13 = vrot.slane %v836_v58, 7  ;;  %v393_v15 = vsel %vm2904_vm13, %v318_v4, %v392_v59  ;;  %v850_v16 = vrot.slane %v837_v35, 7  ;;  %v853_v25 = vrot.slane %v2943_v9, 7  ;;  %v2605_v9 = vld [vmem:[%s3650_s3 + $0x108] sm:$0xff] }
  0x26   : > { %v2958_v26 = vunpack.c.h.b16 %v2683_v6  ;;  %1183 = vmatpush.bf16.msra.mxu3 %v2593_v51  ;;  %v327_v30 = vsel %vm2863_vm9, %v319_v5, %v326_v1  ;;  %v336_v31 = vsel %vm2863_vm9, %v328_v10, %v335_v7  ;;  %394 = vst [vmem:[#allocation2 + $0x4] sm:$0xf] %v393_v15  ;;  %v846_v32 = vrot.slane %v845_v12, 4 }
  0x27   : > { %v849_v36 = vrot.slane %v847_v13, 4  ;;  %395 = vst [vmem:[#allocation2 + $0x8] sm:$0xf] %v327_v30  ;;  %v852_v38 = vrot.slane %v850_v16, 4  ;;  %v868_v39 = vunpack.c.l.b16 %v845_v12  ;;  %v869_v40 = vunpack.c.h.b16 %v845_v12  ;;  %v2572_v12 = vld [vmem:[%s3650_s3 + $0x20] sm:$0xff] }
  0x28   : > { %2655 = vmatpush.bf16.msra.mxu1 %v2576_v52  ;;  %703 = vmatpush.bf16.msra.mxu0 %v2576_v52  ;;  %v2566_v42 = vld [vmem:[#allocation2 + $0x10] sm:$0xff]  ;;  %vm3656_vm1 = vsmask.f32 7424  ;;  %396 = vst [vmem:[#allocation2 + $0xc] sm:$0xf] %v336_v31  ;;  %v848_v43 = vsel %vm2952_vm2, %v846_v32, %v847_v13  ;;  %v267_v46 = vmul.f32 %v2769_v17, %v255_v28  ;;  %v3679_v53 = vmov 0 }
  0x29   : > { %1049 = vmatpush.bf16.msra.mxu2 %v2584_v56  ;;  %v851_v44 = vsel %vm2952_vm2, %v849_v36, %v850_v16  ;;  %v854_v47 = vsel %vm2952_vm2, %v852_v38, %v853_v25  ;;  %vm872_vm3 = vcmp.ne.s32.totalorder %v868_v39, %v2785_v23  ;;  %vm873_vm5 = vcmp.ne.s32.totalorder %v869_v40, %v2958_v26  ;;  %v826_v52 = vld [vmem:[#allocation2] sm:$0xe]  ;;  %v2627_v40 = vld [vmem:[%s3650_s3 + $0x1b8] sm:$0xff] }
  0x2a   : > { %v875_v48 = vunpack.c.l.b16 %v848_v43  ;;  %v2982_v49 = vld [vmem:[#allocation2 + $0x18] sm:$0xff]  ;;  %v624_v50 = vshll.u32 %v2566_v42, 16  ;;  %v628_v51 = vshrl.u32 %v2566_v42, 16  ;;  %vm2984_vm6 = vmpackc.low %vm873_vm5, %vm872_vm3  ;;  %v876_v17 = vunpack.c.h.b16 %v848_v43  ;;  %v2592_v42 = vld [vmem:[%s3650_s3 + $0xc0] sm:$0xff] }
  0x2b   : > { %v3680_v53 = vsel %vm2984_vm6, 4294967295, %v3679_v53  ;;  %v882_v54 = vunpack.c.l.b16 %v851_v44  ;;  %v883_v57 = vunpack.c.h.b16 %v851_v44  ;;  %v889_v59 = vunpack.c.l.b16 %v854_v47  ;;  %v2608_v43 = vld [vmem:[%s3650_s3 + $0x120] sm:$0xff]  ;;  %1184 = vmatpush.bf16.msra.mxu3 %v2592_v42  ;;  %v2569_v42 = vld [vmem:[%s3650_s3 + $0x8] sm:$0xff] }
  0x2c   : > { %797 = vmatpush.bf16.msrb.mxu1 %v2575_v3  ;;  %1351 = vmatpush.bf16.msrb.mxu0 %v2611_v11  ;;  %vm879_vm7 = vcmp.ne.s32.totalorder %v875_v48, %v2785_v23  ;;  %v890_v61 = vunpack.c.h.b16 %v854_v47  ;;  %v2992_v62 = vrot.slane %v624_v50, 1  ;;  %v632_v63 = vshll.u32 %v2982_v49, 16 }
  0x2d   : > { %vm880_vm8 = vcmp.ne.s32.totalorder %v876_v17, %v2958_v26  ;;  %vm886_vm10 = vcmp.ne.s32.totalorder %v882_v54, %v2785_v23  ;;  %v2564_v2 = vld [vmem:[#allocation2] sm:$0xff]  ;;  %vm887_vm12 = vcmp.ne.s32.totalorder %v883_v57, %v2958_v26  ;;  %vm3008_vm14 = vcmp.ne.s32.totalorder %v889_v59, %v2785_v23  ;;  %1634 = vmatpush.bf16.msrb.mxu2 %v2627_v40  ;;  %v2571_v54 = vld [vmem:[%s3650_s3 + $0x18] sm:$0xff] }
  0x2e   : > { %v3000_v58 = vld [vmem:[#allocation2 + $0x4] sm:$0xf]  ;;  %vm3002_vm11 = vmpackc.low %vm880_vm8, %vm879_vm7  ;;  %vm894_vm15 = vcmp.ne.s32.totalorder %v890_v61, %v2958_v26  ;;  %v931_v56 = vsel %vm2984_vm6, %v826_v52, 0  ;;  %v630_v4 = vor.u32 %v628_v51, %v2992_v62  ;;  %v3016_v5 = vrot.slane %v632_v63, 1  ;;  %v3018_v7 = vld [vmem:[#allocation2 + $0x8] sm:$0xf] }
  0x2f   : > { %vm3020_vm0 = vmpackc.low %vm887_vm12, %vm886_vm10  ;;  %v932_v10 = vsel %vm3002_vm11, %v3000_v58, 0  ;;  %v966_v11 = vunpack.c.l.b16 %v931_v56  ;;  %v3030_v13 = vld [vmem:[#allocation2 + $0x8] sm:$0xff]  ;;  %v609_v15 = vshrl.u32 %v2564_v2, 16  ;;  %v611_v16 = vshll.u32 %v2564_v2, 16  ;;  %v2607_v61 = vld [vmem:[%s3650_s3 + $0x118] sm:$0xff] }
  0x30   : > { %798 = vmatpush.bf16.msrb.mxu1 %v2574_v37  ;;  %1352 = vmatpush.bf16.msrb.mxu0 %v2610_v45  ;;  %v3032_v28 = vld [vmem:[#allocation2 + $0xc] sm:$0xf]  ;;  %vm3036_vm3 = vmpackc.low %vm894_vm15, %vm3008_vm14  ;;  %v933_v31 = vsel %vm3020_vm0, %v3018_v7, 0  ;;  %v967_v32 = vunpack.c.l.b16 %v932_v10  ;;  %v635_v36 = vsel %vm3656_vm1, %v630_v4, %v3016_v5  ;;  %v279_v39 = vadd.f32 %v2780_v20, %v267_v46  ;;  %v2639_v63 = vld [vmem:[%s3650_s3 + $0x1f8] sm:$0xff] }
  0x31   : > { %v934_v37 = vsel %vm3036_vm3, %v3032_v28, 0  ;;  %v968_v38 = vunpack.c.l.b16 %v933_v31  ;;  %714 = vmatmul.bf16.vlgmr.msra.gmra.mxu1 %v635_v36  ;;  %v613_v44 = vrot.slane %v611_v16, 1  ;;  %v616_v45 = vshll.u32 %v3030_v13, 16  ;;  %1808 = vmatpush.bf16.msrb.mxu3 %v2639_v63 }
  0x32   : > { %v969_v47 = vunpack.c.l.b16 %v934_v37  ;;  %v975_v48 = vpack.c.b16 %v967_v32, %v966_v11  ;;  %v287_v50 = vmax.f32 %v279_v39, 0.0  ;;  %vm510_vm5 = vcmp.ne.s32.totalorder %v418_v21, 0  ;;  %v2626_v21 = vld [vmem:[%s3650_s3 + $0x1b0] sm:$0xff] }
  0x33   : > { %v3062_v20 = vadd.s32 32, %v2743_v8  ;;  %v614_v46 = vor.u32 %v613_v44, %v609_v15  ;;  %v618_v51 = vrot.slane %v616_v45, 1  ;;  %vm3067_vm7 = vmpackc.low %vm510_vm5, %vm510_vm5  ;;  %vm3653_vm8 = vcmask 1046528   ;;  %1635 = vmatpush.bf16.msrb.mxu2 %v2626_v21  ;;  %v2606_v37 = vld [vmem:[%s3650_s3 + $0x110] sm:$0xff]  ;;  %v2619_v21 = vld [vmem:[%s3650_s3 + $0x178] sm:$0xff] }
  0x34   : > { %799 = vmatpush.bf16.msrb.mxu1 %v2573_v55  ;;  %1353 = vmatpush.bf16.msrb.mxu0 %v2609_v0  ;;  %v976_v52 = vpack.c.b16 %v969_v47, %v968_v38  ;;  %v981_v17 = vrot.slane %v975_v48, 1  ;;  %v309_v57 = vpack.c.bf16 %v287_v50, %v287_v50  ;;  %vm511_vm10 = vcmp.ne.s32.totalorder %v425_v22, 0 }
  0x35   : > { %v1080_v59 = vsel %vm3067_vm7, %v3000_v58, 0  ;;  %v619_v0 = vsel %vm3656_vm1, %v614_v46, %v618_v51  ;;  %vm3088_vm12 = vmpackc.low %vm511_vm10, %vm511_vm10  ;;  %v3096_v10 = vadd.s32 40, %v2743_v8  ;;  %v446_v16 = vand.u32 7, %v3062_v20  ;;  %v3143_v46 = vld [vmem:[#allocation2 + $0x10] sm:$0xf] }
  0x36   : > { %v3086_v2 = vrot.slane %v976_v52, 1  ;;  %v1113_v14 = vunpack.c.l.b16 %v1080_v59  ;;  %704 = vmatmul.bf16.vlgmr.msra.gmra.mxu0 %v619_v0  ;;  %v375_v22 = vshrl.u32 %v309_v57, 16  ;;  %v378_v56 = vshll.u32 %v309_v57, 16  ;;  %v2604_v57 = vld [vmem:[%s3650_s3 + $0x100] sm:$0xff]  ;;  %v2641_v59 = vld [vmem:[%s3650_s3 + $0x208] sm:$0xff] }
  0x37   : > { %v1081_v4 = vsel %vm3088_vm12, %v3018_v7, 0  ;;  %v373_v31 = vrot.slane %v2867_v29, 4  ;;  %v453_v36 = vand.u32 7, %v3096_v10  ;;  %vm522_vm14 = vcmp.ne.s32.totalorder %v446_v16, 7 }
  0x38   : > { %800 = vmatpush.bf16.msrb.mxu1 %v2572_v12  ;;  %1354 = vmatpush.bf16.msrb.mxu0 %v2608_v43  ;;  %v983_v11 = vsel %vm3653_vm8, %v981_v17, %v3086_v2  ;;  %v2570_v12 = vld [vmem:[%s3650_s3 + $0x10] sm:$0xff]  ;;  %v1114_v15 = vunpack.c.l.b16 %v1081_v4  ;;  %v3105_v32 = vrot.slane %v375_v22, 7  ;;  %v620_v40 = vshrl.u32 %v3030_v13, 16  ;;  %vm831_vm5 = vmpackc.low %vm522_vm14, %vm522_vm14  ;;  %v2637_v4 = vld [vmem:[%s3650_s3 + $0x1e8] sm:$0xff] }
  0x39   : > { %1050 = vmatmul.bf16.vlgmr.msra.gmra.mxu2 %v983_v11  ;;  %vm523_vm15 = vcmp.ne.s32.totalorder %v453_v36, 7  ;;  %v855_v29 = vrot.slane %v853_v25, 4  ;;  %v839_v43 = vsel %vm831_vm5, 65537, %v2683_v6  ;;  %v3124_v44 = vadd.s32 48, %v2743_v8 }
  0x3a   : > { %v1121_v38 = vpack.c.b16 %v1114_v15, %v1113_v14  ;;  %v380_v39 = vor.u32 %v378_v56, %v3105_v32  ;;  %vm832_vm10 = vmpackc.low %vm523_vm15, %vm523_vm15  ;;  %v856_v47 = vrot.slane %v839_v43, 7  ;;  %v3133_v25 = vadd.s32 56, %v2743_v8  ;;  %v2625_v8 = vld [vmem:[%s3650_s3 + $0x1a8] sm:$0xff]  ;;  %v2624_v56 = vld [vmem:[%s3650_s3 + $0x1a0] sm:$0xff] }
  0x3b   : > { %v840_v45 = vsel %vm832_vm10, 65537, %v2683_v6  ;;  %vm512_vm14 = vcmp.ne.s32.totalorder %v432_v33, 0  ;;  %vm3139_vm15 = vcmp.ne.s32.totalorder %v439_v34, 0  ;;  %v622_v50 = vor.u32 %v620_v40, %v618_v51  ;;  %v2638_v51 = vld [vmem:[%s3650_s3 + $0x1f0] sm:$0xff]  ;;  %1636 = vmatpush.bf16.msrb.mxu2 %v2625_v8 }
  0x3c   : > { %801 = vmatpush.bf16.msrb.mxu1 %v2571_v54  ;;  %1355 = vmatpush.bf16.msrb.mxu0 %v2607_v61  ;;  %v381_v13 = vsel %vm2863_vm9, %v373_v31, %v380_v39  ;;  %v859_v48 = vrot.slane %v840_v45, 7  ;;  %v857_v52 = vsel %vm2952_vm2, %v855_v29, %v856_v47  ;;  %v858_v17 = vrot.slane %v856_v47, 4  ;;  %vm3153_vm9 = vmpackc.low %vm512_vm14, %vm512_vm14 }
  0x3d   : > { %1185 = vmatmul.bf16.vlgmr.msra.gmra.mxu3 %v1121_v38  ;;  %401 = vst [vmem:[#allocation2 + $0x20] sm:$0xf] %v381_v13  ;;  %v896_v18 = vunpack.c.l.b16 %v857_v52  ;;  %v897_v33 = vunpack.c.h.b16 %v857_v52  ;;  %vm3171_vm5 = vmpackc.low %vm3139_vm15, %vm3139_vm15  ;;  %v1082_v61 = vsel %vm3153_vm9, %v3032_v28, 0  ;;  %v460_v63 = vand.u32 7, %v3124_v44  ;;  %v3199_v38 = vld [vmem:[#allocation2 + $0x4] sm:$0xff] }
  0x3e   : > { %v860_v54 = vsel %vm2952_vm2, %v858_v17, %v859_v48  ;;  %v467_v0 = vand.u32 7, %v3133_v25  ;;  %1809 = vmatpush.bf16.msrb.mxu3 %v2638_v51  ;;  %v627_v11 = vsel %vm3656_vm1, %v622_v50, %v2992_v62  ;;  %v3699_v15 = vmov 0  ;;  %v3228_v50 = vld [vmem:[#allocation2 + $0xc] sm:$0xff]  ;;  %v3253_v13 = vld [vmem:[#allocation2 + $0x1c] sm:$0xf] }
  0x3f   : > { %vm900_vm10 = vcmp.ne.s32.totalorder %v896_v18, %v2785_v23  ;;  %vm901_vm14 = vcmp.ne.s32.totalorder %v897_v33, %v2958_v26  ;;  %v903_v14 = vunpack.c.l.b16 %v860_v54  ;;  %v904_v22 = vunpack.c.h.b16 %v860_v54  ;;  %1637 = vmatpush.bf16.msrb.mxu2 %v2624_v56 }
  0x40   : > { %802 = vmatpush.bf16.msrb.mxu1 %v2570_v12  ;;  %1356 = vmatpush.bf16.msrb.mxu0 %v2606_v37  ;;  %v3190_v12 = vld [vmem:[#allocation2 + $0x14] sm:$0xf]  ;;  %vm3192_vm15 = vmpackc.low %vm901_vm14, %vm900_vm10  ;;  %v1083_v31 = vsel %vm3171_vm5, %v3143_v46, 0  ;;  %v1115_v37 = vunpack.c.l.b16 %v1082_v61  ;;  %v636_v29 = vshrl.u32 %v2982_v49, 16  ;;  %vm524_vm14 = vcmp.ne.s32.totalorder %v460_v63, 7 }
  0x41   : > { %v3700_v15 = vsel %vm3192_vm15, 4294967295, %v3699_v15  ;;  %vm907_vm8 = vcmp.ne.s32.totalorder %v903_v14, %v2785_v23  ;;  %vm908_vm6 = vcmp.ne.s32.totalorder %v904_v22, %v2958_v26  ;;  %v935_v62 = vsel %vm3192_vm15, %v3143_v46, 0  ;;  %v2618_v49 = vld [vmem:[%s3650_s3 + $0x170] sm:$0xff] }
  0x42   : > { %v1116_v39 = vunpack.c.l.b16 %v1083_v31  ;;  %vm3209_vm10 = vmpackc.low %vm908_vm6, %vm907_vm8  ;;  %v970_v43 = vunpack.c.l.b16 %v935_v62  ;;  %vm3217_vm1 = vcmp.ne.s32.totalorder %v467_v0, 7  ;;  %1810 = vmatpush.bf16.msrb.mxu3 %v2637_v4  ;;  %v1266_v52 = vshll.u32 %v3199_v38, 16 }
  0x43   : > { %v936_v47 = vsel %vm3209_vm10, %v3190_v12, 0  ;;  %vm833_vm6 = vmpackc.low %vm524_vm14, %vm524_vm14  ;;  %v1271_v56 = vshll.u32 %v3228_v50, 16  ;;  %v382_v3 = vrot.slane %v3105_v32, 4 }
  0x44   : > { %803 = vmatpush.bf16.msrb.mxu1 %v2569_v42  ;;  %1357 = vmatpush.bf16.msrb.mxu0 %v2605_v9  ;;  %v3206_v40 = vld [vmem:[#allocation2 + $0x20] sm:$0x1]  ;;  %v3701_v42 = vmov 0  ;;  %v861_v9 = vrot.slane %v859_v48, 4  ;;  %v971_v27 = vunpack.c.l.b16 %v936_v47  ;;  %vm834_vm8 = vmpackc.low %vm3217_vm1, %vm3217_vm1  ;;  %v841_v17 = vsel %vm833_vm6, 65537, %v2683_v6  ;;  %v2623_v47 = vld [vmem:[%s3650_s3 + $0x198] sm:$0xff] }
  0x45   : > { %v3702_v42 = vsel %vm3209_vm10, 4294967295, %v3701_v42  ;;  %v601_v45 = vunpack.c.l.b16 %v3206_v40  ;;  %v1122_v18 = vpack.c.b16 %v1116_v39, %v1115_v37  ;;  %v842_v33 = vsel %vm834_vm8, 65537, %v2683_v6  ;;  %1638 = vmatpush.bf16.msrb.mxu2 %v2623_v47 }
  0x46   : > { %709 = vmatmul.bf16.gmra.mxu0 %v627_v11  ;;  %v638_v48 = vor.u32 %v636_v29, %v3016_v5  ;;  %v977_v51 = vpack.c.b16 %v971_v27, %v970_v43  ;;  %v865_v54 = vrot.slane %v842_v33, 7  ;;  %v1268_v31 = vrot.slane %v1266_v52, 1  ;;  %v3243_v5 = vld [vmem:[#allocation2 + $0x18] sm:$0xf]  ;;  %v526_v43 = vld [vmem:[#allocation2] sm:$0xf] }
  0x47   : > { %v606_v8 = vpack.c.b16 %v601_v45, %v601_v45  ;;  %vm3705_vm1 = vcmask 1046528   ;;  %vm3706_vm8 = vsmask.f32 7424  ;;  %v2617_v45 = vld [vmem:[%s3650_s3 + $0x168] sm:$0xff]  ;;  %v3288_v27 = vld [vmem:[%s3650_s3 + $0x238] sm:$0xff]  ;;  %v3713_v52 = vmov 0 }
  0x48   : > { %804 = vmatpush.bf16.msrb.mxu1 %v2568_v19  ;;  %1358 = vmatpush.bf16.msrb.mxu0 %v2604_v57  ;;  %v862_v19 = vrot.slane %v841_v17, 7  ;;  %v1264_v57 = vshrl.u32 %v3199_v38, 16  ;;  %v3240_v22 = vrot.slane %v977_v51, 1  ;;  %v867_v62 = vrot.slane %v865_v54, 4  ;;  %v2616_v33 = vld [vmem:[%s3650_s3 + $0x160] sm:$0xff] }
  0x4a   : > { %v863_v61 = vsel %vm2952_vm2, %v861_v9, %v862_v19  ;;  %v864_v14 = vrot.slane %v862_v19, 4  ;;  %v985_v38 = vsel %vm3705_vm1, %v3086_v2, %v3240_v22  ;;  %vm515_vm1 = vcmp.ne.s32.totalorder %v453_v36, 0  ;;  %v2636_v9 = vld [vmem:[%s3650_s3 + $0x1e0] sm:$0xff]  ;;  %v2622_v19 = vld [vmem:[%s3650_s3 + $0x190] sm:$0xff] }
  0x4b   : > { %v910_v4 = vunpack.c.l.b16 %v863_v61  ;;  %v911_v11 = vunpack.c.h.b16 %v863_v61  ;;  %1055 = vmatmul.bf16.gmra.mxu2 %v985_v38  ;;  %v1269_v10 = vor.u32 %v1268_v31, %v1264_v57  ;;  %1811 = vmatpush.bf16.msrb.mxu3 %v2636_v9  ;;  %v924_v51 = vunpack.c.l.b16 %v867_v62  ;;  %v3316_v57 = vld [vmem:[%s3650_s3 + $0x230] sm:$0xff] }
  0x4c   : > { %1499 = vmatpush.bf16.msra.mxu1 %v2619_v21  ;;  %v640_v21 = vshll.u32 %v606_v8, 16  ;;  %v866_v37 = vsel %vm2952_vm2, %v864_v14, %v865_v54  ;;  %vm514_vm2 = vcmp.ne.s32.totalorder %v446_v16, 0  ;;  %v1273_v16 = vrot.slane %v1271_v56, 1  ;;  %1956 = vmatpush.bf16.msra.mxu0 %v3288_v27 }
  0x4d   : > { %1190 = vmatmul.bf16.gmra.mxu3 %v1122_v18  ;;  %vm914_vm14 = vcmp.ne.s32.totalorder %v910_v4, %v2785_v23  ;;  %vm915_vm6 = vcmp.ne.s32.totalorder %v911_v11, %v2958_v26  ;;  %v917_v39 = vunpack.c.l.b16 %v866_v37  ;;  %v918_v24 = vunpack.c.h.b16 %v866_v37  ;;  %1639 = vmatpush.bf16.msrb.mxu2 %v2622_v19 }
  0x4e   : > { %v642_v6 = vrot.slane %v640_v21, 1  ;;  %vm3255_vm10 = vmpackc.low %vm915_vm6, %vm914_vm14  ;;  %v925_v54 = vunpack.c.h.b16 %v867_v62  ;;  %v2635_v21 = vld [vmem:[%s3650_s3 + $0x1d8] sm:$0xff]  ;;  %v542_v61 = vsel %vm3067_vm7, %v526_v43, 0  ;;  %v543_v56 = vsel %vm3088_vm12, %v3000_v58, 0  ;;  %v298_v43 = vld [vmem:[#allocation2 + $0x24] sm:$0xf] }
  0x4f   : > { %vm921_vm15 = vcmp.ne.s32.totalorder %v917_v39, %v2785_v23  ;;  %v937_v2 = vsel %vm3255_vm10, %v3243_v5, 0  ;;  %vm3273_vm14 = vmpackc.low %vm514_vm2, %vm514_vm2  ;;  %vm922_vm6 = vcmp.ne.s32.totalorder %v918_v24, %v2958_v26  ;;  %1812 = vmatpush.bf16.msrb.mxu3 %v2635_v21  ;;  %v733_v37 = vunpack.c.l.b16 %v542_v61  ;;  %v3329_v39 = vld [vmem:[#allocation2 + $0x14] sm:$0xff] }
  0x50   : > { %1500 = vmatpush.bf16.msra.mxu1 %v2618_v49  ;;  %v643_v29 = vsel %vm3706_vm8, %v638_v48, %v642_v6  ;;  %vm3278_vm8 = vmpackc.low %vm515_vm1, %vm515_vm1  ;;  %v972_v17 = vunpack.c.l.b16 %v937_v2  ;;  %v1084_v8 = vsel %vm3273_vm14, %v3190_v12, 0  ;;  %vm928_vm1 = vcmp.ne.s32.totalorder %v924_v51, %v2785_v23  ;;  %1957 = vmatpush.bf16.msra.mxu0 %v3316_v57 }
  0x51   : > { %719 = vmatmul.bf16.gmra.mxu1 %v643_v29  ;;  %vm3290_vm2 = vmpackc.low %vm922_vm6, %vm921_vm15  ;;  %v1085_v18 = vsel %vm3278_vm8, %v3243_v5, 0  ;;  %vm3715_vm15 = vsmask.f32 7424  ;;  %v1117_v11 = vunpack.c.l.b16 %v1084_v8  ;;  %vm929_vm6 = vcmp.ne.s32.totalorder %v925_v54, %v2958_v26  ;;  %1640 = vmatpush.bf16.msrb.mxu2 %v2621_v60  ;;  %v2633_v54 = vld [vmem:[%s3650_s3 + $0x1c8] sm:$0xff] }
  0x52   : > { %v3714_v52 = vsel %vm3290_vm2, 4294967295, %v3713_v52  ;;  %v938_v48 = vsel %vm3290_vm2, %v3253_v13, 0  ;;  %v1274_v4 = vsel %vm3715_vm15, %v1269_v10, %v1273_v16  ;;  %v1118_v6 = vunpack.c.l.b16 %v1085_v18  ;;  %vm3331_vm15 = vmpackc.low %vm929_vm6, %vm928_vm1  ;;  %v2614_v18 = vld [vmem:[%s3650_s3 + $0x150] sm:$0xff] }
  0x53   : > { %v973_v14 = vunpack.c.l.b16 %v938_v48  ;;  %v734_v62 = vunpack.c.l.b16 %v543_v56  ;;  %v299_v23 = vsel %vm2904_vm13, 0, %v298_v43  ;;  %vm3718_vm2 = vcmask 1046528   ;;  %v3385_v48 = vld [vmem:[#allocation2 + $0xc] sm:$0xf]  ;;  %v3411_v43 = vld [vmem:[#allocation2 + $0x1c] sm:$0xff] }
  0x54   : > { %1501 = vmatpush.bf16.msra.mxu1 %v2617_v45  ;;  %v1123_v58 = vpack.c.b16 %v1118_v6, %v1117_v11  ;;  %300 = vst [vmem:[#allocation2 + $0x24] sm:$0xf] %v299_v23  ;;  %v1275_v2 = vshrl.u32 %v3228_v50, 16  ;;  %v1279_v45 = vshll.u32 %v3329_v39, 16  ;;  %v939_v47 = vsel %vm3331_vm15, %v3206_v40, 0  ;;  %v2615_v50 = vld [vmem:[%s3650_s3 + $0x158] sm:$0xff] }
  0x55   : > { %v978_v31 = vpack.c.b16 %v973_v14, %v972_v17  ;;  %v741_v26 = vpack.c.b16 %v734_v62, %v733_v37  ;;  %vm516_vm13 = vcmp.ne.s32.totalorder %v460_v63, 0  ;;  %v2620_v40 = vld [vmem:[%s3650_s3 + $0x180] sm:$0xff]  ;;  %v544_v19 = vsel %vm3153_vm9, %v3018_v7, 0 }
  0x56   : > { %1359 = vmatmul.bf16.vlgmr.msrb.gmra.mxu0 %v1274_v4  ;;  %vm3358_vm1 = vmpackc.low %vm516_vm13, %vm516_vm13  ;;  %v1277_v9 = vor.u32 %v1275_v2, %v1273_v16  ;;  %v1281_v44 = vrot.slane %v1279_v45, 1  ;;  %v1079_v63 = vld [vmem:[#allocation2 + $0x20] sm:$0xf]  ;;  %v2645_v16 = vld [vmem:[%s3650_s3 + $0x228] sm:$0xff]  ;;  %v545_v21 = vsel %vm3171_vm5, %v3032_v28, 0  ;;  %v1538_v7 = vsel %vm3088_vm12, %v3385_v48, 0  ;;  %1641 = vmatpush.bf16.msrb.mxu2 %v2620_v40 }
  0x57   : > { %v3327_v38 = vrot.slane %v978_v31, 1  ;;  %v1086_v17 = vsel %vm3358_vm1, %v3253_v13, 0  ;;  %1958 = vmatpush.bf16.msra.mxu0 %v2645_v16  ;;  %vm3723_vm13 = vsmask.f32 7424  ;;  %v3402_v11 = vunpack.c.l.b16 %v1538_v7  ;;  %v2644_v6 = vld [vmem:[%s3650_s3 + $0x220] sm:$0xff]  ;;  %v2628_v45 = vld [vmem:[#allocation2 + $0x8] sm:$0xff] }
  0x58   : > { %1502 = vmatpush.bf16.msra.mxu1 %v2616_v33  ;;  %v3380_v33 = vld [vmem:[#allocation2 + $0x8] sm:$0xf]  ;;  %v1282_v56 = vsel %vm3723_vm13, %v1277_v9, %v1281_v44  ;;  %v1119_v55 = vunpack.c.l.b16 %v1086_v17  ;;  %v735_v37 = vunpack.c.l.b16 %v544_v19  ;;  %v736_v62 = vunpack.c.l.b16 %v545_v21  ;;  %v2643_v40 = vld [vmem:[%s3650_s3 + $0x218] sm:$0xff]  ;;  %v3433_v9 = vld [vmem:[#allocation2 + $0x10] sm:$0xf] }
  0x59   : > { %v987_v24 = vsel %vm3718_vm2, %v3240_v22, %v3327_v38  ;;  %vm517_vm2 = vcmp.ne.s32.totalorder %v467_v0, 0  ;;  %v974_v22 = vunpack.c.l.b16 %v939_v47  ;;  %v2634_v0 = vld [vmem:[%s3650_s3 + $0x1d0] sm:$0xff]  ;;  %v1537_v51 = vsel %vm3067_vm7, %v3380_v33, 0  ;;  %v2612_v17 = vld [vmem:[%s3650_s3 + $0x140] sm:$0xff] }
  0x5a   : > { %vm3362_vm6 = vmpackc.low %vm517_vm2, %vm517_vm2  ;;  %1813 = vmatpush.bf16.msrb.mxu3 %v2634_v0  ;;  %v3399_v14 = vunpack.c.l.b16 %v1537_v51  ;;  %2656 = vmatpush.bf16.msra.mxu2 %v3288_v27  ;;  %v742_v27 = vpack.c.b16 %v736_v62, %v735_v37  ;;  %vm3724_vm7 = vcmask 1046528   ;;  %v1283_v2 = vshrl.u32 %v3329_v39, 16  ;;  %v3420_v47 = vld [vmem:[#allocation2 + $0x10] sm:$0xff]  ;;  %v3472_v62 = vld [vmem:[#allocation2 + $0x18] sm:$0xff] }
  0x5b   : > { %1060 = vmatmul.bf16.gmra.mxu2 %v987_v24  ;;  %v1087_v8 = vsel %vm3362_vm6, %v1079_v63, 0  ;;  %v979_v61 = vpack.c.b16 %v974_v22, %v974_v22  ;;  %v402_v28 = vld [vmem:[#allocation2 + $0x24] sm:$0x1]  ;;  %1959 = vmatpush.bf16.msra.mxu0 %v2644_v6  ;;  %v1287_v24 = vshll.u32 %v3411_v43, 16  ;;  %v1723_v41 = vshll.u32 %v2628_v45, 16  ;;  %vm3734_vm2 = vmmov %vm3724_vm7 }
  0x5c   : > { %1503 = vmatpush.bf16.msra.mxu1 %v2615_v50  ;;  %v1120_v4 = vunpack.c.l.b16 %v1087_v8  ;;  %v1578_v31 = vpack.c.b16 %v3402_v11, %v3399_v14  ;;  %v403_v23 = vsel %vm2817_vm4, %v382_v3, %v402_v28  ;;  %v1285_v22 = vor.u32 %v1283_v2, %v1281_v44  ;;  %v3439_v8 = vld [vmem:[#allocation2 + $0x14] sm:$0xf]  ;;  %vm3725_vm4 = vmmov %vm3723_vm13  ;;  %v1673_v11 = vld [vmem:[#allocation2 + $0x10] sm:$0xf] }
  0x5d   : > { %1195 = vmatmul.bf16.gmra.mxu3 %v1123_v58  ;;  %v988_v58 = vrot.slane %v979_v61, 1  ;;  %404 = vst [vmem:[#allocation2 + $0x24] sm:$0x1] %v403_v23  ;;  %v1289_v60 = vrot.slane %v1287_v24, 1  ;;  %v1721_v39 = vshrl.u32 %v2628_v45, 16  ;;  %v1725_v63 = vrot.slane %v1723_v41, 1  ;;  %vm3726_vm12 = vmmov %vm3725_vm4 }
  0x5e   : > { %1814 = vmatpush.bf16.msrb.mxu3 %v2633_v54  ;;  %2657 = vmatpush.bf16.msra.mxu2 %v3316_v57  ;;  %v2613_v57 = vld [vmem:[%s3650_s3 + $0x148] sm:$0xff]  ;;  %v1728_v0 = vshll.u32 %v3420_v47, 16  ;;  %v1539_v44 = vsel %vm3153_vm9, %v3433_v9, 0  ;;  %v1540_v19 = vsel %vm3171_vm5, %v3439_v8, 0  ;;  %v547_v34 = vsel %vm3278_vm8, %v3190_v12, 0  ;;  %vm3727_vm9 = vmmov %vm3725_vm4 }
  0x5f   : > { %v989_v32 = vsel %vm3724_vm7, %v3327_v38, %v988_v58  ;;  %v2632_v38 = vld [vmem:[%s3650_s3 + $0x1c0] sm:$0xff]  ;;  %1960 = vmatpush.bf16.msra.mxu0 %v2643_v40  ;;  %v3453_v51 = vunpack.c.l.b16 %v1539_v44  ;;  %v1290_v54 = vsel %vm3725_vm4, %v1285_v22, %v1289_v60  ;;  %v3460_v61 = vunpack.c.l.b16 %v1540_v19  ;;  %v3477_v23 = vld [vmem:[#allocation2 + $0x18] sm:$0xf]  ;;  %v1845_v2 = vld [vmem:[#allocation2 + $0x8] sm:$0xe] }
  0x60   : > { %1504 = vmatpush.bf16.msra.mxu1 %v2614_v18  ;;  %v546_v18 = vsel %vm3273_vm14, %v3143_v46, 0  ;;  %v1726_v7 = vor.u32 %v1725_v63, %v1721_v39  ;;  %v738_v12 = vunpack.c.l.b16 %v547_v34  ;;  %v1291_v3 = vshrl.u32 %v3411_v43, 16  ;;  %v2640_v58 = vld [vmem:[%s3650_s3 + $0x200] sm:$0xff]  ;;  %vm3737_vm13 = vmmov %vm3725_vm4 }
  0x61   : > { %805 = vmatmul.bf16.vlgmr.msrb.gmra.mxu1 %v741_v26  ;;  %v1124_v26 = vpack.c.b16 %v1120_v4, %v1119_v55  ;;  %v1579_v46 = vpack.c.b16 %v3460_v61, %v3453_v51  ;;  %v737_v55 = vunpack.c.l.b16 %v546_v18  ;;  %v1732_v24 = vshrl.u32 %v3420_v47, 16 }
  0x62   : > { %2658 = vmatpush.bf16.msra.mxu2 %v2645_v16  ;;  %1815 = vmatpush.bf16.msrb.mxu3 %v2632_v38  ;;  %v2642_v16 = vld [vmem:[%s3650_s3 + $0x210] sm:$0xff]  ;;  %v1736_v14 = vshll.u32 %v3472_v62, 16  ;;  %v1541_v45 = vsel %vm3273_vm14, %v3477_v23, 0  ;;  %v549_v47 = vsel %vm3362_vm6, %v3253_v13, 0  ;;  %v1848_v36 = vsel %vm3020_vm0, %v1673_v11, 0  ;;  %vm3729_vm14 = vmmov %vm3725_vm4 }
  0x63   : > { %1961 = vmatpush.bf16.msra.mxu0 %v2642_v16  ;;  %v743_v28 = vpack.c.b16 %v738_v12, %v737_v55  ;;  %vm3728_vm5 = vnez %v3680_v53  ;;  %v1883_v18 = vunpack.c.l.b16 %v1848_v36 }
  0x64   : > { %v3428_v50 = vld [vmem:[#allocation2 + $0x24] sm:$0x1]  ;;  %1505 = vmatpush.bf16.msra.mxu1 %v2613_v57  ;;  %v3495_v57 = vunpack.c.l.b16 %v1541_v45  ;;  %v1846_v13 = vsel %vm3728_vm5, %v1845_v2, 0 }
  0x65   : > { %v1257_v21 = vunpack.c.l.b16 %v3428_v50  ;;  %v1881_v44 = vunpack.c.l.b16 %v1846_v13  ;;  %v2631_v35 = vld [vmem:[#allocation2 + $0x20] sm:$0xff] }
  0x66   : > { %1364 = vmatmul.bf16.gmra.mxu0 %v1282_v56  ;;  %2659 = vmatpush.bf16.msra.mxu2 %v2644_v6  ;;  %v1730_v56 = vrot.slane %v1728_v0, 1 }
  0x67   : > { %v1262_v4 = vpack.c.b16 %v1257_v21, %v1257_v21  ;;  %1962 = vmatpush.bf16.msra.mxu0 %v2641_v59  ;;  %v1390_v21 = vsel %vm3002_vm11, %v3380_v33, 0 }
  0x68   : > { %1506 = vmatpush.bf16.msra.mxu1 %v2612_v17  ;;  %v1731_v6 = vsel %vm3726_vm12, %v1726_v7, %v1730_v56  ;;  %v1734_v39 = vor.u32 %v1732_v24, %v1730_v56  ;;  %v740_v17 = vunpack.c.l.b16 %v549_v47  ;;  %v1391_v56 = vsel %vm3020_vm0, %v3385_v48, 0  ;;  %v3525_v48 = vld [vmem:[#allocation2 + $0x20] sm:$0xf] }
  0x69   : > { %v1295_v37 = vshll.u32 %v1262_v4, 16  ;;  %v1425_v33 = vunpack.c.l.b16 %v1390_v21  ;;  %v1543_v53 = vsel %vm3358_vm1, %v3525_v48, 0  ;;  %vm3731_vm0 = vnez %v3700_v15 }
  0x6a   : > { %2660 = vmatpush.bf16.msra.mxu2 %v2643_v40  ;;  %v1738_v40 = vrot.slane %v1736_v14, 1  ;;  %v1576_v61 = vunpack.c.l.b16 %v1543_v53  ;;  %v1393_v36 = vsel %vm3731_vm0, %v3439_v8, 0 }
  0x6b   : > { %1065 = vmatmul.bf16.gmra.mxu2 %v989_v32  ;;  %v1297_v43 = vrot.slane %v1295_v37, 1  ;;  %v1672_v32 = vld [vmem:[#allocation2 + $0xc] sm:$0xf]  ;;  %1963 = vmatpush.bf16.msra.mxu0 %v2640_v58  ;;  %v1740_v37 = vshrl.u32 %v3472_v62, 16 }
  0x6c   : > { %v1847_v22 = vsel %vm3002_vm11, %v1672_v32, 0  ;;  %v1739_v34 = vsel %vm3729_vm14, %v1734_v39, %v1738_v40  ;;  %vm3730_vm11 = vmmov %vm3724_vm7 }
  0x6d   : > { %1200 = vmatmul.bf16.gmra.mxu3 %v1124_v26  ;;  %v3479_v26 = vld [vmem:[#allocation2 + $0x1c] sm:$0xf] }
  0x6e   : > { %2661 = vmatpush.bf16.msra.mxu2 %v2642_v16  ;;  %v1542_v41 = vsel %vm3278_vm8, %v3479_v26, 0  ;;  %v1882_v16 = vunpack.c.l.b16 %v1847_v22  ;;  %vm3733_vm8 = vmmov %vm3725_vm4 }
  0x6f   : > { %v3497_v38 = vunpack.c.l.b16 %v1542_v41 }
  0x70   : > { %v1890_v55 = vpack.c.b16 %v1882_v16, %v1881_v44  ;;  %v1677_v16 = vld [vmem:[#allocation2 + $0x20] sm:$0xf] }
  0x71   : > { %810 = vmatmul.bf16.gmra.mxu1 %v742_v27  ;;  %v1293_v27 = vor.u32 %v1291_v3, %v1289_v60  ;;  %v548_v60 = vsel %vm3358_vm1, %v3243_v5, 0  ;;  %v1580_v63 = vpack.c.b16 %v3497_v38, %v3495_v57  ;;  %v1679_v57 = vld [vmem:[#allocation2 + $0x28] sm:$0x1]  ;;  %vm3735_vm1 = vmmov %vm3734_vm2  ;;  %v1852_v8 = vsel %vm3255_vm10, %v1677_v16, 0 }
  0x72   : > { %2662 = vmatpush.bf16.msra.mxu2 %v2641_v59  ;;  %v739_v0 = vunpack.c.l.b16 %v548_v60  ;;  %v1392_v59 = vsel %vm3036_vm3, %v3433_v9, 0  ;;  %v1895_v9 = vrot.slane %v1890_v55, 1  ;;  %v1714_v22 = vunpack.c.l.b16 %v1679_v57  ;;  %vm3738_vm7 = vmmov %vm3735_vm1 }
  0x73   : > { %v1298_v20 = vsel %vm3727_vm9, %v1293_v27, %v1297_v43  ;;  %v1427_v1 = vunpack.c.l.b16 %v1392_v59  ;;  %v1676_v27 = vld [vmem:[#allocation2 + $0x1c] sm:$0xf]  ;;  %v1854_v59 = vsel %vm3331_vm15, %v1679_v57, 0  ;;  %vm3739_vm4 = vmmov %vm3735_vm1 }
  0x74   : > { %v744_v7 = vpack.c.b16 %v740_v17, %v739_v0  ;;  %v1719_v39 = vpack.c.b16 %v1714_v22, %v1714_v22  ;;  %v1748_v17 = vshrl.u32 %v2631_v35, 16  ;;  %vm3741_vm12 = vmmov %vm3735_vm1 }
  0x75   : > { %vm3742_vm9 = vmmov %vm3735_vm1 }
  0x76   : > { %1369 = vmatmul.bf16.gmra.mxu0 %v1290_v54  ;;  %2663 = vmatpush.bf16.msra.mxu2 %v2640_v58  ;;  %v1388_v54 = vld [vmem:[#allocation2 + $0x4] sm:$0xe]  ;;  %v1744_v58 = vshll.u32 %v2631_v35, 16  ;;  %v1752_v44 = vshll.u32 %v1719_v39, 16  ;;  %v1889_v35 = vunpack.c.l.b16 %v1854_v59 }
  0x77   : > { %v1389_v4 = vsel %vm3728_vm5, %v1388_v54, 0 }
  0x78   : > { %v1424_v30 = vunpack.c.l.b16 %v1389_v4  ;;  %v1746_v2 = vrot.slane %v1744_v58, 1  ;;  %v1754_v15 = vrot.slane %v1752_v44, 1 }
  0x7a   : > { %v1433_v24 = vpack.c.b16 %v1425_v33, %v1424_v30  ;;  %v1750_v54 = vor.u32 %v1748_v17, %v1746_v2 }
  0x7b   : > { %1642 = vmatmul.bf16.vlgmr.msrb.gmra.mxu2 %v1578_v31  ;;  %v1674_v31 = vld [vmem:[#allocation2 + $0x14] sm:$0xf] }
  0x7c   : > { %v1849_v5 = vsel %vm3036_vm3, %v1674_v31, 0  ;;  %v1742_v31 = vor.u32 %v1740_v37, %v1738_v40  ;;  %vm3732_vm3 = vnez %v3702_v42  ;;  %v1438_v25 = vrot.slane %v1433_v24, 1 }
  0x7d   : > { %1816 = vmatmul.bf16.vlgmr.msrb.gmra.mxu3 %v1731_v6  ;;  %v1884_v19 = vunpack.c.l.b16 %v1849_v5  ;;  %v1426_v6 = vunpack.c.l.b16 %v1391_v56  ;;  %v1851_v62 = vsel %vm3732_vm3, %v1676_v27, 0  ;;  %v1394_v5 = vsel %vm3732_vm3, %v3477_v23, 0 }
  0x7e   : > { %v1886_v60 = vunpack.c.l.b16 %v1851_v62  ;;  %v1747_v47 = vsel %vm3733_vm8, %v1742_v31, %v1746_v2  ;;  %v1428_v40 = vunpack.c.l.b16 %v1393_v36  ;;  %v1429_v13 = vunpack.c.l.b16 %v1394_v5 }
  0x7f   : > { %v1891_v12 = vpack.c.b16 %v1884_v19, %v1883_v18  ;;  %v1434_v32 = vpack.c.b16 %v1427_v1, %v1426_v6  ;;  %v1678_v18 = vld [vmem:[#allocation2 + $0x24] sm:$0xf] }
  0x80   : > { %v1435_v19 = vpack.c.b16 %v1429_v13, %v1428_v40 }
  0x81   : > { %815 = vmatmul.bf16.gmra.mxu1 %v743_v28  ;;  %v1536_v28 = vld [vmem:[#allocation2 + $0x24] sm:$0xf]  ;;  %v1896_v3 = vrot.slane %v1891_v12, 1  ;;  %v1439_v45 = vrot.slane %v1434_v32, 1  ;;  %v1395_v12 = vsel %vm3255_vm10, %v3479_v26, 0  ;;  %vm3740_vm10 = vmmov %vm3735_vm1 }
  0x82   : > { %v1544_v51 = vsel %vm3362_vm6, %v1536_v28, 0  ;;  %vm3736_vm6 = vnez %v3714_v52  ;;  %v1441_v23 = vrot.slane %v1435_v19, 1  ;;  %v1430_v33 = vunpack.c.l.b16 %v1395_v12 }
  0x83   : > { %v1577_v43 = vunpack.c.l.b16 %v1544_v51  ;;  %v1897_v14 = vsel %vm3730_vm11, %v1895_v9, %v1896_v3  ;;  %v1440_v38 = vsel %vm3734_vm2, %v1438_v25, %v1439_v45  ;;  %v1853_v42 = vsel %vm3736_vm6, %v1678_v18, 0 }
  0x84   : > { %v1888_v21 = vunpack.c.l.b16 %v1853_v42  ;;  %v1442_v56 = vsel %vm3738_vm7, %v1439_v45, %v1441_v23  ;;  %v1396_v4 = vsel %vm3736_vm6, %v3525_v48, 0  ;;  %v1894_v28 = vpack.c.b16 %v1889_v35, %v1889_v35 }
  0x85   : > { %v1581_v11 = vpack.c.b16 %v1577_v43, %v1576_v61  ;;  %v1431_v6 = vunpack.c.l.b16 %v1396_v4  ;;  %v1397_v51 = vsel %vm3331_vm15, %v3428_v50, 0 }
  0x86   : > { %1374 = vmatmul.bf16.gmra.mxu0 %v1298_v20  ;;  %v1902_v53 = vrot.slane %v1894_v28, 1  ;;  %v1432_v61 = vunpack.c.l.b16 %v1397_v51 }
  0x87   : > { %v1436_v30 = vpack.c.b16 %v1431_v6, %v1430_v33 }
  0x88   : > { %v1437_v43 = vpack.c.b16 %v1432_v61, %v1432_v61 }
  0x89   : > { %v1443_v49 = vrot.slane %v1436_v30, 1 }
  0x8b   : > { %1647 = vmatmul.bf16.gmra.mxu2 %v1579_v46  ;;  %v1675_v46 = vld [vmem:[#allocation2 + $0x18] sm:$0xf]  ;;  %v1444_v52 = vsel %vm3741_vm12, %v1441_v23, %v1443_v49 }
  0x8c   : > { %v1850_v10 = vsel %vm3731_vm0, %v1675_v46, 0 }
  0x8d   : > { %1821 = vmatmul.bf16.gmra.mxu3 %v1739_v34  ;;  %v1885_v41 = vunpack.c.l.b16 %v1850_v10 }
  0x8f   : > { %v1892_v20 = vpack.c.b16 %v1886_v60, %v1885_v41 }
  0x91   : > { %820 = vmatmul.bf16.gmra.mxu1 %v744_v7  ;;  %v1898_v0 = vrot.slane %v1892_v20, 1  ;;  %v1755_v7 = vsel %vm3737_vm13, %v1750_v54, %v1754_v15 }
  0x93   : > { %v1899_v34 = vsel %vm3735_vm1, %v1896_v3, %v1898_v0 }
  0x96   : > { %1964 = vmatmul.bf16.vlgmr.msra.gmra.mxu0 %v1897_v14  ;;  %v1445_v14 = vrot.slane %v1437_v43, 1 }
  0x98   : > { %v1446_v2 = vsel %vm3742_vm9, %v1443_v49, %v1445_v14 }
  0x9b   : > { %1652 = vmatmul.bf16.gmra.mxu2 %v1580_v63  ;;  %v1887_v63 = vunpack.c.l.b16 %v1852_v8 }
  0x9d   : > { %1826 = vmatmul.bf16.gmra.mxu3 %v1747_v47  ;;  %v1893_v55 = vpack.c.b16 %v1888_v21, %v1887_v63 }
  0x9f   : > { %v1900_v1 = vrot.slane %v1893_v55, 1 }
  0xa1   : > { %1507 = vmatmul.bf16.vlgmr.msra.gmra.mxu1 %v1440_v38  ;;  %v1901_v3 = vsel %vm3739_vm4, %v1898_v0, %v1900_v1  ;;  %v1903_v26 = vsel %vm3740_vm10, %v1900_v1, %v1902_v53 }
  0xa6   : > { %1969 = vmatmul.bf16.gmra.mxu0 %v1899_v34 }
  0xab   : > { %1657 = vmatmul.bf16.gmra.mxu2 %v1581_v11 }
  0xad   : > { %1831 = vmatmul.bf16.gmra.mxu3 %v1755_v7 }
  0xae   : > { %v3562_v37 = vpop.f32.mrf.mxu1 }
  0xb1   : > { %1512 = vmatmul.bf16.gmra.mxu1 %v1442_v56 }
  0xb3   : > { %v705_v9 = vpop.f32.mrf.mxu0 }
  0xb6   : > { %1974 = vmatmul.bf16.gmra.mxu0 %v1901_v3  ;;  %v717_v27 = vpop.f32.mrf.mxu1 }
  0xbb   : > { %v707_v48 = vpop.f32.mrf.mxu0  ;;  %1979 = vmatmul.bf16.vlgmr.msra.gmra.mxu2 %v1903_v26 }
  0xbc   : > { %v1051_v58 = vpop.f32.mrf.mxu2 }
  0xc0   : > { %v1186_v46 = vpop.f32.mrf.mxu3 }
  0xc1   : > { %1517 = vmatmul.bf16.gmra.mxu1 %v1444_v52 }
  0xc3   : > { %v710_v32 = vpop.f32.mrf.mxu0 }
  0xc4   : > { %v1053_v24 = vpop.f32.mrf.mxu2 }
  0xc8   : > { %v1188_v11 = vpop.f32.mrf.mxu3 }
  0xcb   : > { %v712_v10 = vpop.f32.mrf.mxu0 }
  0xce   : > { %v720_v31 = vpop.f32.mrf.mxu1  ;;  %v1056_v62 = vpop.f32.mrf.mxu2 }
  0xd0   : > { %v3570_v29 = vpop.f32.mrf.mxu3 }
  0xd1   : > { %1522 = vmatmul.bf16.gmra.mxu1 %v1446_v2 }
  0xd3   : > { %v1360_v45 = vpop.f32.mrf.mxu0 }
  0xd6   : > { %v722_v25 = vpop.f32.mrf.mxu1  ;;  %v1058_v50 = vpop.f32.mrf.mxu2 }
  0xd8   : > { %v3572_v38 = vpop.f32.mrf.mxu3 }
  0xdb   : > { %v1362_v60 = vpop.f32.mrf.mxu0 }
  0xde   : > { %v806_v41 = vpop.f32.mrf.mxu1  ;;  %v3574_v20 = vpop.f32.mrf.mxu2 }
  0xdf   : > { %v807_v47 = vadd.f32 %v806_v41, %v705_v9 }
  0xe0   : > { %v3576_v13 = vpop.f32.mrf.mxu3 }
  0xe1   : > { %v1071_v57 = vadd.f32 %v1051_v58, %v807_v47 }
  0xe3   : > { %v1365_v36 = vpop.f32.mrf.mxu0  ;;  %v1206_v26 = vadd.f32 %v1186_v46, %v1071_v57 }
  0xe6   : > { %v808_v22 = vpop.f32.mrf.mxu1  ;;  %v1063_v40 = vpop.f32.mrf.mxu2 }
  0xe7   : > { %v809_v5 = vadd.f32 %v808_v22, %v707_v48  ;;  %v1380_v48 = vadd.f32 %v1360_v45, %v1206_v26 }
  0xe8   : > { %v3580_v19 = vpop.f32.mrf.mxu3 }
  0xe9   : > { %v1072_v39 = vadd.f32 %v1053_v24, %v809_v5 }
  0xeb   : > { %v3578_v17 = vpop.f32.mrf.mxu0  ;;  %v1207_v43 = vadd.f32 %v1188_v11, %v1072_v39 }
  0xed   : > { %v1381_v46 = vadd.f32 %v1362_v60, %v1207_v43  ;;  %v1994_v60 = vld [vmem:[%s3604_s11 + $0x8] sm:$0xff] }
  0xee   : > { %v811_v0 = vpop.f32.mrf.mxu1  ;;  %v1066_v18 = vpop.f32.mrf.mxu2 }
  0xef   : > { %v812_v44 = vadd.f32 %v811_v0, %v710_v32 }
  0xf0   : > { %v3586_v21 = vpop.f32.mrf.mxu3 }
  0xf1   : > { %v1073_v16 = vadd.f32 %v1056_v62, %v812_v44 }
  0xf3   : > { %v3582_v54 = vpop.f32.mrf.mxu0  ;;  %v1208_v45 = vadd.f32 %v3570_v29, %v1073_v16 }
  0xf5   : > { %v1382_v22 = vadd.f32 %v1365_v36, %v1208_v45 }
  0xf6   : > { %v813_v34 = vpop.f32.mrf.mxu1  ;;  %v1068_v42 = vpop.f32.mrf.mxu2 }
  0xf7   : > { %v814_v15 = vadd.f32 %v813_v34, %v712_v10 }
  0xf8   : > { %v3592_v4 = vpop.f32.mrf.mxu3 }
  0xf9   : > { %v1074_v8 = vadd.f32 %v1058_v50, %v814_v15 }
  0xfb   : > { %v3584_v63 = vpop.f32.mrf.mxu0  ;;  %v1209_v44 = vadd.f32 %v3572_v38, %v1074_v8 }
  0xfe   : > { %v816_v23 = vpop.f32.mrf.mxu1  ;;  %v1643_v7 = vpop.f32.mrf.mxu2 }
 0x100   : > { %v1817_v30 = vpop.f32.mrf.mxu3 }
 0x103   : > { %v3588_v59 = vpop.f32.mrf.mxu0 }
 0x106   : > { %v818_v56 = vpop.f32.mrf.mxu1  ;;  %v1645_v35 = vpop.f32.mrf.mxu2 }
 0x107   : > { %v819_v55 = vadd.f32 %v818_v56, %v717_v27 }
 0x108   : > { %v1819_v51 = vpop.f32.mrf.mxu3 }
 0x109   : > { %v3590_v12 = vadd.f32 %v1063_v40, %v819_v55 }
 0x10b   : > { %v3594_v6 = vpop.f32.mrf.mxu0 }
 0x10e   : > { %v821_v33 = vpop.f32.mrf.mxu1  ;;  %v1648_v3 = vpop.f32.mrf.mxu2 }
 0x10f   : > { %v822_v1 = vadd.f32 %v821_v33, %v720_v31  ;;  %v1993_v31 = vld [vmem:[%s3604_s11] sm:$0xff] }
 0x111   : > { %v3596_v28 = vadd.f32 %v1066_v18, %v822_v1  ;;  %v817_v18 = vadd.f32 %v816_v23, %v3562_v37 }
 0x113   : > { %v1965_v49 = vpop.f32.mrf.mxu0  ;;  %v1075_v36 = vadd.f32 %v3574_v20, %v817_v18  ;;  %v2000_v18 = vld [vmem:[%s3604_s11 + $0x38] sm:$0xff] }
 0x115   : > { %v1210_v8 = vadd.f32 %v3576_v13, %v1075_v36 }
 0x116   : > { %v823_v9 = vpop.f32.mrf.mxu1  ;;  %v1650_v27 = vpop.f32.mrf.mxu2 }
 0x117   : > { %v824_v53 = vadd.f32 %v823_v9, %v722_v25  ;;  %v1822_v25 = vpop.f32.mrf.mxu3  ;;  %v1384_v9 = vadd.f32 %v3582_v54, %v1210_v8 }
 0x119   : > { %v3598_v52 = vadd.f32 %v1068_v42, %v824_v53  ;;  %v1995_v42 = vld [vmem:[%s3604_s11 + $0x10] sm:$0xff] }
 0x11b   : > { %v1967_v24 = vpop.f32.mrf.mxu0 }
 0x11e   : > { %v1508_v58 = vpop.f32.mrf.mxu1  ;;  %v1653_v41 = vpop.f32.mrf.mxu2 }
 0x11f   : > { %v1528_v61 = vadd.f32 %v1508_v58, %v1380_v48  ;;  %v1824_v29 = vpop.f32.mrf.mxu3  ;;  %v1211_v48 = vadd.f32 %v3580_v19, %v3590_v12 }
 0x121   : > { %v1663_v32 = vadd.f32 %v1643_v7, %v1528_v61  ;;  %v1383_v7 = vadd.f32 %v3578_v17, %v1209_v44  ;;  %v1385_v61 = vadd.f32 %v3584_v63, %v1211_v48 }
 0x123   : > { %v1837_v14 = vadd.f32 %v1817_v30, %v1663_v32  ;;  %v1970_v57 = vpop.f32.mrf.mxu0  ;;  %v1996_v30 = vld [vmem:[%s3604_s11 + $0x18] sm:$0xff] }
 0x125   : > { %v1985_v2 = vadd.f32 %v1965_v49, %v1837_v14 }
 0x126   : > { %v1510_v11 = vpop.f32.mrf.mxu1  ;;  %v1655_v15 = vpop.f32.mrf.mxu2 }
 0x127   : > { %v2001_v10 = vadd.f32 %v1993_v31, %v1985_v2  ;;  %v1529_v62 = vadd.f32 %v1510_v11, %v1381_v46  ;;  %v1827_v1 = vpop.f32.mrf.mxu3  ;;  %v1212_v31 = vadd.f32 %v3586_v21, %v3596_v28  ;;  %v1998_v2 = vld [vmem:[%s3604_s11 + $0x28] sm:$0xff] }
 0x129   : > { %2009 = vst [vmem:[%s3611_s15] sm:$0xff] %v2001_v10  ;;  %v1664_v50 = vadd.f32 %v1645_v35, %v1529_v62  ;;  %v1386_v11 = vadd.f32 %v3588_v59, %v1212_v31 }
 0x12b   : > { %v1838_v47 = vadd.f32 %v1819_v51, %v1664_v50  ;;  %v1972_v35 = vpop.f32.mrf.mxu0  ;;  %v1997_v51 = vld [vmem:[%s3604_s11 + $0x20] sm:$0xff]  ;;  %v1213_v50 = vadd.f32 %v3592_v4, %v3598_v52 }
 0x12d   : > { %v1986_v5 = vadd.f32 %v1967_v24, %v1838_v47  ;;  %v1999_v47 = vld [vmem:[%s3604_s11 + $0x30] sm:$0xff] }
 0x12e   : > { %v1513_v39 = vpop.f32.mrf.mxu1  ;;  %v1658_v17 = vpop.f32.mrf.mxu2 }
 0x12f   : > { %v2002_v40 = vadd.f32 %v1994_v60, %v1986_v5  ;;  %v1530_v0 = vadd.f32 %v1513_v39, %v1382_v22  ;;  %v1829_v43 = vpop.f32.mrf.mxu3  ;;  %v1387_v60 = vadd.f32 %v3594_v6, %v1213_v50 }
 0x131   : > { %2010 = vst [vmem:[%s3611_s15 + $0x8] sm:$0xff] %v2002_v40  ;;  %v1665_v34 = vadd.f32 %v1648_v3, %v1530_v0 }
 0x133   : > { %v1839_v16 = vadd.f32 %v1822_v25, %v1665_v34  ;;  %v1975_v26 = vpop.f32.mrf.mxu0 }
 0x135   : > { %v1987_v56 = vadd.f32 %v1970_v57, %v1839_v16 }
 0x136   : > { %v1515_v55 = vpop.f32.mrf.mxu1  ;;  %v1660_v14 = vpop.f32.mrf.mxu2 }
 0x137   : > { %v2003_v33 = vadd.f32 %v1995_v42, %v1987_v56  ;;  %v1531_v38 = vadd.f32 %v1515_v55, %v1383_v7  ;;  %v1832_v45 = vpop.f32.mrf.mxu3 }
 0x139   : > { %2011 = vst [vmem:[%s3611_s15 + $0x10] sm:$0xff] %v2003_v33  ;;  %v1666_v37 = vadd.f32 %v1650_v27, %v1531_v38 }
 0x13b   : > { %v1840_v23 = vadd.f32 %v1824_v29, %v1666_v37  ;;  %v1977_v12 = vpop.f32.mrf.mxu0 }
 0x13d   : > { %v1988_v3 = vadd.f32 %v1972_v35, %v1840_v23 }
 0x13e   : > { %v1518_v53 = vpop.f32.mrf.mxu1  ;;  %v1980_v28 = vpop.f32.mrf.mxu2 }
 0x13f   : > { %v2004_v20 = vadd.f32 %v1996_v30, %v1988_v3  ;;  %v1532_v49 = vadd.f32 %v1518_v53, %v1384_v9  ;;  %v1834_v40 = vpop.f32.mrf.mxu3 }
 0x141   : > { %2012 = vst [vmem:[%s3611_s15 + $0x18] sm:$0xff] %v2004_v20  ;;  %v1667_v13 = vadd.f32 %v1653_v41, %v1532_v49 }
 0x143   : > { %v1841_v58 = vadd.f32 %v1827_v1, %v1667_v13 }
 0x145   : > { %v1989_v27 = vadd.f32 %v1975_v26, %v1841_v58 }
 0x146   : > { %v1520_v54 = vpop.f32.mrf.mxu1  ;;  %v1982_v44 = vpop.f32.mrf.mxu2 }
 0x147   : > { %v2005_v32 = vadd.f32 %v1997_v51, %v1989_v27  ;;  %v1533_v24 = vadd.f32 %v1520_v54, %v1385_v61 }
 0x149   : > { %2013 = vst [vmem:[%s3611_s15 + $0x20] sm:$0xff] %v2005_v32  ;;  %v1668_v19 = vadd.f32 %v1655_v15, %v1533_v24 }
 0x14b   : > { %v1842_v46 = vadd.f32 %v1829_v43, %v1668_v19 }
 0x14d   : > { %v1990_v10 = vadd.f32 %v1977_v12, %v1842_v46 }
 0x14e   : > { %v1523_v63 = vpop.f32.mrf.mxu1 }
 0x14f   : > { %v2006_v62 = vadd.f32 %v1998_v2, %v1990_v10  ;;  %v1534_v25 = vadd.f32 %v1523_v63, %v1386_v11 }
 0x151   : > { %2014 = vst [vmem:[%s3611_s15 + $0x28] sm:$0xff] %v2006_v62  ;;  %v1669_v21 = vadd.f32 %v1658_v17, %v1534_v25 }
 0x153   : > { %v1843_v41 = vadd.f32 %v1832_v45, %v1669_v21 }
 0x155   : > { %v1991_v57 = vadd.f32 %v1980_v28, %v1843_v41 }
 0x156   : > { %v1525_v59 = vpop.f32.mrf.mxu1 }
 0x157   : > { %v2007_v22 = vadd.f32 %v1999_v47, %v1991_v57  ;;  %v1535_v5 = vadd.f32 %v1525_v59, %v1387_v60 }
 0x159   : > { %2015 = vst [vmem:[%s3611_s15 + $0x30] sm:$0xff] %v2007_v22  ;;  %v1670_v39 = vadd.f32 %v1660_v14, %v1535_v5 }
 0x15b   : > { %v1844_v0 = vadd.f32 %v1834_v40, %v1670_v39 }
 0x15d   : > { %v1992_v4 = vadd.f32 %v1982_v44, %v1844_v0 }
 0x15f   : > { %v2008_v52 = vadd.f32 %v2000_v18, %v1992_v4 }
 0x161   : > { %2016 = vst [vmem:[%s3611_s15 + $0x38] sm:$0xff] %v2008_v52 }
 0x162 PF: > { %s15_s18 = sadd.s32 1, %s2681_s18  }
 0x163   : > { %p12_p4 = scmp.ge.s32.totalorder %s15_s18, 4  }
 0x165   :  { %14 = sbr.rel (!%p12_p4) target bundleno = 1 (0x1), region = 81 }

// kernel: network_block_forward.13
= control target key start
LH: loop header
LB: loop body
LE: loop exit
PB: predicated region body
PF: predicated region fallthrough
CT: control target
= control target key end

     0   :  { %s2631_s15 = smov 0   ;;  %s3550_s0 = inlined_call_operand.vmem [shape: f32[2,64,128], index: 0, kind: input, shape index: {}]   ;;  %s3551_s1 = inlined_call_operand.vmem [shape: f32[1,128], index: 1, kind: input, shape index: {}]   ;;  %s3552_s2 = inlined_call_operand.vmem [shape: f32[1,128], index: 2, kind: input, shape index: {}]   ;;  %s3553_s3 = inlined_call_operand.vmem [shape: bf16[9,128,128], index: 3, kind: input, shape index: {}]   ;;  %s3554_s4 = inlined_call_operand.vmem [shape: f32[2,64,128], index: 4, kind: output, shape index: {}]  }
   0x1 LB: > { %s2009_s16 = sadd.s32 4294967295, %s2603_s15   ;;  %p2013_p0 = scmp.ge.s32.totalorder %s2603_s15, 1  ;;  %s2603_s15 = sphi %s2631_s15, %s14_s15  }
   0x2   : > { %p162_p1 = scmp.lt.s32.totalorder %s2603_s15, 3 }
   0x4   : > { %p163_p2 = pnand %p2013_p0, %p162_p1 }
   0x5   : > { %p188_p3 = scmp.lt.s32.totalorder (!%p163_p2), %s2009_s16, 1 }
   0x6   : > { %166 = sbr.rel (%p163_p2) target bundleno = 352 (0x160), region = 36 }
   0xb   : > { %v2505_v0 = vld [vmem:[%s3553_s3 + $0x78] sm:$0xff]  ;;  %v358_v1 = vlaneseq  ;;  %v2504_v3 = vld [vmem:[%s3553_s3 + $0x70] sm:$0xff]  ;;  %s3646_s16 = smov (!%p188_p3, %s2009_s16), 1  ;;  %v2605_v6 = vmov 0   ;;  %v2503_v7 = vld [vmem:[%s3553_s3 + $0x68] sm:$0xff]  ;;  %vm242_vm1 = vcmask 1040384  }
   0xc   : > { %v2513_v2 = vld [vmem:[%s3553_s3 + $0xb8] sm:$0xff]  ;;  %2570 = vmatpush.bf16.msra.mxu1 %v2505_v0  ;;  %649 = vmatpush.bf16.msra.mxu0 %v2505_v0  ;;  %v2512_v4 = vld [vmem:[%s3553_s3 + $0xb0] sm:$0xff]  ;;  %241 = vst [vmem:[#allocation2] sm:$0xf] %v2605_v6  ;;  %s2484_s29 = sshll.u32 %s3646_s16, 6  ;;  %v2511_v9 = vld [vmem:[%s3553_s3 + $0xa8] sm:$0xff]  ;;  %v2704_v23 = vunpack.c.l.b16 %v2605_v6 }
   0xd   : > { %995 = vmatpush.bf16.msra.mxu2 %v2513_v2  ;;  %v2521_v5 = vld [vmem:[%s3553_s3 + $0xf8] sm:$0xff]  ;;  %vm243_vm0 = vsmask.f32 256  ;;  %v2661_v8 = vshrl.u32 %v358_v1, 7  ;;  %v2520_v10 = vld [vmem:[%s3553_s3 + $0xf0] sm:$0xff]  ;;  %s2674_s10 = scalar_lea.vmem %s3550_s0, %s2484_s29  ;;  %v2519_v24 = vld [vmem:[%s3553_s3 + $0xe8] sm:$0xff]  ;;  %s3522_s7 = scalar_lea.vmem %s3554_s4, %s2484_s29 }
   0xe   : > { %1130 = vmatpush.bf16.msra.mxu3 %v2521_v5  ;;  %v203_v11 = vld [vmem:[%s2674_s10 + $0x10] sm:$0xff]  ;;  %v204_v12 = vld [vmem:[%s2674_s10 + $0x18] sm:$0xff]  ;;  %v205_v13 = vld [vmem:[%s2674_s10 + $0x20] sm:$0xff]  ;;  %254 = vst [vmem:[#allocation2 + $0x28] sm:$0x1] %v2605_v6  ;;  %vm248_vm5 = vcmask 1043456  }
   0xf   : > { %v2681_v14 = vadd.s32 8, %v2661_v8  ;;  %v206_v15 = vld [vmem:[%s2674_s10 + $0x28] sm:$0xff]  ;;  %v207_v16 = vld [vmem:[%s2674_s10 + $0x30] sm:$0xff]  ;;  %v2688_v17 = vld [vmem:[%s3551_s1] ss:$0 sm:$0xff]  ;;  %v2691_v18 = vadd.s32 16, %v2661_v8 }
  0x10   : > { %2571 = vmatpush.bf16.msra.mxu1 %v2504_v3  ;;  %650 = vmatpush.bf16.msra.mxu0 %v2504_v3  ;;  %v2694_v19 = vadd.s32 24, %v2661_v8  ;;  %v2699_v20 = vld [vmem:[%s3552_s2] ss:$0 sm:$0xff]  ;;  %v371_v21 = vand.u32 7, %v2661_v8  ;;  %v215_v25 = vmul.f32 %v2688_v17, %v203_v11  ;;  %v216_v26 = vmul.f32 %v2688_v17, %v204_v12  ;;  %v202_v40 = vld [vmem:[%s2674_s10 + $0x8] sm:$0xff]  ;;  %vm2736_vm4 = vmand %vm242_vm1, %vm243_vm0 }
  0x11   : > { %996 = vmatpush.bf16.msra.mxu2 %v2512_v4  ;;  %v378_v22 = vand.u32 7, %v2681_v14  ;;  %v217_v27 = vmul.f32 %v2688_v17, %v205_v13  ;;  %v218_v28 = vmul.f32 %v2688_v17, %v206_v15  ;;  %vm263_vm2 = vsmask.f32 4368  ;;  %v2502_v29 = vld [vmem:[%s3553_s3 + $0x60] sm:$0xff]  ;;  %v2501_v52 = vld [vmem:[%s3553_s3 + $0x58] sm:$0xff]  ;;  %v2508_v15 = vld [vmem:[%s3553_s3 + $0x90] sm:$0xff] }
  0x12   : > { %1131 = vmatpush.bf16.msra.mxu3 %v2520_v10  ;;  %v2510_v30 = vld [vmem:[%s3553_s3 + $0xa0] sm:$0xff]  ;;  %v219_v31 = vmul.f32 %v2688_v17, %v207_v16  ;;  %v385_v33 = vand.u32 7, %v2691_v18  ;;  %v392_v34 = vand.u32 7, %v2694_v19  ;;  %vm2725_vm3 = vcmp.ne.s32.totalorder %v371_v21, 7  ;;  %v2509_v57 = vld [vmem:[%s3553_s3 + $0x98] sm:$0xff]  ;;  %vm2782_vm9 = vmor %vm243_vm0, %vm263_vm2 }
  0x13   : > { %v201_v32 = vld [vmem:[%s2674_s10] sm:$0xff]  ;;  %v227_v36 = vadd.f32 %v2699_v20, %v215_v25  ;;  %v228_v37 = vadd.f32 %v2699_v20, %v216_v26  ;;  %v229_v38 = vadd.f32 %v2699_v20, %v217_v27  ;;  %v230_v39 = vadd.f32 %v2699_v20, %v218_v28  ;;  %vm780_vm10 = vmpackc.low %vm2725_vm3, %vm2725_vm3 }
  0x14   : > { %2572 = vmatpush.bf16.msra.mxu1 %v2503_v7  ;;  %651 = vmatpush.bf16.msra.mxu0 %v2503_v7  ;;  %v245_v42 = vld [vmem:[#allocation2 + $0x4] sm:$0x1]  ;;  %v231_v43 = vadd.f32 %v2699_v20, %v219_v31  ;;  %v213_v45 = vmul.f32 %v2688_v17, %v201_v32  ;;  %v214_v46 = vmul.f32 %v2688_v17, %v202_v40  ;;  %vm249_vm6 = vsmask.f32 7938  ;;  %v2517_v7 = vld [vmem:[%s3553_s3 + $0xd8] sm:$0xff]  ;;  %v2499_v40 = vld [vmem:[%s3553_s3 + $0x48] sm:$0xff] }
  0x15   : > { %997 = vmatpush.bf16.msra.mxu2 %v2511_v9  ;;  %v2518_v44 = vld [vmem:[%s3553_s3 + $0xe0] sm:$0xff]  ;;  %v246_v47 = vsel %vm2736_vm4, 0, %v245_v42  ;;  %v235_v48 = vmax.f32 %v227_v36, 0.0  ;;  %v236_v49 = vmax.f32 %v228_v37, 0.0  ;;  %v237_v50 = vmax.f32 %v229_v38, 0.0  ;;  %v2500_v9 = vld [vmem:[%s3553_s3 + $0x50] sm:$0xff]  ;;  %vm2823_vm13 = vmand %vm248_vm5, %vm249_vm6 }
  0x16   : > { %1132 = vmatpush.bf16.msra.mxu3 %v2519_v24  ;;  %v238_v51 = vmax.f32 %v230_v39, 0.0  ;;  %247 = vst [vmem:[#allocation2 + $0x4] sm:$0x1] %v246_v47  ;;  %v239_v53 = vmax.f32 %v231_v43, 0.0  ;;  %v225_v54 = vadd.f32 %v2699_v20, %v213_v45  ;;  %v226_v55 = vadd.f32 %v2699_v20, %v214_v46  ;;  %v2516_v39 = vld [vmem:[%s3553_s3 + $0xd0] sm:$0xff]  ;;  %v2506_v56 = vld [vmem:[%s3553_s3 + $0x80] sm:$0xff] }
  0x17   : > { %vm2755_vm7 = vcmp.ne.s32.totalorder %v378_v22, 7  ;;  %v2762_v58 = vpack.c.bf16 %v235_v48, %v235_v48  ;;  %v258_v59 = vpack.c.bf16 %v236_v49, %v236_v49  ;;  %v259_v60 = vpack.c.bf16 %v237_v50, %v237_v50  ;;  %v2507_v48 = vld [vmem:[%s3553_s3 + $0x88] sm:$0xff]  ;;  %v2490_v19 = vld [vmem:[%s3553_s3] sm:$0xff] }
  0x18   : > { %2573 = vmatpush.bf16.msra.mxu1 %v2502_v29  ;;  %652 = vmatpush.bf16.msra.mxu0 %v2502_v29  ;;  %v260_v61 = vpack.c.bf16 %v238_v51, %v238_v51  ;;  %v261_v62 = vpack.c.bf16 %v239_v53, %v239_v53  ;;  %v233_v63 = vmax.f32 %v225_v54, 0.0  ;;  %v234_v0 = vmax.f32 %v226_v55, 0.0  ;;  %vm781_vm11 = vmpackc.low %vm2755_vm7, %vm2755_vm7  ;;  %v2515_v51 = vld [vmem:[%s3553_s3 + $0xc8] sm:$0xff] }
  0x19   : > { %998 = vmatpush.bf16.msra.mxu2 %v2510_v30  ;;  %vm2766_vm8 = vcmp.ne.s32.totalorder %v385_v33, 7  ;;  %v283_v2 = vshrl.u32 %v2762_v58, 16  ;;  %v292_v3 = vshrl.u32 %v258_v59, 16  ;;  %v295_v4 = vshll.u32 %v258_v59, 16 }
  0x1a   : > { %v301_v5 = vshrl.u32 %v259_v60, 16  ;;  %1133 = vmatpush.bf16.msra.mxu3 %v2518_v44  ;;  %v304_v10 = vshll.u32 %v259_v60, 16  ;;  %v310_v11 = vshrl.u32 %v260_v61, 16  ;;  %v313_v12 = vshll.u32 %v260_v61, 16  ;;  %vm782_vm12 = vmpackc.low %vm2766_vm8, %vm2766_vm8  ;;  %v2543_v60 = vld [vmem:[%s3553_s3 + $0x188] sm:$0xff] }
  0x1b   : > { %v319_v13 = vshrl.u32 %v261_v62, 16  ;;  %v285_v16 = vrot.slane %v283_v2, 7  ;;  %v294_v24 = vrot.slane %v292_v3, 7  ;;  %v322_v26 = vshll.u32 %v261_v62, 16  ;;  %v2497_v3 = vld [vmem:[%s3553_s3 + $0x38] sm:$0xff] }
  0x1c   : > { %2574 = vmatpush.bf16.msra.mxu1 %v2501_v52  ;;  %653 = vmatpush.bf16.msra.mxu0 %v2501_v52  ;;  %v303_v25 = vrot.slane %v301_v5, 7  ;;  %v312_v28 = vrot.slane %v310_v11, 7  ;;  %v255_v30 = vpack.c.bf16 %v233_v63, %v233_v63  ;;  %v256_v31 = vpack.c.bf16 %v234_v0, %v234_v0  ;;  %v2498_v52 = vld [vmem:[%s3553_s3 + $0x40] sm:$0xff]  ;;  %v2533_v11 = vld [vmem:[%s3553_s3 + $0x138] sm:$0xff] }
  0x1d   : > { %999 = vmatpush.bf16.msra.mxu2 %v2509_v57  ;;  %v2786_v29 = vrot.slane %v319_v13, 7  ;;  %v290_v32 = vrot.slane %v285_v16, 4  ;;  %v297_v36 = vor.u32 %v295_v4, %v294_v24  ;;  %v299_v37 = vrot.slane %v294_v24, 4  ;;  %v345_v59 = vld [vmem:[#allocation2 + $0x4] sm:$0xf] }
  0x1e   : > { %v306_v38 = vor.u32 %v304_v10, %v303_v25  ;;  %1134 = vmatpush.bf16.msra.mxu3 %v2517_v7  ;;  %v308_v42 = vrot.slane %v303_v25, 4  ;;  %v315_v43 = vor.u32 %v313_v12, %v312_v28  ;;  %v317_v44 = vrot.slane %v312_v28, 4  ;;  %v208_v28 = vld [vmem:[%s2674_s10 + $0x38] sm:$0xff] }
  0x1f   : > { %v324_v45 = vor.u32 %v322_v26, %v2786_v29  ;;  %v298_v46 = vsel %vm2782_vm9, %v290_v32, %v297_v36  ;;  %v266_v49 = vshrl.u32 %v255_v30, 16  ;;  %v269_v50 = vshll.u32 %v255_v30, 16 }
  0x20   : > { %2575 = vmatpush.bf16.msra.mxu1 %v2500_v9  ;;  %654 = vmatpush.bf16.msra.mxu0 %v2500_v9  ;;  %v307_v47 = vsel %vm2782_vm9, %v299_v37, %v306_v38  ;;  %v316_v53 = vsel %vm2782_vm9, %v308_v42, %v315_v43  ;;  %350 = vst [vmem:[#allocation2 + $0x10] sm:$0xf] %v298_v46  ;;  %v274_v55 = vshrl.u32 %v256_v31, 16  ;;  %v277_v57 = vshll.u32 %v256_v31, 16  ;;  %v2496_v37 = vld [vmem:[%s3553_s3 + $0x30] sm:$0xff] }
  0x21   : > { %1000 = vmatpush.bf16.msra.mxu2 %v2508_v15  ;;  %v325_v54 = vsel %vm2782_vm9, %v317_v44, %v324_v45  ;;  %351 = vst [vmem:[#allocation2 + $0x14] sm:$0xf] %v307_v47  ;;  %v268_v61 = vrot.slane %v266_v49, 7  ;;  %v286_v62 = vshll.u32 %v2762_v58, 16  ;;  %vm2830_vm14 = vcmp.ne.s32.totalorder %v392_v34, 7  ;;  %v2532_v45 = vld [vmem:[%s3553_s3 + $0x130] sm:$0xff] }
  0x22   : > { %v788_v0 = vsel %vm780_vm10, 65537, %v2605_v6  ;;  %1135 = vmatpush.bf16.msra.mxu3 %v2516_v39  ;;  %352 = vst [vmem:[#allocation2 + $0x18] sm:$0xf] %v316_v53  ;;  %v276_v2 = vrot.slane %v274_v55, 7  ;;  %vm783_vm15 = vmpackc.low %vm2830_vm14, %vm2830_vm14  ;;  %v789_v58 = vsel %vm781_vm11, 65537, %v2605_v6  ;;  %v790_v35 = vsel %vm782_vm12, 65537, %v2605_v6 }
  0x23   : > { %vm796_vm0 = vcmask 1044484   ;;  %353 = vst [vmem:[#allocation2 + $0x1c] sm:$0xf] %v325_v54  ;;  %v271_v4 = vor.u32 %v269_v50, %v268_v61  ;;  %v272_v5 = vrot.slane %v268_v61, 4  ;;  %v288_v7 = vor.u32 %v286_v62, %v285_v16  ;;  %v2495_v55 = vld [vmem:[%s3553_s3 + $0x28] sm:$0xff] }
  0x24   : > { %2576 = vmatpush.bf16.msra.mxu1 %v2499_v40  ;;  %655 = vmatpush.bf16.msra.mxu0 %v2499_v40  ;;  %v2862_v9 = vsel %vm783_vm15, 65537, %v2605_v6  ;;  %v279_v1 = vor.u32 %v277_v57, %v276_v2  ;;  %v281_v10 = vrot.slane %v276_v2, 4  ;;  %v798_v12 = vrot.slane %v788_v0, 7  ;;  %vm2871_vm2 = vmor %vm242_vm1, %vm796_vm0  ;;  %v2531_v0 = vld [vmem:[%s3553_s3 + $0x128] sm:$0xff] }
  0x25   : > { %1001 = vmatpush.bf16.msra.mxu2 %v2507_v48  ;;  %v800_v13 = vrot.slane %v789_v58, 7  ;;  %v346_v15 = vsel %vm2823_vm13, %v271_v4, %v345_v59  ;;  %v803_v16 = vrot.slane %v790_v35, 7  ;;  %v806_v25 = vrot.slane %v2862_v9, 7  ;;  %v2527_v9 = vld [vmem:[%s3553_s3 + $0x108] sm:$0xff] }
  0x26   : > { %v2877_v26 = vunpack.c.h.b16 %v2605_v6  ;;  %1136 = vmatpush.bf16.msra.mxu3 %v2515_v51  ;;  %v280_v30 = vsel %vm2782_vm9, %v272_v5, %v279_v1  ;;  %v289_v31 = vsel %vm2782_vm9, %v281_v10, %v288_v7  ;;  %347 = vst [vmem:[#allocation2 + $0x4] sm:$0xf] %v346_v15  ;;  %v799_v32 = vrot.slane %v798_v12, 4 }
  0x27   : > { %v802_v36 = vrot.slane %v800_v13, 4  ;;  %348 = vst [vmem:[#allocation2 + $0x8] sm:$0xf] %v280_v30  ;;  %v805_v38 = vrot.slane %v803_v16, 4  ;;  %v821_v39 = vunpack.c.l.b16 %v798_v12  ;;  %v822_v40 = vunpack.c.h.b16 %v798_v12  ;;  %v2494_v12 = vld [vmem:[%s3553_s3 + $0x20] sm:$0xff] }
  0x28   : > { %2577 = vmatpush.bf16.msra.mxu1 %v2498_v52  ;;  %656 = vmatpush.bf16.msra.mxu0 %v2498_v52  ;;  %v2488_v42 = vld [vmem:[#allocation2 + $0x10] sm:$0xff]  ;;  %vm3558_vm1 = vsmask.f32 7424  ;;  %349 = vst [vmem:[#allocation2 + $0xc] sm:$0xf] %v289_v31  ;;  %v801_v43 = vsel %vm2871_vm2, %v799_v32, %v800_v13  ;;  %v220_v46 = vmul.f32 %v2688_v17, %v208_v28  ;;  %v3581_v53 = vmov 0 }
  0x29   : > { %1002 = vmatpush.bf16.msra.mxu2 %v2506_v56  ;;  %v804_v44 = vsel %vm2871_vm2, %v802_v36, %v803_v16  ;;  %v807_v47 = vsel %vm2871_vm2, %v805_v38, %v806_v25  ;;  %vm825_vm3 = vcmp.ne.s32.totalorder %v821_v39, %v2704_v23  ;;  %vm826_vm5 = vcmp.ne.s32.totalorder %v822_v40, %v2877_v26  ;;  %v779_v52 = vld [vmem:[#allocation2] sm:$0xe]  ;;  %v2549_v40 = vld [vmem:[%s3553_s3 + $0x1b8] sm:$0xff] }
  0x2a   : > { %v828_v48 = vunpack.c.l.b16 %v801_v43  ;;  %v2901_v49 = vld [vmem:[#allocation2 + $0x18] sm:$0xff]  ;;  %v577_v50 = vshll.u32 %v2488_v42, 16  ;;  %v581_v51 = vshrl.u32 %v2488_v42, 16  ;;  %vm2903_vm6 = vmpackc.low %vm826_vm5, %vm825_vm3  ;;  %v829_v17 = vunpack.c.h.b16 %v801_v43  ;;  %v2514_v42 = vld [vmem:[%s3553_s3 + $0xc0] sm:$0xff] }
  0x2b   : > { %v3582_v53 = vsel %vm2903_vm6, 4294967295, %v3581_v53  ;;  %v835_v54 = vunpack.c.l.b16 %v804_v44  ;;  %v836_v57 = vunpack.c.h.b16 %v804_v44  ;;  %v842_v59 = vunpack.c.l.b16 %v807_v47  ;;  %v2530_v43 = vld [vmem:[%s3553_s3 + $0x120] sm:$0xff]  ;;  %1137 = vmatpush.bf16.msra.mxu3 %v2514_v42  ;;  %v2491_v42 = vld [vmem:[%s3553_s3 + $0x8] sm:$0xff] }
  0x2c   : > { %750 = vmatpush.bf16.msrb.mxu1 %v2497_v3  ;;  %1304 = vmatpush.bf16.msrb.mxu0 %v2533_v11  ;;  %vm832_vm7 = vcmp.ne.s32.totalorder %v828_v48, %v2704_v23  ;;  %v843_v61 = vunpack.c.h.b16 %v807_v47  ;;  %v2911_v62 = vrot.slane %v577_v50, 1  ;;  %v585_v63 = vshll.u32 %v2901_v49, 16 }
  0x2d   : > { %vm833_vm8 = vcmp.ne.s32.totalorder %v829_v17, %v2877_v26  ;;  %vm839_vm10 = vcmp.ne.s32.totalorder %v835_v54, %v2704_v23  ;;  %v2486_v2 = vld [vmem:[#allocation2] sm:$0xff]  ;;  %vm840_vm12 = vcmp.ne.s32.totalorder %v836_v57, %v2877_v26  ;;  %vm2927_vm14 = vcmp.ne.s32.totalorder %v842_v59, %v2704_v23  ;;  %1587 = vmatpush.bf16.msrb.mxu2 %v2549_v40  ;;  %v2493_v54 = vld [vmem:[%s3553_s3 + $0x18] sm:$0xff] }
  0x2e   : > { %v2919_v58 = vld [vmem:[#allocation2 + $0x4] sm:$0xf]  ;;  %vm2921_vm11 = vmpackc.low %vm833_vm8, %vm832_vm7  ;;  %vm847_vm15 = vcmp.ne.s32.totalorder %v843_v61, %v2877_v26  ;;  %v884_v56 = vsel %vm2903_vm6, %v779_v52, 0  ;;  %v583_v4 = vor.u32 %v581_v51, %v2911_v62  ;;  %v2935_v5 = vrot.slane %v585_v63, 1  ;;  %v2937_v7 = vld [vmem:[#allocation2 + $0x8] sm:$0xf] }
  0x2f   : > { %vm2939_vm0 = vmpackc.low %vm840_vm12, %vm839_vm10  ;;  %v885_v10 = vsel %vm2921_vm11, %v2919_v58, 0  ;;  %v919_v11 = vunpack.c.l.b16 %v884_v56  ;;  %v2949_v13 = vld [vmem:[#allocation2 + $0x8] sm:$0xff]  ;;  %v562_v15 = vshrl.u32 %v2486_v2, 16  ;;  %v564_v16 = vshll.u32 %v2486_v2, 16  ;;  %v2529_v61 = vld [vmem:[%s3553_s3 + $0x118] sm:$0xff] }
  0x30   : > { %751 = vmatpush.bf16.msrb.mxu1 %v2496_v37  ;;  %1305 = vmatpush.bf16.msrb.mxu0 %v2532_v45  ;;  %v2951_v28 = vld [vmem:[#allocation2 + $0xc] sm:$0xf]  ;;  %vm2955_vm3 = vmpackc.low %vm847_vm15, %vm2927_vm14  ;;  %v886_v31 = vsel %vm2939_vm0, %v2937_v7, 0  ;;  %v920_v32 = vunpack.c.l.b16 %v885_v10  ;;  %v588_v36 = vsel %vm3558_vm1, %v583_v4, %v2935_v5  ;;  %v232_v39 = vadd.f32 %v2699_v20, %v220_v46  ;;  %v2561_v63 = vld [vmem:[%s3553_s3 + $0x1f8] sm:$0xff] }
  0x31   : > { %v887_v37 = vsel %vm2955_vm3, %v2951_v28, 0  ;;  %v921_v38 = vunpack.c.l.b16 %v886_v31  ;;  %667 = vmatmul.bf16.vlgmr.msra.gmra.mxu1 %v588_v36  ;;  %v566_v44 = vrot.slane %v564_v16, 1  ;;  %v569_v45 = vshll.u32 %v2949_v13, 16  ;;  %1761 = vmatpush.bf16.msrb.mxu3 %v2561_v63 }
  0x32   : > { %v922_v47 = vunpack.c.l.b16 %v887_v37  ;;  %v928_v48 = vpack.c.b16 %v920_v32, %v919_v11  ;;  %v240_v50 = vmax.f32 %v232_v39, 0.0  ;;  %vm463_vm5 = vcmp.ne.s32.totalorder %v371_v21, 0  ;;  %v2548_v21 = vld [vmem:[%s3553_s3 + $0x1b0] sm:$0xff] }
  0x33   : > { %v2981_v20 = vadd.s32 32, %v2661_v8  ;;  %v567_v46 = vor.u32 %v566_v44, %v562_v15  ;;  %v571_v51 = vrot.slane %v569_v45, 1  ;;  %vm2986_vm7 = vmpackc.low %vm463_vm5, %vm463_vm5  ;;  %vm3555_vm8 = vcmask 1046528   ;;  %1588 = vmatpush.bf16.msrb.mxu2 %v2548_v21  ;;  %v2528_v37 = vld [vmem:[%s3553_s3 + $0x110] sm:$0xff]  ;;  %v2541_v21 = vld [vmem:[%s3553_s3 + $0x178] sm:$0xff] }
  0x34   : > { %752 = vmatpush.bf16.msrb.mxu1 %v2495_v55  ;;  %1306 = vmatpush.bf16.msrb.mxu0 %v2531_v0  ;;  %v929_v52 = vpack.c.b16 %v922_v47, %v921_v38  ;;  %v934_v17 = vrot.slane %v928_v48, 1  ;;  %v262_v57 = vpack.c.bf16 %v240_v50, %v240_v50  ;;  %vm464_vm10 = vcmp.ne.s32.totalorder %v378_v22, 0 }
  0x35   : > { %v1033_v59 = vsel %vm2986_vm7, %v2919_v58, 0  ;;  %v572_v0 = vsel %vm3558_vm1, %v567_v46, %v571_v51  ;;  %vm3007_vm12 = vmpackc.low %vm464_vm10, %vm464_vm10  ;;  %v3015_v10 = vadd.s32 40, %v2661_v8  ;;  %v399_v16 = vand.u32 7, %v2981_v20  ;;  %v3062_v46 = vld [vmem:[#allocation2 + $0x10] sm:$0xf] }
  0x36   : > { %v3005_v2 = vrot.slane %v929_v52, 1  ;;  %v1066_v14 = vunpack.c.l.b16 %v1033_v59  ;;  %657 = vmatmul.bf16.vlgmr.msra.gmra.mxu0 %v572_v0  ;;  %v328_v22 = vshrl.u32 %v262_v57, 16  ;;  %v331_v56 = vshll.u32 %v262_v57, 16  ;;  %v2526_v57 = vld [vmem:[%s3553_s3 + $0x100] sm:$0xff]  ;;  %v2563_v59 = vld [vmem:[%s3553_s3 + $0x208] sm:$0xff] }
  0x37   : > { %v1034_v4 = vsel %vm3007_vm12, %v2937_v7, 0  ;;  %v326_v31 = vrot.slane %v2786_v29, 4  ;;  %v406_v36 = vand.u32 7, %v3015_v10  ;;  %vm475_vm14 = vcmp.ne.s32.totalorder %v399_v16, 7 }
  0x38   : > { %753 = vmatpush.bf16.msrb.mxu1 %v2494_v12  ;;  %1307 = vmatpush.bf16.msrb.mxu0 %v2530_v43  ;;  %v936_v11 = vsel %vm3555_vm8, %v934_v17, %v3005_v2  ;;  %v2492_v12 = vld [vmem:[%s3553_s3 + $0x10] sm:$0xff]  ;;  %v1067_v15 = vunpack.c.l.b16 %v1034_v4  ;;  %v3024_v32 = vrot.slane %v328_v22, 7  ;;  %v573_v40 = vshrl.u32 %v2949_v13, 16  ;;  %vm784_vm5 = vmpackc.low %vm475_vm14, %vm475_vm14  ;;  %v2559_v4 = vld [vmem:[%s3553_s3 + $0x1e8] sm:$0xff] }
  0x39   : > { %1003 = vmatmul.bf16.vlgmr.msra.gmra.mxu2 %v936_v11  ;;  %vm476_vm15 = vcmp.ne.s32.totalorder %v406_v36, 7  ;;  %v808_v29 = vrot.slane %v806_v25, 4  ;;  %v792_v43 = vsel %vm784_vm5, 65537, %v2605_v6  ;;  %v3043_v44 = vadd.s32 48, %v2661_v8 }
  0x3a   : > { %v1074_v38 = vpack.c.b16 %v1067_v15, %v1066_v14  ;;  %v333_v39 = vor.u32 %v331_v56, %v3024_v32  ;;  %vm785_vm10 = vmpackc.low %vm476_vm15, %vm476_vm15  ;;  %v809_v47 = vrot.slane %v792_v43, 7  ;;  %v3052_v25 = vadd.s32 56, %v2661_v8  ;;  %v2547_v8 = vld [vmem:[%s3553_s3 + $0x1a8] sm:$0xff]  ;;  %v2546_v56 = vld [vmem:[%s3553_s3 + $0x1a0] sm:$0xff] }
  0x3b   : > { %v793_v45 = vsel %vm785_vm10, 65537, %v2605_v6  ;;  %vm465_vm14 = vcmp.ne.s32.totalorder %v385_v33, 0  ;;  %vm3058_vm15 = vcmp.ne.s32.totalorder %v392_v34, 0  ;;  %v575_v50 = vor.u32 %v573_v40, %v571_v51  ;;  %v2560_v51 = vld [vmem:[%s3553_s3 + $0x1f0] sm:$0xff]  ;;  %1589 = vmatpush.bf16.msrb.mxu2 %v2547_v8 }
  0x3c   : > { %754 = vmatpush.bf16.msrb.mxu1 %v2493_v54  ;;  %1308 = vmatpush.bf16.msrb.mxu0 %v2529_v61  ;;  %v334_v13 = vsel %vm2782_vm9, %v326_v31, %v333_v39  ;;  %v812_v48 = vrot.slane %v793_v45, 7  ;;  %v810_v52 = vsel %vm2871_vm2, %v808_v29, %v809_v47  ;;  %v811_v17 = vrot.slane %v809_v47, 4  ;;  %vm3072_vm9 = vmpackc.low %vm465_vm14, %vm465_vm14 }
  0x3d   : > { %1138 = vmatmul.bf16.vlgmr.msra.gmra.mxu3 %v1074_v38  ;;  %354 = vst [vmem:[#allocation2 + $0x20] sm:$0xf] %v334_v13  ;;  %v849_v18 = vunpack.c.l.b16 %v810_v52  ;;  %v850_v33 = vunpack.c.h.b16 %v810_v52  ;;  %vm3090_vm5 = vmpackc.low %vm3058_vm15, %vm3058_vm15  ;;  %v1035_v61 = vsel %vm3072_vm9, %v2951_v28, 0  ;;  %v413_v63 = vand.u32 7, %v3043_v44  ;;  %v3118_v38 = vld [vmem:[#allocation2 + $0x4] sm:$0xff] }
  0x3e   : > { %v813_v54 = vsel %vm2871_vm2, %v811_v17, %v812_v48  ;;  %v420_v0 = vand.u32 7, %v3052_v25  ;;  %1762 = vmatpush.bf16.msrb.mxu3 %v2560_v51  ;;  %v580_v11 = vsel %vm3558_vm1, %v575_v50, %v2911_v62  ;;  %v3601_v15 = vmov 0  ;;  %v3147_v50 = vld [vmem:[#allocation2 + $0xc] sm:$0xff]  ;;  %v3172_v13 = vld [vmem:[#allocation2 + $0x1c] sm:$0xf] }
  0x3f   : > { %vm853_vm10 = vcmp.ne.s32.totalorder %v849_v18, %v2704_v23  ;;  %vm854_vm14 = vcmp.ne.s32.totalorder %v850_v33, %v2877_v26  ;;  %v856_v14 = vunpack.c.l.b16 %v813_v54  ;;  %v857_v22 = vunpack.c.h.b16 %v813_v54  ;;  %1590 = vmatpush.bf16.msrb.mxu2 %v2546_v56 }
  0x40   : > { %755 = vmatpush.bf16.msrb.mxu1 %v2492_v12  ;;  %1309 = vmatpush.bf16.msrb.mxu0 %v2528_v37  ;;  %v3109_v12 = vld [vmem:[#allocation2 + $0x14] sm:$0xf]  ;;  %vm3111_vm15 = vmpackc.low %vm854_vm14, %vm853_vm10  ;;  %v1036_v31 = vsel %vm3090_vm5, %v3062_v46, 0  ;;  %v1068_v37 = vunpack.c.l.b16 %v1035_v61  ;;  %v589_v29 = vshrl.u32 %v2901_v49, 16  ;;  %vm477_vm14 = vcmp.ne.s32.totalorder %v413_v63, 7 }
  0x41   : > { %v3602_v15 = vsel %vm3111_vm15, 4294967295, %v3601_v15  ;;  %vm860_vm8 = vcmp.ne.s32.totalorder %v856_v14, %v2704_v23  ;;  %vm861_vm6 = vcmp.ne.s32.totalorder %v857_v22, %v2877_v26  ;;  %v888_v62 = vsel %vm3111_vm15, %v3062_v46, 0  ;;  %v2540_v49 = vld [vmem:[%s3553_s3 + $0x170] sm:$0xff] }
  0x42   : > { %v1069_v39 = vunpack.c.l.b16 %v1036_v31  ;;  %vm3128_vm10 = vmpackc.low %vm861_vm6, %vm860_vm8  ;;  %v923_v43 = vunpack.c.l.b16 %v888_v62  ;;  %vm3136_vm1 = vcmp.ne.s32.totalorder %v420_v0, 7  ;;  %1763 = vmatpush.bf16.msrb.mxu3 %v2559_v4  ;;  %v1219_v52 = vshll.u32 %v3118_v38, 16 }
  0x43   : > { %v889_v47 = vsel %vm3128_vm10, %v3109_v12, 0  ;;  %vm786_vm6 = vmpackc.low %vm477_vm14, %vm477_vm14  ;;  %v1224_v56 = vshll.u32 %v3147_v50, 16  ;;  %v335_v3 = vrot.slane %v3024_v32, 4 }
  0x44   : > { %756 = vmatpush.bf16.msrb.mxu1 %v2491_v42  ;;  %1310 = vmatpush.bf16.msrb.mxu0 %v2527_v9  ;;  %v3125_v40 = vld [vmem:[#allocation2 + $0x20] sm:$0x1]  ;;  %v3603_v42 = vmov 0  ;;  %v814_v9 = vrot.slane %v812_v48, 4  ;;  %v924_v27 = vunpack.c.l.b16 %v889_v47  ;;  %vm787_vm8 = vmpackc.low %vm3136_vm1, %vm3136_vm1  ;;  %v794_v17 = vsel %vm786_vm6, 65537, %v2605_v6  ;;  %v2545_v47 = vld [vmem:[%s3553_s3 + $0x198] sm:$0xff] }
  0x45   : > { %v3604_v42 = vsel %vm3128_vm10, 4294967295, %v3603_v42  ;;  %v554_v45 = vunpack.c.l.b16 %v3125_v40  ;;  %v1075_v18 = vpack.c.b16 %v1069_v39, %v1068_v37  ;;  %v795_v33 = vsel %vm787_vm8, 65537, %v2605_v6  ;;  %1591 = vmatpush.bf16.msrb.mxu2 %v2545_v47 }
  0x46   : > { %662 = vmatmul.bf16.gmra.mxu0 %v580_v11  ;;  %v591_v48 = vor.u32 %v589_v29, %v2935_v5  ;;  %v930_v51 = vpack.c.b16 %v924_v27, %v923_v43  ;;  %v818_v54 = vrot.slane %v795_v33, 7  ;;  %v1221_v31 = vrot.slane %v1219_v52, 1  ;;  %v3162_v5 = vld [vmem:[#allocation2 + $0x18] sm:$0xf]  ;;  %v479_v43 = vld [vmem:[#allocation2] sm:$0xf] }
  0x47   : > { %v559_v8 = vpack.c.b16 %v554_v45, %v554_v45  ;;  %vm3607_vm1 = vcmask 1046528   ;;  %vm3608_vm8 = vsmask.f32 7424  ;;  %v2539_v45 = vld [vmem:[%s3553_s3 + $0x168] sm:$0xff]  ;;  %v3207_v27 = vld [vmem:[%s3553_s3 + $0x238] sm:$0xff]  ;;  %v3615_v52 = vmov 0 }
  0x48   : > { %757 = vmatpush.bf16.msrb.mxu1 %v2490_v19  ;;  %1311 = vmatpush.bf16.msrb.mxu0 %v2526_v57  ;;  %v815_v19 = vrot.slane %v794_v17, 7  ;;  %v1217_v57 = vshrl.u32 %v3118_v38, 16  ;;  %v3159_v22 = vrot.slane %v930_v51, 1  ;;  %v820_v62 = vrot.slane %v818_v54, 4  ;;  %v2538_v33 = vld [vmem:[%s3553_s3 + $0x160] sm:$0xff] }
  0x4a   : > { %v816_v61 = vsel %vm2871_vm2, %v814_v9, %v815_v19  ;;  %v817_v14 = vrot.slane %v815_v19, 4  ;;  %v938_v38 = vsel %vm3607_vm1, %v3005_v2, %v3159_v22  ;;  %vm468_vm1 = vcmp.ne.s32.totalorder %v406_v36, 0  ;;  %v2558_v9 = vld [vmem:[%s3553_s3 + $0x1e0] sm:$0xff]  ;;  %v2544_v19 = vld [vmem:[%s3553_s3 + $0x190] sm:$0xff] }
  0x4b   : > { %v863_v4 = vunpack.c.l.b16 %v816_v61  ;;  %v864_v11 = vunpack.c.h.b16 %v816_v61  ;;  %1008 = vmatmul.bf16.gmra.mxu2 %v938_v38  ;;  %v1222_v10 = vor.u32 %v1221_v31, %v1217_v57  ;;  %1764 = vmatpush.bf16.msrb.mxu3 %v2558_v9  ;;  %v877_v51 = vunpack.c.l.b16 %v820_v62  ;;  %v3235_v57 = vld [vmem:[%s3553_s3 + $0x230] sm:$0xff] }
  0x4c   : > { %1452 = vmatpush.bf16.msra.mxu1 %v2541_v21  ;;  %v593_v21 = vshll.u32 %v559_v8, 16  ;;  %v819_v37 = vsel %vm2871_vm2, %v817_v14, %v818_v54  ;;  %vm467_vm2 = vcmp.ne.s32.totalorder %v399_v16, 0  ;;  %v1226_v16 = vrot.slane %v1224_v56, 1  ;;  %1909 = vmatpush.bf16.msra.mxu0 %v3207_v27 }
  0x4d   : > { %1143 = vmatmul.bf16.gmra.mxu3 %v1075_v18  ;;  %vm867_vm14 = vcmp.ne.s32.totalorder %v863_v4, %v2704_v23  ;;  %vm868_vm6 = vcmp.ne.s32.totalorder %v864_v11, %v2877_v26  ;;  %v870_v39 = vunpack.c.l.b16 %v819_v37  ;;  %v871_v24 = vunpack.c.h.b16 %v819_v37  ;;  %1592 = vmatpush.bf16.msrb.mxu2 %v2544_v19 }
  0x4e   : > { %v595_v6 = vrot.slane %v593_v21, 1  ;;  %vm3174_vm10 = vmpackc.low %vm868_vm6, %vm867_vm14  ;;  %v878_v54 = vunpack.c.h.b16 %v820_v62  ;;  %v2557_v21 = vld [vmem:[%s3553_s3 + $0x1d8] sm:$0xff]  ;;  %v495_v61 = vsel %vm2986_vm7, %v479_v43, 0  ;;  %v496_v56 = vsel %vm3007_vm12, %v2919_v58, 0  ;;  %v251_v43 = vld [vmem:[#allocation2 + $0x24] sm:$0xf] }
  0x4f   : > { %vm874_vm15 = vcmp.ne.s32.totalorder %v870_v39, %v2704_v23  ;;  %v890_v2 = vsel %vm3174_vm10, %v3162_v5, 0  ;;  %vm3192_vm14 = vmpackc.low %vm467_vm2, %vm467_vm2  ;;  %vm875_vm6 = vcmp.ne.s32.totalorder %v871_v24, %v2877_v26  ;;  %1765 = vmatpush.bf16.msrb.mxu3 %v2557_v21  ;;  %v686_v37 = vunpack.c.l.b16 %v495_v61  ;;  %v3248_v39 = vld [vmem:[#allocation2 + $0x14] sm:$0xff] }
  0x50   : > { %1453 = vmatpush.bf16.msra.mxu1 %v2540_v49  ;;  %v596_v29 = vsel %vm3608_vm8, %v591_v48, %v595_v6  ;;  %vm3197_vm8 = vmpackc.low %vm468_vm1, %vm468_vm1  ;;  %v925_v17 = vunpack.c.l.b16 %v890_v2  ;;  %v1037_v8 = vsel %vm3192_vm14, %v3109_v12, 0  ;;  %vm881_vm1 = vcmp.ne.s32.totalorder %v877_v51, %v2704_v23  ;;  %1910 = vmatpush.bf16.msra.mxu0 %v3235_v57 }
  0x51   : > { %672 = vmatmul.bf16.gmra.mxu1 %v596_v29  ;;  %vm3209_vm2 = vmpackc.low %vm875_vm6, %vm874_vm15  ;;  %v1038_v18 = vsel %vm3197_vm8, %v3162_v5, 0  ;;  %vm3617_vm15 = vsmask.f32 7424  ;;  %v1070_v11 = vunpack.c.l.b16 %v1037_v8  ;;  %vm882_vm6 = vcmp.ne.s32.totalorder %v878_v54, %v2877_v26  ;;  %1593 = vmatpush.bf16.msrb.mxu2 %v2543_v60  ;;  %v2555_v54 = vld [vmem:[%s3553_s3 + $0x1c8] sm:$0xff] }
  0x52   : > { %v3616_v52 = vsel %vm3209_vm2, 4294967295, %v3615_v52  ;;  %v891_v48 = vsel %vm3209_vm2, %v3172_v13, 0  ;;  %v1227_v4 = vsel %vm3617_vm15, %v1222_v10, %v1226_v16  ;;  %v1071_v6 = vunpack.c.l.b16 %v1038_v18  ;;  %vm3250_vm15 = vmpackc.low %vm882_vm6, %vm881_vm1  ;;  %v2536_v18 = vld [vmem:[%s3553_s3 + $0x150] sm:$0xff] }
  0x53   : > { %v926_v14 = vunpack.c.l.b16 %v891_v48  ;;  %v687_v62 = vunpack.c.l.b16 %v496_v56  ;;  %v252_v23 = vsel %vm2823_vm13, 0, %v251_v43  ;;  %vm3620_vm2 = vcmask 1046528   ;;  %v3304_v48 = vld [vmem:[#allocation2 + $0xc] sm:$0xf]  ;;  %v3330_v43 = vld [vmem:[#allocation2 + $0x1c] sm:$0xff] }
  0x54   : > { %1454 = vmatpush.bf16.msra.mxu1 %v2539_v45  ;;  %v1076_v58 = vpack.c.b16 %v1071_v6, %v1070_v11  ;;  %253 = vst [vmem:[#allocation2 + $0x24] sm:$0xf] %v252_v23  ;;  %v1228_v2 = vshrl.u32 %v3147_v50, 16  ;;  %v1232_v45 = vshll.u32 %v3248_v39, 16  ;;  %v892_v47 = vsel %vm3250_vm15, %v3125_v40, 0  ;;  %v2537_v50 = vld [vmem:[%s3553_s3 + $0x158] sm:$0xff] }
  0x55   : > { %v931_v31 = vpack.c.b16 %v926_v14, %v925_v17  ;;  %v694_v26 = vpack.c.b16 %v687_v62, %v686_v37  ;;  %vm469_vm13 = vcmp.ne.s32.totalorder %v413_v63, 0  ;;  %v2542_v40 = vld [vmem:[%s3553_s3 + $0x180] sm:$0xff]  ;;  %v497_v19 = vsel %vm3072_vm9, %v2937_v7, 0 }
  0x56   : > { %1312 = vmatmul.bf16.vlgmr.msrb.gmra.mxu0 %v1227_v4  ;;  %vm3277_vm1 = vmpackc.low %vm469_vm13, %vm469_vm13  ;;  %v1230_v9 = vor.u32 %v1228_v2, %v1226_v16  ;;  %v1234_v44 = vrot.slane %v1232_v45, 1  ;;  %v1032_v63 = vld [vmem:[#allocation2 + $0x20] sm:$0xf]  ;;  %v2567_v16 = vld [vmem:[%s3553_s3 + $0x228] sm:$0xff]  ;;  %v498_v21 = vsel %vm3090_vm5, %v2951_v28, 0  ;;  %v1491_v7 = vsel %vm3007_vm12, %v3304_v48, 0  ;;  %1594 = vmatpush.bf16.msrb.mxu2 %v2542_v40 }
  0x57   : > { %v3246_v38 = vrot.slane %v931_v31, 1  ;;  %v1039_v17 = vsel %vm3277_vm1, %v3172_v13, 0  ;;  %1911 = vmatpush.bf16.msra.mxu0 %v2567_v16  ;;  %vm3625_vm13 = vsmask.f32 7424  ;;  %v3321_v11 = vunpack.c.l.b16 %v1491_v7  ;;  %v2566_v6 = vld [vmem:[%s3553_s3 + $0x220] sm:$0xff]  ;;  %v2550_v45 = vld [vmem:[#allocation2 + $0x8] sm:$0xff] }
  0x58   : > { %1455 = vmatpush.bf16.msra.mxu1 %v2538_v33  ;;  %v3299_v33 = vld [vmem:[#allocation2 + $0x8] sm:$0xf]  ;;  %v1235_v56 = vsel %vm3625_vm13, %v1230_v9, %v1234_v44  ;;  %v1072_v55 = vunpack.c.l.b16 %v1039_v17  ;;  %v688_v37 = vunpack.c.l.b16 %v497_v19  ;;  %v689_v62 = vunpack.c.l.b16 %v498_v21  ;;  %v2565_v40 = vld [vmem:[%s3553_s3 + $0x218] sm:$0xff]  ;;  %v3352_v9 = vld [vmem:[#allocation2 + $0x10] sm:$0xf] }
  0x59   : > { %v940_v24 = vsel %vm3620_vm2, %v3159_v22, %v3246_v38  ;;  %vm470_vm2 = vcmp.ne.s32.totalorder %v420_v0, 0  ;;  %v927_v22 = vunpack.c.l.b16 %v892_v47  ;;  %v2556_v0 = vld [vmem:[%s3553_s3 + $0x1d0] sm:$0xff]  ;;  %v1490_v51 = vsel %vm2986_vm7, %v3299_v33, 0  ;;  %v2534_v17 = vld [vmem:[%s3553_s3 + $0x140] sm:$0xff] }
  0x5a   : > { %vm3281_vm6 = vmpackc.low %vm470_vm2, %vm470_vm2  ;;  %1766 = vmatpush.bf16.msrb.mxu3 %v2556_v0  ;;  %v3318_v14 = vunpack.c.l.b16 %v1490_v51  ;;  %2578 = vmatpush.bf16.msra.mxu2 %v3207_v27  ;;  %v695_v27 = vpack.c.b16 %v689_v62, %v688_v37  ;;  %vm3626_vm7 = vcmask 1046528   ;;  %v1236_v2 = vshrl.u32 %v3248_v39, 16  ;;  %v3339_v47 = vld [vmem:[#allocation2 + $0x10] sm:$0xff]  ;;  %v3391_v62 = vld [vmem:[#allocation2 + $0x18] sm:$0xff] }
  0x5b   : > { %1013 = vmatmul.bf16.gmra.mxu2 %v940_v24  ;;  %v1040_v8 = vsel %vm3281_vm6, %v1032_v63, 0  ;;  %v932_v61 = vpack.c.b16 %v927_v22, %v927_v22  ;;  %v355_v28 = vld [vmem:[#allocation2 + $0x24] sm:$0x1]  ;;  %1912 = vmatpush.bf16.msra.mxu0 %v2566_v6  ;;  %v1240_v24 = vshll.u32 %v3330_v43, 16  ;;  %v1676_v41 = vshll.u32 %v2550_v45, 16  ;;  %vm3636_vm2 = vmmov %vm3626_vm7 }
  0x5c   : > { %1456 = vmatpush.bf16.msra.mxu1 %v2537_v50  ;;  %v1073_v4 = vunpack.c.l.b16 %v1040_v8  ;;  %v1531_v31 = vpack.c.b16 %v3321_v11, %v3318_v14  ;;  %v356_v23 = vsel %vm2736_vm4, %v335_v3, %v355_v28  ;;  %v1238_v22 = vor.u32 %v1236_v2, %v1234_v44  ;;  %v3358_v8 = vld [vmem:[#allocation2 + $0x14] sm:$0xf]  ;;  %vm3627_vm4 = vmmov %vm3625_vm13  ;;  %v1626_v11 = vld [vmem:[#allocation2 + $0x10] sm:$0xf] }
  0x5d   : > { %1148 = vmatmul.bf16.gmra.mxu3 %v1076_v58  ;;  %v941_v58 = vrot.slane %v932_v61, 1  ;;  %357 = vst [vmem:[#allocation2 + $0x24] sm:$0x1] %v356_v23  ;;  %v1242_v60 = vrot.slane %v1240_v24, 1  ;;  %v1674_v39 = vshrl.u32 %v2550_v45, 16  ;;  %v1678_v63 = vrot.slane %v1676_v41, 1  ;;  %vm3628_vm12 = vmmov %vm3627_vm4 }
  0x5e   : > { %1767 = vmatpush.bf16.msrb.mxu3 %v2555_v54  ;;  %2579 = vmatpush.bf16.msra.mxu2 %v3235_v57  ;;  %v2535_v57 = vld [vmem:[%s3553_s3 + $0x148] sm:$0xff]  ;;  %v1681_v0 = vshll.u32 %v3339_v47, 16  ;;  %v1492_v44 = vsel %vm3072_vm9, %v3352_v9, 0  ;;  %v1493_v19 = vsel %vm3090_vm5, %v3358_v8, 0  ;;  %v500_v34 = vsel %vm3197_vm8, %v3109_v12, 0  ;;  %vm3629_vm9 = vmmov %vm3627_vm4 }
  0x5f   : > { %v942_v32 = vsel %vm3626_vm7, %v3246_v38, %v941_v58  ;;  %v2554_v38 = vld [vmem:[%s3553_s3 + $0x1c0] sm:$0xff]  ;;  %1913 = vmatpush.bf16.msra.mxu0 %v2565_v40  ;;  %v3372_v51 = vunpack.c.l.b16 %v1492_v44  ;;  %v1243_v54 = vsel %vm3627_vm4, %v1238_v22, %v1242_v60  ;;  %v3379_v61 = vunpack.c.l.b16 %v1493_v19  ;;  %v3396_v23 = vld [vmem:[#allocation2 + $0x18] sm:$0xf]  ;;  %v1798_v2 = vld [vmem:[#allocation2 + $0x8] sm:$0xe] }
  0x60   : > { %1457 = vmatpush.bf16.msra.mxu1 %v2536_v18  ;;  %v499_v18 = vsel %vm3192_vm14, %v3062_v46, 0  ;;  %v1679_v7 = vor.u32 %v1678_v63, %v1674_v39  ;;  %v691_v12 = vunpack.c.l.b16 %v500_v34  ;;  %v1244_v3 = vshrl.u32 %v3330_v43, 16  ;;  %v2562_v58 = vld [vmem:[%s3553_s3 + $0x200] sm:$0xff]  ;;  %vm3639_vm13 = vmmov %vm3627_vm4 }
  0x61   : > { %758 = vmatmul.bf16.vlgmr.msrb.gmra.mxu1 %v694_v26  ;;  %v1077_v26 = vpack.c.b16 %v1073_v4, %v1072_v55  ;;  %v1532_v46 = vpack.c.b16 %v3379_v61, %v3372_v51  ;;  %v690_v55 = vunpack.c.l.b16 %v499_v18  ;;  %v1685_v24 = vshrl.u32 %v3339_v47, 16 }
  0x62   : > { %2580 = vmatpush.bf16.msra.mxu2 %v2567_v16  ;;  %1768 = vmatpush.bf16.msrb.mxu3 %v2554_v38  ;;  %v2564_v16 = vld [vmem:[%s3553_s3 + $0x210] sm:$0xff]  ;;  %v1689_v14 = vshll.u32 %v3391_v62, 16  ;;  %v1494_v45 = vsel %vm3192_vm14, %v3396_v23, 0  ;;  %v502_v47 = vsel %vm3281_vm6, %v3172_v13, 0  ;;  %v1801_v36 = vsel %vm2939_vm0, %v1626_v11, 0  ;;  %vm3631_vm14 = vmmov %vm3627_vm4 }
  0x63   : > { %1914 = vmatpush.bf16.msra.mxu0 %v2564_v16  ;;  %v696_v28 = vpack.c.b16 %v691_v12, %v690_v55  ;;  %vm3630_vm5 = vnez %v3582_v53  ;;  %v1836_v18 = vunpack.c.l.b16 %v1801_v36 }
  0x64   : > { %v3347_v50 = vld [vmem:[#allocation2 + $0x24] sm:$0x1]  ;;  %1458 = vmatpush.bf16.msra.mxu1 %v2535_v57  ;;  %v3414_v57 = vunpack.c.l.b16 %v1494_v45  ;;  %v1799_v13 = vsel %vm3630_vm5, %v1798_v2, 0 }
  0x65   : > { %v1210_v21 = vunpack.c.l.b16 %v3347_v50  ;;  %v1834_v44 = vunpack.c.l.b16 %v1799_v13  ;;  %v2553_v35 = vld [vmem:[#allocation2 + $0x20] sm:$0xff] }
  0x66   : > { %1317 = vmatmul.bf16.gmra.mxu0 %v1235_v56  ;;  %2581 = vmatpush.bf16.msra.mxu2 %v2566_v6  ;;  %v1683_v56 = vrot.slane %v1681_v0, 1 }
  0x67   : > { %v1215_v4 = vpack.c.b16 %v1210_v21, %v1210_v21  ;;  %1915 = vmatpush.bf16.msra.mxu0 %v2563_v59  ;;  %v1343_v21 = vsel %vm2921_vm11, %v3299_v33, 0 }
  0x68   : > { %1459 = vmatpush.bf16.msra.mxu1 %v2534_v17  ;;  %v1684_v6 = vsel %vm3628_vm12, %v1679_v7, %v1683_v56  ;;  %v1687_v39 = vor.u32 %v1685_v24, %v1683_v56  ;;  %v693_v17 = vunpack.c.l.b16 %v502_v47  ;;  %v1344_v56 = vsel %vm2939_vm0, %v3304_v48, 0  ;;  %v3444_v48 = vld [vmem:[#allocation2 + $0x20] sm:$0xf] }
  0x69   : > { %v1248_v37 = vshll.u32 %v1215_v4, 16  ;;  %v1378_v33 = vunpack.c.l.b16 %v1343_v21  ;;  %v1496_v53 = vsel %vm3277_vm1, %v3444_v48, 0  ;;  %vm3633_vm0 = vnez %v3602_v15 }
  0x6a   : > { %2582 = vmatpush.bf16.msra.mxu2 %v2565_v40  ;;  %v1691_v40 = vrot.slane %v1689_v14, 1  ;;  %v1529_v61 = vunpack.c.l.b16 %v1496_v53  ;;  %v1346_v36 = vsel %vm3633_vm0, %v3358_v8, 0 }
  0x6b   : > { %1018 = vmatmul.bf16.gmra.mxu2 %v942_v32  ;;  %v1250_v43 = vrot.slane %v1248_v37, 1  ;;  %v1625_v32 = vld [vmem:[#allocation2 + $0xc] sm:$0xf]  ;;  %1916 = vmatpush.bf16.msra.mxu0 %v2562_v58  ;;  %v1693_v37 = vshrl.u32 %v3391_v62, 16 }
  0x6c   : > { %v1800_v22 = vsel %vm2921_vm11, %v1625_v32, 0  ;;  %v1692_v34 = vsel %vm3631_vm14, %v1687_v39, %v1691_v40  ;;  %vm3632_vm11 = vmmov %vm3626_vm7 }
  0x6d   : > { %1153 = vmatmul.bf16.gmra.mxu3 %v1077_v26  ;;  %v3398_v26 = vld [vmem:[#allocation2 + $0x1c] sm:$0xf] }
  0x6e   : > { %2583 = vmatpush.bf16.msra.mxu2 %v2564_v16  ;;  %v1495_v41 = vsel %vm3197_vm8, %v3398_v26, 0  ;;  %v1835_v16 = vunpack.c.l.b16 %v1800_v22  ;;  %vm3635_vm8 = vmmov %vm3627_vm4 }
  0x6f   : > { %v3416_v38 = vunpack.c.l.b16 %v1495_v41 }
  0x70   : > { %v1843_v55 = vpack.c.b16 %v1835_v16, %v1834_v44  ;;  %v1630_v16 = vld [vmem:[#allocation2 + $0x20] sm:$0xf] }
  0x71   : > { %763 = vmatmul.bf16.gmra.mxu1 %v695_v27  ;;  %v1246_v27 = vor.u32 %v1244_v3, %v1242_v60  ;;  %v501_v60 = vsel %vm3277_vm1, %v3162_v5, 0  ;;  %v1533_v63 = vpack.c.b16 %v3416_v38, %v3414_v57  ;;  %v1632_v57 = vld [vmem:[#allocation2 + $0x28] sm:$0x1]  ;;  %vm3637_vm1 = vmmov %vm3636_vm2  ;;  %v1805_v8 = vsel %vm3174_vm10, %v1630_v16, 0 }
  0x72   : > { %2584 = vmatpush.bf16.msra.mxu2 %v2563_v59  ;;  %v692_v0 = vunpack.c.l.b16 %v501_v60  ;;  %v1345_v59 = vsel %vm2955_vm3, %v3352_v9, 0  ;;  %v1848_v9 = vrot.slane %v1843_v55, 1  ;;  %v1667_v22 = vunpack.c.l.b16 %v1632_v57  ;;  %vm3640_vm7 = vmmov %vm3637_vm1 }
  0x73   : > { %v1251_v20 = vsel %vm3629_vm9, %v1246_v27, %v1250_v43  ;;  %v1380_v1 = vunpack.c.l.b16 %v1345_v59  ;;  %v1629_v27 = vld [vmem:[#allocation2 + $0x1c] sm:$0xf]  ;;  %v1807_v59 = vsel %vm3250_vm15, %v1632_v57, 0  ;;  %vm3641_vm4 = vmmov %vm3637_vm1 }
  0x74   : > { %v697_v7 = vpack.c.b16 %v693_v17, %v692_v0  ;;  %v1672_v39 = vpack.c.b16 %v1667_v22, %v1667_v22  ;;  %v1701_v17 = vshrl.u32 %v2553_v35, 16  ;;  %vm3643_vm12 = vmmov %vm3637_vm1 }
  0x75   : > { %vm3644_vm9 = vmmov %vm3637_vm1 }
  0x76   : > { %1322 = vmatmul.bf16.gmra.mxu0 %v1243_v54  ;;  %2585 = vmatpush.bf16.msra.mxu2 %v2562_v58  ;;  %v1341_v54 = vld [vmem:[#allocation2 + $0x4] sm:$0xe]  ;;  %v1697_v58 = vshll.u32 %v2553_v35, 16  ;;  %v1705_v44 = vshll.u32 %v1672_v39, 16  ;;  %v1842_v35 = vunpack.c.l.b16 %v1807_v59 }
  0x77   : > { %v1342_v4 = vsel %vm3630_vm5, %v1341_v54, 0 }
  0x78   : > { %v1377_v30 = vunpack.c.l.b16 %v1342_v4  ;;  %v1699_v2 = vrot.slane %v1697_v58, 1  ;;  %v1707_v15 = vrot.slane %v1705_v44, 1 }
  0x7a   : > { %v1386_v24 = vpack.c.b16 %v1378_v33, %v1377_v30  ;;  %v1703_v54 = vor.u32 %v1701_v17, %v1699_v2 }
  0x7b   : > { %1595 = vmatmul.bf16.vlgmr.msrb.gmra.mxu2 %v1531_v31  ;;  %v1627_v31 = vld [vmem:[#allocation2 + $0x14] sm:$0xf] }
  0x7c   : > { %v1802_v5 = vsel %vm2955_vm3, %v1627_v31, 0  ;;  %v1695_v31 = vor.u32 %v1693_v37, %v1691_v40  ;;  %vm3634_vm3 = vnez %v3604_v42  ;;  %v1391_v25 = vrot.slane %v1386_v24, 1 }
  0x7d   : > { %1769 = vmatmul.bf16.vlgmr.msrb.gmra.mxu3 %v1684_v6  ;;  %v1837_v19 = vunpack.c.l.b16 %v1802_v5  ;;  %v1379_v6 = vunpack.c.l.b16 %v1344_v56  ;;  %v1804_v62 = vsel %vm3634_vm3, %v1629_v27, 0  ;;  %v1347_v5 = vsel %vm3634_vm3, %v3396_v23, 0 }
  0x7e   : > { %v1839_v60 = vunpack.c.l.b16 %v1804_v62  ;;  %v1700_v47 = vsel %vm3635_vm8, %v1695_v31, %v1699_v2  ;;  %v1381_v40 = vunpack.c.l.b16 %v1346_v36  ;;  %v1382_v13 = vunpack.c.l.b16 %v1347_v5 }
  0x7f   : > { %v1844_v12 = vpack.c.b16 %v1837_v19, %v1836_v18  ;;  %v1387_v32 = vpack.c.b16 %v1380_v1, %v1379_v6  ;;  %v1631_v18 = vld [vmem:[#allocation2 + $0x24] sm:$0xf] }
  0x80   : > { %v1388_v19 = vpack.c.b16 %v1382_v13, %v1381_v40 }
  0x81   : > { %768 = vmatmul.bf16.gmra.mxu1 %v696_v28  ;;  %v1489_v28 = vld [vmem:[#allocation2 + $0x24] sm:$0xf]  ;;  %v1849_v3 = vrot.slane %v1844_v12, 1  ;;  %v1392_v45 = vrot.slane %v1387_v32, 1  ;;  %v1348_v12 = vsel %vm3174_vm10, %v3398_v26, 0  ;;  %vm3642_vm10 = vmmov %vm3637_vm1 }
  0x82   : > { %v1497_v51 = vsel %vm3281_vm6, %v1489_v28, 0  ;;  %vm3638_vm6 = vnez %v3616_v52  ;;  %v1394_v23 = vrot.slane %v1388_v19, 1  ;;  %v1383_v33 = vunpack.c.l.b16 %v1348_v12 }
  0x83   : > { %v1530_v43 = vunpack.c.l.b16 %v1497_v51  ;;  %v1850_v14 = vsel %vm3632_vm11, %v1848_v9, %v1849_v3  ;;  %v1393_v38 = vsel %vm3636_vm2, %v1391_v25, %v1392_v45  ;;  %v1806_v42 = vsel %vm3638_vm6, %v1631_v18, 0 }
  0x84   : > { %v1841_v21 = vunpack.c.l.b16 %v1806_v42  ;;  %v1395_v56 = vsel %vm3640_vm7, %v1392_v45, %v1394_v23  ;;  %v1349_v4 = vsel %vm3638_vm6, %v3444_v48, 0  ;;  %v1847_v28 = vpack.c.b16 %v1842_v35, %v1842_v35 }
  0x85   : > { %v1534_v11 = vpack.c.b16 %v1530_v43, %v1529_v61  ;;  %v1384_v6 = vunpack.c.l.b16 %v1349_v4  ;;  %v1350_v51 = vsel %vm3250_vm15, %v3347_v50, 0 }
  0x86   : > { %1327 = vmatmul.bf16.gmra.mxu0 %v1251_v20  ;;  %v1855_v53 = vrot.slane %v1847_v28, 1  ;;  %v1385_v61 = vunpack.c.l.b16 %v1350_v51 }
  0x87   : > { %v1389_v30 = vpack.c.b16 %v1384_v6, %v1383_v33 }
  0x88   : > { %v1390_v43 = vpack.c.b16 %v1385_v61, %v1385_v61 }
  0x89   : > { %v1396_v49 = vrot.slane %v1389_v30, 1 }
  0x8b   : > { %1600 = vmatmul.bf16.gmra.mxu2 %v1532_v46  ;;  %v1628_v46 = vld [vmem:[#allocation2 + $0x18] sm:$0xf]  ;;  %v1397_v52 = vsel %vm3643_vm12, %v1394_v23, %v1396_v49 }
  0x8c   : > { %v1803_v10 = vsel %vm3633_vm0, %v1628_v46, 0 }
  0x8d   : > { %1774 = vmatmul.bf16.gmra.mxu3 %v1692_v34  ;;  %v1838_v41 = vunpack.c.l.b16 %v1803_v10 }
  0x8f   : > { %v1845_v20 = vpack.c.b16 %v1839_v60, %v1838_v41 }
  0x91   : > { %773 = vmatmul.bf16.gmra.mxu1 %v697_v7  ;;  %v1851_v0 = vrot.slane %v1845_v20, 1  ;;  %v1708_v7 = vsel %vm3639_vm13, %v1703_v54, %v1707_v15 }
  0x93   : > { %v1852_v34 = vsel %vm3637_vm1, %v1849_v3, %v1851_v0 }
  0x96   : > { %1917 = vmatmul.bf16.vlgmr.msra.gmra.mxu0 %v1850_v14  ;;  %v1398_v14 = vrot.slane %v1390_v43, 1 }
  0x98   : > { %v1399_v2 = vsel %vm3644_vm9, %v1396_v49, %v1398_v14 }
  0x9b   : > { %1605 = vmatmul.bf16.gmra.mxu2 %v1533_v63  ;;  %v1840_v63 = vunpack.c.l.b16 %v1805_v8 }
  0x9d   : > { %1779 = vmatmul.bf16.gmra.mxu3 %v1700_v47  ;;  %v1846_v55 = vpack.c.b16 %v1841_v21, %v1840_v63 }
  0x9f   : > { %v1853_v1 = vrot.slane %v1846_v55, 1 }
  0xa1   : > { %1460 = vmatmul.bf16.vlgmr.msra.gmra.mxu1 %v1393_v38  ;;  %v1854_v3 = vsel %vm3641_vm4, %v1851_v0, %v1853_v1  ;;  %v1856_v26 = vsel %vm3642_vm10, %v1853_v1, %v1855_v53 }
  0xa6   : > { %1922 = vmatmul.bf16.gmra.mxu0 %v1852_v34 }
  0xab   : > { %1610 = vmatmul.bf16.gmra.mxu2 %v1534_v11 }
  0xad   : > { %1784 = vmatmul.bf16.gmra.mxu3 %v1708_v7 }
  0xae   : > { %v3481_v37 = vpop.f32.mrf.mxu1 }
  0xb1   : > { %1465 = vmatmul.bf16.gmra.mxu1 %v1395_v56 }
  0xb3   : > { %v658_v9 = vpop.f32.mrf.mxu0 }
  0xb6   : > { %1927 = vmatmul.bf16.gmra.mxu0 %v1854_v3  ;;  %v670_v27 = vpop.f32.mrf.mxu1 }
  0xbb   : > { %v660_v48 = vpop.f32.mrf.mxu0  ;;  %1932 = vmatmul.bf16.vlgmr.msra.gmra.mxu2 %v1856_v26 }
  0xbc   : > { %v1004_v58 = vpop.f32.mrf.mxu2 }
  0xc0   : > { %v1139_v46 = vpop.f32.mrf.mxu3 }
  0xc1   : > { %1470 = vmatmul.bf16.gmra.mxu1 %v1397_v52 }
  0xc3   : > { %v663_v32 = vpop.f32.mrf.mxu0 }
  0xc4   : > { %v1006_v24 = vpop.f32.mrf.mxu2 }
  0xc8   : > { %v1141_v11 = vpop.f32.mrf.mxu3 }
  0xcb   : > { %v665_v10 = vpop.f32.mrf.mxu0 }
  0xce   : > { %v673_v31 = vpop.f32.mrf.mxu1  ;;  %v1009_v62 = vpop.f32.mrf.mxu2 }
  0xd0   : > { %v1144_v29 = vpop.f32.mrf.mxu3 }
  0xd1   : > { %1475 = vmatmul.bf16.gmra.mxu1 %v1399_v2 }
  0xd3   : > { %v1313_v45 = vpop.f32.mrf.mxu0 }
  0xd6   : > { %v675_v25 = vpop.f32.mrf.mxu1  ;;  %v1011_v50 = vpop.f32.mrf.mxu2 }
  0xd8   : > { %v3489_v38 = vpop.f32.mrf.mxu3 }
  0xdb   : > { %v1315_v60 = vpop.f32.mrf.mxu0 }
  0xde   : > { %v759_v41 = vpop.f32.mrf.mxu1  ;;  %v3491_v20 = vpop.f32.mrf.mxu2 }
  0xdf   : > { %v760_v47 = vadd.f32 %v759_v41, %v658_v9 }
  0xe0   : > { %v3493_v13 = vpop.f32.mrf.mxu3 }
  0xe1   : > { %v1024_v57 = vadd.f32 %v1004_v58, %v760_v47 }
  0xe3   : > { %v1318_v36 = vpop.f32.mrf.mxu0  ;;  %v1159_v26 = vadd.f32 %v1139_v46, %v1024_v57 }
  0xe6   : > { %v761_v22 = vpop.f32.mrf.mxu1  ;;  %v1016_v40 = vpop.f32.mrf.mxu2 }
  0xe7   : > { %v762_v5 = vadd.f32 %v761_v22, %v660_v48  ;;  %v1333_v48 = vadd.f32 %v1313_v45, %v1159_v26 }
  0xe8   : > { %v3497_v19 = vpop.f32.mrf.mxu3 }
  0xe9   : > { %v1025_v39 = vadd.f32 %v1006_v24, %v762_v5 }
  0xeb   : > { %v3495_v17 = vpop.f32.mrf.mxu0  ;;  %v1160_v43 = vadd.f32 %v1141_v11, %v1025_v39 }
  0xed   : > { %v1334_v46 = vadd.f32 %v1315_v60, %v1160_v43 }
  0xee   : > { %v764_v0 = vpop.f32.mrf.mxu1  ;;  %v1019_v18 = vpop.f32.mrf.mxu2 }
  0xef   : > { %v765_v44 = vadd.f32 %v764_v0, %v663_v32 }
  0xf0   : > { %v3503_v21 = vpop.f32.mrf.mxu3 }
  0xf1   : > { %v1026_v16 = vadd.f32 %v1009_v62, %v765_v44 }
  0xf3   : > { %v3499_v54 = vpop.f32.mrf.mxu0 }
  0xf6   : > { %v766_v34 = vpop.f32.mrf.mxu1  ;;  %v1021_v42 = vpop.f32.mrf.mxu2 }
  0xf7   : > { %v767_v15 = vadd.f32 %v766_v34, %v665_v10 }
  0xf8   : > { %v3509_v4 = vpop.f32.mrf.mxu3 }
  0xf9   : > { %v1027_v8 = vadd.f32 %v1011_v50, %v767_v15 }
  0xfb   : > { %v3501_v63 = vpop.f32.mrf.mxu0  ;;  %v1162_v39 = vadd.f32 %v3489_v38, %v1027_v8 }
  0xfe   : > { %v769_v23 = vpop.f32.mrf.mxu1  ;;  %v1596_v7 = vpop.f32.mrf.mxu2 }
  0xff   : > { %v770_v60 = vadd.f32 %v769_v23, %v3481_v37 }
 0x100   : > { %v1770_v30 = vpop.f32.mrf.mxu3 }
 0x103   : > { %v3505_v59 = vpop.f32.mrf.mxu0 }
 0x106   : > { %v771_v56 = vpop.f32.mrf.mxu1  ;;  %v1598_v35 = vpop.f32.mrf.mxu2 }
 0x107   : > { %v772_v55 = vadd.f32 %v771_v56, %v670_v27 }
 0x108   : > { %v1772_v51 = vpop.f32.mrf.mxu3 }
 0x109   : > { %v3507_v12 = vadd.f32 %v1016_v40, %v772_v55 }
 0x10b   : > { %v3511_v6 = vpop.f32.mrf.mxu0 }
 0x10e   : > { %v774_v33 = vpop.f32.mrf.mxu1  ;;  %v1601_v3 = vpop.f32.mrf.mxu2 }
 0x10f   : > { %v775_v1 = vadd.f32 %v774_v33, %v673_v31 }
 0x110   : > { %v1775_v62 = vpop.f32.mrf.mxu3 }
 0x111   : > { %v3513_v28 = vadd.f32 %v1019_v18, %v775_v1 }
 0x113   : > { %v1918_v49 = vpop.f32.mrf.mxu0  ;;  %v1165_v26 = vadd.f32 %v3503_v21, %v3513_v28 }
 0x116   : > { %v776_v9 = vpop.f32.mrf.mxu1  ;;  %v1603_v27 = vpop.f32.mrf.mxu2 }
 0x117   : > { %v777_v53 = vadd.f32 %v776_v9, %v675_v25  ;;  %v1161_v25 = vadd.f32 %v1144_v29, %v1026_v16  ;;  %v1336_v29 = vadd.f32 %v3495_v17, %v1162_v39  ;;  %v1028_v16 = vadd.f32 %v3491_v20, %v770_v60 }
 0x118   : > { %v1777_v0 = vpop.f32.mrf.mxu3  ;;  %v1164_v20 = vadd.f32 %v3497_v19, %v3507_v12  ;;  %v1339_v19 = vadd.f32 %v3505_v59, %v1165_v26 }
 0x119   : > { %v3515_v52 = vadd.f32 %v1021_v42, %v777_v53  ;;  %v1335_v47 = vadd.f32 %v1318_v36, %v1161_v25 }
 0x11b   : > { %v1920_v24 = vpop.f32.mrf.mxu0  ;;  %v1166_v43 = vadd.f32 %v3509_v4, %v3515_v52 }
 0x11d   : > { %v1340_v21 = vadd.f32 %v3511_v6, %v1166_v43 }
 0x11e   : > { %v1461_v58 = vpop.f32.mrf.mxu1  ;;  %v1606_v11 = vpop.f32.mrf.mxu2 }
 0x11f   : > { %v1481_v61 = vadd.f32 %v1461_v58, %v1333_v48 }
 0x120   : > { %v1780_v37 = vpop.f32.mrf.mxu3 }
 0x121   : > { %v1616_v32 = vadd.f32 %v1596_v7, %v1481_v61  ;;  %v1163_v7 = vadd.f32 %v3493_v13, %v1028_v16  ;;  %v1338_v13 = vadd.f32 %v3501_v63, %v1164_v20 }
 0x123   : > { %v1790_v14 = vadd.f32 %v1770_v30, %v1616_v32  ;;  %v1923_v41 = vpop.f32.mrf.mxu0  ;;  %v1337_v8 = vadd.f32 %v3499_v54, %v1163_v7 }
 0x125   : > { %v1938_v31 = vadd.f32 %v1918_v49, %v1790_v14 }
 0x126   : > { %v1463_v2 = vpop.f32.mrf.mxu1  ;;  %v1608_v18 = vpop.f32.mrf.mxu2 }
 0x127   : > { %1946 = vst [vmem:[%s3522_s7] sm:$0xff] %v1938_v31  ;;  %v1482_v10 = vadd.f32 %v1463_v2, %v1334_v46 }
 0x129   : > { %v1617_v45 = vadd.f32 %v1598_v35, %v1482_v10 }
 0x12b   : > { %v1791_v50 = vadd.f32 %v1772_v51, %v1617_v45  ;;  %v1925_v15 = vpop.f32.mrf.mxu0 }
 0x12d   : > { %v1939_v57 = vadd.f32 %v1920_v24, %v1791_v50 }
 0x12e   : > { %v1466_v22 = vpop.f32.mrf.mxu1  ;;  %v1611_v55 = vpop.f32.mrf.mxu2 }
 0x12f   : > { %1947 = vst [vmem:[%s3522_s7 + $0x8] sm:$0xff] %v1939_v57  ;;  %v1483_v5 = vadd.f32 %v1466_v22, %v1335_v47 }
 0x131   : > { %v1618_v40 = vadd.f32 %v1601_v3, %v1483_v5  ;;  %v1782_v3 = vpop.f32.mrf.mxu3 }
 0x133   : > { %v1792_v44 = vadd.f32 %v1775_v62, %v1618_v40  ;;  %v1928_v33 = vpop.f32.mrf.mxu0 }
 0x135   : > { %v1940_v34 = vadd.f32 %v1923_v41, %v1792_v44 }
 0x136   : > { %v1468_v36 = vpop.f32.mrf.mxu1  ;;  %v1613_v54 = vpop.f32.mrf.mxu2 }
 0x137   : > { %1948 = vst [vmem:[%s3522_s7 + $0x10] sm:$0xff] %v1940_v34  ;;  %v1484_v42 = vadd.f32 %v1468_v36, %v1336_v29 }
 0x139   : > { %v1619_v56 = vadd.f32 %v1603_v27, %v1484_v42  ;;  %v1785_v63 = vpop.f32.mrf.mxu3 }
 0x13b   : > { %v1793_v38 = vadd.f32 %v1777_v0, %v1619_v56  ;;  %v1930_v58 = vpop.f32.mrf.mxu0 }
 0x13d   : > { %v1941_v23 = vadd.f32 %v1925_v15, %v1793_v38 }
 0x13e   : > { %v1471_v35 = vpop.f32.mrf.mxu1  ;;  %v1933_v24 = vpop.f32.mrf.mxu2 }
 0x13f   : > { %1949 = vst [vmem:[%s3522_s7 + $0x18] sm:$0xff] %v1941_v23  ;;  %v1485_v17 = vadd.f32 %v1471_v35, %v1337_v8 }
 0x141   : > { %v1620_v1 = vadd.f32 %v1606_v11, %v1485_v17  ;;  %v1787_v59 = vpop.f32.mrf.mxu3 }
 0x143   : > { %v1794_v30 = vadd.f32 %v1780_v37, %v1620_v1 }
 0x145   : > { %v1942_v9 = vadd.f32 %v1928_v33, %v1794_v30 }
 0x146   : > { %v1473_v53 = vpop.f32.mrf.mxu1  ;;  %v1935_v62 = vpop.f32.mrf.mxu2 }
 0x147   : > { %1950 = vst [vmem:[%s3522_s7 + $0x20] sm:$0xff] %v1942_v9  ;;  %v1486_v49 = vadd.f32 %v1473_v53, %v1338_v13 }
 0x149   : > { %v1621_v48 = vadd.f32 %v1608_v18, %v1486_v49 }
 0x14b   : > { %v1795_v51 = vadd.f32 %v1782_v3, %v1621_v48 }
 0x14d   : > { %v1943_v12 = vadd.f32 %v1930_v58, %v1795_v51 }
 0x14e   : > { %v1476_v61 = vpop.f32.mrf.mxu1 }
 0x14f   : > { %1951 = vst [vmem:[%s3522_s7 + $0x28] sm:$0xff] %v1943_v12  ;;  %v1487_v27 = vadd.f32 %v1476_v61, %v1339_v19 }
 0x151   : > { %v1622_v32 = vadd.f32 %v1611_v55, %v1487_v27 }
 0x153   : > { %v1796_v14 = vadd.f32 %v1785_v63, %v1622_v32 }
 0x155   : > { %v1944_v28 = vadd.f32 %v1933_v24, %v1796_v14 }
 0x156   : > { %v1478_v46 = vpop.f32.mrf.mxu1 }
 0x157   : > { %1952 = vst [vmem:[%s3522_s7 + $0x30] sm:$0xff] %v1944_v28  ;;  %v1488_v31 = vadd.f32 %v1478_v46, %v1340_v21 }
 0x159   : > { %v1623_v2 = vadd.f32 %v1613_v54, %v1488_v31 }
 0x15b   : > { %v1797_v10 = vadd.f32 %v1787_v59, %v1623_v2 }
 0x15d   : > { %v1945_v25 = vadd.f32 %v1935_v62, %v1797_v10 }
 0x15f   : > { %1953 = vst [vmem:[%s3522_s7 + $0x38] sm:$0xff] %v1945_v25 }
 0x160 PF: > { %s14_s15 = sadd.s32 1, %s2603_s15  }
 0x161   : > { %p11_p4 = scmp.ge.s32.totalorder %s14_s15, 4  }
 0x163   :  { %13 = sbr.rel (!%p11_p4) target bundleno = 1 (0x1), region = 74 }

// kernel: network_block_forward.9
= control target key start
LH: loop header
LB: loop body
LE: loop exit
PB: predicated region body
PF: predicated region fallthrough
CT: control target
= control target key end

     0   :  { %s6597_s21 = smov 0   ;;  %s9728_s0 = inlined_call_operand.vmem [shape: f32[2,256,128], index: 0, kind: input, shape index: {}]   ;;  %s9729_s1 = inlined_call_operand.vmem [shape: f32[1,128], index: 1, kind: input, shape index: {}]   ;;  %s9730_s2 = inlined_call_operand.vmem [shape: f32[1,128], index: 2, kind: input, shape index: {}]   ;;  %s9731_s3 = inlined_call_operand.vmem [shape: bf16[9,128,128], index: 3, kind: input, shape index: {}]   ;;  %s9732_s4 = inlined_call_operand.vmem [shape: bf16[128,128], index: 4, kind: input, shape index: {}]   ;;  %s9733_s5 = inlined_call_operand.vmem [shape: f32[2,256,128], index: 5, kind: output, shape index: {0}]   ;;  %s9734_s6 = inlined_call_operand.vmem [shape: f32[2,256,128], index: 6, kind: output, shape index: {1}]  }
   0x1 LB: > { %s5634_s22 = sadd.s32 4294967295, %s6558_s21   ;;  %p5638_p0 = scmp.ge.s32.totalorder %s6558_s21, 1  ;;  %s6558_s21 = sphi %s6597_s21, %s17_s21  }
   0x2   : > { %p215_p1 = scmp.lt.s32.totalorder %s6558_s21, 3 }
   0x4   : > { %p216_p2 = pnand %p5638_p0, %p215_p1 }
   0x6   : > { %219 = sbr.rel (%p216_p2) target bundleno = 862 (0x35e), region = 40 }
   0xb   : > { %v6377_v0 = vld [vmem:[%s9731_s3 + $0x38] sm:$0xff]  ;;  %p250_p3 = scmp.lt.s32.totalorder %s5634_s22, 1  ;;  %v6376_v2 = vld [vmem:[%s9731_s3 + $0x30] sm:$0xff]  ;;  %v9757_v4 = vmov 0   ;;  %v6375_v5 = vld [vmem:[%s9731_s3 + $0x28] sm:$0xff]  ;;  %v811_v15 = vlaneseq  ;;  %vm9735_vm0 = vcmask 1040384  }
   0xc   : > { %v6385_v1 = vld [vmem:[%s9731_s3 + $0x78] sm:$0xff]  ;;  %6506 = vmatpush.bf16.msra.mxu3 %v6377_v0  ;;  %v6384_v3 = vld [vmem:[%s9731_s3 + $0x70] sm:$0xff]  ;;  %1935 = vmatpush.bf16.msra.mxu1 %v6377_v0  ;;  %404 = vst [vmem:[#allocation2] sm:$0xf] %v9757_v4  ;;  %v6383_v6 = vld [vmem:[%s9731_s3 + $0x68] sm:$0xff]  ;;  %v9854_v40 = vmov 0 }
   0xd   : > { %6498 = vmatpush.bf16.msra.mxu2 %v6385_v1  ;;  %s10429_s22 = smov (!%p250_p3, %s5634_s22), 1  ;;  %1702 = vmatpush.bf16.msra.mxu0 %v6385_v1  ;;  %v6635_v7 = vld [vmem:[%s9729_s1] ss:$0 sm:$0xff]  ;;  %405 = vst [vmem:[#allocation2 + $0x4] sm:$0xf] %v9757_v4  ;;  %v6663_v27 = vshrl.u32 %v811_v15, 7 }
   0xe   : > { %s6624_s11 = sshll.u32 %s10429_s22, 8  ;;  %v6646_v14 = vld [vmem:[%s9730_s2] ss:$0 sm:$0xff]  ;;  %418 = vst [vmem:[#allocation2 + $0x8c] sm:$0xf] %v9757_v4  ;;  %v6373_v32 = vld [vmem:[%s9731_s3 + $0x18] sm:$0xff] }
   0xf   : > { %s6630_s14 = scalar_lea.vmem %s9728_s0, %s6624_s11  ;;  %419 = vst [vmem:[#allocation2 + $0x90] sm:$0x1] %v9757_v4  ;;  %v6374_v21 = vld [vmem:[%s9731_s3 + $0x20] sm:$0xff]  ;;  %vm407_vm1 = vsmask.f32 256  ;;  %v6381_v33 = vld [vmem:[%s9731_s3 + $0x58] sm:$0xff]  ;;  %s9410_s30 = scalar_lea.vmem %s9734_s6, %s6624_s11 }
  0x10   : > { %6507 = vmatpush.bf16.msra.mxu3 %v6376_v2  ;;  %v281_v8 = vld [vmem:[%s6630_s14 + $0x68] sm:$0xff]  ;;  %v282_v9 = vld [vmem:[%s6630_s14 + $0x70] sm:$0xff]  ;;  %v283_v10 = vld [vmem:[%s6630_s14 + $0x78] sm:$0xff]  ;;  %1936 = vmatpush.bf16.msra.mxu1 %v6376_v2  ;;  %vm452_vm2 = vsmask.f32 4368  ;;  %v828_v43 = vadd.s32 128, %v6663_v27  ;;  %s9480_s9 = scalar_lea.vmem %s9733_s5, %s6624_s11 }
  0x11   : > { %6499 = vmatpush.bf16.msra.mxu2 %v6384_v3  ;;  %1703 = vmatpush.bf16.msra.mxu0 %v6384_v3  ;;  %v317_v11 = vmul.f32 %v6635_v7, %v281_v8  ;;  %v318_v12 = vmul.f32 %v6635_v7, %v282_v9  ;;  %v319_v13 = vmul.f32 %v6635_v7, %v283_v10  ;;  %v284_v16 = vld [vmem:[%s6630_s14 + $0x80] sm:$0xff]  ;;  %v285_v20 = vld [vmem:[%s6630_s14 + $0x88] sm:$0xff]  ;;  %vm6679_vm3 = vmand %vm9735_vm0, %vm407_vm1  ;;  %v9857_v52 = vmov 0 }
  0x12   : > { %v6382_v22 = vld [vmem:[%s9731_s3 + $0x60] sm:$0xff]  ;;  %v320_v26 = vmul.f32 %v6635_v7, %v284_v16  ;;  %v321_v28 = vmul.f32 %v6635_v7, %v285_v20  ;;  %v9855_v40 = vsel %vm6679_vm3, 4294967295, %v9854_v40  ;;  %v409_v41 = vld [vmem:[#allocation2 + $0x8] sm:$0x1]  ;;  %v6372_v50 = vld [vmem:[%s9731_s3 + $0x10] sm:$0xff]  ;;  %v960_v59 = vand.u32 15, %v828_v43 }
  0x13   : > { %v353_v17 = vadd.f32 %v6646_v14, %v317_v11  ;;  %v354_v18 = vadd.f32 %v6646_v14, %v318_v12  ;;  %v355_v19 = vadd.f32 %v6646_v14, %v319_v13  ;;  %9856 = vst [vmem:[#allocation3_spill] sm:$0xff] %v9855_v40  ;;  %v268_v49 = vld [vmem:[%s6630_s14] sm:$0xff]  ;;  %v6380_v51 = vld [vmem:[%s9731_s3 + $0x50] sm:$0xff]  ;;  %vm6697_vm4 = vmor %vm407_vm1, %vm452_vm2  ;;  %v410_v54 = vsel %vm6679_vm3, 0, %v409_v41 }
  0x14   : > { %6508 = vmatpush.bf16.msra.mxu3 %v6375_v5  ;;  %1937 = vmatpush.bf16.msra.mxu1 %v6375_v5  ;;  %v356_v34 = vadd.f32 %v6646_v14, %v320_v26  ;;  %v357_v35 = vadd.f32 %v6646_v14, %v321_v28  ;;  %v9858_v52 = vsel %vm6697_vm4, 4294967295, %v9857_v52  ;;  %411 = vst [vmem:[#allocation2 + $0x8] sm:$0x1] %v410_v54  ;;  %v269_v0 = vld [vmem:[%s6630_s14 + $0x8] sm:$0xff]  ;;  %v270_v3 = vld [vmem:[%s6630_s14 + $0x10] sm:$0xff]  ;;  %v271_v9 = vld [vmem:[%s6630_s14 + $0x18] sm:$0xff] }
  0x15   : > { %6500 = vmatpush.bf16.msra.mxu2 %v6383_v6  ;;  %1704 = vmatpush.bf16.msra.mxu0 %v6383_v6  ;;  %v385_v23 = vmax.f32 %v353_v17, 0.0  ;;  %v386_v24 = vmax.f32 %v354_v18, 0.0  ;;  %v387_v25 = vmax.f32 %v355_v19, 0.0  ;;  %9859 = vst [vmem:[#allocation4_spill] sm:$0xff] %v9858_v52  ;;  %v304_v60 = vmul.f32 %v6635_v7, %v268_v49  ;;  %v6371_v1 = vld [vmem:[%s9731_s3 + $0x8] sm:$0xff]  ;;  %v6370_v19 = vld [vmem:[%s9731_s3] sm:$0xff] }
  0x16   : > { %v388_v44 = vmax.f32 %v356_v34, 0.0  ;;  %v389_v48 = vmax.f32 %v357_v35, 0.0  ;;  %v6379_v2 = vld [vmem:[%s9731_s3 + $0x48] sm:$0xff]  ;;  %vm6719_vm5 = vcmp.ne.s32.totalorder %v960_v59, 0  ;;  %v305_v12 = vmul.f32 %v6635_v7, %v269_v0  ;;  %v6378_v20 = vld [vmem:[%s9731_s3 + $0x40] sm:$0xff]  ;;  %v6401_v34 = vld [vmem:[%s9731_s3 + $0xf8] sm:$0xff] }
  0x17   : > { %v6666_v29 = vpack.c.bf16 %v385_v23, %v385_v23  ;;  %v434_v30 = vpack.c.bf16 %v386_v24, %v386_v24  ;;  %v435_v31 = vpack.c.bf16 %v387_v25, %v387_v25  ;;  %v340_v13 = vadd.f32 %v6646_v14, %v304_v60  ;;  %vm6740_vm6 = vmpackc.low %vm6719_vm5, %vm6719_vm5  ;;  %v6433_v41 = vld [vmem:[%s9731_s3 + $0x178] sm:$0xff]  ;;  %v1293_v10 = vld [vmem:[#allocation2 + $0x4] sm:$0xf] }
  0x18   : > { %6509 = vmatpush.bf16.msra.mxu3 %v6374_v21  ;;  %1938 = vmatpush.bf16.msra.mxu1 %v6374_v21  ;;  %v436_v53 = vpack.c.bf16 %v388_v44, %v388_v44  ;;  %v437_v63 = vpack.c.bf16 %v389_v48, %v389_v48  ;;  %v306_v18 = vmul.f32 %v6635_v7, %v270_v3  ;;  %v9862_v24 = vmov 0 }
  0x19   : > { %6501 = vmatpush.bf16.msra.mxu2 %v6382_v22  ;;  %1705 = vmatpush.bf16.msra.mxu0 %v6382_v22  ;;  %v571_v36 = vshrl.u32 %v6666_v29, 16  ;;  %v580_v37 = vshrl.u32 %v434_v30, 16  ;;  %v583_v38 = vshll.u32 %v434_v30, 16  ;;  %v589_v39 = vshrl.u32 %v435_v31, 16 }
  0x1a   : > { %v592_v42 = vshll.u32 %v435_v31, 16  ;;  %v598_v5 = vshrl.u32 %v436_v53, 16  ;;  %v601_v6 = vshll.u32 %v436_v53, 16  ;;  %v607_v8 = vshrl.u32 %v437_v63, 16  ;;  %v6393_v31 = vld [vmem:[%s9731_s3 + $0xb8] sm:$0xff] }
  0x1b   : > { %v6684_v45 = vrot.slane %v571_v36, 7  ;;  %v582_v46 = vrot.slane %v580_v37, 7  ;;  %v6686_v47 = vrot.slane %v589_v39, 7  ;;  %v610_v11 = vshll.u32 %v437_v63, 16  ;;  %v6425_v39 = vld [vmem:[%s9731_s3 + $0x138] sm:$0xff] }
  0x1c   : > { %6510 = vmatpush.bf16.msra.mxu3 %v6373_v32  ;;  %1939 = vmatpush.bf16.msra.mxu1 %v6373_v32  ;;  %v600_v16 = vrot.slane %v598_v5, 7  ;;  %v6726_v17 = vrot.slane %v607_v8, 7  ;;  %v341_v21 = vadd.f32 %v6646_v14, %v305_v12  ;;  %v372_v22 = vmax.f32 %v340_v13, 0.0 }
  0x1d   : > { %6502 = vmatpush.bf16.msra.mxu2 %v6381_v33  ;;  %1706 = vmatpush.bf16.msra.mxu0 %v6381_v33  ;;  %v578_v55 = vrot.slane %v6684_v45, 4  ;;  %v585_v56 = vor.u32 %v583_v38, %v582_v46  ;;  %v587_v57 = vrot.slane %v582_v46, 4  ;;  %v594_v58 = vor.u32 %v592_v42, %v6686_v47 }
  0x1e   : > { %v596_v15 = vrot.slane %v6686_v47, 4  ;;  %v307_v23 = vmul.f32 %v6635_v7, %v271_v9  ;;  %v9863_v24 = vsel %vm6740_vm6, 4294967295, %v9862_v24  ;;  %v603_v25 = vor.u32 %v601_v6, %v600_v16  ;;  %v1292_v9 = vld [vmem:[#allocation2] sm:$0xf] }
  0x1f   : > { %v586_v61 = vsel %vm6697_vm4, %v578_v55, %v585_v56  ;;  %v595_v62 = vsel %vm6697_vm4, %v587_v57, %v594_v58  ;;  %9864 = vst [vmem:[#allocation5_spill] sm:$0xff] %v9863_v24  ;;  %v605_v26 = vrot.slane %v600_v16, 4  ;;  %v612_v28 = vor.u32 %v610_v11, %v6726_v17 }
  0x20   : > { %6511 = vmatpush.bf16.msra.mxu3 %v6372_v50  ;;  %790 = vst [vmem:[#allocation2 + $0x40] sm:$0xf] %v586_v61  ;;  %1940 = vmatpush.bf16.msra.mxu1 %v6372_v50  ;;  %vm6561_vm7 = vmmov 1   ;;  %v373_v32 = vmax.f32 %v341_v21, 0.0  ;;  %v420_v33 = vpack.c.bf16 %v372_v22, %v372_v22  ;;  %v604_v36 = vsel %vm6697_vm4, %v596_v15, %v603_v25  ;;  %v6354_v15 = vld [vmem:[#allocation2] sm:$0xff] }
  0x21   : > { %6503 = vmatpush.bf16.msra.mxu2 %v6380_v51  ;;  %1707 = vmatpush.bf16.msra.mxu0 %v6380_v51  ;;  %791 = vst [vmem:[#allocation2 + $0x44] sm:$0xf] %v595_v62  ;;  %vm6745_vm8 = vmpackc.low %vm6561_vm7, %vm6561_vm7  ;;  %v613_v37 = vsel %vm6697_vm4, %v605_v26, %v612_v28  ;;  %v342_v38 = vadd.f32 %v6646_v14, %v306_v18  ;;  %vm412_vm9 = vcmask 1043456   ;;  %v848_v50 = vand.u32 15, %v6663_v27 }
  0x22   : > { %792 = vst [vmem:[#allocation2 + $0x48] sm:$0xf] %v604_v36  ;;  %v421_v44 = vpack.c.bf16 %v373_v32, %v373_v32  ;;  %v343_v46 = vadd.f32 %v6646_v14, %v307_v23  ;;  %vm413_vm10 = vsmask.f32 7938  ;;  %v455_v53 = vshrl.u32 %v420_v33, 16 }
  0x23   : > { %793 = vst [vmem:[#allocation2 + $0x4c] sm:$0xf] %v613_v37  ;;  %v458_v54 = vshll.u32 %v420_v33, 16  ;;  %v374_v61 = vmax.f32 %v342_v38, 0.0  ;;  %vm6776_vm11 = vmand %vm412_vm9, %vm413_vm10  ;;  %v9867_v0 = vmov 0  ;;  %vm1228_vm12 = vcmp.ne.s32.totalorder %v848_v50, 0 }
  0x24   : > { %6512 = vmatpush.bf16.msra.mxu3 %v6371_v1  ;;  %1941 = vmatpush.bf16.msra.mxu1 %v6371_v1  ;;  %v463_v57 = vshrl.u32 %v421_v44, 16  ;;  %v466_v58 = vshll.u32 %v421_v44, 16  ;;  %v457_v60 = vrot.slane %v455_v53, 7  ;;  %v375_v62 = vmax.f32 %v343_v46, 0.0  ;;  %vm6780_vm13 = vmpackc.low %vm1228_vm12, %vm1228_vm12 }
  0x25   : > { %6504 = vmatpush.bf16.msra.mxu2 %v6379_v2  ;;  %1708 = vmatpush.bf16.msra.mxu0 %v6379_v2  ;;  %v9868_v0 = vsel %vm6776_vm11, 4294967295, %v9867_v0  ;;  %v774_v2 = vld [vmem:[#allocation2 + $0x8] sm:$0xf]  ;;  %v422_v6 = vpack.c.bf16 %v374_v61, %v374_v61  ;;  %v9870_v11 = vmov 0  ;;  %v1356_v26 = vsel %vm6780_vm13, %v1292_v9, 0 }
  0x26   : > { %9869 = vst [vmem:[#allocation6_spill] sm:$0xff] %v9868_v0  ;;  %v465_v1 = vrot.slane %v463_v57, 7  ;;  %v460_v3 = vor.u32 %v458_v54, %v457_v60  ;;  %v461_v5 = vrot.slane %v457_v60, 4  ;;  %v423_v8 = vpack.c.bf16 %v375_v62, %v375_v62 }
  0x27   : > { %v1308_v35 = vld [vmem:[#allocation2 + $0x40] sm:$0xf]  ;;  %v9871_v11 = vsel %vm6780_vm13, 4294967295, %v9870_v11  ;;  %v475_v21 = vshll.u32 %v422_v6, 16  ;;  %v1357_v28 = vsel %vm6745_vm8, %v1293_v10, 0  ;;  %v1509_v36 = vshll.u32 %v6354_v15, 16 }
  0x28   : > { %6513 = vmatpush.bf16.msra.mxu3 %v6370_v19  ;;  %v1309_v42 = vld [vmem:[#allocation2 + $0x44] sm:$0xf]  ;;  %v1372_v43 = vsel %vm6740_vm6, %v1308_v35, 0  ;;  %1942 = vmatpush.bf16.msra.mxu1 %v6370_v19  ;;  %9872 = vst [vmem:[#allocation7_spill] sm:$0xff] %v9871_v11  ;;  %v468_v13 = vor.u32 %v466_v58, %v465_v1  ;;  %v470_v16 = vrot.slane %v465_v1, 4  ;;  %v775_v19 = vsel %vm6776_vm11, %v460_v3, %v774_v2  ;;  %v286_v35 = vld [vmem:[%s6630_s14 + $0x90] sm:$0xff] }
  0x29   : > { %6505 = vmatpush.bf16.msra.mxu2 %v6378_v20  ;;  %v1373_v47 = vsel %vm6745_vm8, %v1309_v42, 0  ;;  %v1839_v48 = vunpack.c.l.b16 %v1372_v43  ;;  %1709 = vmatpush.bf16.msra.mxu0 %v6378_v20  ;;  %v6362_v49 = vld [vmem:[#allocation2 + $0x40] sm:$0xff]  ;;  %v472_v20 = vshrl.u32 %v422_v6, 16  ;;  %v481_v22 = vshrl.u32 %v423_v8, 16  ;;  %776 = vst [vmem:[#allocation2 + $0x8] sm:$0xf] %v775_v19 }
  0x2a   : > { %v1840_v51 = vunpack.c.l.b16 %v1373_v47  ;;  %v1570_v55 = vshll.u32 %v6362_v49, 16  ;;  %v1574_v56 = vshrl.u32 %v6362_v49, 16  ;;  %v6785_v18 = vld [vmem:[#allocation2 + $0x48] sm:$0xff]  ;;  %v469_v23 = vsel %vm6697_vm4, %v461_v5, %v468_v13  ;;  %v6392_v2 = vld [vmem:[%s9731_s3 + $0xb0] sm:$0xff] }
  0x2b   : > { %v484_v25 = vshll.u32 %v423_v8, 16  ;;  %777 = vst [vmem:[#allocation2 + $0xc] sm:$0xf] %v469_v23  ;;  %v474_v32 = vrot.slane %v472_v20, 7  ;;  %v6796_v33 = vrot.slane %v481_v22, 7  ;;  %v1824_v37 = vunpack.c.l.b16 %v1357_v28  ;;  %v6400_v13 = vld [vmem:[%s9731_s3 + $0xf0] sm:$0xff] }
  0x2c   : > { %2994 = vmatpush.bf16.msrb.mxu3 %v6401_v34  ;;  %3796 = vmatpush.bf16.msrb.mxu1 %v6433_v41  ;;  %v1863_v59 = vpack.c.b16 %v1840_v51, %v1839_v48  ;;  %v6772_v63 = vrot.slane %v1570_v55, 1  ;;  %v1823_v34 = vunpack.c.l.b16 %v1356_v26  ;;  %vm9736_vm14 = vsmask.f32 7424  ;;  %v287_v48 = vld [vmem:[%s6630_s14 + $0x98] sm:$0xff]  ;;  %v1310_v54 = vld [vmem:[#allocation2 + $0x48] sm:$0xf] }
  0x2d   : > { %2648 = vmatpush.bf16.msrb.mxu2 %v6393_v31  ;;  %3444 = vmatpush.bf16.msrb.mxu0 %v6425_v39  ;;  %v1578_v31 = vshll.u32 %v6785_v18, 16  ;;  %v830_v38 = vadd.s32 144, %v6663_v27  ;;  %v1311_v39 = vld [vmem:[#allocation2 + $0x4c] sm:$0xf]  ;;  %v477_v42 = vor.u32 %v475_v21, %v474_v32  ;;  %v479_v43 = vrot.slane %v474_v32, 4  ;;  %v6432_v21 = vld [vmem:[%s9731_s3 + $0x170] sm:$0xff] }
  0x2e   : > { %1983 = vmatmul.bf16.vlgmr.msra.gmra.mxu3 %v1863_v59  ;;  %v1576_v12 = vor.u32 %v1574_v56, %v6772_v63  ;;  %v486_v44 = vor.u32 %v484_v25, %v6796_v33  ;;  %v1855_v46 = vpack.c.b16 %v1824_v37, %v1823_v34  ;;  %v322_v49 = vmul.f32 %v6635_v7, %v286_v35  ;;  %v272_v28 = vld [vmem:[%s6630_s14 + $0x20] sm:$0xff] }
  0x2f   : > { %v6800_v41 = vrot.slane %v1578_v31, 1  ;;  %v974_v47 = vand.u32 15, %v830_v38  ;;  %v478_v51 = vsel %vm6697_vm4, %v470_v16, %v477_v42  ;;  %v1375_v55 = vsel %vm6745_vm8, %v1311_v39, 0  ;;  %v273_v31 = vld [vmem:[%s6630_s14 + $0x28] sm:$0xff] }
  0x30   : > { %v487_v53 = vsel %vm6697_vm4, %v479_v43, %v486_v44  ;;  %v1507_v56 = vshrl.u32 %v6354_v15, 16  ;;  %v1511_v57 = vrot.slane %v1509_v36, 1  ;;  %778 = vst [vmem:[#allocation2 + $0x10] sm:$0xf] %v478_v51  ;;  %1943 = vmatmul.bf16.vlgmr.msra.gmra.mxu1 %v1855_v46  ;;  %v9873_v58 = vmov 0  ;;  %v6424_v15 = vld [vmem:[%s9731_s3 + $0x130] sm:$0xff]  ;;  %2995 = vmatpush.bf16.msrb.mxu3 %v6400_v13 }
  0x31   : > { %v1581_v50 = vsel %vm9736_vm14, %v1576_v12, %v6800_v41  ;;  %vm1246_vm15 = vcmp.ne.s32.totalorder %v974_v47, 0  ;;  %779 = vst [vmem:[#allocation2 + $0x14] sm:$0xf] %v487_v53  ;;  %v1842_v59 = vunpack.c.l.b16 %v1375_v55  ;;  %v323_v60 = vmul.f32 %v6635_v7, %v287_v48  ;;  %2649 = vmatpush.bf16.msrb.mxu2 %v6392_v2  ;;  %3445 = vmatpush.bf16.msrb.mxu0 %v6424_v15 }
  0x32   : > { %1750 = vmatmul.bf16.vlgmr.msra.gmra.mxu2 %v1581_v50  ;;  %vm6813_vm1 = vmpackc.low %vm1246_vm15, %vm1246_vm15  ;;  %v6355_v61 = vld [vmem:[#allocation2 + $0x8] sm:$0xff]  ;;  %v358_v1 = vadd.f32 %v6646_v14, %v322_v49  ;;  %v1512_v5 = vor.u32 %v1511_v57, %v1507_v56  ;;  %3797 = vmatpush.bf16.msrb.mxu1 %v6432_v21  ;;  %v614_v32 = vrot.slane %v6726_v17, 4  ;;  %v308_v39 = vmul.f32 %v6635_v7, %v272_v28 }
  0x33   : > { %v9874_v58 = vsel %vm6813_vm1, 4294967295, %v9873_v58  ;;  %v1374_v62 = vsel %vm6813_vm1, %v1310_v54, 0  ;;  %v1514_v6 = vshll.u32 %v6355_v61, 16  ;;  %v359_v8 = vadd.f32 %v6646_v14, %v323_v60  ;;  %v1295_v47 = vld [vmem:[#allocation2 + $0xc] sm:$0xf] }
  0x34   : > { %9875 = vst [vmem:[#allocation8_spill] sm:$0xff] %v9874_v58  ;;  %v1841_v3 = vunpack.c.l.b16 %v1374_v62  ;;  %v390_v12 = vmax.f32 %v358_v1, 0.0  ;;  %v1518_v37 = vshrl.u32 %v6355_v61, 16  ;;  %v309_v42 = vmul.f32 %v6635_v7, %v273_v31  ;;  %v1294_v1 = vld [vmem:[#allocation2 + $0x8] sm:$0xf] }
  0x35   : > { %v1516_v10 = vrot.slane %v1514_v6, 1  ;;  %v391_v19 = vmax.f32 %v359_v8, 0.0  ;;  %v344_v48 = vadd.f32 %v6646_v14, %v308_v39  ;;  %v814_v17 = vadd.s32 16, %v6663_v27 }
  0x36   : > { %v1864_v9 = vpack.c.b16 %v1842_v59, %v1841_v3  ;;  %v438_v20 = vpack.c.bf16 %v390_v12, %v390_v12  ;;  %v345_v49 = vadd.f32 %v6646_v14, %v309_v42  ;;  %v1359_v59 = vsel %vm6745_vm8, %v1295_v47, 0 }
  0x37   : > { %v1517_v16 = vsel %vm9736_vm14, %v1512_v5, %v1516_v10  ;;  %v439_v23 = vpack.c.bf16 %v391_v19, %v391_v19  ;;  %v1520_v53 = vor.u32 %v1518_v37, %v1516_v10  ;;  %v376_v55 = vmax.f32 %v344_v48, 0.0  ;;  %v288_v37 = vld [vmem:[%s6630_s14 + $0xa0] sm:$0xff]  ;;  %v289_v48 = vld [vmem:[%s6630_s14 + $0xa8] sm:$0xff] }
  0x38   : > { %1710 = vmatmul.bf16.vlgmr.msra.gmra.mxu0 %v1517_v16  ;;  %v6835_v22 = vld [vmem:[#allocation2 + $0x10] sm:$0xff]  ;;  %v616_v25 = vshrl.u32 %v438_v20, 16  ;;  %v619_v26 = vshll.u32 %v438_v20, 16  ;;  %v377_v56 = vmax.f32 %v345_v49, 0.0  ;;  %v862_v57 = vand.u32 15, %v814_v17 }
  0x39   : > { %v625_v35 = vshrl.u32 %v439_v23, 16  ;;  %v628_v36 = vshll.u32 %v439_v23, 16  ;;  %v1522_v38 = vshll.u32 %v6835_v22, 16  ;;  %v424_v61 = vpack.c.bf16 %v376_v55, %v376_v55  ;;  %v6431_v55 = vld [vmem:[%s9731_s3 + $0x168] sm:$0xff]  ;;  %v6531_v58 = vld [vmem:[#allocation2 + $0x14] sm:$0xf] }
  0x3a   : > { %v618_v34 = vrot.slane %v616_v25, 7  ;;  %v425_v62 = vpack.c.bf16 %v377_v56, %v377_v56  ;;  %vm1230_vm2 = vcmp.ne.s32.totalorder %v862_v57, 0  ;;  %v9876_v3 = vmov 0  ;;  %3798 = vmatpush.bf16.msrb.mxu1 %v6431_v55  ;;  %v3118_v11 = vld [vmem:[#allocation2 + $0x14] sm:$0xf] }
  0x3b   : > { %v6843_v46 = vrot.slane %v625_v35, 7  ;;  %v6851_v54 = vrot.slane %v1522_v38, 1  ;;  %vm6859_vm5 = vmpackc.low %vm1230_vm2, %vm1230_vm2  ;;  %v1826_v5 = vunpack.c.l.b16 %v1359_v59  ;;  %v832_v6 = vadd.s32 160, %v6663_v27 }
  0x3c   : > { %v621_v43 = vor.u32 %v619_v26, %v618_v34  ;;  %v623_v44 = vrot.slane %v618_v34, 4  ;;  %v9877_v3 = vsel %vm6859_vm5, 4294967295, %v9876_v3  ;;  %v490_v8 = vshrl.u32 %v424_v61, 16 }
  0x3d   : > { %v630_v51 = vor.u32 %v628_v36, %v6843_v46  ;;  %v1525_v2 = vsel %vm9736_vm14, %v1520_v53, %v6851_v54  ;;  %9878 = vst [vmem:[#allocation9_spill] sm:$0xff] %v9877_v3  ;;  %v499_v10 = vshrl.u32 %v425_v62, 16  ;;  %v502_v12 = vshll.u32 %v425_v62, 16  ;;  %v6423_v53 = vld [vmem:[%s9731_s3 + $0x128] sm:$0xff] }
  0x3e   : > { %1988 = vmatmul.bf16.gmra.mxu3 %v1864_v9  ;;  %v622_v50 = vsel %vm6697_vm4, %v614_v32, %v621_v43  ;;  %v493_v9 = vshll.u32 %v424_v61, 16  ;;  %v1358_v13 = vsel %vm6859_vm5, %v1294_v1, 0  ;;  %v488_v15 = vrot.slane %v6796_v33, 4  ;;  %3446 = vmatpush.bf16.msrb.mxu0 %v6423_v53 }
  0x3f   : > { %794 = vst [vmem:[#allocation2 + $0x50] sm:$0xf] %v622_v50  ;;  %v631_v60 = vsel %vm6697_vm4, %v623_v44, %v630_v51  ;;  %v492_v16 = vrot.slane %v490_v8, 7  ;;  %v6867_v19 = vrot.slane %v499_v10, 7  ;;  %v1825_v20 = vunpack.c.l.b16 %v1358_v13  ;;  %v6399_v50 = vld [vmem:[%s9731_s3 + $0xe8] sm:$0xff] }
  0x40   : > { %795 = vst [vmem:[#allocation2 + $0x54] sm:$0xf] %v631_v60  ;;  %v1582_v21 = vshrl.u32 %v6785_v18, 16  ;;  %v988_v23 = vand.u32 15, %v832_v6  ;;  %v9879_v18 = vmov 0  ;;  %v324_v17 = vmul.f32 %v6635_v7, %v288_v37  ;;  %2996 = vmatpush.bf16.msrb.mxu3 %v6399_v50 }
  0x41   : > { %v495_v25 = vor.u32 %v493_v9, %v492_v16  ;;  %v497_v26 = vrot.slane %v492_v16, 4  ;;  %v504_v28 = vor.u32 %v502_v12, %v6867_v19  ;;  %v1856_v31 = vpack.c.b16 %v1826_v5, %v1825_v20  ;;  %v1297_v8 = vld [vmem:[#allocation2 + $0x14] sm:$0xf] }
  0x42   : > { %vm1248_vm7 = vcmp.ne.s32.totalorder %v988_v23, 0  ;;  %v1584_v38 = vor.u32 %v1582_v21, %v6800_v41  ;;  %v6391_v41 = vld [vmem:[%s9731_s3 + $0xa8] sm:$0xff]  ;;  %v325_v57 = vmul.f32 %v6635_v7, %v289_v48  ;;  %v360_v59 = vadd.f32 %v6646_v14, %v324_v17 }
  0x43   : > { %v496_v35 = vsel %vm6697_vm4, %v488_v15, %v495_v25  ;;  %v505_v36 = vsel %vm6697_vm4, %v497_v26, %v504_v28  ;;  %1948 = vmatmul.bf16.gmra.mxu1 %v1856_v31  ;;  %vm6877_vm9 = vmpackc.low %vm1248_vm7, %vm1248_vm7  ;;  %2650 = vmatpush.bf16.msrb.mxu2 %v6391_v41  ;;  %v1526_v62 = vshrl.u32 %v6835_v22, 16  ;;  %v6917_v22 = vld [vmem:[#allocation2 + $0x10] sm:$0xf]  ;;  %v1361_v25 = vsel %vm6745_vm8, %v1297_v8, 0 }
  0x44   : > { %v9880_v18 = vsel %vm6877_vm9, 4294967295, %v9879_v18  ;;  %780 = vst [vmem:[#allocation2 + $0x18] sm:$0xf] %v496_v35  ;;  %v361_v60 = vadd.f32 %v6646_v14, %v325_v57  ;;  %v392_v61 = vmax.f32 %v360_v59, 0.0  ;;  %v632_v26 = vrot.slane %v6843_v46, 4 }
  0x45   : > { %9881 = vst [vmem:[#allocation10_spill] sm:$0xff] %v9880_v18  ;;  %v1528_v10 = vor.u32 %v1526_v62, %v6851_v54  ;;  %v834_v35 = vadd.s32 176, %v6663_v27 }
  0x46   : > { %v1312_v32 = vld [vmem:[#allocation2 + $0x50] sm:$0xf]  ;;  %781 = vst [vmem:[#allocation2 + $0x1c] sm:$0xf] %v505_v36  ;;  %v393_v5 = vmax.f32 %v361_v60, 0.0  ;;  %v440_v6 = vpack.c.bf16 %v392_v61, %v392_v61 }
  0x47   : > { %v6871_v34 = vld [vmem:[#allocation2 + $0x50] sm:$0xff]  ;;  %v1376_v42 = vsel %vm6877_vm9, %v1312_v32, 0  ;;  %v9882_v32 = vmov 0  ;;  %v1002_v17 = vand.u32 15, %v834_v35 }
  0x48   : > { %1715 = vmatmul.bf16.gmra.mxu0 %v1525_v2  ;;  %v1313_v33 = vld [vmem:[#allocation2 + $0x54] sm:$0xf]  ;;  %v1586_v39 = vshll.u32 %v6871_v34, 16  ;;  %v1843_v44 = vunpack.c.l.b16 %v1376_v42  ;;  %v816_v2 = vadd.s32 32, %v6663_v27  ;;  %v441_v9 = vpack.c.bf16 %v393_v5, %v393_v5 }
  0x49   : > { %v1377_v43 = vsel %vm6745_vm8, %v1313_v33, 0  ;;  %v634_v13 = vshrl.u32 %v440_v6, 16  ;;  %v637_v15 = vshll.u32 %v440_v6, 16  ;;  %v1828_v33 = vunpack.c.l.b16 %v1361_v25  ;;  %v274_v6 = vld [vmem:[%s6630_s14 + $0x30] sm:$0xff]  ;;  %v6422_v25 = vld [vmem:[%s9731_s3 + $0x120] sm:$0xff] }
  0x4a   : > { %v1844_v47 = vunpack.c.l.b16 %v1377_v43  ;;  %v6889_v49 = vrot.slane %v1586_v39, 1  ;;  %v876_v16 = vand.u32 15, %v816_v2  ;;  %v643_v20 = vshrl.u32 %v441_v9, 16  ;;  %v290_v43 = vld [vmem:[%s6630_s14 + $0xb0] sm:$0xff]  ;;  %3447 = vmatpush.bf16.msrb.mxu0 %v6422_v25 }
  0x4b   : > { %v646_v21 = vshll.u32 %v441_v9, 16  ;;  %v636_v28 = vrot.slane %v634_v13, 7  ;;  %vm1250_vm15 = vcmp.ne.s32.totalorder %v1002_v17, 0  ;;  %v326_v41 = vmul.f32 %v6635_v7, %v290_v43 }
  0x4c   : > { %v1865_v51 = vpack.c.b16 %v1844_v47, %v1843_v44  ;;  %v1589_v56 = vsel %vm9736_vm14, %v1584_v38, %v6889_v49  ;;  %vm1232_vm10 = vcmp.ne.s32.totalorder %v876_v16, 0  ;;  %v6922_v54 = vrot.slane %v643_v20, 7  ;;  %v291_v44 = vld [vmem:[%s6630_s14 + $0xb8] sm:$0xff]  ;;  %vm6948_vm2 = vmpackc.low %vm1250_vm15, %vm1250_vm15 }
  0x4d   : > { %1755 = vmatmul.bf16.gmra.mxu2 %v1589_v56  ;;  %v6910_v1 = vld [vmem:[#allocation2 + $0x18] sm:$0xff]  ;;  %vm6926_vm12 = vmpackc.low %vm1232_vm10, %vm1232_vm10  ;;  %v639_v36 = vor.u32 %v637_v15, %v636_v28  ;;  %v641_v37 = vrot.slane %v636_v28, 4  ;;  %v327_v50 = vmul.f32 %v6635_v7, %v291_v44  ;;  %v362_v53 = vadd.f32 %v6646_v14, %v326_v41 }
  0x4e   : > { %1993 = vmatmul.bf16.gmra.mxu3 %v1865_v51  ;;  %v1530_v12 = vshll.u32 %v6910_v1, 16  ;;  %v9883_v32 = vsel %vm6926_vm12, 4294967295, %v9882_v32  ;;  %v1360_v46 = vsel %vm6926_vm12, %v6917_v22, 0  ;;  %v648_v38 = vor.u32 %v646_v21, %v6922_v54  ;;  %v6390_v51 = vld [vmem:[%s9731_s3 + $0xa0] sm:$0xff]  ;;  %v275_v15 = vld [vmem:[%s6630_s14 + $0x38] sm:$0xff] }
  0x4f   : > { %9884 = vst [vmem:[#allocation11_spill] sm:$0xff] %v9883_v32  ;;  %v1827_v39 = vunpack.c.l.b16 %v1360_v46  ;;  %v640_v42 = vsel %vm6697_vm4, %v632_v26, %v639_v36  ;;  %v363_v55 = vadd.f32 %v6646_v14, %v327_v50  ;;  %2651 = vmatpush.bf16.msrb.mxu2 %v6390_v51  ;;  %v9885_v56 = vmov 0  ;;  %v6398_v21 = vld [vmem:[%s9731_s3 + $0xe0] sm:$0xff]  ;;  %v6980_v17 = vld [vmem:[#allocation2 + $0x1c] sm:$0xf] }
  0x50   : > { %v6915_v23 = vrot.slane %v1530_v12, 1  ;;  %v649_v47 = vsel %vm6697_vm4, %v641_v37, %v648_v38  ;;  %796 = vst [vmem:[#allocation2 + $0x58] sm:$0xf] %v640_v42  ;;  %v9886_v56 = vsel %vm6948_vm2, 4294967295, %v9885_v56  ;;  %v1590_v57 = vshrl.u32 %v6871_v34, 16  ;;  %2997 = vmatpush.bf16.msrb.mxu3 %v6398_v21 }
  0x51   : > { %v1857_v48 = vpack.c.b16 %v1828_v33, %v1827_v39  ;;  %797 = vst [vmem:[#allocation2 + $0x5c] sm:$0xf] %v649_v47  ;;  %v394_v59 = vmax.f32 %v362_v53, 0.0  ;;  %v395_v61 = vmax.f32 %v363_v55, 0.0  ;;  %v310_v20 = vmul.f32 %v6635_v7, %v274_v6 }
  0x52   : > { %v1533_v31 = vsel %vm9736_vm14, %v1528_v10, %v6915_v23  ;;  %9887 = vst [vmem:[#allocation12_spill] sm:$0xff] %v9886_v56  ;;  %v1592_v10 = vor.u32 %v1590_v57, %v6889_v49  ;;  %v6430_v49 = vld [vmem:[%s9731_s3 + $0x160] sm:$0xff]  ;;  %v650_v46 = vrot.slane %v6922_v54, 4  ;;  %v311_v39 = vmul.f32 %v6635_v7, %v275_v15 }
  0x53   : > { %1953 = vmatmul.bf16.gmra.mxu1 %v1857_v48  ;;  %v442_v34 = vpack.c.bf16 %v394_v59, %v394_v59  ;;  %v443_v16 = vpack.c.bf16 %v395_v61, %v395_v61  ;;  %v346_v43 = vadd.f32 %v6646_v14, %v310_v20  ;;  %v818_v54 = vadd.s32 48, %v6663_v27 }
  0x54   : > { %3799 = vmatpush.bf16.msrb.mxu1 %v6430_v49  ;;  %v347_v48 = vadd.f32 %v6646_v14, %v311_v39 }
  0x55   : > { %v655_v33 = vshll.u32 %v442_v34, 16  ;;  %v661_v35 = vshrl.u32 %v443_v16, 16  ;;  %v664_v36 = vshll.u32 %v443_v16, 16  ;;  %v378_v50 = vmax.f32 %v346_v43, 0.0 }
  0x56   : > { %v379_v53 = vmax.f32 %v347_v48, 0.0  ;;  %v890_v59 = vand.u32 15, %v818_v54 }
  0x57   : > { %v1314_v60 = vld [vmem:[#allocation2 + $0x58] sm:$0xf]  ;;  %v6976_v42 = vrot.slane %v661_v35, 7  ;;  %v426_v57 = vpack.c.bf16 %v378_v50, %v378_v50 }
  0x58   : > { %1720 = vmatmul.bf16.gmra.mxu0 %v1533_v31  ;;  %v6953_v62 = vld [vmem:[#allocation2 + $0x58] sm:$0xff]  ;;  %v1378_v5 = vsel %vm6948_vm2, %v1314_v60, 0  ;;  %v652_v31 = vshrl.u32 %v442_v34, 16  ;;  %v1363_v60 = vsel %vm6745_vm8, %v6980_v17, 0  ;;  %v427_v61 = vpack.c.bf16 %v379_v53, %v379_v53 }
  0x59   : > { %v1315_v2 = vld [vmem:[#allocation2 + $0x5c] sm:$0xf]  ;;  %v1845_v9 = vunpack.c.l.b16 %v1378_v5  ;;  %v1594_v12 = vshll.u32 %v6953_v62, 16  ;;  %v666_v41 = vor.u32 %v664_v36, %v6976_v42  ;;  %v836_v5 = vadd.s32 192, %v6663_v27 }
  0x5a   : > { %v1379_v8 = vsel %vm6745_vm8, %v1315_v2, 0  ;;  %v654_v38 = vrot.slane %v652_v31, 7  ;;  %v6991_v2 = vld [vmem:[#allocation2 + $0x18] sm:$0xf]  ;;  %v508_v6 = vshrl.u32 %v426_v57, 16  ;;  %vm1234_vm7 = vcmp.ne.s32.totalorder %v890_v59, 0 }
  0x5b   : > { %v1846_v13 = vunpack.c.l.b16 %v1379_v8  ;;  %v1596_v26 = vrot.slane %v1594_v12, 1  ;;  %v511_v8 = vshll.u32 %v426_v57, 16  ;;  %vm6994_vm10 = vmpackc.low %vm1234_vm7, %vm1234_vm7  ;;  %v9888_v12 = vmov 0  ;;  %v276_v59 = vld [vmem:[%s6630_s14 + $0x40] sm:$0xff] }
  0x5c   : > { %v657_v44 = vor.u32 %v655_v33, %v654_v38  ;;  %v659_v47 = vrot.slane %v654_v38, 4  ;;  %v9889_v12 = vsel %vm6994_vm10, 4294967295, %v9888_v12  ;;  %v506_v34 = vrot.slane %v6867_v19, 4 }
  0x5d   : > { %v1866_v28 = vpack.c.b16 %v1846_v13, %v1845_v9  ;;  %v1597_v37 = vsel %vm9736_vm14, %v1592_v10, %v1596_v26  ;;  %v517_v9 = vshrl.u32 %v427_v61, 16  ;;  %v520_v10 = vshll.u32 %v427_v61, 16  ;;  %9890 = vst [vmem:[#allocation13_spill] sm:$0xff] %v9889_v12 }
  0x5e   : > { %1760 = vmatmul.bf16.gmra.mxu2 %v1597_v37  ;;  %v658_v51 = vsel %vm6697_vm4, %v650_v46, %v657_v44  ;;  %v667_v55 = vsel %vm6697_vm4, %v659_v47, %v666_v41  ;;  %v1830_v13 = vunpack.c.l.b16 %v1363_v60  ;;  %v510_v15 = vrot.slane %v508_v6, 7  ;;  %v292_v41 = vld [vmem:[%s6630_s14 + $0xc0] sm:$0xff]  ;;  %v277_v6 = vld [vmem:[%s6630_s14 + $0x48] sm:$0xff] }
  0x5f   : > { %1998 = vmatmul.bf16.gmra.mxu3 %v1866_v28  ;;  %798 = vst [vmem:[#allocation2 + $0x60] sm:$0xf] %v658_v51  ;;  %v1362_v16 = vsel %vm6994_vm10, %v6991_v2, 0  ;;  %v7002_v20 = vrot.slane %v517_v9, 7  ;;  %v1016_v25 = vand.u32 15, %v836_v5  ;;  %v1598_v49 = vshrl.u32 %v6953_v62, 16 }
  0x60   : > { %799 = vst [vmem:[#allocation2 + $0x64] sm:$0xf] %v667_v55  ;;  %v1829_v21 = vunpack.c.l.b16 %v1362_v16  ;;  %v513_v28 = vor.u32 %v511_v8, %v510_v15  ;;  %v515_v31 = vrot.slane %v510_v15, 4  ;;  %v9891_v62 = vmov 0  ;;  %v293_v51 = vld [vmem:[%s6630_s14 + $0xc8] sm:$0xff]  ;;  %v6397_v8 = vld [vmem:[%s9731_s3 + $0xd8] sm:$0xff] }
  0x61   : > { %v522_v33 = vor.u32 %v520_v10, %v7002_v20  ;;  %vm1252_vm15 = vcmp.ne.s32.totalorder %v1016_v25, 0  ;;  %v1600_v39 = vor.u32 %v1598_v49, %v1596_v26  ;;  %v6389_v26 = vld [vmem:[%s9731_s3 + $0x98] sm:$0xff]  ;;  %v328_v57 = vmul.f32 %v6635_v7, %v292_v41  ;;  %2998 = vmatpush.bf16.msrb.mxu3 %v6397_v8 }
  0x62   : > { %v1858_v35 = vpack.c.b16 %v1830_v13, %v1829_v21  ;;  %v514_v19 = vsel %vm6697_vm4, %v506_v34, %v513_v28  ;;  %vm7012_vm7 = vmpackc.low %vm1252_vm15, %vm1252_vm15  ;;  %2652 = vmatpush.bf16.msrb.mxu2 %v6389_v26  ;;  %v1534_v60 = vshrl.u32 %v6910_v1, 16  ;;  %v329_v61 = vmul.f32 %v6635_v7, %v293_v51  ;;  %v6421_v1 = vld [vmem:[%s9731_s3 + $0x118] sm:$0xff] }
  0x63   : > { %v523_v38 = vsel %vm6697_vm4, %v515_v31, %v522_v33  ;;  %782 = vst [vmem:[#allocation2 + $0x20] sm:$0xf] %v514_v19  ;;  %v9892_v62 = vsel %vm7012_vm7, 4294967295, %v9891_v62  ;;  %v364_v5 = vadd.f32 %v6646_v14, %v328_v57  ;;  %v312_v13 = vmul.f32 %v6635_v7, %v276_v59  ;;  %v6429_v15 = vld [vmem:[%s9731_s3 + $0x158] sm:$0xff]  ;;  %3448 = vmatpush.bf16.msrb.mxu0 %v6421_v1 }
  0x64   : > { %1958 = vmatmul.bf16.gmra.mxu1 %v1858_v35  ;;  %9893 = vst [vmem:[#allocation14_spill] sm:$0xff] %v9892_v62  ;;  %v365_v10 = vadd.f32 %v6646_v14, %v329_v61  ;;  %v1536_v16 = vor.u32 %v1534_v60, %v6915_v23  ;;  %v313_v49 = vmul.f32 %v6635_v7, %v277_v6  ;;  %v524_v8 = vrot.slane %v7002_v20, 4 }
  0x65   : > { %783 = vst [vmem:[#allocation2 + $0x24] sm:$0xf] %v523_v38  ;;  %v396_v34 = vmax.f32 %v364_v5, 0.0  ;;  %v348_v31 = vadd.f32 %v6646_v14, %v312_v13  ;;  %3800 = vmatpush.bf16.msrb.mxu1 %v6429_v15  ;;  %vm9912_vm2 = vcmask 1040384  }
  0x66   : > { %v1316_v36 = vld [vmem:[#allocation2 + $0x60] sm:$0xf]  ;;  %v397_v25 = vmax.f32 %v365_v10, 0.0 }
  0x67   : > { %v7006_v37 = vld [vmem:[#allocation2 + $0x60] sm:$0xff]  ;;  %v1380_v44 = vsel %vm7012_vm7, %v1316_v36, 0  ;;  %v444_v28 = vpack.c.bf16 %v396_v34, %v396_v34  ;;  %v349_v36 = vadd.f32 %v6646_v14, %v313_v49  ;;  %v380_v38 = vmax.f32 %v348_v31, 0.0 }
  0x68   : > { %v1317_v46 = vld [vmem:[#allocation2 + $0x64] sm:$0xf]  ;;  %v1602_v43 = vshll.u32 %v7006_v37, 16  ;;  %v1847_v48 = vunpack.c.l.b16 %v1380_v44  ;;  %v445_v35 = vpack.c.bf16 %v397_v25, %v397_v25  ;;  %v838_v25 = vadd.s32 208, %v6663_v27 }
  0x69   : > { %v1381_v47 = vsel %vm6745_vm8, %v1317_v46, 0  ;;  %v670_v19 = vshrl.u32 %v444_v28, 16  ;;  %v673_v46 = vshll.u32 %v444_v28, 16  ;;  %v381_v7 = vmax.f32 %v349_v36, 0.0 }
  0x6a   : > { %v7022_v50 = vrot.slane %v1602_v43, 1  ;;  %v1848_v54 = vunpack.c.l.b16 %v1381_v47  ;;  %v679_v43 = vshrl.u32 %v445_v35, 16  ;;  %v682_v44 = vshll.u32 %v445_v35, 16  ;;  %v7068_v13 = vld [vmem:[#allocation2 + $0x20] sm:$0xf] }
  0x6b   : > { %v668_v47 = vrot.slane %v6976_v42, 4  ;;  %v428_v41 = vpack.c.bf16 %v380_v38, %v380_v38  ;;  %v429_v14 = vpack.c.bf16 %v381_v7, %v381_v7 }
  0x6c   : > { %v1605_v53 = vsel %vm9736_vm14, %v1600_v39, %v7022_v50  ;;  %v1867_v55 = vpack.c.b16 %v1848_v54, %v1847_v48  ;;  %v7039_v9 = vld [vmem:[#allocation2 + $0x20] sm:$0xff]  ;;  %v672_v48 = vrot.slane %v670_v19, 7  ;;  %v820_v54 = vadd.s32 64, %v6663_v27 }
  0x6d   : > { %v1538_v21 = vshll.u32 %v7039_v9, 16  ;;  %v1301_v39 = vld [vmem:[#allocation2 + $0x24] sm:$0xf]  ;;  %v7060_v51 = vrot.slane %v679_v43, 7  ;;  %v526_v57 = vshrl.u32 %v428_v41, 16  ;;  %v529_v59 = vshll.u32 %v428_v41, 16 }
  0x6e   : > { %1765 = vmatmul.bf16.gmra.mxu2 %v1605_v53  ;;  %v1365_v26 = vsel %vm6745_vm8, %v1301_v39, 0  ;;  %v675_v53 = vor.u32 %v673_v46, %v672_v48  ;;  %v535_v61 = vshrl.u32 %v429_v14, 16  ;;  %v538_v5 = vshll.u32 %v429_v14, 16  ;;  %v294_v39 = vld [vmem:[%s6630_s14 + $0xd0] sm:$0xff] }
  0x6f   : > { %2003 = vmatmul.bf16.gmra.mxu3 %v1867_v55  ;;  %v7053_v33 = vrot.slane %v1538_v21, 1  ;;  %v677_v55 = vrot.slane %v672_v48, 4  ;;  %v684_v60 = vor.u32 %v682_v44, %v7060_v51  ;;  %v904_v6 = vand.u32 15, %v820_v54  ;;  %v7099_v48 = vld [vmem:[%s9729_s1] ss:$0 sm:$0xff] }
  0x70   : > { %v676_v42 = vsel %vm6697_vm4, %v668_v47, %v675_v53  ;;  %v528_v10 = vrot.slane %v526_v57, 7  ;;  %v7072_v34 = vrot.slane %v535_v61, 7  ;;  %v9894_v21 = vmov 0 }
  0x71   : > { %v1541_v23 = vsel %vm9736_vm14, %v1536_v16, %v7053_v33  ;;  %v685_v1 = vsel %vm6697_vm4, %v677_v55, %v684_v60  ;;  %800 = vst [vmem:[#allocation2 + $0x68] sm:$0xf] %v676_v42  ;;  %vm1236_vm15 = vcmp.ne.s32.totalorder %v904_v6, 0  ;;  %v1832_v20 = vunpack.c.l.b16 %v1365_v26  ;;  %v6388_v26 = vld [vmem:[%s9731_s3 + $0x90] sm:$0xff]  ;;  %v7121_v6 = vld [vmem:[%s9730_s2] ss:$0 sm:$0xff] }
  0x72   : > { %1725 = vmatmul.bf16.gmra.mxu0 %v1541_v23  ;;  %801 = vst [vmem:[#allocation2 + $0x6c] sm:$0xf] %v685_v1  ;;  %v531_v15 = vor.u32 %v529_v59, %v528_v10  ;;  %v533_v16 = vrot.slane %v528_v10, 4  ;;  %vm7074_vm0 = vmpackc.low %vm1236_vm15, %vm1236_vm15  ;;  %v540_v49 = vor.u32 %v538_v5, %v7072_v34  ;;  %v1030_v19 = vand.u32 15, %v838_v25  ;;  %v295_v23 = vld [vmem:[%s6630_s14 + $0xd8] sm:$0xff]  ;;  %2653 = vmatpush.bf16.msrb.mxu2 %v6388_v26 }
  0x73   : > { %v9895_v21 = vsel %vm7074_vm0, 4294967295, %v9894_v21  ;;  %v1364_v28 = vsel %vm7074_vm0, %v7068_v13, 0  ;;  %v1606_v46 = vshrl.u32 %v7006_v37, 16  ;;  %v9897_v47 = vmov 0 }
  0x74   : > { %9896 = vst [vmem:[#allocation15_spill] sm:$0xff] %v9895_v21  ;;  %v532_v31 = vsel %vm6697_vm4, %v524_v8, %v531_v15  ;;  %v1831_v35 = vunpack.c.l.b16 %v1364_v28  ;;  %v541_v36 = vsel %vm6697_vm4, %v533_v16, %v540_v49  ;;  %vm1254_vm15 = vcmp.ne.s32.totalorder %v1030_v19, 0  ;;  %v278_v16 = vld [vmem:[%s6630_s14 + $0x50] sm:$0xff]  ;;  %v279_v49 = vld [vmem:[%s6630_s14 + $0x58] sm:$0xff] }
  0x75   : > { %784 = vst [vmem:[#allocation2 + $0x28] sm:$0xf] %v532_v31  ;;  %vm7092_vm14 = vmpackc.low %vm1254_vm15, %vm1254_vm15  ;;  %v330_v37 = vmul.f32 %v7099_v48, %v294_v39  ;;  %v1608_v41 = vor.u32 %v1606_v46, %v7022_v50  ;;  %v331_v14 = vmul.f32 %v7099_v48, %v295_v23  ;;  %v1542_v55 = vshrl.u32 %v7039_v9, 16 }
  0x76   : > { %785 = vst [vmem:[#allocation2 + $0x2c] sm:$0xf] %v541_v36  ;;  %v1859_v38 = vpack.c.b16 %v1832_v20, %v1831_v35  ;;  %v9898_v47 = vsel %vm7092_vm14, 4294967295, %v9897_v47  ;;  %v813_v50 = vadd.s32 8, %v6663_v27  ;;  %vm9900_vm15 = vsmask.f32 7424 }
  0x77   : > { %9899 = vst [vmem:[#allocation16_spill] sm:$0xff] %v9898_v47  ;;  %v366_v9 = vadd.f32 %v7121_v6, %v330_v37  ;;  %v367_v8 = vadd.f32 %v7121_v6, %v331_v14  ;;  %v1544_v1 = vor.u32 %v1542_v55, %v7053_v33  ;;  %v6396_v35 = vld [vmem:[%s9731_s3 + $0xd0] sm:$0xff]  ;;  %v315_v23 = vmul.f32 %v7099_v48, %v279_v49 }
  0x78   : > { %1963 = vmatmul.bf16.gmra.mxu1 %v1859_v38  ;;  %v1318_v43 = vld [vmem:[#allocation2 + $0x68] sm:$0xf]  ;;  %v855_v28 = vand.u32 15, %v813_v50  ;;  %v6420_v36 = vld [vmem:[%s9731_s3 + $0x110] sm:$0xff]  ;;  %v314_v38 = vmul.f32 %v7099_v48, %v278_v16  ;;  %2999 = vmatpush.bf16.msrb.mxu3 %v6396_v35  ;;  %v686_v55 = vrot.slane %v7060_v51, 4  ;;  %v2057_v51 = vsel %vm6745_vm8, 65537, %v9757_v4 }
  0x79   : > { %v7090_v44 = vld [vmem:[#allocation2 + $0x68] sm:$0xff]  ;;  %v1382_v54 = vsel %vm7092_vm14, %v1318_v43, 0  ;;  %v398_v20 = vmax.f32 %v366_v9, 0.0  ;;  %v399_v25 = vmax.f32 %v367_v8, 0.0  ;;  %v6428_v33 = vld [vmem:[%s9731_s3 + $0x150] sm:$0xff]  ;;  %3449 = vmatpush.bf16.msrb.mxu0 %v6420_v36  ;;  %v815_v16 = vadd.s32 24, %v6663_v27 }
  0x7a   : > { %v1319_v7 = vld [vmem:[#allocation2 + $0x6c] sm:$0xf]  ;;  %v1610_v53 = vshll.u32 %v7090_v44, 16  ;;  %v1849_v59 = vunpack.c.l.b16 %v1382_v54  ;;  %3801 = vmatpush.bf16.msrb.mxu1 %v6428_v33  ;;  %vm7148_vm3 = vcmp.ne.s32.totalorder %v855_v28, 15  ;;  %v350_v26 = vadd.f32 %v7121_v6, %v314_v38 }
  0x7b   : > { %v1383_v57 = vsel %vm6745_vm8, %v1319_v7, 0  ;;  %v446_v19 = vpack.c.bf16 %v398_v20, %v398_v20  ;;  %v447_v46 = vpack.c.bf16 %v399_v25, %v399_v25  ;;  %vm9906_vm14 = vmpackc.low %vm7148_vm3, %vm7148_vm3  ;;  %vm2089_vm3 = vcmask 1044484  }
  0x7c   : > { %v1850_v60 = vunpack.c.l.b16 %v1383_v57  ;;  %v7114_v61 = vrot.slane %v1610_v53, 1  ;;  %v351_v53 = vadd.f32 %v7121_v6, %v315_v23  ;;  %v382_v50 = vmax.f32 %v350_v26, 0.0  ;;  %v7169_v49 = vld [vmem:[#allocation2 + $0x28] sm:$0xf]  ;;  %vm7214_vm9 = vmor %vm9912_vm2, %vm2089_vm3 }
  0x7d   : > { %v7116_v5 = vld [vmem:[#allocation2 + $0x28] sm:$0xff]  ;;  %v688_v43 = vshrl.u32 %v446_v19, 16  ;;  %v691_v7 = vshll.u32 %v446_v19, 16  ;;  %v697_v37 = vshrl.u32 %v447_v46, 16  ;;  %v700_v14 = vshll.u32 %v447_v46, 16 }
  0x7e   : > { %v1868_v42 = vpack.c.b16 %v1850_v60, %v1849_v59  ;;  %v1613_v10 = vsel %vm9900_vm15, %v1608_v41, %v7114_v61  ;;  %v1546_v15 = vshll.u32 %v7116_v5, 16  ;;  %v7146_v41 = vld [vmem:[#allocation2 + $0x2c] sm:$0xf]  ;;  %v822_v60 = vadd.s32 80, %v6663_v27 }
  0x7f   : > { %1770 = vmatmul.bf16.gmra.mxu2 %v1613_v10  ;;  %v690_v57 = vrot.slane %v688_v43, 7  ;;  %v7155_v59 = vrot.slane %v697_v37, 7  ;;  %v383_v9 = vmax.f32 %v351_v53, 0.0  ;;  %v430_v20 = vpack.c.bf16 %v382_v50, %v382_v50 }
  0x80   : > { %2008 = vmatmul.bf16.gmra.mxu3 %v1868_v42  ;;  %v7131_v31 = vrot.slane %v1546_v15, 1  ;;  %v1367_v42 = vsel %vm6745_vm8, %v7146_v41, 0  ;;  %v918_v15 = vand.u32 15, %v822_v60  ;;  %v7179_v23 = vrot.slane %v2057_v51, 7 }
  0x81   : > { %v693_v8 = vor.u32 %v691_v7, %v690_v57  ;;  %v695_v10 = vrot.slane %v690_v57, 4  ;;  %v431_v25 = vpack.c.bf16 %v383_v9, %v383_v9  ;;  %v1834_v36 = vunpack.c.l.b16 %v1367_v42 }
  0x82   : > { %v1549_v39 = vsel %vm9900_vm15, %v1544_v1, %v7131_v31  ;;  %v702_v1 = vor.u32 %v700_v14, %v7155_v59  ;;  %vm1238_vm11 = vcmp.ne.s32.totalorder %v918_v15, 0  ;;  %v544_v33 = vshrl.u32 %v430_v20, 16 }
  0x83   : > { %1730 = vmatmul.bf16.gmra.mxu0 %v1549_v39  ;;  %v694_v28 = vsel %vm6697_vm4, %v686_v55, %v693_v8  ;;  %v547_v19 = vshll.u32 %v430_v20, 16  ;;  %v553_v46 = vshrl.u32 %v431_v25, 16  ;;  %v556_v38 = vshll.u32 %v431_v25, 16  ;;  %vm7175_vm15 = vmpackc.low %vm1238_vm11, %vm1238_vm11 }
  0x84   : > { %v703_v35 = vsel %vm6697_vm4, %v695_v10, %v702_v1  ;;  %802 = vst [vmem:[#allocation2 + $0x70] sm:$0xf] %v694_v28  ;;  %v9903_v39 = vmov 0  ;;  %v2058_v43 = vsel %vm9906_vm14, 65537, %v9757_v4  ;;  %v1366_v7 = vsel %vm7175_vm15, %v7169_v49, 0  ;;  %v296_v1 = vld [vmem:[%s6630_s14 + $0xe0] sm:$0xff] }
  0x85   : > { %v9904_v39 = vsel %vm7175_vm15, 4294967295, %v9903_v39  ;;  %803 = vst [vmem:[#allocation2 + $0x74] sm:$0xf] %v703_v35  ;;  %v840_v37 = vadd.s32 224, %v6663_v27  ;;  %v542_v14 = vrot.slane %v7072_v34, 4  ;;  %v546_v26 = vrot.slane %v544_v33, 7 }
  0x86   : > { %9905 = vst [vmem:[#allocation17_spill] sm:$0xff] %v9904_v39  ;;  %v7192_v53 = vrot.slane %v553_v46, 7  ;;  %v1833_v55 = vunpack.c.l.b16 %v1366_v7  ;;  %v869_v57 = vand.u32 15, %v815_v16  ;;  %v7196_v8 = vrot.slane %v7179_v23, 4  ;;  %v297_v28 = vld [vmem:[%s6630_s14 + $0xe8] sm:$0xff] }
  0x87   : > { %v1044_v60 = vand.u32 15, %v840_v37  ;;  %v549_v50 = vor.u32 %v547_v19, %v546_v26  ;;  %v551_v54 = vrot.slane %v546_v26, 4  ;;  %v2093_v10 = vrot.slane %v2058_v43, 7  ;;  %v6387_v43 = vld [vmem:[%s9731_s3 + $0x88] sm:$0xff] }
  0x88   : > { %v558_v9 = vor.u32 %v556_v38, %v7192_v53  ;;  %v1860_v42 = vpack.c.b16 %v1834_v36, %v1833_v55  ;;  %v1614_v34 = vshrl.u32 %v7090_v44, 16  ;;  %vm7204_vm14 = vcmp.ne.s32.totalorder %v869_v57, 15  ;;  %2654 = vmatpush.bf16.msrb.mxu2 %v6387_v43  ;;  %v6467_v44 = vld [vmem:[%s9731_s3 + $0x208] sm:$0xff] }
  0x89   : > { %v550_v15 = vsel %vm6697_vm4, %v542_v14, %v549_v50  ;;  %vm1256_vm11 = vcmp.ne.s32.totalorder %v1044_v60, 0  ;;  %v9909_v25 = vmov 0  ;;  %v332_v19 = vmul.f32 %v7099_v48, %v296_v1  ;;  %vm2028_vm2 = vmpackc.low %vm7204_vm14, %vm7204_vm14 }
  0x8a   : > { %v559_v51 = vsel %vm6697_vm4, %v551_v54, %v558_v9  ;;  %1968 = vmatmul.bf16.gmra.mxu1 %v1860_v42  ;;  %786 = vst [vmem:[#allocation2 + $0x30] sm:$0xf] %v550_v15  ;;  %vm7208_vm7 = vmpackc.low %vm1256_vm11, %vm1256_vm11  ;;  %v1616_v7 = vor.u32 %v1614_v34, %v7114_v61  ;;  %v2094_v26 = vsel %vm7214_vm9, %v7196_v8, %v2093_v10  ;;  %v2095_v55 = vrot.slane %v2093_v10, 4 }
  0x8b   : > { %v1320_v20 = vld [vmem:[#allocation2 + $0x70] sm:$0xf]  ;;  %v9910_v25 = vsel %vm7208_vm7, 4294967295, %v9909_v25  ;;  %787 = vst [vmem:[#allocation2 + $0x34] sm:$0xf] %v559_v51  ;;  %v817_v57 = vadd.s32 40, %v6663_v27  ;;  %v333_v60 = vmul.f32 %v7099_v48, %v297_v28  ;;  %v368_v61 = vadd.f32 %v7121_v6, %v332_v19 }
  0x8c   : > { %9911 = vst [vmem:[#allocation18_spill] sm:$0xff] %v9910_v25  ;;  %v7218_v35 = vld [vmem:[#allocation2 + $0x70] sm:$0xff]  ;;  %v1384_v33 = vsel %vm7208_vm7, %v1320_v20, 0  ;;  %v819_v50 = vadd.s32 56, %v6663_v27  ;;  %v7243_v42 = vunpack.c.l.b16 %v9757_v4  ;;  %v2060_v1 = vsel %vm2028_vm2, 65537, %v9757_v4  ;;  %v280_v20 = vld [vmem:[%s6630_s14 + $0x60] sm:$0xff] }
  0x8d   : > { %v1321_v36 = vld [vmem:[#allocation2 + $0x74] sm:$0xf]  ;;  %v1851_v38 = vunpack.c.l.b16 %v1384_v33  ;;  %v1618_v37 = vshll.u32 %v7218_v35, 16  ;;  %v1550_v10 = vshrl.u32 %v7116_v5, 16  ;;  %v7248_v34 = vunpack.c.h.b16 %v9757_v4 }
  0x8e   : > { %v1385_v46 = vsel %vm6745_vm8, %v1321_v36, 0  ;;  %v2193_v15 = vunpack.c.l.b16 %v2094_v26  ;;  %vm9915_vm3 = vsmask.f32 7424  ;;  %v369_v16 = vadd.f32 %v7121_v6, %v333_v60  ;;  %v6427_v60 = vld [vmem:[%s9731_s3 + $0x148] sm:$0xff] }
  0x8f   : > { %v1852_v14 = vunpack.c.l.b16 %v1385_v46  ;;  %v7239_v54 = vrot.slane %v1618_v37, 1  ;;  %v2194_v28 = vunpack.c.h.b16 %v2094_v26  ;;  %v7257_v36 = vsel %vm7214_vm9, %v2095_v55, %v7179_v23  ;;  %v6419_v37 = vld [vmem:[%s9731_s3 + $0x108] sm:$0xff]  ;;  %3802 = vmatpush.bf16.msrb.mxu1 %v6427_v60 }
  0x90   : > { %v883_v33 = vand.u32 15, %v817_v57  ;;  %v400_v19 = vmax.f32 %v368_v61, 0.0  ;;  %v2099_v46 = vrot.slane %v2060_v1, 7  ;;  %v401_v43 = vmax.f32 %v369_v16, 0.0  ;;  %3450 = vmatpush.bf16.msrb.mxu0 %v6419_v37 }
  0x91   : > { %v1869_v9 = vpack.c.b16 %v1852_v14, %v1851_v38  ;;  %v1621_v51 = vsel %vm9915_vm3, %v1616_v7, %v7239_v54  ;;  %v897_v38 = vand.u32 15, %v819_v50  ;;  %v6395_v7 = vld [vmem:[%s9731_s3 + $0xc8] sm:$0xff]  ;;  %v1552_v14 = vor.u32 %v1550_v10, %v7131_v31 }
  0x92   : > { %1775 = vmatmul.bf16.gmra.mxu2 %v1621_v51  ;;  %v7259_v5 = vld [vmem:[#allocation2 + $0x30] sm:$0xff]  ;;  %v448_v55 = vpack.c.bf16 %v400_v19, %v400_v19  ;;  %v316_v57 = vmul.f32 %v7099_v48, %v280_v20  ;;  %v449_v61 = vpack.c.bf16 %v401_v43, %v401_v43  ;;  %3000 = vmatpush.bf16.msrb.mxu3 %v6395_v7  ;;  %vm7284_vm2 = vcmp.ne.s32.totalorder %v883_v33, 15 }
  0x93   : > { %2013 = vmatmul.bf16.gmra.mxu3 %v1869_v9  ;;  %v1554_v26 = vshll.u32 %v7259_v5, 16  ;;  %v2101_v9 = vrot.slane %v2099_v46, 4  ;;  %vm7275_vm11 = vcmp.ne.s32.totalorder %v2193_v15, %v7243_v42  ;;  %vm7280_vm14 = vcmp.ne.s32.totalorder %v2194_v28, %v7248_v34  ;;  %v7295_v7 = vld [vmem:[#allocation2 + $0x34] sm:$0xf]  ;;  %vm2030_vm1 = vmpackc.low %vm7284_vm2, %vm7284_vm2 }
  0x94   : > { %v706_v16 = vshrl.u32 %v448_v55, 16  ;;  %v709_v20 = vshll.u32 %v448_v55, 16  ;;  %vm7290_vm3 = vcmp.ne.s32.totalorder %v897_v38, 15  ;;  %v715_v15 = vshrl.u32 %v449_v61, 16 }
  0x95   : > { %v7288_v51 = vrot.slane %v1554_v26, 1  ;;  %v718_v43 = vshll.u32 %v449_v61, 16  ;;  %v352_v28 = vadd.f32 %v7121_v6, %v316_v57  ;;  %vm9924_vm7 = vsmask.f32 7424 }
  0x96   : > { %v704_v37 = vrot.slane %v7155_v59, 4  ;;  %v708_v26 = vrot.slane %v706_v16, 7  ;;  %v824_v50 = vadd.s32 96, %v6663_v27  ;;  %v2100_v38 = vsel %vm7214_vm9, %v7196_v8, %v2099_v46 }
  0x97   : > { %v1557_v33 = vsel %vm9924_vm7, %v1552_v14, %v7288_v51  ;;  %v2201_v55 = vunpack.c.h.b16 %v7257_v36  ;;  %v7308_v57 = vrot.slane %v715_v15, 7  ;;  %v384_v60 = vmax.f32 %v352_v28, 0.0 }
  0x98   : > { %1735 = vmatmul.bf16.gmra.mxu0 %v1557_v33  ;;  %v711_v14 = vor.u32 %v709_v20, %v708_v26  ;;  %v713_v61 = vrot.slane %v708_v26, 4  ;;  %v932_v59 = vand.u32 15, %v824_v50  ;;  %v1369_v16 = vsel %vm6745_vm8, %v7295_v7, 0  ;;  %v7321_v20 = vld [vmem:[#allocation2 + $0x30] sm:$0xf] }
  0x99   : > { %v2103_v46 = vsel %vm7214_vm9, %v2101_v9, %v7179_v23  ;;  %v720_v10 = vor.u32 %v718_v43, %v7308_v57  ;;  %v432_v15 = vpack.c.bf16 %v384_v60, %v384_v60  ;;  %v574_v28 = vshll.u32 %v6666_v29, 16 }
  0x9a   : > { %v2062_v50 = vsel %vm2030_vm1, 65537, %v9757_v4  ;;  %v712_v33 = vsel %vm6697_vm4, %v704_v37, %v711_v14  ;;  %vm1240_vm2 = vcmp.ne.s32.totalorder %v932_v59, 0  ;;  %v842_v26 = vadd.s32 240, %v6663_v27  ;;  %vm9928_vm1 = vmpackc.low %vm7290_vm3, %vm7290_vm3 }
  0x9b   : > { %v721_v9 = vsel %vm6697_vm4, %v713_v61, %v720_v10  ;;  %804 = vst [vmem:[#allocation2 + $0x78] sm:$0xf] %v712_v33  ;;  %v562_v40 = vshrl.u32 %v432_v15, 16  ;;  %v565_v25 = vshll.u32 %v432_v15, 16  ;;  %vm7329_vm7 = vmpackc.low %vm1240_vm2, %vm1240_vm2  ;;  %v9925_v43 = vmov 0 }
  0x9c   : > { %v9926_v43 = vsel %vm7329_vm7, 4294967295, %v9925_v43  ;;  %v1836_v29 = vunpack.c.l.b16 %v1369_v16  ;;  %v2207_v60 = vunpack.c.l.b16 %v2100_v38  ;;  %v7339_v37 = vsel %vm9928_vm1, 65537, %v9757_v4  ;;  %805 = vst [vmem:[#allocation2 + $0x7c] sm:$0xf] %v721_v9  ;;  %vm7350_vm3 = vmpackc.low %vm7280_vm14, %vm7275_vm11 }
  0x9d   : > { %9927 = vst [vmem:[#allocation19_spill] sm:$0xff] %v9926_v43  ;;  %v1368_v14 = vsel %vm7329_vm7, %v7321_v20, 0  ;;  %v1058_v61 = vand.u32 15, %v842_v26  ;;  %v560_v59 = vrot.slane %v7192_v53, 4  ;;  %v564_v10 = vrot.slane %v562_v40, 7  ;;  %v298_v40 = vld [vmem:[%s6630_s14 + $0xf0] sm:$0xff] }
  0x9e   : > { %v576_v16 = vor.u32 %v574_v28, %v6684_v45  ;;  %v1835_v15 = vunpack.c.l.b16 %v1368_v14  ;;  %v2208_v33 = vunpack.c.h.b16 %v2100_v38  ;;  %v2105_v0 = vrot.slane %v2062_v50, 7 }
  0x9f   : > { %v2214_v47 = vunpack.c.l.b16 %v2103_v46  ;;  %vm1258_vm2 = vcmp.ne.s32.totalorder %v1058_v61, 0  ;;  %v9929_v19 = vmov 0  ;;  %v2215_v9 = vunpack.c.h.b16 %v2103_v46 }
  0xa0   : > { %v9930_v19 = vsel %vm7350_vm3, 4294967295, %v9929_v19  ;;  %v567_v26 = vor.u32 %v565_v25, %v564_v10  ;;  %v569_v4 = vrot.slane %v564_v10, 4  ;;  %v1861_v53 = vpack.c.b16 %v1836_v29, %v1835_v15  ;;  %vm7368_vm11 = vmpackc.low %vm1258_vm2, %vm1258_vm2 }
  0xa1   : > { %9931 = vst [vmem:[#allocation20_spill] sm:$0xff] %v9930_v19  ;;  %v9932_v45 = vunpack.c.l.b16 %v7257_v36  ;;  %vm7363_vm6 = vcmp.ne.s32.totalorder %v2201_v55, %v7248_v34  ;;  %v2107_v31 = vrot.slane %v2105_v0, 4  ;;  %v9767_v28 = vrot.slane %v7339_v37, 7  ;;  %v7377_v55 = vld [vmem:[#allocation2 + $0x4] sm:$0xf] }
  0xa2   : > { %v9937_v25 = vmov 0  ;;  %v1622_v46 = vshrl.u32 %v7218_v35, 16  ;;  %v568_v36 = vsel %vm6697_vm4, %v560_v59, %v567_v26  ;;  %v577_v50 = vsel %vm6697_vm4, %v569_v4, %v576_v16  ;;  %1973 = vmatmul.bf16.gmra.mxu1 %v1861_v53  ;;  %v1322_v61 = vld [vmem:[#allocation2 + $0x78] sm:$0xf]  ;;  %v6386_v53 = vld [vmem:[%s9731_s3 + $0x80] sm:$0xff] }
  0xa3   : > { %vm7358_vm1 = vcmp.ne.s32.totalorder %v9932_v45, %v7243_v42  ;;  %v9938_v25 = vsel %vm7368_vm11, 4294967295, %v9937_v25  ;;  %vm7383_vm14 = vcmp.ne.s32.totalorder %v2207_v60, %v7243_v42  ;;  %vm7388_vm2 = vcmp.ne.s32.totalorder %v2208_v33, %v7248_v34  ;;  %788 = vst [vmem:[#allocation2 + $0x38] sm:$0xf] %v568_v36  ;;  %v7414_v16 = vld [vmem:[#allocation2 + $0x78] sm:$0xff]  ;;  %2655 = vmatpush.bf16.msrb.mxu2 %v6386_v53 }
  0xa4   : > { %9939 = vst [vmem:[#allocation21_spill] sm:$0xff] %v9938_v25  ;;  %v334_v4 = vmul.f32 %v7099_v48, %v298_v40  ;;  %vm7397_vm7 = vmpackc.low %vm7363_vm6, %vm7358_vm1  ;;  %v9944_v59 = vmov 0  ;;  %v2106_v60 = vsel %vm7214_vm9, %v7196_v8, %v2105_v0  ;;  %vm7405_vm15 = vcmp.ne.s32.totalorder %v2214_v47, %v7243_v42  ;;  %v1323_v15 = vld [vmem:[#allocation2 + $0x7c] sm:$0xf]  ;;  %v6394_v40 = vld [vmem:[%s9731_s3 + $0xc0] sm:$0xff] }
  0xa5   : > { %v9945_v59 = vsel %vm7397_vm7, 4294967295, %v9944_v59  ;;  %vm7410_vm0 = vcmp.ne.s32.totalorder %v2215_v9, %v7248_v34  ;;  %789 = vst [vmem:[#allocation2 + $0x3c] sm:$0xf] %v577_v50  ;;  %v1386_v33 = vsel %vm7368_vm11, %v1322_v61, 0  ;;  %v2109_v0 = vsel %vm7214_vm9, %v2107_v31, %v7179_v23  ;;  %vm7438_vm6 = vmpackc.low %vm7388_vm2, %vm7383_vm14  ;;  %v6418_v50 = vld [vmem:[%s9731_s3 + $0x100] sm:$0xff]  ;;  %3001 = vmatpush.bf16.msrb.mxu3 %v6394_v40 }
  0xa6   : > { %9946 = vst [vmem:[#allocation22_spill] sm:$0xff] %v9945_v59  ;;  %v2112_v47 = vsel %vm7214_vm9, %v7196_v8, %v9767_v28  ;;  %v1387_v9 = vsel %vm6745_vm8, %v1323_v15, 0  ;;  %v1853_v26 = vunpack.c.l.b16 %v1386_v33  ;;  %v9951_v45 = vmov 0  ;;  %v7448_v61 = vld [vmem:[#allocation2 + $0x8] sm:$0xf]  ;;  %vm7461_vm1 = vmpackc.low %vm7410_vm0, %vm7405_vm15  ;;  %3451 = vmatpush.bf16.msrb.mxu0 %v6418_v50 }
  0xa7   : > { %v9952_v45 = vsel %vm7438_vm6, 4294967295, %v9951_v45  ;;  %v821_v38 = vadd.s32 72, %v6663_v27  ;;  %v1624_v1 = vor.u32 %v1622_v46, %v7239_v54  ;;  %v1626_v31 = vshll.u32 %v7414_v16, 16  ;;  %v6426_v54 = vld [vmem:[%s9731_s3 + $0x140] sm:$0xff] }
  0xa8   : > { %9953 = vst [vmem:[#allocation23_spill] sm:$0xff] %v9952_v45  ;;  %v1854_v36 = vunpack.c.l.b16 %v1387_v9  ;;  %v2419_v14 = vsel %vm7397_vm7, %v7448_v61, 0  ;;  %v2221_v35 = vunpack.c.l.b16 %v2106_v60  ;;  %v2222_v15 = vunpack.c.h.b16 %v2106_v60  ;;  %3803 = vmatpush.bf16.msrb.mxu1 %v6426_v54  ;;  %v6402_v45 = vld [vmem:[#allocation2 + $0x8] sm:$0xff] }
  0xa9   : > { %v370_v33 = vadd.f32 %v7121_v6, %v334_v4  ;;  %v9954_v46 = vmov 0  ;;  %v2228_v9 = vunpack.c.l.b16 %v2109_v0  ;;  %v2229_v61 = vunpack.c.h.b16 %v2109_v0  ;;  %v6530_v6 = vld [vmem:[#allocation2 + $0xc] sm:$0xf] }
  0xaa   : > { %v9955_v46 = vsel %vm7461_vm1, 4294967295, %v9954_v46  ;;  %v7465_v28 = vrot.slane %v1626_v31, 1  ;;  %v1870_v60 = vpack.c.b16 %v1854_v36, %v1853_v26  ;;  %v2420_v4 = vsel %vm7438_vm6, %v6530_v6, 0 }
  0xab   : > { %9956 = vst [vmem:[#allocation24_spill] sm:$0xff] %v9955_v46  ;;  %v2235_v53 = vunpack.c.l.b16 %v2112_v47  ;;  %v1558_v40 = vshrl.u32 %v7259_v5, 16  ;;  %v402_v10 = vmax.f32 %v370_v33, 0.0  ;;  %v2236_v48 = vunpack.c.h.b16 %v2112_v47 }
  0xac   : > { %v911_v29 = vand.u32 15, %v821_v38  ;;  %vm9957_vm0 = vsmask.f32 7424  ;;  %2018 = vmatmul.bf16.gmra.mxu3 %v1870_v60  ;;  %v826_v0 = vadd.s32 112, %v6663_v27  ;;  %vm7474_vm15 = vcmp.ne.s32.totalorder %v2221_v35, %v7243_v42  ;;  %v7486_v47 = vld [vmem:[#allocation2 + $0x38] sm:$0xff] }
  0xad   : > { %v1629_v25 = vsel %vm9957_vm0, %v1624_v1, %v7465_v28  ;;  %vm7479_vm14 = vcmp.ne.s32.totalorder %v2222_v15, %v7248_v34  ;;  %v2421_v5 = vsel %vm7461_vm1, %v6917_v22, 0  ;;  %v450_v38 = vpack.c.bf16 %v402_v10, %v402_v10  ;;  %v7488_v1 = vld [vmem:[#allocation2 + $0x3c] sm:$0xf]  ;;  %v7507_v10 = vld [vmem:[#allocation2 + $0x38] sm:$0xf] }
  0xae   : > { %1780 = vmatmul.bf16.gmra.mxu2 %v1629_v25  ;;  %vm7491_vm2 = vcmp.ne.s32.totalorder %v2228_v9, %v7243_v42  ;;  %vm7496_vm0 = vcmp.ne.s32.totalorder %v2229_v61, %v7248_v34  ;;  %v946_v15 = vand.u32 15, %v826_v0  ;;  %v1371_v22 = vsel %vm6745_vm8, %v7488_v1, 0  ;;  %v1944_v25 = vpop.f32.mrf.mxu1  ;;  %vm7513_vm11 = vmpackc.low %vm7479_vm14, %vm7474_vm15 }
  0xaf   : > { %v1560_v54 = vor.u32 %v1558_v40, %v7288_v51  ;;  %v1562_v9 = vshll.u32 %v7486_v47, 16  ;;  %v724_v60 = vshrl.u32 %v450_v38, 16  ;;  %v727_v6 = vshll.u32 %v450_v38, 16  ;;  %vm7544_vm14 = vmpackc.low %vm7496_vm0, %vm7491_vm2 }
  0xb0   : > { %v9966_v61 = vmov 0  ;;  %vm7518_vm10 = vcmp.ne.s32.totalorder %v2235_v53, %v7243_v42  ;;  %vm7523_vm12 = vcmp.ne.s32.totalorder %v2236_v48, %v7248_v34  ;;  %vm7527_vm1 = vcmp.ne.s32.totalorder %v911_v29, 15 }
  0xb1   : > { %v7503_v33 = vpop.f32.mrf.mxu3  ;;  %v9967_v61 = vsel %vm7513_vm11, 4294967295, %v9966_v61  ;;  %vm1242_vm5 = vcmp.ne.s32.totalorder %v946_v15, 0  ;;  %v7531_v26 = vrot.slane %v1562_v9, 1  ;;  %v722_v31 = vrot.slane %v7308_v57, 4  ;;  %v2769_v57 = vld [vmem:[#allocation2 + $0x8] sm:$0xf]  ;;  %vm7575_vm0 = vmpackc.low %vm7523_vm12, %vm7518_vm10 }
  0xb2   : > { %9968 = vst [vmem:[#allocation25_spill] sm:$0xff] %v9967_v61  ;;  %v7534_v38 = vrot.slane %v724_v60, 7  ;;  %vm7536_vm15 = vmpackc.low %vm1242_vm5, %vm1242_vm5  ;;  %v9976_v53 = vmov 0  ;;  %v1838_v62 = vunpack.c.l.b16 %v1371_v22  ;;  %v9979_v29 = vmov 0  ;;  %v2770_v60 = vld [vmem:[#allocation2 + $0xc] sm:$0xf] }
  0xb3   : > { %v9977_v53 = vsel %vm7536_vm15, 4294967295, %v9976_v53  ;;  %v9980_v29 = vsel %vm7544_vm14, 4294967295, %v9979_v29  ;;  %v1370_v48 = vsel %vm7536_vm15, %v7507_v10, 0  ;;  %v9982_v15 = vsel %vm7350_vm3, %v7377_v55, 0  ;;  %vm2034_vm5 = vmpackc.low %vm7527_vm1, %vm7527_vm1 }
  0xb4   : > { %9975 = vst [vmem:[#allocation26_spill] sm:$0xff] %v7534_v38  ;;  %v7555_v9 = vunpack.c.l.b16 %v9982_v15  ;;  %vm9983_vm2 = vsmask.f32 7424  ;;  %v729_v35 = vor.u32 %v727_v6, %v7534_v38  ;;  %v1837_v22 = vunpack.c.l.b16 %v1370_v48 }
  0xb5   : > { %v1711_v36 = vpop.f32.mrf.mxu0  ;;  %9978 = vst [vmem:[#allocation27_spill] sm:$0xff] %v9977_v53  ;;  %v1565_v50 = vsel %vm9983_vm2, %v1560_v54, %v7531_v26  ;;  %v7563_v56 = vunpack.c.l.b16 %v2419_v14  ;;  %v7565_v18 = vunpack.c.l.b16 %v2420_v4  ;;  %v2422_v55 = vsel %vm7513_vm11, %v6531_v58, 0  ;;  %v2785_v53 = vld [vmem:[#allocation2 + $0x48] sm:$0xf] }
  0xb6   : > { %9981 = vst [vmem:[#allocation28_spill] sm:$0xff] %v9980_v29  ;;  %v7569_v15 = vunpack.c.l.b16 %v2421_v5  ;;  %v9984_v54 = vmov 0  ;;  %1740 = vmatmul.bf16.gmra.mxu0 %v1565_v50  ;;  %v2423_v14 = vsel %vm7544_vm14, %v6991_v2, 0  ;;  %v730_v4 = vsel %vm6697_vm4, %v722_v31, %v729_v35  ;;  %v3116_v31 = vld [vmem:[#allocation2 + $0xc] sm:$0xf]  ;;  %v6441_v35 = vld [vmem:[%s9731_s3 + $0x1b8] sm:$0xff]  ;;  %v7621_v52 = vpop.f32.mrf.mxu1 }
  0xb7   : > { %v9985_v54 = vsel %vm7575_vm0, 4294967295, %v9984_v54  ;;  %v1862_v6 = vpack.c.b16 %v1838_v62, %v1837_v22  ;;  %v2801_v58 = vsel %vm6780_vm13, %v2769_v57, 0  ;;  %v9987_v5 = vmov 0   ;;  %806 = vst [vmem:[#allocation2 + $0x80] sm:$0xf] %v730_v4  ;;  %4142 = vmatpush.bf16.msra.mxu2 %v6441_v35  ;;  %v6496_v29 = vld [vmem:[%s9732_s4 + $0x30] sm:$0xff] }
  0xb8   : > { %9986 = vst [vmem:[#allocation29_spill] sm:$0xff] %v9985_v54  ;;  %v7592_v0 = vsel %vm2034_vm5, 65537, %v9987_v5  ;;  %v2802_v51 = vsel %vm6745_vm8, %v2770_v60, 0  ;;  %v2882_v2 = vunpack.c.l.b16 %v2801_v58  ;;  %v7596_v48 = vadd.f32 %v1944_v25, %v1711_v36  ;;  %v6465_v36 = vld [vmem:[%s9731_s3 + $0x1f8] sm:$0xff]  ;;  %v1751_v25 = vpop.f32.mrf.mxu2  ;;  %vm9997_vm5 = vmmov %vm9983_vm2 }
  0xb9   : > { %v2424_v62 = vsel %vm7575_vm0, %v6980_v17, 0  ;;  %v1566_v57 = vshrl.u32 %v7486_v47, 16  ;;  %1978 = vmatmul.bf16.gmra.mxu1 %v1862_v6  ;;  %v2883_v50 = vunpack.c.l.b16 %v2802_v51  ;;  %v2186_v40 = vunpack.c.l.b16 %v7179_v23  ;;  %v6473_v17 = vld [vmem:[%s9731_s3 + $0x238] sm:$0xff]  ;;  %v3117_v51 = vld [vmem:[#allocation2 + $0x10] sm:$0xf]  ;;  %9991 = vst [vmem:[#allocation32_spill] sm:$0xff] %v7621_v52  ;;  %v7623_v38 = vpop.f32.mrf.mxu3  ;;  %4592 = vmatpush.bf16.msra.mxu3 %v6465_v36 }
  0xba   : > { %9988 = vst [vmem:[#allocation30_spill] sm:$0xff] %v7596_v48  ;;  %v7614_v47 = vunpack.c.l.b16 %v2422_v55  ;;  %v9990_v60 = vrot.slane %v7339_v37, 7  ;;  %v2187_v6 = vunpack.c.h.b16 %v7179_v23  ;;  %v2534_v58 = vpack.c.b16 %v7565_v18, %v7563_v56  ;;  %v2024_v48 = vld [vmem:[#allocation2] sm:$0xe]  ;;  %v3565_v18 = vld [vmem:[#allocation2 + $0x8] sm:$0xe]  ;;  %4944 = vmatpush.bf16.msra.mxu0 %v6473_v17 }
  0xbb   : > { %9992 = vst [vmem:[#allocation33_spill] sm:$0xff] %v7623_v38  ;;  %v7628_v55 = vunpack.c.l.b16 %v2423_v14  ;;  %v9791_v37 = vrot.slane %v7592_v0, 7  ;;  %vm2190_vm12 = vcmp.ne.s32.totalorder %v2186_v40, %v7243_v42  ;;  %v7632_v56 = vunpack.c.l.b16 %v2424_v62  ;;  %v2771_v17 = vld [vmem:[#allocation2 + $0x10] sm:$0xf] }
  0xbc   : > { %v2113_v4 = vrot.slane %v9990_v60, 4  ;;  %v2914_v60 = vpack.c.b16 %v2883_v50, %v2882_v2  ;;  %v7635_v52 = vadd.s32 88, %v6663_v27  ;;  %vm2191_vm10 = vcmp.ne.s32.totalorder %v2187_v6, %v7248_v34 }
  0xbd   : > { %v7609_v22 = vpop.f32.mrf.mxu0  ;;  %v7639_v38 = vadd.f32 %v7503_v33, %v1751_v25  ;;  %v1568_v14 = vor.u32 %v1566_v57, %v7531_v26  ;;  %vm7642_vm1 = vmpackc.low %vm2191_vm10, %vm2190_vm12  ;;  %v9994_v2 = vmov 0  ;;  %v3567_v62 = vsel %vm7350_vm3, %v3116_v31, 0 }
  0xbe   : > { %9989 = vst [vmem:[#allocation31_spill] sm:$0xff] %v7609_v22  ;;  %v6497_v22 = vld [vmem:[%s9732_s4 + $0x38] sm:$0xff]  ;;  %v9995_v2 = vsel %vm7642_vm1, 4294967295, %v9994_v2  ;;  %v3568_v50 = vsel %vm7397_vm7, %v3117_v51, 0  ;;  %v3569_v40 = vsel %vm7438_vm6, %v3118_v11, 0  ;;  %v7655_v33 = vsel %vm7214_vm9, %v2113_v4, %v7179_v23  ;;  %3002 = vmatmul.bf16.vlgmr.msrb.gmra.mxu3 %v2914_v60 }
  0xbf   : > { %9993 = vst [vmem:[#allocation34_spill] sm:$0xff] %v7639_v38  ;;  %5425 = vmatpush.bf16.msra.mxu1 %v6497_v22  ;;  %v2417_v26 = vsel %vm7642_vm1, %v2024_v48, 0  ;;  %v3566_v57 = vsel %vm7642_vm1, %v3565_v18, 0  ;;  %v3650_v35 = vunpack.c.l.b16 %v3567_v62  ;;  %v7666_v31 = vsel %vm7214_vm9, %v7196_v8, %v9791_v37  ;;  %v1404_v11 = vld [vmem:[#allocation2 + $0x80] sm:$0x1] }
  0xc0   : > { %9996 = vst [vmem:[#allocation35_spill] sm:$0xff] %v9995_v2  ;;  %v2500_v36 = vunpack.c.l.b16 %v2417_v26  ;;  %v3649_v25 = vunpack.c.l.b16 %v3566_v57  ;;  %v3651_v22 = vunpack.c.l.b16 %v3568_v50  ;;  %v925_v4 = vand.u32 15, %v7635_v52  ;;  %v2772_v60 = vld [vmem:[#allocation2 + $0x14] sm:$0xf]  ;;  %v7673_v2 = vpop.f32.mrf.mxu2 }
  0xc1   : > { %v1487_v6 = vunpack.c.l.b16 %v1404_v11  ;;  %v1630_v48 = vshrl.u32 %v7414_v16, 16  ;;  %v3652_v51 = vunpack.c.l.b16 %v3569_v40  ;;  %v1573_v18 = vsel %vm9997_vm5, %v1568_v14, %v6772_v63  ;;  %9998 = vst [vmem:[#allocation36_spill] sm:$0xff] %v7673_v2  ;;  %v1949_v11 = vpop.f32.mrf.mxu1  ;;  %v1989_v16 = vpop.f32.mrf.mxu3 }
  0xc2   : > { %v2533_v62 = vpack.c.b16 %v7555_v9, %v2500_v36  ;;  %v2552_v38 = vrot.slane %v2534_v58, 1  ;;  %v3682_v37 = vpack.c.b16 %v3650_v35, %v3649_v25  ;;  %vm9795_vm2 = vcmask 1046528   ;;  %v3119_v25 = vld [vmem:[#allocation2 + $0x18] sm:$0xf] }
  0xc3   : > { %v1504_v57 = vpack.c.b16 %v1487_v6, %v1487_v6  ;;  %v3683_v50 = vpack.c.b16 %v3652_v51, %v3651_v22  ;;  %vm9999_vm12 = vnez %v9877_v3  ;;  %v2804_v63 = vsel %vm6745_vm8, %v2772_v60, 0  ;;  %v3120_v51 = vld [vmem:[#allocation2 + $0x1c] sm:$0xf]  ;;  %5426 = vmatpush.bf16.msra.mxu1 %v6496_v29 }
  0xc4   : > { %v2803_v52 = vsel %vm9999_vm12, %v2771_v17, 0  ;;  %v2551_v40 = vrot.slane %v2533_v62, 1  ;;  %v3699_v59 = vrot.slane %v3682_v37, 1  ;;  %v1632_v58 = vor.u32 %v1630_v48, %v7465_v28 }
  0xc5   : > { %v1716_v26 = vpop.f32.mrf.mxu0  ;;  %v1634_v14 = vshll.u32 %v1504_v57, 16  ;;  %v7682_v35 = vrot.slane %v3683_v50, 1  ;;  %v2535_v36 = vpack.c.b16 %v7614_v47, %v7569_v15  ;;  %v2242_v22 = vunpack.c.l.b16 %v7655_v33  ;;  %v7694_v15 = vld [vmem:[#allocation2 + $0x10] sm:$0xff] }
  0xc6   : > { %v7679_v9 = vadd.f32 %v1949_v11, %v1716_v26  ;;  %v2243_v17 = vunpack.c.h.b16 %v7655_v33  ;;  %v7689_v37 = vsel %vm9795_vm2, %v2551_v40, %v2552_v38  ;;  %v2884_v6 = vunpack.c.l.b16 %v2803_v52  ;;  %1745 = vmatmul.bf16.gmra.mxu0 %v1573_v18  ;;  %v6532_v11 = vld [vmem:[#allocation2 + $0x24] sm:$0xf] }
  0xc7   : > { %v1636_v60 = vrot.slane %v1634_v14, 1  ;;  %v3701_v28 = vsel %vm9795_vm2, %v3699_v59, %v7682_v35  ;;  %v2885_v48 = vunpack.c.l.b16 %v2804_v63  ;;  %v2554_v62 = vrot.slane %v2535_v36, 1 }
  0xc8   : > { %v2249_v26 = vunpack.c.l.b16 %v7666_v31  ;;  %v3251_v47 = vshll.u32 %v6402_v45, 16  ;;  %vm10000_vm10 = vnez %v9955_v46  ;;  %v3571_v57 = vsel %vm7513_vm11, %v3120_v51, 0 }
  0xc9   : > { %v3570_v33 = vsel %vm10000_vm10, %v3119_v25, 0  ;;  %v2250_v50 = vunpack.c.h.b16 %v7666_v31  ;;  %vm7701_vm5 = vcmp.ne.s32.totalorder %v925_v4, 15  ;;  %vm10003_vm2 = vsmask.f32 7424  ;;  %3804 = vmatmul.bf16.vlgmr.msrb.gmra.mxu1 %v3701_v28  ;;  %v7722_v25 = vpop.f32.mrf.mxu3 }
  0xca   : > { %v1637_v59 = vsel %vm10003_vm2, %v1632_v58, %v1636_v60  ;;  %vm10004_vm12 = vcmask 1046528   ;;  %vm7710_vm13 = vcmp.ne.s32.totalorder %v2242_v22, %v7243_v42  ;;  %v2536_v31 = vpack.c.b16 %v7632_v56, %v7628_v55  ;;  %10008 = vst [vmem:[#allocation38_spill] sm:$0xff] %v7722_v25 }
  0xcb   : > { %v7707_v52 = vsel %vm10004_vm12, %v2552_v38, %v2554_v62  ;;  %1785 = vmatmul.bf16.gmra.mxu2 %v1637_v59  ;;  %v2915_v4 = vpack.c.b16 %v2885_v48, %v2884_v6  ;;  %v3653_v58 = vunpack.c.l.b16 %v3570_v33  ;;  %v3654_v36 = vunpack.c.l.b16 %v3571_v57  ;;  %v7720_v38 = vpop.f32.mrf.mxu1  ;;  %vm2036_vm12 = vmpackc.low %vm7701_vm5, %vm7701_vm5  ;;  %v2773_v33 = vld [vmem:[#allocation2 + $0x18] sm:$0xf]  ;;  %v2774_v57 = vld [vmem:[#allocation2 + $0x1c] sm:$0xf] }
  0xcc   : > { %vm2247_vm2 = vcmp.ne.s32.totalorder %v2243_v17, %v7248_v34  ;;  %v3249_v22 = vshrl.u32 %v6402_v45, 16  ;;  %v3253_v51 = vrot.slane %v3251_v47, 1  ;;  %v3256_v60 = vshll.u32 %v7694_v15, 16 }
  0xcd   : > { %v7714_v63 = vpop.f32.mrf.mxu0  ;;  %vm2253_vm11 = vcmp.ne.s32.totalorder %v2249_v26, %v7243_v42  ;;  %vm2254_vm10 = vcmp.ne.s32.totalorder %v2250_v50, %v7248_v34  ;;  %v7731_v55 = vrot.slane %v2536_v31, 1  ;;  %vm7735_vm1 = vmpackc.low %vm2247_vm2, %vm7710_vm13  ;;  %v10009_v56 = vmov 0  ;;  %v3122_v50 = vld [vmem:[#allocation2 + $0x24] sm:$0xf] }
  0xce   : > { %v10010_v56 = vsel %vm7735_vm1, 4294967295, %v10009_v56  ;;  %v10012_v45 = vrot.slane %v7592_v0, 7  ;;  %3007 = vmatmul.bf16.gmra.mxu3 %v2915_v4  ;;  %v3684_v6 = vpack.c.b16 %v3654_v36, %v3653_v58  ;;  %vm10013_vm5 = vcmask 1046528   ;;  %vm7748_vm6 = vmpackc.low %vm2254_vm10, %vm2253_vm11 }
  0xcf   : > { %10011 = vst [vmem:[#allocation39_spill] sm:$0xff] %v10010_v56  ;;  %v7746_v28 = vsel %vm10013_vm5, %v2554_v62, %v7731_v55  ;;  %v10014_v48 = vmov 0  ;;  %v3254_v26 = vor.u32 %v3253_v51, %v3249_v22  ;;  %v7752_v47 = vrot.slane %v3256_v60, 1  ;;  %vm10021_vm10 = vmmov %vm10013_vm5 }
  0xd0   : > { %v1756_v40 = vpop.f32.mrf.mxu2  ;;  %v2119_v17 = vrot.slane %v10012_v45, 4  ;;  %v10015_v48 = vsel %vm7748_vm6, 4294967295, %v10014_v48  ;;  %v2425_v0 = vsel %vm7735_vm1, %v7068_v13, 0  ;;  %v825_v18 = vadd.s32 104, %v6663_v27 }
  0xd1   : > { %v7718_v14 = vadd.f32 %v1989_v16, %v1756_v40  ;;  %v7740_v16 = vsel %vm2036_vm12, 65537, %v9987_v5  ;;  %10016 = vst [vmem:[#allocation40_spill] sm:$0xff] %v10015_v48  ;;  %v2426_v40 = vsel %vm7748_vm6, %v6532_v11, 0  ;;  %v7766_v4 = vrot.slane %v3684_v6, 1  ;;  %v1994_v36 = vpop.f32.mrf.mxu3  ;;  %v3121_v11 = vld [vmem:[#allocation2 + $0x20] sm:$0xf] }
  0xd2   : > { %v2121_v31 = vsel %vm7214_vm9, %v2119_v17, %v7179_v23  ;;  %vm10018_vm13 = vsmask.f32 7424  ;;  %vm10019_vm11 = vnez %v9883_v32  ;;  %v2806_v51 = vsel %vm6745_vm8, %v2774_v57, 0 }
  0xd3   : > { %10007 = vst [vmem:[#allocation37_spill] sm:$0xff] %v7718_v14  ;;  %v1954_v58 = vpop.f32.mrf.mxu1  ;;  %v3259_v13 = vsel %vm10018_vm13, %v3254_v26, %v7752_v47  ;;  %v2805_v22 = vsel %vm10019_vm11, %v2773_v33, 0  ;;  %v2508_v45 = vunpack.c.l.b16 %v2425_v0  ;;  %v2509_v25 = vunpack.c.l.b16 %v2426_v40  ;;  %v7784_v0 = vld [vmem:[#allocation2 + $0x18] sm:$0xff] }
  0xd4   : > { %v10020_v17 = vrot.slane %v7740_v16, 7  ;;  %v939_v26 = vand.u32 15, %v825_v18  ;;  %v3703_v33 = vsel %vm10021_vm10, %v7682_v35, %v7766_v4  ;;  %v2886_v57 = vunpack.c.l.b16 %v2805_v22  ;;  %v6472_v22 = vld [vmem:[%s9731_s3 + $0x230] sm:$0xff] }
  0xd5   : > { %v1721_v62 = vpop.f32.mrf.mxu0  ;;  %v3572_v40 = vsel %vm7544_vm14, %v3121_v11, 0  ;;  %v3573_v32 = vsel %vm7575_vm0, %v3122_v50, 0  ;;  %v6464_v50 = vld [vmem:[%s9731_s3 + $0x1f0] sm:$0xff]  ;;  %v3260_v2 = vshrl.u32 %v7694_v15, 16  ;;  %v3264_v3 = vshll.u32 %v7784_v0, 16  ;;  %4945 = vmatpush.bf16.msra.mxu0 %v6472_v22 }
  0xd6   : > { %v7774_v60 = vadd.f32 %v1954_v58, %v1721_v62  ;;  %v2124_v6 = vsel %vm7214_vm9, %v7196_v8, %v10020_v17  ;;  %3452 = vmatmul.bf16.vlgmr.msrb.gmra.mxu0 %v3259_v13  ;;  %v2887_v62 = vunpack.c.l.b16 %v2806_v51  ;;  %v2257_v58 = vunpack.c.h.b16 %v2121_v31  ;;  %4593 = vmatpush.bf16.msra.mxu3 %v6464_v50 }
  0xd7   : > { %v2263_v14 = vunpack.c.l.b16 %v2124_v6  ;;  %v2264_v17 = vunpack.c.h.b16 %v2124_v6  ;;  %vm7795_vm12 = vcmp.ne.s32.totalorder %v939_v26, 15  ;;  %v2537_v51 = vpack.c.b16 %v2509_v25, %v2508_v45 }
  0xd8   : > { %v7759_v59 = vpop.f32.mrf.mxu2  ;;  %v2916_v11 = vpack.c.b16 %v2887_v62, %v2886_v57  ;;  %v3656_v26 = vunpack.c.l.b16 %v3573_v32  ;;  %vm2261_vm5 = vcmp.ne.s32.totalorder %v2257_v58, %v7248_v34  ;;  %vm2038_vm11 = vmpackc.low %vm7795_vm12, %vm7795_vm12  ;;  %vm10028_vm0 = vcmask 1046528   ;;  %v2776_v62 = vld [vmem:[#allocation2 + $0x24] sm:$0xf] }
  0xd9   : > { %10017 = vst [vmem:[#allocation41_spill] sm:$0xff] %v7759_v59  ;;  %v2256_v59 = vunpack.c.l.b16 %v2121_v31  ;;  %3809 = vmatmul.bf16.gmra.mxu1 %v3703_v33  ;;  %v6440_v31 = vld [vmem:[%s9731_s3 + $0x1b0] sm:$0xff]  ;;  %v7815_v54 = vpop.f32.mrf.mxu3  ;;  %v7823_v25 = vrot.slane %v2537_v51, 1  ;;  %vm2267_vm13 = vcmp.ne.s32.totalorder %v2263_v14, %v7243_v42  ;;  %vm2268_vm10 = vcmp.ne.s32.totalorder %v2264_v17, %v7248_v34  ;;  %v3124_v51 = vld [vmem:[#allocation2 + $0x2c] sm:$0xf] }
  0xda   : > { %10027 = vst [vmem:[#allocation43_spill] sm:$0xff] %v7815_v54  ;;  %4143 = vmatpush.bf16.msra.mxu2 %v6440_v31  ;;  %v10029_v15 = vmov 0  ;;  %vm7841_vm7 = vmpackc.low %vm2268_vm10, %vm2267_vm13  ;;  %v7846_v45 = vsel %vm2038_vm11, 65537, %v9987_v5  ;;  %v3262_v29 = vor.u32 %v3260_v2, %v7752_v47  ;;  %v3266_v57 = vrot.slane %v3264_v3, 1 }
  0xdb   : > { %vm7791_vm2 = vcmp.ne.s32.totalorder %v2256_v59, %v7243_v42  ;;  %2656 = vmatmul.bf16.vlgmr.msrb.gmra.mxu2 %v7689_v37  ;;  %v3655_v37 = vunpack.c.l.b16 %v3572_v40  ;;  %v7813_v33 = vpop.f32.mrf.mxu1  ;;  %v7833_v32 = vsel %vm10028_vm0, %v7731_v55, %v7823_v25  ;;  %v2775_v55 = vld [vmem:[#allocation2 + $0x20] sm:$0xf]  ;;  %v10035_v58 = vrot.slane %v7740_v16, 7 }
  0xdc   : > { %vm7837_vm14 = vmpackc.low %vm2261_vm5, %vm7791_vm2  ;;  %v2428_v35 = vsel %vm7841_vm7, %v7146_v41, 0  ;;  %v9807_v31 = vrot.slane %v7846_v45, 7  ;;  %vm10037_vm0 = vsmask.f32 7424  ;;  %vm10038_vm11 = vnez %v9889_v12 }
  0xdd   : > { %v7806_v59 = vpop.f32.mrf.mxu0  ;;  %v10030_v15 = vsel %vm7837_vm14, 4294967295, %v10029_v15  ;;  %v3685_v14 = vpack.c.b16 %v3656_v26, %v3655_v37  ;;  %v2125_v40 = vrot.slane %v10035_v58, 4  ;;  %v2427_v18 = vsel %vm7837_vm14, %v7169_v49, 0  ;;  %v3123_v49 = vld [vmem:[#allocation2 + $0x28] sm:$0xf]  ;;  %v7880_v58 = vld [vmem:[#allocation2 + $0x20] sm:$0xff] }
  0xde   : > { %10031 = vst [vmem:[#allocation44_spill] sm:$0xff] %v10030_v15  ;;  %3012 = vmatmul.bf16.gmra.mxu3 %v2916_v11  ;;  %v3267_v2 = vsel %vm10037_vm0, %v3262_v29, %v3266_v57  ;;  %v2807_v16 = vsel %vm10038_vm11, %v2775_v55, 0  ;;  %v2808_v47 = vsel %vm6745_vm8, %v2776_v62, 0  ;;  %v2510_v11 = vunpack.c.l.b16 %v2427_v18 }
  0xdf   : > { %v7860_v50 = vrot.slane %v3685_v14, 1  ;;  %v2511_v37 = vunpack.c.l.b16 %v2428_v35  ;;  %v2127_v41 = vsel %vm7214_vm9, %v2125_v40, %v7179_v23  ;;  %v2130_v14 = vsel %vm7214_vm9, %v7196_v8, %v9807_v31 }
  0xe0   : > { %vm10039_vm2 = vcmask 1046528   ;;  %v2888_v55 = vunpack.c.l.b16 %v2807_v16  ;;  %v2889_v62 = vunpack.c.l.b16 %v2808_v47  ;;  %v3574_v40 = vsel %vm7735_vm1, %v3123_v49, 0 }
  0xe1   : > { %v1761_v13 = vpop.f32.mrf.mxu2  ;;  %v3705_v29 = vsel %vm10039_vm2, %v7766_v4, %v7860_v50  ;;  %v3575_v18 = vsel %vm7748_vm6, %v3124_v51, 0  ;;  %v2270_v35 = vunpack.c.l.b16 %v2127_v41  ;;  %v2277_v31 = vunpack.c.l.b16 %v2130_v14  ;;  %vm10042_vm0 = vmmov %vm10039_vm2 }
  0xe2   : > { %v7811_v6 = vadd.f32 %v1994_v36, %v1761_v13  ;;  %v10032_v36 = vmov 0  ;;  %v1999_v3 = vpop.f32.mrf.mxu3  ;;  %v2538_v16 = vpack.c.b16 %v2511_v37, %v2510_v11  ;;  %v2917_v47 = vpack.c.b16 %v2889_v62, %v2888_v55  ;;  %v2778_v55 = vld [vmem:[#allocation2 + $0x2c] sm:$0xf] }
  0xe3   : > { %v10033_v36 = vsel %vm7841_vm7, 4294967295, %v10032_v36  ;;  %v1959_v22 = vpop.f32.mrf.mxu1  ;;  %v3658_v12 = vunpack.c.l.b16 %v3575_v18  ;;  %v3268_v49 = vshrl.u32 %v7784_v0, 16  ;;  %v3272_v51 = vshll.u32 %v7880_v58, 16 }
  0xe4   : > { %10026 = vst [vmem:[#allocation42_spill] sm:$0xff] %v7811_v6  ;;  %vm2274_vm12 = vcmp.ne.s32.totalorder %v2270_v35, %v7243_v42  ;;  %vm2281_vm13 = vcmp.ne.s32.totalorder %v2277_v31, %v7243_v42  ;;  %v10043_v11 = vmov 0  ;;  %v2777_v31 = vld [vmem:[#allocation2 + $0x28] sm:$0xf] }
  0xe5   : > { %10034 = vst [vmem:[#allocation45_spill] sm:$0xff] %v10033_v36  ;;  %v3270_v37 = vor.u32 %v3268_v49, %v3266_v57 }
  0xe6   : > { %3457 = vmatmul.bf16.gmra.mxu0 %v3267_v2  ;;  %v2278_v2 = vunpack.c.h.b16 %v2130_v14  ;;  %v3274_v14 = vrot.slane %v3272_v51, 1 }
  0xe8   : > { %vm2282_vm10 = vcmp.ne.s32.totalorder %v2278_v2, %v7248_v34  ;;  %v3125_v2 = vld [vmem:[#allocation2 + $0x30] sm:$0xf] }
  0xe9   : > { %v7851_v17 = vpop.f32.mrf.mxu2  ;;  %3814 = vmatmul.bf16.gmra.mxu1 %v3705_v29  ;;  %vm7909_vm11 = vmpackc.low %vm2282_vm10, %vm2281_vm13  ;;  %v10046_v29 = vmov 0 }
  0xea   : > { %10036 = vst [vmem:[#allocation46_spill] sm:$0xff] %v7851_v17  ;;  %v3657_v17 = vunpack.c.l.b16 %v3574_v40  ;;  %v7892_v6 = vpop.f32.mrf.mxu3  ;;  %v10047_v29 = vsel %vm7909_vm11, 4294967295, %v10046_v29  ;;  %v2430_v40 = vsel %vm7909_vm11, %v7295_v7, 0  ;;  %vm10054_vm10 = vmmov %vm10042_vm0 }
  0xeb   : > { %2661 = vmatmul.bf16.gmra.mxu2 %v7707_v52  ;;  %10041 = vst [vmem:[#allocation48_spill] sm:$0xff] %v7892_v6  ;;  %v7913_v62 = vpop.f32.mrf.mxu1 }
  0xec   : > { %10048 = vst [vmem:[#allocation50_spill] sm:$0xff] %v10047_v29  ;;  %v3130_v29 = vld [vmem:[#allocation2 + $0x44] sm:$0xf] }
  0xee   : > { %3017 = vmatmul.bf16.gmra.mxu3 %v2917_v47  ;;  %v2513_v47 = vunpack.c.l.b16 %v2430_v40  ;;  %v6463_v40 = vld [vmem:[%s9731_s3 + $0x1e8] sm:$0xff] }
  0xef   : > { %v1726_v13 = vpop.f32.mrf.mxu0  ;;  %4594 = vmatpush.bf16.msra.mxu3 %v6463_v40  ;;  %v2779_v40 = vld [vmem:[#allocation2 + $0x30] sm:$0xf] }
  0xf0   : > { %v7870_v26 = vadd.f32 %v1959_v22, %v1726_v13  ;;  %v2271_v13 = vunpack.c.h.b16 %v2127_v41  ;;  %v827_v22 = vadd.s32 120, %v6663_v27  ;;  %v7894_v41 = vrot.slane %v2538_v16, 1 }
  0xf1   : > { %v1766_v4 = vpop.f32.mrf.mxu2 }
  0xf2   : > { %v7888_v54 = vadd.f32 %v1999_v3, %v1766_v4  ;;  %vm2275_vm5 = vcmp.ne.s32.totalorder %v2271_v13, %v7248_v34  ;;  %v7903_v52 = vsel %vm10042_vm0, %v7823_v25, %v7894_v41  ;;  %v953_v0 = vand.u32 15, %v827_v22  ;;  %v2004_v16 = vpop.f32.mrf.mxu3 }
  0xf3   : > { %v3686_v3 = vpack.c.b16 %v3658_v12, %v3657_v17  ;;  %vm7905_vm2 = vmpackc.low %vm2275_vm5, %vm2274_vm12  ;;  %vm10051_vm12 = vsmask.f32 7424  ;;  %vm10052_vm5 = vnez %v9895_v21  ;;  %v2810_v13 = vsel %vm6745_vm8, %v2778_v55, 0 }
  0xf4   : > { %10040 = vst [vmem:[#allocation47_spill] sm:$0xff] %v7888_v54  ;;  %v10044_v11 = vsel %vm7905_vm2, 4294967295, %v10043_v11  ;;  %vm7915_vm6 = vcmp.ne.s32.totalorder %v953_v0, 15  ;;  %v2429_v12 = vsel %vm7905_vm2, %v7321_v20, 0  ;;  %v3275_v18 = vsel %vm10051_vm12, %v3270_v37, %v3274_v14  ;;  %v3126_v20 = vld [vmem:[#allocation2 + $0x34] sm:$0xf] }
  0xf5   : > { %10045 = vst [vmem:[#allocation49_spill] sm:$0xff] %v10044_v11  ;;  %v7922_v17 = vrot.slane %v3686_v3, 1  ;;  %v2809_v35 = vsel %vm10052_vm5, %v2777_v31, 0  ;;  %vm2040_vm13 = vmpackc.low %vm7915_vm6, %vm7915_vm6  ;;  %v2512_v4 = vunpack.c.l.b16 %v2429_v12  ;;  %v2891_v51 = vunpack.c.l.b16 %v2810_v13  ;;  %v7942_v0 = vld [vmem:[#allocation2 + $0x28] sm:$0xff]  ;;  %v1964_v6 = vpop.f32.mrf.mxu1  ;;  %v2784_v11 = vld [vmem:[#allocation2 + $0x44] sm:$0xf] }
  0xf6   : > { %3462 = vmatmul.bf16.gmra.mxu0 %v3275_v18  ;;  %v2890_v49 = vunpack.c.l.b16 %v2809_v35  ;;  %v3576_v3 = vsel %vm7837_vm14, %v3125_v2, 0  ;;  %v3577_v37 = vsel %vm7841_vm7, %v3126_v20, 0  ;;  %v7949_v31 = vsel %vm2040_vm13, 65537, %v9987_v5  ;;  %v6471_v18 = vld [vmem:[%s9731_s3 + $0x228] sm:$0xff]  ;;  %vm10056_vm6 = vmmov %vm10042_vm0 }
  0xf7   : > { %v7924_v57 = vpop.f32.mrf.mxu0  ;;  %v3707_v7 = vsel %vm10054_vm10, %v7860_v50, %v7922_v17  ;;  %v829_v55 = vadd.s32 136, %v6663_v27  ;;  %v10055_v25 = vrot.slane %v7846_v45, 7  ;;  %v6439_v50 = vld [vmem:[%s9731_s3 + $0x1a8] sm:$0xff]  ;;  %v3659_v13 = vunpack.c.l.b16 %v3576_v3  ;;  %4946 = vmatpush.bf16.msra.mxu0 %v6471_v18 }
  0xf8   : > { %v2918_v35 = vpack.c.b16 %v2891_v51, %v2890_v49  ;;  %v3660_v2 = vunpack.c.l.b16 %v3577_v37  ;;  %v2539_v45 = vpack.c.b16 %v2513_v47, %v2512_v4  ;;  %v2135_v20 = vrot.slane %v7949_v31, 7  ;;  %4144 = vmatpush.bf16.msra.mxu2 %v6439_v50 }
  0xf9   : > { %v7934_v22 = vpop.f32.mrf.mxu2  ;;  %v2131_v12 = vrot.slane %v10055_v25, 4  ;;  %3819 = vmatmul.bf16.gmra.mxu1 %v3707_v7  ;;  %v3276_v7 = vshrl.u32 %v7880_v58, 16  ;;  %v3280_v25 = vshll.u32 %v7942_v0, 16  ;;  %v967_v3 = vand.u32 15, %v829_v55 }
  0xfa   : > { %10053 = vst [vmem:[#allocation51_spill] sm:$0xff] %v7934_v22  ;;  %v7970_v49 = vrot.slane %v2539_v45, 1  ;;  %v3687_v58 = vpack.c.b16 %v3660_v2, %v3659_v13  ;;  %v2136_v31 = vsel %vm7214_vm9, %v7196_v8, %v2135_v20  ;;  %v7987_v55 = vpop.f32.mrf.mxu3  ;;  %vm10061_vm13 = vnez %v9904_v39  ;;  %v2781_v39 = vld [vmem:[#allocation2 + $0x38] sm:$0xf] }
  0xfb   : > { %2666 = vmatmul.bf16.gmra.mxu2 %v7746_v28  ;;  %v6495_v28 = vld [vmem:[%s9732_s4 + $0x28] sm:$0xff]  ;;  %v2133_v4 = vsel %vm7214_vm9, %v2131_v12, %v7179_v23  ;;  %v3278_v50 = vor.u32 %v3276_v7, %v3274_v14  ;;  %10058 = vst [vmem:[#allocation53_spill] sm:$0xff] %v7987_v55  ;;  %v2780_v12 = vld [vmem:[#allocation2 + $0x34] sm:$0xf]  ;;  %vm7989_vm0 = vcmp.ne.s32.totalorder %v967_v3, 15  ;;  %v2811_v14 = vsel %vm10061_vm13, %v2779_v40, 0 }
  0xfc   : > { %5427 = vmatpush.bf16.msra.mxu1 %v6495_v28  ;;  %v7980_v37 = vsel %vm10056_vm6, %v7894_v41, %v7970_v49  ;;  %v2284_v18 = vunpack.c.l.b16 %v2133_v4  ;;  %v2285_v13 = vunpack.c.h.b16 %v2133_v4  ;;  %v2291_v41 = vunpack.c.l.b16 %v2136_v31  ;;  %v3127_v7 = vld [vmem:[#allocation2 + $0x38] sm:$0xf]  ;;  %vm2042_vm10 = vmpackc.low %vm7989_vm0, %vm7989_vm0 }
  0xfd   : > { %v7993_v2 = vrot.slane %v3687_v58, 1  ;;  %v2292_v28 = vunpack.c.h.b16 %v2136_v31  ;;  %v831_v3 = vadd.s32 152, %v6663_v27  ;;  %v8005_v4 = vpop.f32.mrf.mxu1  ;;  %vm10062_vm13 = vcmask 1046528  }
  0xfe   : > { %3022 = vmatmul.bf16.gmra.mxu3 %v2918_v35  ;;  %vm2288_vm6 = vcmp.ne.s32.totalorder %v2284_v18, %v7243_v42  ;;  %v2892_v58 = vunpack.c.l.b16 %v2811_v14  ;;  %vm2295_vm5 = vcmp.ne.s32.totalorder %v2291_v41, %v7243_v42  ;;  %v3578_v40 = vsel %vm7905_vm2, %v3127_v7, 0 }
  0xff   : > { %vm2296_vm7 = vcmp.ne.s32.totalorder %v2292_v28, %v7248_v34  ;;  %v2074_v18 = vsel %vm2042_vm10, 65537, %v9987_v5  ;;  %v10063_v35 = vmov 0  ;;  %v10066_v41 = vmov 0 }
 0x100   : > { %v1731_v22 = vpop.f32.mrf.mxu0  ;;  %v981_v7 = vand.u32 15, %v831_v3  ;;  %vm10072_vm10 = vsmask.f32 7424 }
 0x101   : > { %v7972_v51 = vadd.f32 %v1964_v6, %v1731_v22  ;;  %v3282_v6 = vrot.slane %v3280_v25, 1  ;;  %v3128_v25 = vld [vmem:[#allocation2 + $0x3c] sm:$0xf] }
 0x102   : > { %v1771_v47 = vpop.f32.mrf.mxu2 }
 0x103   : > { %v7985_v22 = vadd.f32 %v2004_v16, %v1771_v47  ;;  %v3283_v45 = vsel %vm10051_vm12, %v3278_v50, %v3282_v6  ;;  %v2812_v16 = vsel %vm6745_vm8, %v2780_v12, 0  ;;  %vm2289_vm12 = vcmp.ne.s32.totalorder %v2285_v13, %v7248_v34  ;;  %v8013_v50 = vld [vmem:[#allocation2 + $0x30] sm:$0xff] }
 0x104   : > { %v3709_v47 = vsel %vm10062_vm13, %v7922_v17, %v7993_v2  ;;  %v2893_v31 = vunpack.c.l.b16 %v2812_v16  ;;  %v3579_v12 = vsel %vm7909_vm11, %v3128_v25, 0  ;;  %vm8020_vm0 = vmpackc.low %vm2289_vm12, %vm2288_vm6  ;;  %v2009_v17 = vpop.f32.mrf.mxu3  ;;  %v2137_v13 = vrot.slane %v2135_v20, 4 }
 0x105   : > { %10057 = vst [vmem:[#allocation52_spill] sm:$0xff] %v7985_v22  ;;  %v10064_v35 = vsel %vm8020_vm0, 4294967295, %v10063_v35  ;;  %vm8025_vm13 = vmpackc.low %vm2296_vm7, %vm2295_vm5  ;;  %v3662_v14 = vunpack.c.l.b16 %v3579_v12  ;;  %v2141_v16 = vrot.slane %v2074_v18, 7  ;;  %v3284_v25 = vshrl.u32 %v7942_v0, 16 }
 0x106   : > { %3467 = vmatmul.bf16.gmra.mxu0 %v3283_v45  ;;  %10065 = vst [vmem:[#allocation54_spill] sm:$0xff] %v10064_v35  ;;  %v10067_v41 = vsel %vm8025_vm13, 4294967295, %v10066_v41  ;;  %v2919_v28 = vpack.c.b16 %v2893_v31, %v2892_v58  ;;  %v3661_v45 = vunpack.c.l.b16 %v3578_v40  ;;  %v3288_v55 = vshll.u32 %v8013_v50, 16  ;;  %v2783_v35 = vld [vmem:[#allocation2 + $0x40] sm:$0xf] }
 0x107   : > { %10068 = vst [vmem:[#allocation55_spill] sm:$0xff] %v10067_v41  ;;  %v2432_v20 = vsel %vm8025_vm13, %v7488_v1, 0  ;;  %v2142_v0 = vsel %vm7214_vm9, %v7196_v8, %v2141_v16  ;;  %vm8045_vm7 = vcmp.ne.s32.totalorder %v981_v7, 15  ;;  %v1969_v12 = vpop.f32.mrf.mxu1  ;;  %vm10074_vm6 = vnez %v9926_v43  ;;  %v6534_v41 = vld [vmem:[#allocation2 + $0x44] sm:$0xf] }
 0x108   : > { %v3688_v3 = vpack.c.b16 %v3662_v14, %v3661_v45  ;;  %v8049_v40 = vrot.slane %v3288_v55, 1  ;;  %v8051_v1 = vpop.f32.mrf.mxu0  ;;  %v2305_v14 = vunpack.c.l.b16 %v2142_v0  ;;  %vm2044_vm5 = vmpackc.low %vm8045_vm7, %vm8045_vm7  ;;  %v2306_v22 = vunpack.c.h.b16 %v2142_v0 }
 0x109   : > { %3824 = vmatmul.bf16.gmra.mxu1 %v3709_v47  ;;  %v2139_v47 = vsel %vm7214_vm9, %v2137_v13, %v7179_v23  ;;  %v2515_v13 = vunpack.c.l.b16 %v2432_v20 }
 0x10a   : > { %v8040_v58 = vpop.f32.mrf.mxu2  ;;  %v2299_v45 = vunpack.c.h.b16 %v2139_v47  ;;  %v8056_v7 = vrot.slane %v3688_v3, 1  ;;  %v8073_v3 = vsel %vm2044_vm5, 65537, %v9987_v5  ;;  %vm8086_vm11 = vcmp.ne.s32.totalorder %v2306_v22, %v7248_v34 }
 0x10b   : > { %2671 = vmatmul.bf16.gmra.mxu2 %v7833_v32  ;;  %v2431_v32 = vsel %vm8020_vm0, %v7507_v10, 0  ;;  %10069 = vst [vmem:[#allocation56_spill] sm:$0xff] %v8040_v58  ;;  %v3286_v10 = vor.u32 %v3284_v25, %v3282_v6  ;;  %v2782_v58 = vld [vmem:[#allocation2 + $0x3c] sm:$0xf]  ;;  %v2813_v25 = vsel %vm10074_vm6, %v2781_v39, 0  ;;  %vm8081_vm6 = vcmp.ne.s32.totalorder %v2305_v14, %v7243_v42 }
 0x10c   : > { %v2514_v18 = vunpack.c.l.b16 %v2431_v32  ;;  %v8060_v55 = vpop.f32.mrf.mxu3  ;;  %v2814_v32 = vsel %vm6745_vm8, %v2782_v58, 0  ;;  %vm2303_vm7 = vcmp.ne.s32.totalorder %v2299_v45, %v7248_v34  ;;  %v2894_v0 = vunpack.c.l.b16 %v2813_v25 }
 0x10d   : > { %v3291_v6 = vsel %vm10072_vm10, %v3286_v10, %v8049_v40  ;;  %10073 = vst [vmem:[#allocation57_spill] sm:$0xff] %v8060_v55  ;;  %vm10077_vm10 = vcmask 1046528   ;;  %v2895_v58 = vunpack.c.l.b16 %v2814_v32  ;;  %v10083_v22 = vmov 0 }
 0x10e   : > { %3027 = vmatmul.bf16.gmra.mxu3 %v2919_v28  ;;  %v2298_v28 = vunpack.c.l.b16 %v2139_v47  ;;  %v2540_v20 = vpack.c.b16 %v2515_v13, %v2514_v18  ;;  %v3129_v47 = vld [vmem:[#allocation2 + $0x40] sm:$0xf]  ;;  %v3711_v39 = vsel %vm10077_vm10, %v7993_v2, %v8056_v7  ;;  %v3581_v2 = vsel %vm8025_vm13, %v3130_v29, 0  ;;  %vm10082_vm5 = vmmov %vm10077_vm10 }
 0x10f   : > { %v3580_v45 = vsel %vm8020_vm0, %v3129_v47, 0  ;;  %v2143_v25 = vrot.slane %v2141_v16, 4  ;;  %v8112_v55 = vpop.f32.mrf.mxu1  ;;  %v6462_v16 = vld [vmem:[%s9731_s3 + $0x1e0] sm:$0xff]  ;;  %v2920_v31 = vpack.c.b16 %v2895_v58, %v2894_v0  ;;  %v3292_v32 = vshrl.u32 %v8013_v50, 16 }
 0x110   : > { %vm8067_vm12 = vcmp.ne.s32.totalorder %v2298_v28, %v7243_v42  ;;  %v8078_v10 = vrot.slane %v2540_v20, 1  ;;  %v8090_v28 = vld [vmem:[#allocation2 + $0x38] sm:$0xff]  ;;  %v833_v20 = vadd.s32 168, %v6663_v27  ;;  %10087 = vst [vmem:[#allocation60_spill] sm:$0xff] %v8112_v55  ;;  %4595 = vmatpush.bf16.msra.mxu3 %v6462_v16  ;;  %v6470_v18 = vld [vmem:[%s9731_s3 + $0x220] sm:$0xff] }
 0x111   : > { %vm8103_vm10 = vmpackc.low %vm2303_vm7, %vm8067_vm12  ;;  %v3296_v43 = vshll.u32 %v8090_v28, 16  ;;  %v6533_v13 = vld [vmem:[#allocation2 + $0x40] sm:$0xf]  ;;  %4947 = vmatpush.bf16.msra.mxu0 %v6470_v18  ;;  %v3132_v18 = vld [vmem:[#allocation2 + $0x4c] sm:$0xf] }
 0x112   : > { %v8099_v14 = vsel %vm10082_vm5, %v7970_v49, %v8078_v10  ;;  %v10084_v22 = vsel %vm8103_vm10, 4294967295, %v10083_v22  ;;  %v6438_v49 = vld [vmem:[%s9731_s3 + $0x1a0] sm:$0xff]  ;;  %vm8124_vm12 = vmpackc.low %vm8086_vm11, %vm8081_vm6  ;;  %v995_v0 = vand.u32 15, %v833_v20  ;;  %vm10094_vm6 = vsmask.f32 7424 }
 0x113   : > { %10085 = vst [vmem:[#allocation58_spill] sm:$0xff] %v10084_v22  ;;  %4145 = vmatpush.bf16.msra.mxu2 %v6438_v49  ;;  %v6494_v50 = vld [vmem:[%s9732_s4 + $0x20] sm:$0xff]  ;;  %v3298_v20 = vrot.slane %v3296_v43, 1  ;;  %v2815_v43 = vsel %vm7536_vm15, %v2783_v35, 0 }
 0x114   : > { %5428 = vmatpush.bf16.msra.mxu1 %v6494_v50  ;;  %vm8153_vm11 = vcmp.ne.s32.totalorder %v995_v0, 15  ;;  %v2896_v35 = vunpack.c.l.b16 %v2815_v43 }
 0x115   : > { %v1736_v29 = vpop.f32.mrf.mxu0  ;;  %vm2046_vm7 = vmpackc.low %vm8153_vm11, %vm8153_vm11  ;;  %vm10101_vm11 = vcmask 1046528  }
 0x116   : > { %3472 = vmatmul.bf16.gmra.mxu0 %v3291_v6  ;;  %v1776_v6 = vpop.f32.mrf.mxu2  ;;  %v8139_v58 = vpop.f32.mrf.mxu3 }
 0x117   : > { %v8110_v47 = vadd.f32 %v2009_v17, %v1776_v6  ;;  %v8128_v17 = vadd.f32 %v1969_v12, %v1736_v29  ;;  %v3664_v6 = vunpack.c.l.b16 %v3581_v2  ;;  %v2434_v12 = vsel %vm8124_vm12, %v6534_v41, 0 }
 0x118   : > { %v10091_v2 = vrot.slane %v8073_v3, 7  ;;  %v3294_v41 = vor.u32 %v3292_v32, %v8049_v40  ;;  %v2816_v40 = vsel %vm6745_vm8, %v2784_v11, 0  ;;  %v6536_v11 = vld [vmem:[#allocation2 + $0x4c] sm:$0xf] }
 0x119   : > { %10086 = vst [vmem:[#allocation59_spill] sm:$0xff] %v8110_v47  ;;  %3829 = vmatmul.bf16.gmra.mxu1 %v3711_v39  ;;  %v3663_v39 = vunpack.c.l.b16 %v3580_v45  ;;  %v2433_v47 = vsel %vm8103_vm10, %v6533_v13, 0  ;;  %v2145_v45 = vsel %vm7214_vm9, %v2143_v25, %v7179_v23  ;;  %v2517_v13 = vunpack.c.l.b16 %v2434_v12 }
 0x11a   : > { %v2148_v29 = vsel %vm7214_vm9, %v7196_v8, %v10091_v2  ;;  %v2516_v16 = vunpack.c.l.b16 %v2433_v47  ;;  %v2312_v21 = vunpack.c.l.b16 %v2145_v45  ;;  %v2313_v54 = vunpack.c.h.b16 %v2145_v45  ;;  %v3131_v47 = vld [vmem:[#allocation2 + $0x48] sm:$0xf]  ;;  %v8193_v45 = vld [vmem:[#allocation2 + $0x40] sm:$0xff] }
 0x11b   : > { %2676 = vmatmul.bf16.gmra.mxu2 %v7903_v52  ;;  %v10088_v52 = vmov 0  ;;  %v3689_v49 = vpack.c.b16 %v3664_v6, %v3663_v39  ;;  %v2319_v25 = vunpack.c.l.b16 %v2148_v29  ;;  %v3299_v39 = vsel %vm10094_vm6, %v3294_v41, %v3298_v20 }
 0x11c   : > { %v10089_v52 = vsel %vm8124_vm12, 4294967295, %v10088_v52  ;;  %v2541_v32 = vpack.c.b16 %v2517_v13, %v2516_v16  ;;  %vm8170_vm5 = vcmp.ne.s32.totalorder %v2312_v21, %v7243_v42  ;;  %vm8175_vm6 = vcmp.ne.s32.totalorder %v2313_v54, %v7248_v34 }
 0x11d   : > { %10090 = vst [vmem:[#allocation61_spill] sm:$0xff] %v10089_v52  ;;  %v8157_v15 = vrot.slane %v3689_v49, 1  ;;  %vm8180_vm15 = vcmp.ne.s32.totalorder %v2319_v25, %v7243_v42  ;;  %v2897_v21 = vunpack.c.l.b16 %v2816_v40  ;;  %v8191_v54 = vsel %vm2046_vm7, 65537, %v9987_v5  ;;  %vm8212_vm7 = vmpackc.low %vm8175_vm6, %vm8170_vm5  ;;  %v2786_v52 = vld [vmem:[#allocation2 + $0x4c] sm:$0xf] }
 0x11e   : > { %3032 = vmatmul.bf16.gmra.mxu3 %v2920_v31  ;;  %v2320_v31 = vunpack.c.h.b16 %v2148_v29  ;;  %v8187_v50 = vrot.slane %v2541_v32, 1  ;;  %v8195_v2 = vpop.f32.mrf.mxu3  ;;  %v3582_v29 = vsel %vm8103_vm10, %v3131_v47, 0  ;;  %v3583_v49 = vsel %vm8124_vm12, %v3132_v18, 0 }
 0x11f   : > { %v8160_v6 = vpop.f32.mrf.mxu1  ;;  %v3713_v36 = vsel %vm10101_vm11, %v8056_v7, %v8157_v15  ;;  %v8201_v7 = vpop.f32.mrf.mxu2  ;;  %v10103_v16 = vmov 0  ;;  %v10106_v13 = vrot.slane %v8073_v3, 7  ;;  %v2153_v43 = vrot.slane %v8191_v54, 7 }
 0x120   : > { %vm2324_vm13 = vcmp.ne.s32.totalorder %v2320_v31, %v7248_v34  ;;  %10102 = vst [vmem:[#allocation62_spill] sm:$0xff] %v8201_v7  ;;  %v8206_v41 = vsel %vm10101_vm11, %v8078_v10, %v8187_v50  ;;  %v10104_v16 = vsel %vm8212_vm7, 4294967295, %v10103_v16  ;;  %v835_v31 = vadd.s32 184, %v6663_v27 }
 0x121   : > { %10105 = vst [vmem:[#allocation63_spill] sm:$0xff] %v10104_v16  ;;  %v2149_v25 = vrot.slane %v10106_v13, 4  ;;  %vm8224_vm11 = vmpackc.low %vm2324_vm13, %vm8180_vm15  ;;  %v10108_v10 = vmov 0  ;;  %v2921_v40 = vpack.c.b16 %v2897_v21, %v2896_v35  ;;  %v3665_v32 = vunpack.c.l.b16 %v3582_v29 }
 0x122   : > { %v10109_v10 = vsel %vm8224_vm11, 4294967295, %v10108_v10  ;;  %v3666_v47 = vunpack.c.l.b16 %v3583_v49  ;;  %v3300_v3 = vshrl.u32 %v8090_v28, 16  ;;  %v3304_v18 = vshll.u32 %v8193_v45, 16 }
 0x123   : > { %10110 = vst [vmem:[#allocation65_spill] sm:$0xff] %v10109_v10  ;;  %v1009_v13 = vand.u32 15, %v835_v31  ;;  %v2151_v35 = vsel %vm7214_vm9, %v2149_v25, %v7179_v23  ;;  %v2154_v28 = vsel %vm7214_vm9, %v7196_v8, %v2153_v43  ;;  %vm10113_vm13 = vsmask.f32 7424 }
 0x124   : > { %v3690_v21 = vpack.c.b16 %v3666_v47, %v3665_v32  ;;  %v3302_v54 = vor.u32 %v3300_v3, %v3298_v20  ;;  %v8243_v29 = vrot.slane %v3304_v18, 1  ;;  %v2326_v22 = vunpack.c.l.b16 %v2151_v35 }
 0x125   : > { %v2333_v31 = vunpack.c.l.b16 %v2154_v28  ;;  %vm8245_vm15 = vcmp.ne.s32.totalorder %v1009_v13, 15  ;;  %v2334_v48 = vunpack.c.h.b16 %v2154_v28  ;;  %vm10115_vm5 = vnez %v9863_v24  ;;  %v3133_v13 = vld [vmem:[#allocation2 + $0x50] sm:$0xf] }
 0x126   : > { %3477 = vmatmul.bf16.gmra.mxu0 %v3299_v39  ;;  %v8220_v39 = vpop.f32.mrf.mxu0  ;;  %v3307_v32 = vsel %vm10113_vm13, %v3302_v54, %v8243_v29  ;;  %v2817_v3 = vsel %vm10115_vm5, %v2785_v53, 0  ;;  %v2818_v18 = vsel %vm6745_vm8, %v2786_v52, 0  ;;  %vm2048_vm6 = vmpackc.low %vm8245_vm15, %vm8245_vm15  ;;  %vm8269_vm13 = vcmp.ne.s32.totalorder %v2326_v22, %v7243_v42  ;;  %v6537_v24 = vld [vmem:[#allocation2 + $0x50] sm:$0xf] }
 0x127   : > { %10107 = vst [vmem:[#allocation64_spill] sm:$0xff] %v8220_v39  ;;  %v8231_v12 = vpop.f32.mrf.mxu1  ;;  %vm8275_vm12 = vcmp.ne.s32.totalorder %v2333_v31, %v7243_v42  ;;  %vm10121_vm15 = vcmask 1046528   ;;  %v2899_v7 = vunpack.c.l.b16 %v2818_v18  ;;  %vm2338_vm10 = vcmp.ne.s32.totalorder %v2334_v48, %v7248_v34 }
 0x128   : > { %v8286_v22 = vsel %vm2048_vm6, 65537, %v9987_v5  ;;  %v3584_v54 = vsel %vm8212_vm7, %v3133_v13, 0  ;;  %v10122_v48 = vmov 0 }
 0x129   : > { %3834 = vmatmul.bf16.gmra.mxu1 %v3713_v36  ;;  %v2436_v36 = vsel %vm8224_vm11, %v6536_v11, 0  ;;  %v2327_v11 = vunpack.c.h.b16 %v2151_v35  ;;  %v3134_v35 = vld [vmem:[#allocation2 + $0x54] sm:$0xf]  ;;  %v3667_v18 = vunpack.c.l.b16 %v3584_v54 }
 0x12b   : > { %2681 = vmatmul.bf16.gmra.mxu2 %v7980_v37  ;;  %v6535_v37 = vld [vmem:[#allocation2 + $0x48] sm:$0xf]  ;;  %vm2331_vm5 = vcmp.ne.s32.totalorder %v2327_v11, %v7248_v34  ;;  %v837_v11 = vadd.s32 200, %v6663_v27 }
 0x12c   : > { %v2435_v0 = vsel %vm8212_vm7, %v6535_v37, 0  ;;  %v2519_v37 = vunpack.c.l.b16 %v2436_v36  ;;  %vm8301_vm0 = vmpackc.low %vm2331_vm5, %vm8269_vm13 }
 0x12d   : > { %v2518_v49 = vunpack.c.l.b16 %v2435_v0  ;;  %v10123_v48 = vsel %vm8301_vm0, 4294967295, %v10122_v48  ;;  %vm8317_vm5 = vmpackc.low %vm2338_vm10, %vm8275_vm12  ;;  %v1023_v54 = vand.u32 15, %v837_v11  ;;  %v6469_v11 = vld [vmem:[%s9731_s3 + $0x218] sm:$0xff]  ;;  %vm10133_vm12 = vsmask.f32 7424 }
 0x12e   : > { %3037 = vmatmul.bf16.gmra.mxu3 %v2921_v40  ;;  %v8251_v40 = vrot.slane %v3690_v21, 1  ;;  %v8288_v21 = vld [vmem:[#allocation2 + $0x48] sm:$0xff]  ;;  %10124 = vst [vmem:[#allocation68_spill] sm:$0xff] %v10123_v48  ;;  %4948 = vmatpush.bf16.msra.mxu0 %v6469_v11  ;;  %v3136_v11 = vld [vmem:[#allocation2 + $0x5c] sm:$0xf] }
 0x12f   : > { %v8249_v25 = vpop.f32.mrf.mxu3  ;;  %v2542_v36 = vpack.c.b16 %v2519_v37, %v2518_v49  ;;  %v3585_v49 = vsel %vm8224_vm11, %v3134_v35, 0  ;;  %v2155_v37 = vrot.slane %v2153_v43, 4  ;;  %v2437_v43 = vsel %vm8301_vm0, %v6537_v24, 0  ;;  %v6539_v48 = vld [vmem:[#allocation2 + $0x58] sm:$0xf] }
 0x130   : > { %vm8348_vm10 = vcmp.ne.s32.totalorder %v1023_v54, 15 }
 0x131   : > { %v1781_v56 = vpop.f32.mrf.mxu2  ;;  %v8282_v28 = vrot.slane %v2542_v36, 1  ;;  %v3668_v36 = vunpack.c.l.b16 %v3585_v49  ;;  %vm2050_vm13 = vmpackc.low %vm8348_vm10, %vm8348_vm10  ;;  %vm10143_vm10 = vcmask 1046528  }
 0x132   : > { %v8256_v47 = vadd.f32 %v8139_v58, %v1781_v56  ;;  %v3715_v58 = vsel %vm10121_vm15, %v8157_v15, %v8251_v40  ;;  %v3308_v56 = vshrl.u32 %v8193_v45, 16  ;;  %v2157_v45 = vsel %vm7214_vm9, %v2155_v37, %v7179_v23  ;;  %v2787_v37 = vld [vmem:[#allocation2 + $0x50] sm:$0xf] }
 0x133   : > { %v1741_v20 = vpop.f32.mrf.mxu0  ;;  %v8297_v15 = vsel %vm10121_vm15, %v8187_v50, %v8282_v28  ;;  %v6461_v50 = vld [vmem:[%s9731_s3 + $0x1d8] sm:$0xff]  ;;  %v2341_v10 = vunpack.c.h.b16 %v2157_v45 }
 0x134   : > { %10114 = vst [vmem:[#allocation66_spill] sm:$0xff] %v8256_v47  ;;  %v8266_v0 = vadd.f32 %v8160_v6, %v1741_v20  ;;  %v2898_v6 = vunpack.c.l.b16 %v2817_v3  ;;  %v6437_v20 = vld [vmem:[%s9731_s3 + $0x198] sm:$0xff]  ;;  %4596 = vmatpush.bf16.msra.mxu3 %v6461_v50  ;;  %v3310_v24 = vor.u32 %v3308_v56, %v8243_v29 }
 0x135   : > { %4146 = vmatpush.bf16.msra.mxu2 %v6437_v20  ;;  %v3691_v20 = vpack.c.b16 %v3668_v36, %v3667_v18  ;;  %v10134_v56 = vld [vmem:[#allocation8_spill] sm:$0xff] }
 0x136   : > { %10116 = vst [vmem:[#allocation67_spill] sm:$0xff] %v8266_v0  ;;  %3482 = vmatmul.bf16.gmra.mxu0 %v3307_v32  ;;  %v1979_v52 = vpop.f32.mrf.mxu1  ;;  %v10125_v32 = vmov 0  ;;  %v2922_v3 = vpack.c.b16 %v2899_v7, %v2898_v6  ;;  %v6538_v6 = vld [vmem:[#allocation2 + $0x54] sm:$0xf]  ;;  %vm10135_vm6 = vnez %v10134_v56  ;;  %v3316_v56 = vshrl.u32 %v8288_v21, 16 }
 0x137   : > { %v8307_v31 = vpop.f32.mrf.mxu3  ;;  %v10126_v32 = vsel %vm8317_vm5, 4294967295, %v10125_v32  ;;  %v2438_v7 = vsel %vm8317_vm5, %v6538_v6, 0  ;;  %v2788_v6 = vld [vmem:[#allocation2 + $0x54] sm:$0xf]  ;;  %v8354_v29 = vrot.slane %v3691_v20, 1 }
 0x138   : > { %10127 = vst [vmem:[#allocation69_spill] sm:$0xff] %v10126_v32  ;;  %v3135_v20 = vld [vmem:[#allocation2 + $0x58] sm:$0xf]  ;;  %v6540_v47 = vld [vmem:[#allocation2 + $0x5c] sm:$0xf] }
 0x139   : > { %3839 = vmatmul.bf16.gmra.mxu1 %v3715_v58  ;;  %v3312_v58 = vshll.u32 %v8288_v21, 16  ;;  %v2791_v0 = vld [vmem:[#allocation2 + $0x60] sm:$0xf] }
 0x13b   : > { %2686 = vmatmul.bf16.gmra.mxu2 %v8099_v14  ;;  %v1783_v14 = vpop.f32.mrf.mxu2  ;;  %v1743_v13 = vpop.f32.mrf.mxu0  ;;  %v8343_v50 = vrot.slane %v3312_v58, 1  ;;  %v2819_v58 = vsel %vm10135_vm6, %v2787_v37, 0 }
 0x13c   : > { %v8323_v35 = vadd.f32 %v8195_v2, %v1783_v14  ;;  %v8328_v53 = vadd.f32 %v8231_v12, %v1743_v13  ;;  %v10130_v2 = vrot.slane %v8286_v22, 7  ;;  %v2520_v14 = vunpack.c.l.b16 %v2437_v43 }
 0x13d   : > { %v2521_v13 = vunpack.c.l.b16 %v2438_v7  ;;  %v3315_v43 = vsel %vm10133_vm12, %v3310_v24, %v8343_v50  ;;  %v2820_v7 = vsel %vm6745_vm8, %v2788_v6, 0  ;;  %vm8373_vm12 = vcmp.ne.s32.totalorder %v2341_v10, %v7248_v34 }
 0x13e   : > { %10128 = vst [vmem:[#allocation70_spill] sm:$0xff] %v8323_v35  ;;  %v2160_v12 = vsel %vm7214_vm9, %v7196_v8, %v10130_v2  ;;  %v1981_v49 = vpop.f32.mrf.mxu1  ;;  %3042 = vmatmul.bf16.gmra.mxu3 %v2922_v3  ;;  %v2340_v35 = vunpack.c.l.b16 %v2157_v45  ;;  %v8391_v10 = vsel %vm2050_vm13, 65537, %v9987_v5  ;;  %v6493_v2 = vld [vmem:[%s9732_s4 + $0x18] sm:$0xff] }
 0x13f   : > { %10129 = vst [vmem:[#allocation71_spill] sm:$0xff] %v8328_v53  ;;  %v2347_v16 = vunpack.c.l.b16 %v2160_v12  ;;  %v2348_v18 = vunpack.c.h.b16 %v2160_v12  ;;  %v2543_v45 = vpack.c.b16 %v2521_v13, %v2520_v14  ;;  %v2900_v14 = vunpack.c.l.b16 %v2819_v58  ;;  %5429 = vmatpush.bf16.msra.mxu1 %v6493_v2 }
 0x140   : > { %vm8368_vm15 = vcmp.ne.s32.totalorder %v2340_v35, %v7243_v42  ;;  %v3717_v35 = vsel %vm10143_vm10, %v8251_v40, %v8354_v29  ;;  %v2901_v13 = vunpack.c.l.b16 %v2820_v7  ;;  %v3587_v40 = vsel %vm8317_vm5, %v3136_v11, 0 }
 0x141   : > { %v8352_v3 = vpop.f32.mrf.mxu3  ;;  %vm8378_vm6 = vcmp.ne.s32.totalorder %v2347_v16, %v7243_v42  ;;  %v8387_v6 = vrot.slane %v2543_v45, 1  ;;  %vm2352_vm11 = vcmp.ne.s32.totalorder %v2348_v18, %v7248_v34  ;;  %v8393_v16 = vld [vmem:[#allocation2 + $0x50] sm:$0xff]  ;;  %vm8411_vm13 = vmpackc.low %vm8373_vm12, %vm8368_vm15  ;;  %v10144_v18 = vmov 0 }
 0x142   : > { %v10145_v18 = vsel %vm8411_vm13, 4294967295, %v10144_v18  ;;  %v10147_v58 = vrot.slane %v8286_v22, 7  ;;  %v839_v45 = vadd.s32 216, %v6663_v27  ;;  %v2165_v11 = vrot.slane %v8391_v10, 7 }
 0x143   : > { %v1746_v36 = vpop.f32.mrf.mxu0  ;;  %10146 = vst [vmem:[#allocation73_spill] sm:$0xff] %v10145_v18  ;;  %v2923_v12 = vpack.c.b16 %v2901_v13, %v2900_v14  ;;  %v3670_v22 = vunpack.c.l.b16 %v3587_v40  ;;  %v2439_v37 = vsel %vm8411_vm13, %v6539_v48, 0  ;;  %vm10165_vm12 = vcmask 1046528  }
 0x144   : > { %v8365_v54 = vadd.f32 %v1979_v52, %v1746_v36  ;;  %v3586_v36 = vsel %vm8301_vm0, %v3135_v20, 0  ;;  %v2161_v7 = vrot.slane %v10147_v58, 4  ;;  %v1037_v14 = vand.u32 15, %v839_v45 }
 0x145   : > { %v3669_v24 = vunpack.c.l.b16 %v3586_v36  ;;  %v3318_v36 = vor.u32 %v3316_v56, %v8343_v50  ;;  %v10156_v56 = vld [vmem:[#allocation10_spill] sm:$0xff] }
 0x146   : > { %10136 = vst [vmem:[#allocation72_spill] sm:$0xff] %v8365_v54  ;;  %3487 = vmatmul.bf16.gmra.mxu0 %v3315_v43  ;;  %v8382_v52 = vpop.f32.mrf.mxu1  ;;  %v8405_v43 = vsel %vm10143_vm10, %v8282_v28, %v8387_v6  ;;  %vm8423_vm10 = vmpackc.low %vm2352_vm11, %vm8378_vm6  ;;  %v10148_v28 = vmov 0  ;;  %v2163_v21 = vsel %vm7214_vm9, %v2161_v7, %v7179_v23  ;;  %vm8450_vm11 = vcmp.ne.s32.totalorder %v1037_v14, 15  ;;  %v3137_v14 = vld [vmem:[#allocation2 + $0x60] sm:$0xf] }
 0x147   : > { %v10149_v28 = vsel %vm8423_vm10, 4294967295, %v10148_v28  ;;  %v2440_v10 = vsel %vm8423_vm10, %v6540_v47, 0  ;;  %v3692_v48 = vpack.c.b16 %v3670_v22, %v3669_v24  ;;  %v2522_v47 = vunpack.c.l.b16 %v2439_v37  ;;  %vm10166_vm7 = vmpackc.low %vm8450_vm11, %vm8450_vm11 }
 0x148   : > { %10150 = vst [vmem:[#allocation74_spill] sm:$0xff] %v10149_v28  ;;  %v2523_v45 = vunpack.c.l.b16 %v2440_v10  ;;  %vm10155_vm6 = vsmask.f32 7424  ;;  %vm10157_vm15 = vnez %v10156_v56  ;;  %v10167_v7 = vmov 0  ;;  %v6541_v28 = vld [vmem:[#allocation2 + $0x60] sm:$0xf] }
 0x149   : > { %3844 = vmatmul.bf16.gmra.mxu1 %v3717_v35  ;;  %v8419_v20 = vpop.f32.mrf.mxu3  ;;  %v8456_v46 = vrot.slane %v3692_v48, 1 }
 0x14a   : > { %v2544_v10 = vpack.c.b16 %v2523_v45, %v2522_v47 }
 0x14b   : > { %2691 = vmatmul.bf16.gmra.mxu2 %v8206_v41  ;;  %v1748_v58 = vpop.f32.mrf.mxu0  ;;  %v3320_v41 = vshll.u32 %v8393_v16, 16  ;;  %v3719_v45 = vsel %vm10165_vm12, %v8354_v29, %v8456_v46 }
 0x14c   : > { %v8430_v32 = vadd.f32 %v1981_v49, %v1748_v58  ;;  %v2166_v49 = vsel %vm7214_vm9, %v7196_v8, %v2165_v11  ;;  %v2790_v58 = vld [vmem:[#allocation2 + $0x5c] sm:$0xf] }
 0x14d   : > { %v8448_v40 = vrot.slane %v3320_v41, 1  ;;  %v2822_v41 = vsel %vm6745_vm8, %v2790_v58, 0 }
 0x14e   : > { %v1786_v35 = vpop.f32.mrf.mxu2  ;;  %10151 = vst [vmem:[#allocation75_spill] sm:$0xff] %v8430_v32  ;;  %v8445_v2 = vpop.f32.mrf.mxu1  ;;  %3047 = vmatmul.bf16.gmra.mxu3 %v2923_v12  ;;  %v2361_v32 = vunpack.c.l.b16 %v2166_v49  ;;  %v2362_v12 = vunpack.c.h.b16 %v2166_v49 }
 0x14f   : > { %v8437_v13 = vadd.f32 %v8249_v25, %v1786_v35  ;;  %v2789_v25 = vld [vmem:[#allocation2 + $0x58] sm:$0xf]  ;;  %v2354_v35 = vunpack.c.l.b16 %v2163_v21  ;;  %v3323_v50 = vsel %vm10155_vm6, %v3318_v36, %v8448_v40 }
 0x150   : > { %v2821_v22 = vsel %vm10157_vm15, %v2789_v25, 0  ;;  %vm8480_vm15 = vcmp.ne.s32.totalorder %v2361_v32, %v7243_v42  ;;  %vm2366_vm0 = vcmp.ne.s32.totalorder %v2362_v12, %v7248_v34  ;;  %v8503_v32 = vld [vmem:[#allocation2 + $0x58] sm:$0xff] }
 0x151   : > { %10152 = vst [vmem:[#allocation76_spill] sm:$0xff] %v8437_v13  ;;  %v2355_v13 = vunpack.c.h.b16 %v2163_v21  ;;  %v8454_v61 = vpop.f32.mrf.mxu3  ;;  %v3138_v21 = vld [vmem:[#allocation2 + $0x64] sm:$0xf]  ;;  %vm8470_vm5 = vcmp.ne.s32.totalorder %v2354_v35, %v7243_v42  ;;  %v2902_v58 = vunpack.c.l.b16 %v2821_v22  ;;  %v8492_v35 = vrot.slane %v2544_v10, 1  ;;  %v6460_v10 = vld [vmem:[%s9731_s3 + $0x1d0] sm:$0xff] }
 0x152   : > { %v3589_v29 = vsel %vm8423_vm10, %v3138_v21, 0  ;;  %v2167_v22 = vrot.slane %v2165_v11, 4  ;;  %v3328_v56 = vshll.u32 %v8503_v32, 16  ;;  %4597 = vmatpush.bf16.msra.mxu3 %v6460_v10 }
 0x153   : > { %v8458_v24 = vpop.f32.mrf.mxu0  ;;  %vm8475_vm6 = vcmp.ne.s32.totalorder %v2355_v13, %v7248_v34  ;;  %v2903_v13 = vunpack.c.l.b16 %v2822_v41  ;;  %v8512_v12 = vsel %vm10165_vm12, %v8387_v6, %v8492_v35  ;;  %v841_v41 = vadd.s32 232, %v6663_v27  ;;  %v6436_v6 = vld [vmem:[%s9731_s3 + $0x190] sm:$0xff] }
 0x154   : > { %vm8518_vm11 = vmpackc.low %vm8475_vm6, %vm8470_vm5  ;;  %v3672_v49 = vunpack.c.l.b16 %v3589_v29  ;;  %4147 = vmatpush.bf16.msra.mxu2 %v6436_v6  ;;  %v8560_v53 = vrot.slane %v3328_v56, 1  ;;  %v10177_v56 = vld [vmem:[#allocation31_spill] sm:$0xff]  ;;  %vm10179_vm5 = vsmask.f32 7424 }
 0x155   : > { %v10168_v7 = vsel %vm8518_vm11, 4294967295, %v10167_v7  ;;  %v2441_v36 = vsel %vm8518_vm11, %v6541_v28, 0 }
 0x156   : > { %v1788_v37 = vpop.f32.mrf.mxu2  ;;  %3492 = vmatmul.bf16.gmra.mxu0 %v3323_v50  ;;  %v8487_v47 = vpop.f32.mrf.mxu1  ;;  %v3588_v50 = vsel %vm8411_vm13, %v3137_v14, 0  ;;  %10169 = vst [vmem:[#allocation78_spill] sm:$0xff] %v10168_v7  ;;  %v10170_v14 = vmov 0 }
 0x157   : > { %v8485_v25 = vadd.f32 %v8307_v31, %v1788_v37  ;;  %v8501_v31 = vsel %vm10166_vm7, 65537, %v9987_v5  ;;  %vm8534_vm7 = vmpackc.low %vm2366_vm0, %vm8480_vm15  ;;  %v3671_v21 = vunpack.c.l.b16 %v3588_v50  ;;  %v10173_v50 = vld [vmem:[#allocation30_spill] sm:$0xff] }
 0x158   : > { %v10171_v14 = vsel %vm8534_vm7, 4294967295, %v10170_v14  ;;  %v10174_v29 = vrot.slane %v8501_v31, 7 }
 0x159   : > { %10164 = vst [vmem:[#allocation77_spill] sm:$0xff] %v8485_v25  ;;  %3849 = vmatmul.bf16.gmra.mxu1 %v3719_v45  ;;  %v8524_v37 = vpop.f32.mrf.mxu3  ;;  %v3324_v45 = vshrl.u32 %v8393_v16, 16  ;;  %v6542_v25 = vld [vmem:[#allocation2 + $0x64] sm:$0xf]  ;;  %v3693_v28 = vpack.c.b16 %v3672_v49, %v3671_v21  ;;  %v10178_v21 = vld [vmem:[#allocation32_spill] sm:$0xff] }
 0x15a   : > { %10172 = vst [vmem:[#allocation79_spill] sm:$0xff] %v10171_v14  ;;  %v2442_v11 = vsel %vm8534_vm7, %v6542_v25, 0  ;;  %v2172_v6 = vsel %vm7214_vm9, %v7196_v8, %v10174_v29  ;;  %v2792_v29 = vld [vmem:[#allocation2 + $0x64] sm:$0xf]  ;;  %v1947_v49 = vadd.f32 %v10178_v21, %v10177_v56  ;;  %v6492_v21 = vld [vmem:[%s9732_s4 + $0x10] sm:$0xff] }
 0x15b   : > { %2696 = vmatmul.bf16.gmra.mxu2 %v8297_v15  ;;  %v2924_v15 = vpack.c.b16 %v2903_v13, %v2902_v58  ;;  %v8539_v48 = vpop.f32.mrf.mxu0  ;;  %v2169_v58 = vsel %vm7214_vm9, %v2167_v22, %v7179_v23  ;;  %v1051_v13 = vand.u32 15, %v841_v41  ;;  %v3326_v25 = vor.u32 %v3324_v45, %v8448_v40  ;;  %v8621_v56 = vld [vmem:[#allocation2 + $0x60] sm:$0xff]  ;;  %5430 = vmatpush.bf16.msra.mxu1 %v6492_v21 }
 0x15c   : > { %v2524_v22 = vunpack.c.l.b16 %v2441_v36  ;;  %v2525_v41 = vunpack.c.l.b16 %v2442_v11  ;;  %v2369_v19 = vunpack.c.h.b16 %v2169_v58  ;;  %v2375_v55 = vunpack.c.l.b16 %v2172_v6 }
 0x15d   : > { %v2376_v39 = vunpack.c.h.b16 %v2172_v6  ;;  %vm8565_vm0 = vcmp.ne.s32.totalorder %v1051_v13, 15  ;;  %v8574_v45 = vrot.slane %v3693_v28, 1  ;;  %v3331_v36 = vsel %vm10179_vm5, %v3326_v25, %v8560_v53  ;;  %v3139_v25 = vld [vmem:[#allocation2 + $0x68] sm:$0xf] }
 0x15e   : > { %v2657_v18 = vpop.f32.mrf.mxu2  ;;  %v8556_v10 = vpop.f32.mrf.mxu1  ;;  %3052 = vmatmul.bf16.gmra.mxu3 %v2924_v15  ;;  %vm2054_vm12 = vmpackc.low %vm8565_vm0, %vm8565_vm0  ;;  %v2545_v28 = vpack.c.b16 %v2525_v41, %v2524_v22  ;;  %vm8596_vm5 = vcmp.ne.s32.totalorder %v2369_v19, %v7248_v34  ;;  %vm10190_vm0 = vcmask 1046528  }
 0x15f   : > { %v2737_v16 = vadd.f32 %v2657_v18, %v10173_v50  ;;  %v6468_v18 = vld [vmem:[%s9731_s3 + $0x210] sm:$0xff]  ;;  %v2368_v50 = vunpack.c.l.b16 %v2169_v58  ;;  %v10180_v58 = vld [vmem:[#allocation12_spill] sm:$0xff]  ;;  %vm8606_vm10 = vcmp.ne.s32.totalorder %v2376_v39, %v7248_v34  ;;  %v3721_v19 = vsel %vm10190_vm0, %v8456_v46, %v8574_v45 }
 0x160   : > { %4949 = vmatpush.bf16.msra.mxu0 %v6468_v18  ;;  %vm10181_vm15 = vnez %v10180_v58  ;;  %v3140_v18 = vld [vmem:[#allocation2 + $0x6c] sm:$0xf] }
 0x161   : > { %v3083_v54 = vadd.f32 %v8352_v3, %v2737_v16  ;;  %v8569_v3 = vpop.f32.mrf.mxu3  ;;  %v2823_v13 = vsel %vm10181_vm15, %v2791_v0, 0  ;;  %v2824_v16 = vsel %vm6745_vm8, %v2792_v29, 0  ;;  %vm8588_vm6 = vcmp.ne.s32.totalorder %v2368_v50, %v7243_v42  ;;  %v6543_v50 = vld [vmem:[#allocation2 + $0x68] sm:$0xf]  ;;  %v2794_v58 = vld [vmem:[#allocation2 + $0x6c] sm:$0xf] }
 0x162   : > { %vm8601_vm15 = vcmp.ne.s32.totalorder %v2375_v55, %v7243_v42  ;;  %v2904_v41 = vunpack.c.l.b16 %v2823_v13  ;;  %v2905_v15 = vunpack.c.l.b16 %v2824_v16  ;;  %v8618_v55 = vsel %vm2054_vm12, 65537, %v9987_v5  ;;  %vm8639_vm12 = vmpackc.low %vm8596_vm5, %vm8588_vm6 }
 0x163   : > { %v3533_v40 = vadd.f32 %v8458_v24, %v3083_v54  ;;  %v8576_v11 = vpop.f32.mrf.mxu0  ;;  %v3591_v46 = vsel %vm8534_vm7, %v3140_v18, 0  ;;  %v10193_v13 = vrot.slane %v8501_v31, 7  ;;  %vm8654_vm6 = vmpackc.low %vm8606_vm10, %vm8601_vm15  ;;  %v10194_v54 = vmov 0 }
 0x164   : > { %v10195_v54 = vsel %vm8654_vm6, 4294967295, %v10194_v54  ;;  %v9848_v31 = vrot.slane %v8618_v55, 7  ;;  %v3674_v18 = vunpack.c.l.b16 %v3591_v46  ;;  %v3332_v0 = vshrl.u32 %v8503_v32, 16  ;;  %4950 = vmatpush.bf16.msra.mxu0 %v6467_v44 }
 0x165   : > { %v8585_v6 = vadd.f32 %v8382_v52, %v3533_v40  ;;  %v8615_v40 = vrot.slane %v2545_v28, 1  ;;  %v2173_v16 = vrot.slane %v10193_v13, 4  ;;  %vm10198_vm15 = vsmask.f32 7424 }
 0x166   : > { %v2659_v24 = vpop.f32.mrf.mxu2  ;;  %3497 = vmatmul.bf16.gmra.mxu0 %v3331_v36  ;;  %v8610_v22 = vpop.f32.mrf.mxu1 }
 0x167   : > { %v2738_v29 = vadd.f32 %v2659_v24, %v1947_v49  ;;  %v3590_v49 = vsel %vm8518_vm11, %v3139_v25, 0  ;;  %v8633_v36 = vsel %vm10190_vm0, %v8492_v35, %v8615_v40  ;;  %v843_v24 = vadd.s32 248, %v6663_v27 }
 0x168   : > { %v2925_v25 = vpack.c.b16 %v2905_v15, %v2904_v41  ;;  %v3673_v27 = vunpack.c.l.b16 %v3590_v49  ;;  %v2175_v15 = vsel %vm7214_vm9, %v2173_v16, %v7179_v23 }
 0x169   : > { %v3084_v39 = vadd.f32 %v8419_v20, %v2738_v29  ;;  %3854 = vmatmul.bf16.gmra.mxu1 %v3721_v19  ;;  %v8647_v28 = vpop.f32.mrf.mxu3  ;;  %v2443_v29 = vsel %vm8639_vm12, %v6543_v50, 0  ;;  %v1065_v21 = vand.u32 15, %v843_v24 }
 0x16a   : > { %v3694_v46 = vpack.c.b16 %v3674_v18, %v3673_v27  ;;  %v2526_v16 = vunpack.c.l.b16 %v2443_v29 }
 0x16b   : > { %2701 = vmatmul.bf16.gmra.mxu2 %v8405_v43  ;;  %v3534_v35 = vadd.f32 %v8539_v48, %v3084_v39  ;;  %v8659_v43 = vpop.f32.mrf.mxu0  ;;  %v3336_v48 = vshll.u32 %v8621_v56, 16  ;;  %v6544_v39 = vld [vmem:[#allocation2 + $0x6c] sm:$0xf]  ;;  %vm8685_vm10 = vcmp.ne.s32.totalorder %v1065_v21, 15  ;;  %v3141_v21 = vld [vmem:[#allocation2 + $0x70] sm:$0xf] }
 0x16c   : > { %v2444_v41 = vsel %vm8654_vm6, %v6544_v39, 0  ;;  %v2382_v39 = vunpack.c.l.b16 %v2175_v15  ;;  %v8694_v27 = vrot.slane %v3694_v46, 1  ;;  %vm2056_vm7 = vmpackc.low %vm8685_vm10, %vm8685_vm10  ;;  %vm10209_vm10 = vcmask 1046528  }
 0x16d   : > { %v8664_v52 = vadd.f32 %v8445_v2, %v3534_v35  ;;  %v2178_v2 = vsel %vm7214_vm9, %v7196_v8, %v9848_v31  ;;  %v3334_v35 = vor.u32 %v3332_v0, %v8560_v53  ;;  %v8683_v50 = vrot.slane %v3336_v48, 1  ;;  %v10199_v48 = vld [vmem:[#allocation14_spill] sm:$0xff] }
 0x16e   : > { %v2662_v19 = vpop.f32.mrf.mxu2  ;;  %v8679_v49 = vpop.f32.mrf.mxu1  ;;  %3057 = vmatmul.bf16.gmra.mxu3 %v2925_v25  ;;  %v2527_v24 = vunpack.c.l.b16 %v2444_v41  ;;  %v2389_v14 = vunpack.c.l.b16 %v2178_v2  ;;  %v2390_v7 = vunpack.c.h.b16 %v2178_v2  ;;  %v1952_v53 = vadd.f32 %v7720_v38, %v7714_v63 }
 0x16f   : > { %v2739_v32 = vadd.f32 %v2662_v19, %v7679_v9  ;;  %v2383_v9 = vunpack.c.h.b16 %v2175_v15  ;;  %v2793_v19 = vld [vmem:[#allocation2 + $0x68] sm:$0xf]  ;;  %v3339_v0 = vsel %vm10198_vm15, %v3334_v35, %v8683_v50  ;;  %vm10200_vm5 = vnez %v10199_v48 }
 0x170   : > { %v2825_v29 = vsel %vm10200_vm5, %v2793_v19, 0  ;;  %v2826_v41 = vsel %vm6745_vm8, %v2794_v58, 0  ;;  %vm8708_vm0 = vcmp.ne.s32.totalorder %v2382_v39, %v7243_v42  ;;  %v2546_v38 = vpack.c.b16 %v2527_v24, %v2526_v16  ;;  %v8741_v39 = vld [vmem:[#allocation2 + $0x68] sm:$0xff] }
 0x171   : > { %v3085_v13 = vadd.f32 %v8454_v61, %v2739_v32  ;;  %v8689_v25 = vpop.f32.mrf.mxu3  ;;  %v3142_v32 = vld [vmem:[#allocation2 + $0x74] sm:$0xf]  ;;  %vm8716_vm15 = vcmp.ne.s32.totalorder %v2383_v9, %v7248_v34  ;;  %vm8721_vm5 = vcmp.ne.s32.totalorder %v2389_v14, %v7243_v42  ;;  %vm8726_vm11 = vcmp.ne.s32.totalorder %v2390_v7, %v7248_v34 }
 0x172   : > { %v2906_v35 = vunpack.c.l.b16 %v2825_v29  ;;  %v2907_v16 = vunpack.c.l.b16 %v2826_v41  ;;  %v8735_v24 = vrot.slane %v2546_v38, 1  ;;  %v8738_v14 = vsel %vm2056_vm7, 65537, %v9987_v5  ;;  %vm8756_vm7 = vmpackc.low %vm8716_vm15, %vm8708_vm0 }
 0x173   : > { %v3535_v61 = vadd.f32 %v8576_v11, %v3085_v13  ;;  %v8696_v18 = vpop.f32.mrf.mxu0  ;;  %v3723_v13 = vsel %vm10209_vm10, %v8574_v45, %v8694_v27  ;;  %v3592_v9 = vsel %vm8639_vm12, %v3141_v21, 0  ;;  %v3593_v19 = vsel %vm8654_vm6, %v3142_v32, 0  ;;  %vm8776_vm0 = vmpackc.low %vm8726_vm11, %vm8721_vm5 }
 0x174   : > { %v8750_v45 = vsel %vm10209_vm10, %v8615_v40, %v8735_v24  ;;  %v6435_v40 = vld [vmem:[%s9731_s3 + $0x188] sm:$0xff]  ;;  %v2926_v41 = vpack.c.b16 %v2907_v16, %v2906_v35  ;;  %v3675_v11 = vunpack.c.l.b16 %v3592_v9  ;;  %v3340_v21 = vshrl.u32 %v8621_v56, 16  ;;  %v299_v16 = vld [vmem:[%s6630_s14 + $0xf8] sm:$0xff] }
 0x175   : > { %v8705_v15 = vadd.f32 %v8487_v47, %v3535_v61  ;;  %4148 = vmatpush.bf16.msra.mxu2 %v6435_v40  ;;  %v6545_v47 = vld [vmem:[#allocation2 + $0x70] sm:$0xf] }
 0x176   : > { %v2664_v63 = vpop.f32.mrf.mxu2  ;;  %3502 = vmatmul.bf16.gmra.mxu0 %v3339_v0  ;;  %v8730_v46 = vpop.f32.mrf.mxu1  ;;  %v6459_v0 = vld [vmem:[%s9731_s3 + $0x1c8] sm:$0xff]  ;;  %v2445_v58 = vsel %vm8756_vm7, %v6545_v47, 0 }
 0x177   : > { %v2740_v31 = vadd.f32 %v2664_v63, %v1952_v53  ;;  %v3676_v63 = vunpack.c.l.b16 %v3593_v19  ;;  %4598 = vmatpush.bf16.msra.mxu3 %v6459_v0  ;;  %v6547_v19 = vld [vmem:[%s9729_s1] ss:$0 sm:$0xff] }
 0x179   : > { %v3086_v7 = vadd.f32 %v8524_v37, %v2740_v31  ;;  %v10212_v37 = vrot.slane %v8618_v55, 7  ;;  %3859 = vmatmul.bf16.gmra.mxu1 %v3723_v13  ;;  %v8763_v53 = vpop.f32.mrf.mxu3  ;;  %v6546_v31 = vld [vmem:[#allocation2 + $0x74] sm:$0xf]  ;;  %v3695_v9 = vpack.c.b16 %v3676_v63, %v3675_v11  ;;  %v6548_v11 = vld [vmem:[%s9730_s2] ss:$0 sm:$0xff] }
 0x17a   : > { %v2446_v13 = vsel %vm8776_vm0, %v6546_v31, 0 }
 0x17b   : > { %v2179_v61 = vrot.slane %v10212_v37, 4  ;;  %2706 = vmatmul.bf16.gmra.mxu2 %v8512_v12  ;;  %v3536_v29 = vadd.f32 %v8659_v43, %v3086_v7  ;;  %v9852_v12 = vrot.slane %v8738_v14, 7  ;;  %v8781_v38 = vpop.f32.mrf.mxu0  ;;  %v3344_v43 = vshll.u32 %v8741_v39, 16 }
 0x17c   : > { %v335_v37 = vmul.f32 %v6547_v19, %v299_v16  ;;  %v2529_v40 = vunpack.c.l.b16 %v2446_v13  ;;  %v10216_v16 = vld [vmem:[#allocation16_spill] sm:$0xff] }
 0x17d   : > { %v8786_v32 = vadd.f32 %v8556_v10, %v3536_v29  ;;  %v2181_v56 = vsel %vm7214_vm9, %v2179_v61, %v7179_v23  ;;  %v2184_v10 = vsel %vm7214_vm9, %v7196_v8, %v9852_v12  ;;  %v8809_v61 = vrot.slane %v3344_v43, 1  ;;  %v2795_v29 = vld [vmem:[#allocation2 + $0x70] sm:$0xf]  ;;  %v2797_v12 = vld [vmem:[#allocation2 + $0x78] sm:$0xf] }
 0x17e   : > { %v2667_v2 = vpop.f32.mrf.mxu2  ;;  %v8802_v7 = vpop.f32.mrf.mxu1  ;;  %3062 = vmatmul.bf16.gmra.mxu3 %v2926_v41  ;;  %v2528_v8 = vunpack.c.l.b16 %v2445_v58  ;;  %v2396_v0 = vunpack.c.l.b16 %v2181_v56  ;;  %v2796_v41 = vld [vmem:[#allocation2 + $0x74] sm:$0xf]  ;;  %v371_v63 = vadd.f32 %v6548_v11, %v335_v37  ;;  %v2404_v47 = vunpack.c.h.b16 %v2184_v10  ;;  %v3144_v37 = vld [vmem:[#allocation2 + $0x7c] sm:$0xf] }
 0x17f   : > { %v2741_v35 = vadd.f32 %v2667_v2, %v7774_v60  ;;  %v3342_v60 = vor.u32 %v3340_v21, %v8683_v50  ;;  %v2397_v2 = vunpack.c.h.b16 %v2181_v56  ;;  %v1957_v43 = vadd.f32 %v7813_v33, %v7806_v59 }
 0x180   : > { %v8822_v58 = vrot.slane %v3695_v9, 1  ;;  %v403_v31 = vmax.f32 %v371_v63, 0.0  ;;  %vm10215_vm9 = vsmask.f32 7424  ;;  %vm10217_vm11 = vnez %v10216_v16  ;;  %v3143_v9 = vld [vmem:[#allocation2 + $0x78] sm:$0xf] }
 0x181   : > { %v3087_v23 = vadd.f32 %v8569_v3, %v2741_v35  ;;  %v2403_v3 = vunpack.c.l.b16 %v2184_v10  ;;  %v8817_v50 = vpop.f32.mrf.mxu3  ;;  %v3347_v35 = vsel %vm10215_vm9, %v3342_v60, %v8809_v61  ;;  %v2827_v56 = vsel %vm10217_vm11, %v2795_v29, 0  ;;  %v10233_v16 = vld [vmem:[#allocation6_spill] sm:$0xff] }
 0x182   : > { %v2828_v10 = vsel %vm6745_vm8, %v2796_v41, 0  ;;  %vm8836_vm5 = vcmp.ne.s32.totalorder %v2396_v0, %v7243_v42  ;;  %vm8841_vm15 = vcmp.ne.s32.totalorder %v2397_v2, %v7248_v34  ;;  %vm8851_vm9 = vcmp.ne.s32.totalorder %v2404_v47, %v7248_v34  ;;  %v8863_v2 = vld [vmem:[#allocation2 + $0x70] sm:$0xff] }
 0x183   : > { %v3537_v21 = vadd.f32 %v8696_v18, %v3087_v23  ;;  %v8824_v13 = vpop.f32.mrf.mxu0  ;;  %v2547_v18 = vpack.c.b16 %v2529_v40, %v2528_v8  ;;  %v451_v23 = vpack.c.bf16 %v403_v31, %v403_v31  ;;  %vm8846_vm10 = vcmp.ne.s32.totalorder %v2403_v3, %v7243_v42  ;;  %v6491_v3 = vld [vmem:[%s9732_s4 + $0x8] sm:$0xff]  ;;  %vm8881_vm6 = vmpackc.low %vm8841_vm15, %vm8836_vm5 }
 0x184   : > { %vm10226_vm11 = vcmask 1046528   ;;  %v2908_v29 = vunpack.c.l.b16 %v2827_v56  ;;  %v2909_v41 = vunpack.c.l.b16 %v2828_v10  ;;  %v3594_v47 = vsel %vm8756_vm7, %v3143_v9, 0  ;;  %5431 = vmatpush.bf16.msra.mxu1 %v6491_v3 }
 0x185   : > { %v8833_v19 = vadd.f32 %v8610_v22, %v3537_v21  ;;  %v3725_v40 = vsel %vm10226_vm11, %v8694_v27, %v8822_v58  ;;  %v8860_v11 = vrot.slane %v2547_v18, 1  ;;  %v3595_v21 = vsel %vm8776_vm0, %v3144_v37, 0 }
 0x186   : > { %v2669_v33 = vpop.f32.mrf.mxu2  ;;  %3507 = vmatmul.bf16.gmra.mxu0 %v3347_v35  ;;  %v8855_v8 = vpop.f32.mrf.mxu1  ;;  %v736_v31 = vshll.u32 %v451_v23, 16  ;;  %v2927_v59 = vpack.c.b16 %v2909_v41, %v2908_v29  ;;  %v3678_v18 = vunpack.c.l.b16 %v3595_v21  ;;  %v3352_v60 = vshll.u32 %v8863_v2, 16  ;;  %v6550_v29 = vld [vmem:[#allocation2 + $0x7c] sm:$0xf] }
 0x187   : > { %v2742_v0 = vadd.f32 %v2669_v33, %v1957_v43  ;;  %v733_v43 = vshrl.u32 %v451_v23, 16  ;;  %v8875_v27 = vsel %vm10226_vm11, %v8735_v24, %v8860_v11  ;;  %vm8895_vm11 = vmpackc.low %vm8851_vm9, %vm8846_vm10  ;;  %v3677_v33 = vunpack.c.l.b16 %v3594_v47 }
 0x188   : > { %v3348_v23 = vshrl.u32 %v8741_v39, 16  ;;  %v2448_v41 = vsel %vm8895_vm11, %v6550_v29, 0  ;;  %v2798_v29 = vld [vmem:[#allocation2 + $0x7c] sm:$0xf]  ;;  %vm10234_vm5 = vnez %v10233_v16  ;;  %vm10238_vm10 = vcmask 1046528  }
 0x189   : > { %v3088_v63 = vadd.f32 %v8647_v28, %v2742_v0  ;;  %3864 = vmatmul.bf16.gmra.mxu1 %v3725_v40  ;;  %v8886_v35 = vpop.f32.mrf.mxu3  ;;  %v8888_v56 = vrot.slane %v733_v43, 7  ;;  %v6549_v0 = vld [vmem:[#allocation2 + $0x78] sm:$0xf]  ;;  %v3696_v21 = vpack.c.b16 %v3678_v18, %v3677_v33  ;;  %v1962_v33 = vadd.f32 %v7913_v62, %v7924_v57  ;;  %vm10239_vm9 = vmmov %vm10238_vm10 }
 0x18a   : > { %v2447_v40 = vsel %vm8881_vm6, %v6549_v0, 0  ;;  %v3350_v43 = vor.u32 %v3348_v23, %v8809_v61  ;;  %v2531_v0 = vunpack.c.l.b16 %v2448_v41  ;;  %v2830_v16 = vsel %vm6745_vm8, %v2798_v29, 0  ;;  %v8936_v57 = vld [vmem:[#allocation2 + $0x78] sm:$0xff]  ;;  %v6434_v29 = vld [vmem:[%s9731_s3 + $0x180] sm:$0xff] }
 0x18b   : > { %2711 = vmatmul.bf16.gmra.mxu2 %v8633_v36  ;;  %v3538_v10 = vadd.f32 %v8781_v38, %v3088_v63  ;;  %v10231_v36 = vld [vmem:[#allocation26_spill] sm:$0xff]  ;;  %v3470_v37 = vpop.f32.mrf.mxu0  ;;  %v738_v38 = vor.u32 %v736_v31, %v8888_v56  ;;  %v3354_v31 = vrot.slane %v3352_v60, 1 }
 0x18c   : > { %v731_v9 = vrot.slane %v10231_v36, 4  ;;  %v2530_v36 = vunpack.c.l.b16 %v2447_v40  ;;  %4149 = vmatpush.bf16.msra.mxu2 %v6434_v29  ;;  %v10243_v29 = vld [vmem:[#allocation21_spill] sm:$0xff] }
 0x18d   : > { %v8904_v44 = vadd.f32 %v8679_v49, %v3538_v10  ;;  %v415_v10 = vld [vmem:[#allocation2 + $0x88] sm:$0xf] }
 0x18e   : > { %v2672_v22 = vpop.f32.mrf.mxu2  ;;  %v739_v39 = vsel %vm6697_vm4, %v731_v9, %v738_v38  ;;  %v8913_v47 = vpop.f32.mrf.mxu1  ;;  %3067 = vmatmul.bf16.gmra.mxu3 %v2927_v59  ;;  %vm10235_vm4 = vsmask.f32 7424  ;;  %v10236_v9 = vld [vmem:[#allocation18_spill] sm:$0xff]  ;;  %v2548_v40 = vpack.c.b16 %v2531_v0, %v2530_v36  ;;  %v3356_v0 = vshrl.u32 %v8863_v2, 16 }
 0x18f   : > { %v2743_v63 = vadd.f32 %v2672_v22, %v7870_v26  ;;  %807 = vst [vmem:[#allocation2 + $0x84] sm:$0xf] %v739_v39  ;;  %v416_v26 = vsel %vm10234_vm5, 0, %v415_v10  ;;  %v3355_v18 = vsel %vm10235_vm4, %v3350_v43, %v3354_v31  ;;  %vm10237_vm15 = vnez %v10236_v9 }
 0x190   : > { %417 = vst [vmem:[#allocation2 + $0x88] sm:$0xf] %v416_v26  ;;  %v2829_v23 = vsel %vm10237_vm15, %v2797_v12, 0  ;;  %v2911_v39 = vunpack.c.l.b16 %v2830_v16  ;;  %v740_v10 = vrot.slane %v8888_v56, 4  ;;  %v6458_v56 = vld [vmem:[%s9731_s3 + $0x1c0] sm:$0xff]  ;;  %v10240_v26 = vld [vmem:[#allocation3_spill] sm:$0xff] }
 0x191   : > { %v3089_v49 = vadd.f32 %v8689_v25, %v2743_v63  ;;  %v8919_v22 = vpop.f32.mrf.mxu3  ;;  %v8924_v25 = vrot.slane %v3696_v21, 1  ;;  %v2910_v3 = vunpack.c.l.b16 %v2829_v23  ;;  %v8941_v21 = vrot.slane %v2548_v40, 1  ;;  %4599 = vmatpush.bf16.msra.mxu3 %v6458_v56 }
 0x192   : > { %vm10241_vm5 = vnez %v10240_v26  ;;  %v10242_v16 = vrot.slane %v8738_v14, 7  ;;  %v6466_v14 = vld [vmem:[%s9731_s3 + $0x200] sm:$0xff] }
 0x193   : > { %v3539_v59 = vadd.f32 %v8824_v13, %v3089_v49  ;;  %v3473_v61 = vpop.f32.mrf.mxu0  ;;  %v3145_v13 = vld [vmem:[#allocation2 + $0x80] sm:$0xf]  ;;  %v3727_v12 = vsel %vm10238_vm10, %v8822_v58, %v8924_v25  ;;  %v8952_v36 = vsel %vm10239_vm9, %v8860_v11, %v8941_v21  ;;  %4951 = vmatpush.bf16.msra.mxu0 %v6466_v14  ;;  %vm10244_vm9 = vnez %v10243_v29 }
 0x194   : > { %v3596_v49 = vsel %vm8881_vm6, %v3145_v13, 0 }
 0x195   : > { %v8932_v60 = vadd.f32 %v8730_v46, %v3539_v59 }
 0x196   : > { %v2674_v38 = vpop.f32.mrf.mxu2  ;;  %v3146_v63 = vld [vmem:[#allocation2 + $0x84] sm:$0xf]  ;;  %3512 = vmatmul.bf16.gmra.mxu0 %v3355_v18  ;;  %v8934_v62 = vpop.f32.mrf.mxu1  ;;  %v3679_v18 = vunpack.c.l.b16 %v3596_v49 }
 0x197   : > { %v2744_v41 = vadd.f32 %v2674_v38, %v1962_v33  ;;  %v3597_v43 = vsel %vm8895_vm11, %v3146_v63, 0  ;;  %v808_v58 = vld [vmem:[#allocation2 + $0x88] sm:$0x1]  ;;  %v3360_v33 = vshll.u32 %v8936_v57, 16  ;;  %v2185_v38 = vrot.slane %v10242_v16, 4 }
 0x198   : > { %v809_v11 = vsel %vm10241_vm5, %v740_v10, %v808_v58  ;;  %v3680_v2 = vunpack.c.l.b16 %v3597_v43  ;;  %v3358_v63 = vor.u32 %v3356_v0, %v3354_v31  ;;  %v2799_v43 = vld [vmem:[#allocation2 + $0x80] sm:$0xf]  ;;  %v1967_v31 = vadd.f32 %v8005_v4, %v8051_v1 }
 0x199   : > { %v3090_v46 = vadd.f32 %v8763_v53, %v2744_v41  ;;  %3869 = vmatmul.bf16.gmra.mxu1 %v3727_v12  ;;  %v8956_v53 = vpop.f32.mrf.mxu3  ;;  %810 = vst [vmem:[#allocation2 + $0x88] sm:$0x1] %v809_v11  ;;  %v2411_v49 = vunpack.c.h.b16 %v2185_v38  ;;  %v2831_v56 = vsel %vm10244_vm9, %v2799_v43, 0  ;;  %v8995_v1 = vld [vmem:[#allocation2 + $0x80] sm:$0xff] }
 0x19b   : > { %2716 = vmatmul.bf16.gmra.mxu2 %v8750_v45  ;;  %v3540_v59 = vadd.f32 %v3470_v37, %v3090_v46  ;;  %v2928_v45 = vpack.c.b16 %v2911_v39, %v2910_v3  ;;  %v3475_v23 = vpop.f32.mrf.mxu0  ;;  %v3362_v37 = vrot.slane %v3360_v33, 1  ;;  %v3697_v3 = vpack.c.b16 %v3680_v2, %v3679_v18  ;;  %v6490_v2 = vld [vmem:[%s9732_s4] sm:$0xff] }
 0x19c   : > { %v2410_v39 = vunpack.c.l.b16 %v2185_v38  ;;  %vm2415_vm5 = vcmp.ne.s32.totalorder %v2411_v49, %v7248_v34  ;;  %v2912_v33 = vunpack.c.l.b16 %v2831_v56  ;;  %v10246_v18 = vmov 0  ;;  %5432 = vmatpush.bf16.msra.mxu1 %v6490_v2  ;;  %v6442_v49 = vld [vmem:[#allocation2 + $0x10] sm:$0xff] }
 0x19d   : > { %v8970_v40 = vadd.f32 %v8802_v7, %v3540_v59  ;;  %v2800_v7 = vld [vmem:[#allocation2 + $0x84] sm:$0xf]  ;;  %v3363_v58 = vsel %vm10235_vm4, %v3358_v63, %v3362_v37  ;;  %v3728_v0 = vrot.slane %v3697_v3, 1  ;;  %vm10245_vm4 = vcmask 1046528  }
 0x19e   : > { %v2677_v13 = vpop.f32.mrf.mxu2  ;;  %v8973_v12 = vpop.f32.mrf.mxu1  ;;  %3072 = vmatmul.bf16.gmra.mxu3 %v2928_v45  ;;  %vm2414_vm10 = vcmp.ne.s32.totalorder %v2410_v39, %v7243_v42  ;;  %v2832_v26 = vsel %vm6745_vm8, %v2800_v7, 0 }
 0x19f   : > { %v2745_v41 = vadd.f32 %v2677_v13, %v7972_v51  ;;  %v3729_v42 = vsel %vm10245_vm4, %v8924_v25, %v3728_v0  ;;  %v2913_v45 = vunpack.c.l.b16 %v2832_v26  ;;  %vm8999_vm9 = vmpackc.low %vm2415_vm5, %vm2414_vm10  ;;  %v3364_v13 = vshrl.u32 %v8936_v57, 16  ;;  %v10249_v26 = vld [vmem:[#allocation60_spill] sm:$0xff] }
 0x1a0   : > { %v10247_v18 = vsel %vm8999_vm9, 4294967295, %v10246_v18  ;;  %v3147_v34 = vld [vmem:[#allocation2 + $0x88] sm:$0x1]  ;;  %vm10250_vm10 = vsmask.f32 7424  ;;  %vm10251_vm5 = vmmov %vm10245_vm4 }
 0x1a1   : > { %v3091_v46 = vadd.f32 %v8817_v50, %v2745_v41  ;;  %v8979_v10 = vpop.f32.mrf.mxu3  ;;  %v3598_v16 = vsel %vm8999_vm9, %v3147_v34, 0  ;;  %v3368_v41 = vshll.u32 %v8995_v1, 16  ;;  %v2929_v63 = vpack.c.b16 %v2913_v45, %v2912_v33  ;;  %vm10252_vm4 = vmmov %vm10250_vm10 }
 0x1a2   : > { %v4397_v33 = vshrl.u32 %v6442_v49, 16 }
 0x1a3   : > { %v3541_v51 = vadd.f32 %v3473_v61, %v3091_v46  ;;  %v3478_v50 = vpop.f32.mrf.mxu0  ;;  %v3370_v43 = vrot.slane %v3368_v41, 1 }
 0x1a5   : > { %v8991_v11 = vadd.f32 %v8855_v8, %v3541_v51  ;;  %v9021_v51 = vld [vmem:[#allocation2 + $0x18] sm:$0xff] }
 0x1a6   : > { %v2679_v61 = vpop.f32.mrf.mxu2  ;;  %3517 = vmatmul.bf16.gmra.mxu0 %v3363_v58  ;;  %v8993_v4 = vpop.f32.mrf.mxu1 }
 0x1a7   : > { %v2746_v59 = vadd.f32 %v2679_v61, %v1967_v31  ;;  %v4399_v31 = vshll.u32 %v6442_v49, 16  ;;  %v3372_v49 = vshrl.u32 %v8995_v1, 16 }
 0x1a9   : > { %v3092_v8 = vadd.f32 %v8886_v35, %v2746_v59  ;;  %3874 = vmatmul.bf16.gmra.mxu1 %v3729_v42  ;;  %v9010_v25 = vpop.f32.mrf.mxu3  ;;  %v3681_v35 = vunpack.c.l.b16 %v3598_v16  ;;  %v3230_v59 = vunpack.c.l.b16 %v3147_v34  ;;  %v4401_v45 = vrot.slane %v4399_v31, 1  ;;  %v9042_v31 = vld [vmem:[#allocation2 + $0x10] sm:$0xff] }
 0x1ab   : > { %2721 = vmatmul.bf16.gmra.mxu2 %v8875_v27  ;;  %v3542_v38 = vadd.f32 %v3475_v23, %v3092_v8  ;;  %v3480_v3 = vpop.f32.mrf.mxu0  ;;  %v3366_v27 = vor.u32 %v3364_v13, %v3362_v37  ;;  %v3698_v23 = vpack.c.b16 %v3681_v35, %v3681_v35  ;;  %v4404_v8 = vshll.u32 %v9021_v51, 16 }
 0x1ac   : > { %v3247_v41 = vpack.c.b16 %v3230_v59, %v3230_v59 }
 0x1ad   : > { %v9015_v39 = vadd.f32 %v8913_v47, %v3542_v38  ;;  %v10248_v47 = vld [vmem:[#allocation64_spill] sm:$0xff]  ;;  %v3730_v37 = vrot.slane %v3698_v23, 1 }
 0x1ae   : > { %v2682_v46 = vpop.f32.mrf.mxu2  ;;  %v9018_v7 = vpop.f32.mrf.mxu1  ;;  %3077 = vmatmul.bf16.gmra.mxu3 %v2929_v63  ;;  %v1972_v61 = vadd.f32 %v10249_v26, %v10248_v47  ;;  %v6551_v38 = vld [vmem:[#allocation2 + $0x80] sm:$0x1]  ;;  %v6474_v63 = vld [vmem:[#allocation2 + $0x8] sm:$0xff] }
 0x1af   : > { %v2747_v14 = vadd.f32 %v2682_v46, %v8128_v17  ;;  %v3371_v17 = vsel %vm10250_vm10, %v3366_v27, %v3370_v43  ;;  %v3731_v34 = vsel %vm10251_vm5, %v3728_v0, %v3730_v37  ;;  %v4402_v46 = vor.u32 %v4401_v45, %v4397_v33  ;;  %v4266_v33 = vld [vmem:[#allocation2 + $0x1c] sm:$0xf] }
 0x1b0   : > { %v3374_v37 = vor.u32 %v3372_v49, %v3370_v43 }
 0x1b1   : > { %v3093_v57 = vadd.f32 %v8919_v22, %v2747_v14  ;;  %v9023_v58 = vpop.f32.mrf.mxu3  ;;  %v4406_v14 = vrot.slane %v4404_v8, 1  ;;  %v5230_v8 = vshrl.u32 %v6474_v63, 16 }
 0x1b3   : > { %v3543_v56 = vadd.f32 %v3478_v50, %v3093_v57  ;;  %v3483_v42 = vpop.f32.mrf.mxu0  ;;  %v2449_v50 = vsel %vm8999_vm9, %v6551_v38, 0  ;;  %v3376_v57 = vshll.u32 %v3247_v41, 16  ;;  %v4407_v0 = vsel %vm10252_vm4, %v4402_v46, %v4406_v14  ;;  %v10257_v46 = vld [vmem:[#allocation23_spill] sm:$0xff] }
 0x1b4   : > { %vm10258_vm5 = vnez %v10257_v46  ;;  %v3918_v46 = vld [vmem:[#allocation2 + $0x14] sm:$0xf] }
 0x1b5   : > { %v9030_v22 = vadd.f32 %v8934_v62, %v3543_v56  ;;  %v2532_v62 = vunpack.c.l.b16 %v2449_v50  ;;  %v5232_v56 = vshll.u32 %v6474_v63, 16  ;;  %v3378_v45 = vrot.slane %v3376_v57, 1  ;;  %v4713_v50 = vld [vmem:[#allocation2 + $0x10] sm:$0xe] }
 0x1b6   : > { %v2684_v2 = vpop.f32.mrf.mxu2  ;;  %3522 = vmatmul.bf16.gmra.mxu0 %v3371_v17  ;;  %v9034_v13 = vpop.f32.mrf.mxu1  ;;  %v10253_v17 = vld [vmem:[#allocation67_spill] sm:$0xff] }
 0x1b7   : > { %v2748_v16 = vadd.f32 %v2684_v2, %v1972_v61  ;;  %v4264_v61 = vld [vmem:[#allocation2 + $0x14] sm:$0xf]  ;;  %v2549_v1 = vpack.c.b16 %v2532_v62, %v2532_v62  ;;  %v5234_v2 = vrot.slane %v5232_v56, 1  ;;  %v4717_v62 = vsel %vm10258_vm5, %v4266_v33, 0 }
 0x1b8   : > { %v3379_v57 = vsel %vm10252_vm4, %v3374_v37, %v3378_v45 }
 0x1b9   : > { %v3094_v35 = vadd.f32 %v8956_v53, %v2748_v16  ;;  %3879 = vmatmul.bf16.gmra.mxu1 %v3731_v34  ;;  %v9040_v27 = vpop.f32.mrf.mxu3  ;;  %v5237_v16 = vshll.u32 %v9042_v31, 16  ;;  %v4715_v34 = vsel %vm7350_vm3, %v4264_v61, 0  ;;  %v5235_v56 = vor.u32 %v5234_v2, %v5230_v8 }
 0x1ba   : > { %v4408_v61 = vshrl.u32 %v9021_v51, 16  ;;  %v4798_v41 = vunpack.c.l.b16 %v4715_v34  ;;  %vm10262_vm3 = vcmask 1046528  }
 0x1bb   : > { %2726 = vmatmul.bf16.gmra.mxu2 %v8952_v36  ;;  %v3544_v23 = vadd.f32 %v3480_v3, %v3094_v35  ;;  %v3485_v47 = vpop.f32.mrf.mxu0  ;;  %v4265_v36 = vld [vmem:[#allocation2 + $0x18] sm:$0xf]  ;;  %v10255_v35 = vld [vmem:[#allocation22_spill] sm:$0xff] }
 0x1bc   : > { %vm10256_vm10 = vnez %v10255_v35 }
 0x1bd   : > { %v9046_v53 = vadd.f32 %v8973_v12, %v3544_v23  ;;  %v9053_v12 = vld [vmem:[#allocation2 + $0x20] sm:$0xff]  ;;  %v4716_v43 = vsel %vm10256_vm10, %v4265_v36, 0  ;;  %v2582_v23 = vrot.slane %v2549_v1, 1  ;;  %vm10264_vm10 = vmmov %vm10252_vm4 }
 0x1be   : > { %v2687_v26 = vpop.f32.mrf.mxu2  ;;  %v9049_v3 = vpop.f32.mrf.mxu1  ;;  %4600 = vmatmul.bf16.vlgmr.msra.gmra.mxu3 %v4407_v0  ;;  %v4799_v35 = vunpack.c.l.b16 %v4716_v43  ;;  %v3917_v43 = vld [vmem:[#allocation2 + $0x10] sm:$0xf] }
 0x1bf   : > { %v2749_v59 = vadd.f32 %v2687_v26, %v10253_v17  ;;  %v10259_v26 = vld [vmem:[#allocation35_spill] sm:$0xff]  ;;  %v2583_v37 = vsel %vm10262_vm3, %v8941_v21, %v2582_v23 }
 0x1c0   : > { %vm10260_vm9 = vnez %v10259_v26  ;;  %v9080_v21 = vld [vmem:[#allocation2 + $0x18] sm:$0xff] }
 0x1c1   : > { %v3095_v38 = vadd.f32 %v8979_v10, %v2749_v59  ;;  %v9061_v49 = vpop.f32.mrf.mxu3  ;;  %v5239_v10 = vrot.slane %v5237_v16, 1  ;;  %v4714_v17 = vsel %vm10260_vm9, %v4713_v50, 0  ;;  %v4412_v59 = vshll.u32 %v9053_v12, 16  ;;  %vm10263_vm9 = vmmov %vm10252_vm4 }
 0x1c2   : > { %v4797_v8 = vunpack.c.l.b16 %v4714_v17  ;;  %v4410_v16 = vor.u32 %v4408_v61, %v4406_v14  ;;  %v10265_v14 = vld [vmem:[#allocation7_spill] sm:$0xff]  ;;  %v3950_v17 = vsel %vm6745_vm8, %v3918_v46, 0  ;;  %vm10268_vm4 = vmmov %vm10262_vm3 }
 0x1c3   : > { %v3545_v63 = vadd.f32 %v3483_v42, %v3095_v38  ;;  %v3488_v0 = vpop.f32.mrf.mxu0  ;;  %v10261_v42 = vld [vmem:[#allocation71_spill] sm:$0xff]  ;;  %v4800_v38 = vunpack.c.l.b16 %v4717_v62  ;;  %v5240_v51 = vsel %vm10263_vm9, %v5235_v56, %v5239_v10  ;;  %vm10266_vm5 = vnez %v10265_v14 }
 0x1c4   : > { %v4830_v62 = vpack.c.b16 %v4798_v41, %v4797_v8  ;;  %v3949_v26 = vsel %vm10266_vm5, %v3917_v43, 0  ;;  %v10269_v43 = vld [vmem:[#allocation24_spill] sm:$0xff]  ;;  %vm10274_vm5 = vmmov %vm10264_vm10 }
 0x1c5   : > { %v9069_v36 = vadd.f32 %v8993_v4, %v3545_v63  ;;  %v4414_v4 = vrot.slane %v4412_v59, 1  ;;  %v4831_v63 = vpack.c.b16 %v4800_v38, %v4799_v35  ;;  %v5241_v35 = vshrl.u32 %v9042_v31, 16  ;;  %v9098_v38 = vld [vmem:[#allocation2 + $0x28] sm:$0xff] }
 0x1c6   : > { %v2689_v33 = vpop.f32.mrf.mxu2  ;;  %3527 = vmatmul.bf16.gmra.mxu0 %v3379_v57  ;;  %v9074_v45 = vpop.f32.mrf.mxu1  ;;  %v4847_v59 = vrot.slane %v4830_v62, 1  ;;  %v4030_v8 = vunpack.c.l.b16 %v3949_v26  ;;  %vm10270_vm3 = vnez %v10269_v43  ;;  %v4420_v14 = vshll.u32 %v9098_v38, 16  ;;  %v3920_v43 = vld [vmem:[#allocation2 + $0x1c] sm:$0xf] }
 0x1c7   : > { %v2750_v1 = vadd.f32 %v2689_v33, %v10261_v42  ;;  %v4415_v57 = vsel %vm10264_vm10, %v4410_v16, %v4414_v4  ;;  %v9091_v33 = vrot.slane %v4831_v63, 1  ;;  %v5243_v31 = vor.u32 %v5241_v35, %v5239_v10 }
 0x1c9   : > { %v3096_v2 = vadd.f32 %v9010_v25, %v2750_v1  ;;  %5433 = vmatmul.bf16.vlgmr.msra.gmra.mxu1 %v5240_v51  ;;  %v9078_v50 = vpop.f32.mrf.mxu3  ;;  %v4267_v1 = vld [vmem:[#allocation2 + $0x20] sm:$0xf]  ;;  %v4031_v51 = vunpack.c.l.b16 %v3950_v17 }
 0x1ca   : > { %v4718_v46 = vsel %vm10270_vm3, %v4267_v1, 0  ;;  %vm10281_vm3 = vcmask 1046528  }
 0x1cb   : > { %2731 = vmatmul.bf16.gmra.mxu2 %v2583_v37  ;;  %v3546_v34 = vadd.f32 %v3485_v47, %v3096_v2  ;;  %v3490_v23 = vpop.f32.mrf.mxu0  ;;  %v10267_v47 = vld [vmem:[#allocation72_spill] sm:$0xff]  ;;  %v4268_v37 = vld [vmem:[#allocation2 + $0x24] sm:$0xf]  ;;  %v4062_v17 = vpack.c.b16 %v4031_v51, %v4030_v8  ;;  %v4801_v10 = vunpack.c.l.b16 %v4718_v46 }
 0x1cc   : > { %v9120_v51 = vld [vmem:[#allocation2 + $0x20] sm:$0xff] }
 0x1cd   : > { %v9084_v56 = vadd.f32 %v9018_v7, %v3546_v34  ;;  %v5245_v7 = vshll.u32 %v9080_v21, 16  ;;  %v4849_v34 = vsel %vm10268_vm4, %v4847_v59, %v9091_v33 }
 0x1ce   : > { %v2692_v25 = vpop.f32.mrf.mxu2  ;;  %v9093_v41 = vpop.f32.mrf.mxu1  ;;  %4605 = vmatmul.bf16.gmra.mxu3 %v4415_v57  ;;  %v10271_v57 = vld [vmem:[#allocation25_spill] sm:$0xff] }
 0x1cf   : > { %v2751_v61 = vadd.f32 %v2692_v25, %v10267_v47  ;;  %v5247_v62 = vrot.slane %v5245_v7, 1  ;;  %vm10272_vm9 = vnez %v10271_v57  ;;  %v4416_v25 = vshrl.u32 %v9053_v12, 16  ;;  %v10273_v47 = vld [vmem:[#allocation75_spill] sm:$0xff] }
 0x1d0   : > { %v4422_v12 = vrot.slane %v4420_v14, 1 }
 0x1d1   : > { %v3097_v42 = vadd.f32 %v9023_v58, %v2751_v61  ;;  %v9100_v2 = vpop.f32.mrf.mxu3  ;;  %v4719_v58 = vsel %vm10272_vm9, %v4268_v37, 0  ;;  %v5248_v7 = vsel %vm10264_vm10, %v5243_v31, %v5247_v62  ;;  %v4418_v1 = vor.u32 %v4416_v25, %v4414_v4 }
 0x1d2   : > { %v4802_v35 = vunpack.c.l.b16 %v4719_v58  ;;  %v10277_v58 = vld [vmem:[#allocation9_spill] sm:$0xff] }
 0x1d3   : > { %v3547_v16 = vadd.f32 %v3488_v0, %v3097_v42  ;;  %v3493_v63 = vpop.f32.mrf.mxu0  ;;  %v4423_v46 = vsel %vm10274_vm5, %v4418_v1, %v4422_v12  ;;  %vm10278_vm4 = vnez %v10277_v58  ;;  %v10284_v58 = vld [vmem:[#allocation29_spill] sm:$0xff] }
 0x1d4   : > { %v4832_v8 = vpack.c.b16 %v4802_v35, %v4801_v10  ;;  %v9138_v10 = vld [vmem:[#allocation2 + $0x30] sm:$0xff]  ;;  %v4270_v35 = vld [vmem:[#allocation2 + $0x2c] sm:$0xf]  ;;  %vm10285_vm10 = vnez %v10284_v58 }
 0x1d5   : > { %v9111_v26 = vadd.f32 %v9034_v13, %v3547_v16  ;;  %v3919_v16 = vld [vmem:[#allocation2 + $0x18] sm:$0xf] }
 0x1d6   : > { %v2694_v0 = vpop.f32.mrf.mxu2  ;;  %4952 = vmatmul.bf16.vlgmr.msra.gmra.mxu0 %v4849_v34  ;;  %v9114_v59 = vpop.f32.mrf.mxu1  ;;  %v3951_v25 = vsel %vm10278_vm4, %v3919_v16, 0  ;;  %v9131_v14 = vrot.slane %v4832_v8, 1  ;;  %vm10287_vm4 = vmmov %vm10274_vm5 }
 0x1d7   : > { %v2752_v61 = vadd.f32 %v2694_v0, %v10273_v47  ;;  %v5253_v47 = vshll.u32 %v9120_v51, 16 }
 0x1d9   : > { %v3098_v42 = vadd.f32 %v9040_v27, %v2752_v61  ;;  %5438 = vmatmul.bf16.gmra.mxu1 %v5248_v7  ;;  %v9118_v37 = vpop.f32.mrf.mxu3  ;;  %v10276_v27 = vld [vmem:[#allocation34_spill] sm:$0xff]  ;;  %v4269_v61 = vld [vmem:[#allocation2 + $0x28] sm:$0xf]  ;;  %v10279_v7 = vld [vmem:[#allocation36_spill] sm:$0xff] }
 0x1db   : > { %4150 = vmatmul.bf16.vlgmr.msra.gmra.mxu2 %v4062_v17  ;;  %v3548_v13 = vadd.f32 %v3490_v23, %v3098_v42  ;;  %v3495_v34 = vpop.f32.mrf.mxu0  ;;  %v3952_v23 = vsel %vm6745_vm8, %v3920_v43, 0  ;;  %v5249_v17 = vshrl.u32 %v9080_v21, 16  ;;  %v10280_v42 = vld [vmem:[#allocation33_spill] sm:$0xff]  ;;  %v4851_v21 = vsel %vm10281_vm3, %v9091_v33, %v9131_v14 }
 0x1dc   : > { %v1987_v1 = vadd.f32 %v10280_v42, %v10279_v7  ;;  %v4033_v16 = vunpack.c.l.b16 %v3952_v23  ;;  %v4424_v7 = vshrl.u32 %v9098_v38, 16 }
 0x1dd   : > { %v9124_v57 = vadd.f32 %v9049_v3, %v3548_v13  ;;  %v4032_v13 = vunpack.c.l.b16 %v3951_v25  ;;  %v4428_v25 = vshll.u32 %v9138_v10, 16 }
 0x1de   : > { %v2697_v31 = vpop.f32.mrf.mxu2  ;;  %v9133_v0 = vpop.f32.mrf.mxu1  ;;  %4610 = vmatmul.bf16.gmra.mxu3 %v4423_v46  ;;  %v10282_v46 = vld [vmem:[#allocation28_spill] sm:$0xff] }
 0x1df   : > { %10275 = vst [vmem:[#allocation30_spill] sm:$0xff] %v9124_v57  ;;  %v2753_v4 = vadd.f32 %v2697_v31, %v10276_v27  ;;  %vm10283_vm9 = vnez %v10282_v46  ;;  %v5255_v27 = vrot.slane %v5253_v47, 1  ;;  %v4721_v57 = vsel %vm10285_vm10, %v4270_v35, 0 }
 0x1e0   : > { %v4720_v31 = vsel %vm10283_vm9, %v4269_v61, 0  ;;  %v4063_v42 = vpack.c.b16 %v4033_v16, %v4032_v13  ;;  %v4426_v35 = vor.u32 %v4424_v7, %v4422_v12  ;;  %v4430_v46 = vrot.slane %v4428_v25, 1  ;;  %v3922_v16 = vld [vmem:[#allocation2 + $0x24] sm:$0xf] }
 0x1e1   : > { %v3099_v3 = vadd.f32 %v9061_v49, %v2753_v4  ;;  %v9142_v8 = vpop.f32.mrf.mxu3  ;;  %v5251_v49 = vor.u32 %v5249_v17, %v5247_v62  ;;  %v4803_v61 = vunpack.c.l.b16 %v4720_v31  ;;  %v4804_v62 = vunpack.c.l.b16 %v4721_v57 }
 0x1e2   : > { %vm10294_vm9 = vcmask 1046528  }
 0x1e3   : > { %v3549_v43 = vadd.f32 %v3493_v63, %v3099_v3  ;;  %v3498_v4 = vpop.f32.mrf.mxu0  ;;  %v5256_v17 = vsel %vm10274_vm5, %v5251_v49, %v5255_v27  ;;  %v4833_v58 = vpack.c.b16 %v4804_v62, %v4803_v61  ;;  %v10290_v49 = vld [vmem:[#allocation11_spill] sm:$0xff]  ;;  %v4271_v61 = vld [vmem:[#allocation2 + $0x30] sm:$0xf] }
 0x1e4   : > { %vm10291_vm3 = vnez %v10290_v49  ;;  %v9180_v62 = vld [vmem:[#allocation2 + $0x38] sm:$0xff] }
 0x1e5   : > { %v9154_v23 = vadd.f32 %v9074_v45, %v3549_v43  ;;  %v3921_v43 = vld [vmem:[#allocation2 + $0x20] sm:$0xf]  ;;  %v9173_v25 = vrot.slane %v4833_v58, 1 }
 0x1e6   : > { %v2699_v63 = vpop.f32.mrf.mxu2  ;;  %4957 = vmatmul.bf16.gmra.mxu0 %v4851_v21  ;;  %v9156_v33 = vpop.f32.mrf.mxu1  ;;  %v4431_v21 = vsel %vm10287_vm4, %v4426_v35, %v4430_v46  ;;  %v3953_v7 = vsel %vm10291_vm3, %v3921_v43, 0  ;;  %v10293_v35 = vld [vmem:[#allocation38_spill] sm:$0xff]  ;;  %vm10307_vm3 = vmmov %vm10294_vm9 }
 0x1e7   : > { %10286 = vst [vmem:[#allocation31_spill] sm:$0xff] %v9154_v23  ;;  %v2754_v3 = vadd.f32 %v2699_v63, %v1987_v1  ;;  %v9162_v1 = vld [vmem:[#allocation2 + $0x28] sm:$0xff]  ;;  %v4034_v43 = vunpack.c.l.b16 %v3953_v7  ;;  %v4436_v7 = vshll.u32 %v9180_v62, 16 }
 0x1e9   : > { %v3100_v47 = vadd.f32 %v9078_v50, %v2754_v3  ;;  %5443 = vmatmul.bf16.gmra.mxu1 %v5256_v17  ;;  %v9160_v38 = vpop.f32.mrf.mxu3  ;;  %v10289_v50 = vld [vmem:[#allocation37_spill] sm:$0xff]  ;;  %v5257_v3 = vshrl.u32 %v9120_v51, 16  ;;  %v4272_v17 = vld [vmem:[#allocation2 + $0x34] sm:$0xf]  ;;  %v4853_v51 = vsel %vm10294_vm9, %v9131_v14, %v9173_v25 }
 0x1eb   : > { %4155 = vmatmul.bf16.gmra.mxu2 %v4063_v42  ;;  %v3550_v45 = vadd.f32 %v3495_v34, %v3100_v47  ;;  %v3500_v13 = vpop.f32.mrf.mxu0  ;;  %v3954_v34 = vsel %vm6745_vm8, %v3922_v16, 0  ;;  %v5261_v42 = vshll.u32 %v9162_v1, 16  ;;  %v10292_v47 = vld [vmem:[#allocation41_spill] sm:$0xff] }
 0x1ec   : > { %v4035_v16 = vunpack.c.l.b16 %v3954_v34 }
 0x1ed   : > { %v9166_v57 = vadd.f32 %v9093_v41, %v3550_v45  ;;  %v1992_v45 = vadd.f32 %v10293_v35, %v10292_v47  ;;  %v4432_v47 = vshrl.u32 %v9138_v10, 16 }
 0x1ee   : > { %v2702_v31 = vpop.f32.mrf.mxu2  ;;  %v9175_v63 = vpop.f32.mrf.mxu1  ;;  %4615 = vmatmul.bf16.gmra.mxu3 %v4431_v21  ;;  %v4064_v35 = vpack.c.b16 %v4035_v16, %v4034_v43  ;;  %v3924_v16 = vld [vmem:[#allocation2 + $0x2c] sm:$0xf] }
 0x1ef   : > { %10288 = vst [vmem:[#allocation32_spill] sm:$0xff] %v9166_v57  ;;  %v2755_v12 = vadd.f32 %v2702_v31, %v10289_v50  ;;  %v4722_v50 = vsel %vm7735_vm1, %v4271_v61, 0  ;;  %v10296_v57 = vld [vmem:[#allocation40_spill] sm:$0xff]  ;;  %vm10299_vm1 = vmmov %vm10287_vm4 }
 0x1f0   : > { %vm10297_vm10 = vnez %v10296_v57  ;;  %v4805_v61 = vunpack.c.l.b16 %v4722_v50  ;;  %vm10300_vm5 = vmmov %vm10299_vm1 }
 0x1f1   : > { %v3101_v41 = vadd.f32 %v9100_v2, %v2755_v12  ;;  %v9184_v58 = vpop.f32.mrf.mxu3  ;;  %v5259_v2 = vor.u32 %v5257_v3, %v5255_v27  ;;  %v5263_v12 = vrot.slane %v5261_v42, 1  ;;  %v4723_v23 = vsel %vm10297_vm10, %v4272_v17, 0  ;;  %vm10313_vm10 = vmmov %vm10299_vm1 }
 0x1f2   : > { %v4806_v27 = vunpack.c.l.b16 %v4723_v23  ;;  %v4434_v42 = vor.u32 %v4432_v47, %v4430_v46  ;;  %v4438_v17 = vrot.slane %v4436_v7, 1 }
 0x1f3   : > { %v3551_v31 = vadd.f32 %v3498_v4, %v3101_v41  ;;  %v3503_v49 = vpop.f32.mrf.mxu0  ;;  %v5264_v3 = vsel %vm10299_vm1, %v5259_v2, %v5263_v12  ;;  %v10303_v2 = vld [vmem:[#allocation13_spill] sm:$0xff] }
 0x1f4   : > { %v4834_v21 = vpack.c.b16 %v4806_v27, %v4805_v61  ;;  %vm10304_vm4 = vnez %v10303_v2  ;;  %v4273_v61 = vld [vmem:[#allocation2 + $0x38] sm:$0xf]  ;;  %v9222_v27 = vld [vmem:[#allocation2 + $0x40] sm:$0xff] }
 0x1f5   : > { %v9196_v34 = vadd.f32 %v9114_v59, %v3551_v31  ;;  %v3923_v31 = vld [vmem:[#allocation2 + $0x28] sm:$0xf] }
 0x1f6   : > { %v2704_v4 = vpop.f32.mrf.mxu2  ;;  %4962 = vmatmul.bf16.gmra.mxu0 %v4853_v51  ;;  %v9198_v14 = vpop.f32.mrf.mxu1  ;;  %v4439_v51 = vsel %vm10300_vm5, %v4434_v42, %v4438_v17  ;;  %v3955_v47 = vsel %vm10304_vm4, %v3923_v31, 0  ;;  %v9215_v7 = vrot.slane %v4834_v21, 1  ;;  %v10306_v42 = vld [vmem:[#allocation43_spill] sm:$0xff]  ;;  %vm10320_vm5 = vmmov %vm10307_vm3 }
 0x1f7   : > { %10298 = vst [vmem:[#allocation14_spill] sm:$0xff] %v9196_v34  ;;  %v2756_v41 = vadd.f32 %v2704_v4, %v1992_v45  ;;  %v9204_v45 = vld [vmem:[#allocation2 + $0x30] sm:$0xff]  ;;  %v4036_v31 = vunpack.c.l.b16 %v3955_v47  ;;  %v4444_v47 = vshll.u32 %v9222_v27, 16 }
 0x1f9   : > { %v3102_v57 = vadd.f32 %v9118_v37, %v2756_v41  ;;  %5448 = vmatmul.bf16.gmra.mxu1 %v5264_v3  ;;  %v9202_v10 = vpop.f32.mrf.mxu3  ;;  %v10302_v37 = vld [vmem:[#allocation42_spill] sm:$0xff]  ;;  %v5265_v41 = vshrl.u32 %v9162_v1, 16  ;;  %v4274_v3 = vld [vmem:[#allocation2 + $0x3c] sm:$0xf]  ;;  %v4855_v1 = vsel %vm10307_vm3, %v9173_v25, %v9215_v7 }
 0x1fb   : > { %4160 = vmatmul.bf16.gmra.mxu2 %v4064_v35  ;;  %v3552_v59 = vadd.f32 %v3500_v13, %v3102_v57  ;;  %v3505_v43 = vpop.f32.mrf.mxu0  ;;  %v3956_v13 = vsel %vm6745_vm8, %v3924_v16, 0  ;;  %v5269_v35 = vshll.u32 %v9204_v45, 16  ;;  %v10305_v57 = vld [vmem:[#allocation46_spill] sm:$0xff] }
 0x1fc   : > { %v4037_v16 = vunpack.c.l.b16 %v3956_v13 }
 0x1fd   : > { %v9208_v23 = vadd.f32 %v9133_v0, %v3552_v59  ;;  %v1997_v59 = vadd.f32 %v10306_v42, %v10305_v57  ;;  %v4440_v57 = vshrl.u32 %v9180_v62, 16 }
 0x1fe   : > { %v2707_v50 = vpop.f32.mrf.mxu2  ;;  %v9217_v4 = vpop.f32.mrf.mxu1  ;;  %4620 = vmatmul.bf16.gmra.mxu3 %v4439_v51  ;;  %v4065_v42 = vpack.c.b16 %v4037_v16, %v4036_v31  ;;  %v3926_v16 = vld [vmem:[#allocation2 + $0x34] sm:$0xf] }
 0x1ff   : > { %10301 = vst [vmem:[#allocation26_spill] sm:$0xff] %v9208_v23  ;;  %v2757_v46 = vadd.f32 %v2707_v50, %v10302_v37  ;;  %v4724_v37 = vsel %vm7837_vm14, %v4273_v61, 0  ;;  %v10309_v23 = vld [vmem:[#allocation45_spill] sm:$0xff]  ;;  %vm10312_vm14 = vmmov %vm10299_vm1 }
 0x200   : > { %vm10310_vm9 = vnez %v10309_v23  ;;  %v4807_v61 = vunpack.c.l.b16 %v4724_v37 }
 0x201   : > { %v3103_v0 = vadd.f32 %v9142_v8, %v2757_v46  ;;  %v9226_v21 = vpop.f32.mrf.mxu3  ;;  %v5267_v8 = vor.u32 %v5265_v41, %v5263_v12  ;;  %v5271_v46 = vrot.slane %v5269_v35, 1  ;;  %v4725_v34 = vsel %vm10310_vm9, %v4274_v3, 0 }
 0x202   : > { %v4808_v12 = vunpack.c.l.b16 %v4725_v34  ;;  %v4442_v35 = vor.u32 %v4440_v57, %v4438_v17  ;;  %v4446_v3 = vrot.slane %v4444_v47, 1 }
 0x203   : > { %v3553_v50 = vadd.f32 %v3503_v49, %v3103_v0  ;;  %v3508_v2 = vpop.f32.mrf.mxu0  ;;  %v5272_v41 = vsel %vm10312_vm14, %v5267_v8, %v5271_v46  ;;  %v10316_v8 = vld [vmem:[#allocation15_spill] sm:$0xff]  ;;  %vm10333_vm14 = vmmov %vm10320_vm5 }
 0x204   : > { %v4835_v51 = vpack.c.b16 %v4808_v12, %v4807_v61  ;;  %vm10317_vm1 = vnez %v10316_v8  ;;  %v4275_v61 = vld [vmem:[#allocation2 + $0x40] sm:$0xf]  ;;  %v9264_v12 = vld [vmem:[#allocation2 + $0x48] sm:$0xff] }
 0x205   : > { %v9238_v13 = vadd.f32 %v9156_v33, %v3553_v50  ;;  %v3925_v50 = vld [vmem:[#allocation2 + $0x30] sm:$0xf] }
 0x206   : > { %v2709_v49 = vpop.f32.mrf.mxu2  ;;  %4967 = vmatmul.bf16.gmra.mxu0 %v4855_v1  ;;  %v9240_v25 = vpop.f32.mrf.mxu1  ;;  %v4447_v1 = vsel %vm10313_vm10, %v4442_v35, %v4446_v3  ;;  %v3957_v57 = vsel %vm10317_vm1, %v3925_v50, 0  ;;  %v9257_v47 = vrot.slane %v4835_v51, 1  ;;  %v10319_v35 = vld [vmem:[#allocation48_spill] sm:$0xff] }
 0x207   : > { %10311 = vst [vmem:[#allocation4_spill] sm:$0xff] %v9238_v13  ;;  %v2758_v0 = vadd.f32 %v2709_v49, %v1997_v59  ;;  %v9246_v59 = vld [vmem:[#allocation2 + $0x38] sm:$0xff]  ;;  %v4038_v50 = vunpack.c.l.b16 %v3957_v57  ;;  %v4452_v57 = vshll.u32 %v9264_v12, 16 }
 0x209   : > { %v3104_v23 = vadd.f32 %v9160_v38, %v2758_v0  ;;  %5453 = vmatmul.bf16.gmra.mxu1 %v5272_v41  ;;  %v9244_v62 = vpop.f32.mrf.mxu3  ;;  %v10315_v38 = vld [vmem:[#allocation47_spill] sm:$0xff]  ;;  %v5273_v0 = vshrl.u32 %v9204_v45, 16  ;;  %v4276_v41 = vld [vmem:[#allocation2 + $0x44] sm:$0xf]  ;;  %v4857_v45 = vsel %vm10320_vm5, %v9215_v7, %v9257_v47 }
 0x20b   : > { %4165 = vmatmul.bf16.gmra.mxu2 %v4065_v42  ;;  %v3554_v33 = vadd.f32 %v3505_v43, %v3104_v23  ;;  %v3510_v31 = vpop.f32.mrf.mxu0  ;;  %v3958_v43 = vsel %vm6745_vm8, %v3926_v16, 0  ;;  %v5277_v42 = vshll.u32 %v9246_v59, 16  ;;  %v10318_v23 = vld [vmem:[#allocation51_spill] sm:$0xff] }
 0x20c   : > { %v4039_v16 = vunpack.c.l.b16 %v3958_v43 }
 0x20d   : > { %v9250_v34 = vadd.f32 %v9175_v63, %v3554_v33  ;;  %v2002_v33 = vadd.f32 %v10319_v35, %v10318_v23  ;;  %v4448_v23 = vshrl.u32 %v9222_v27, 16 }
 0x20e   : > { %v2712_v37 = vpop.f32.mrf.mxu2  ;;  %v9259_v49 = vpop.f32.mrf.mxu1  ;;  %4625 = vmatmul.bf16.gmra.mxu3 %v4447_v1  ;;  %v4066_v35 = vpack.c.b16 %v4039_v16, %v4038_v50  ;;  %v3928_v16 = vld [vmem:[#allocation2 + $0x3c] sm:$0xf] }
 0x20f   : > { %10314 = vst [vmem:[#allocation6_spill] sm:$0xff] %v9250_v34  ;;  %v2759_v17 = vadd.f32 %v2712_v37, %v10315_v38  ;;  %v4726_v38 = vsel %vm7905_vm2, %v4275_v61, 0  ;;  %v10322_v34 = vld [vmem:[#allocation50_spill] sm:$0xff]  ;;  %vm10325_vm2 = vmmov %vm10313_vm10 }
 0x210   : > { %vm10323_vm4 = vnez %v10322_v34  ;;  %v4809_v61 = vunpack.c.l.b16 %v4726_v38  ;;  %vm10326_vm3 = vmmov %vm10325_vm2 }
 0x211   : > { %v3105_v63 = vadd.f32 %v9184_v58, %v2759_v17  ;;  %v9268_v51 = vpop.f32.mrf.mxu3  ;;  %v5275_v58 = vor.u32 %v5273_v0, %v5271_v46  ;;  %v5279_v17 = vrot.slane %v5277_v42, 1  ;;  %v4727_v13 = vsel %vm10323_vm4, %v4276_v41, 0  ;;  %vm10339_vm5 = vmmov %vm10325_vm2 }
 0x212   : > { %v4810_v46 = vunpack.c.l.b16 %v4727_v13  ;;  %v4450_v42 = vor.u32 %v4448_v23, %v4446_v3  ;;  %v4454_v41 = vrot.slane %v4452_v57, 1  ;;  %vm10340_vm4 = vmmov %vm10325_vm2 }
 0x213   : > { %v3555_v37 = vadd.f32 %v3508_v2, %v3105_v63  ;;  %v3513_v8 = vpop.f32.mrf.mxu0  ;;  %v5280_v0 = vsel %vm10325_vm2, %v5275_v58, %v5279_v17  ;;  %v10329_v58 = vld [vmem:[#allocation17_spill] sm:$0xff] }
 0x214   : > { %v4836_v1 = vpack.c.b16 %v4810_v46, %v4809_v61  ;;  %vm10330_vm9 = vnez %v10329_v58  ;;  %v4277_v61 = vld [vmem:[#allocation2 + $0x48] sm:$0xf]  ;;  %v9306_v46 = vld [vmem:[#allocation2 + $0x50] sm:$0xff] }
 0x215   : > { %v9280_v43 = vadd.f32 %v9198_v14, %v3555_v37  ;;  %v3927_v37 = vld [vmem:[#allocation2 + $0x38] sm:$0xf] }
 0x216   : > { %v2714_v2 = vpop.f32.mrf.mxu2  ;;  %4972 = vmatmul.bf16.gmra.mxu0 %v4857_v45  ;;  %v9282_v7 = vpop.f32.mrf.mxu1  ;;  %v4455_v45 = vsel %vm10326_vm3, %v4450_v42, %v4454_v41  ;;  %v3959_v23 = vsel %vm10330_vm9, %v3927_v37, 0  ;;  %v9299_v57 = vrot.slane %v4836_v1, 1  ;;  %v10332_v42 = vld [vmem:[#allocation53_spill] sm:$0xff]  ;;  %vm10347_vm3 = vmmov %vm10333_vm14 }
 0x217   : > { %10324 = vst [vmem:[#allocation18_spill] sm:$0xff] %v9280_v43  ;;  %v2760_v63 = vadd.f32 %v2714_v2, %v2002_v33  ;;  %v9288_v33 = vld [vmem:[#allocation2 + $0x40] sm:$0xff]  ;;  %v4040_v37 = vunpack.c.l.b16 %v3959_v23  ;;  %v4460_v23 = vshll.u32 %v9306_v46, 16 }
 0x219   : > { %v3106_v34 = vadd.f32 %v9202_v10, %v2760_v63  ;;  %5458 = vmatmul.bf16.gmra.mxu1 %v5280_v0  ;;  %v9286_v27 = vpop.f32.mrf.mxu3  ;;  %v10328_v10 = vld [vmem:[#allocation52_spill] sm:$0xff]  ;;  %v5281_v63 = vshrl.u32 %v9246_v59, 16  ;;  %v4278_v0 = vld [vmem:[#allocation2 + $0x4c] sm:$0xf]  ;;  %v4859_v59 = vsel %vm10333_vm14, %v9257_v47, %v9299_v57 }
 0x21b   : > { %4170 = vmatmul.bf16.gmra.mxu2 %v4066_v35  ;;  %v3556_v14 = vadd.f32 %v3510_v31, %v3106_v34  ;;  %v3515_v50 = vpop.f32.mrf.mxu0  ;;  %v3960_v31 = vsel %vm6745_vm8, %v3928_v16, 0  ;;  %v5285_v35 = vshll.u32 %v9288_v33, 16  ;;  %v10331_v34 = vld [vmem:[#allocation56_spill] sm:$0xff] }
 0x21c   : > { %v4041_v16 = vunpack.c.l.b16 %v3960_v31 }
 0x21d   : > { %v9292_v13 = vadd.f32 %v9217_v4, %v3556_v14  ;;  %v2007_v14 = vadd.f32 %v10332_v42, %v10331_v34  ;;  %v4456_v34 = vshrl.u32 %v9264_v12, 16 }
 0x21e   : > { %v2717_v38 = vpop.f32.mrf.mxu2  ;;  %v9301_v2 = vpop.f32.mrf.mxu1  ;;  %4630 = vmatmul.bf16.gmra.mxu3 %v4455_v45  ;;  %v10334_v45 = vld [vmem:[#allocation54_spill] sm:$0xff]  ;;  %v4067_v42 = vpack.c.b16 %v4041_v16, %v4040_v37  ;;  %v3930_v16 = vld [vmem:[#allocation2 + $0x44] sm:$0xf] }
 0x21f   : > { %10327 = vst [vmem:[#allocation3_spill] sm:$0xff] %v9292_v13  ;;  %v2761_v3 = vadd.f32 %v2717_v38, %v10328_v10  ;;  %vm10335_vm10 = vnez %v10334_v45  ;;  %v10336_v13 = vld [vmem:[#allocation55_spill] sm:$0xff] }
 0x220   : > { %v4728_v10 = vsel %vm10335_vm10, %v4277_v61, 0  ;;  %vm10337_vm1 = vnez %v10336_v13  ;;  %vm10352_vm10 = vmmov %vm10340_vm4 }
 0x221   : > { %v3107_v4 = vadd.f32 %v9226_v21, %v2761_v3  ;;  %v9310_v1 = vpop.f32.mrf.mxu3  ;;  %v5283_v21 = vor.u32 %v5281_v63, %v5279_v17  ;;  %v5287_v3 = vrot.slane %v5285_v35, 1  ;;  %v4729_v43 = vsel %vm10337_vm1, %v4278_v0, 0  ;;  %vm10353_vm1 = vmmov %vm10340_vm4 }
 0x222   : > { %v4811_v61 = vunpack.c.l.b16 %v4728_v10  ;;  %v4812_v17 = vunpack.c.l.b16 %v4729_v43  ;;  %v4458_v35 = vor.u32 %v4456_v34, %v4454_v41  ;;  %v4462_v0 = vrot.slane %v4460_v23, 1 }
 0x223   : > { %v3557_v38 = vadd.f32 %v3513_v8, %v3107_v4  ;;  %v3518_v58 = vpop.f32.mrf.mxu0  ;;  %v5288_v63 = vsel %vm10339_vm5, %v5283_v21, %v5287_v3  ;;  %v10343_v21 = vld [vmem:[#allocation19_spill] sm:$0xff] }
 0x224   : > { %v4837_v45 = vpack.c.b16 %v4812_v17, %v4811_v61  ;;  %vm10344_vm2 = vnez %v10343_v21  ;;  %v4279_v61 = vld [vmem:[#allocation2 + $0x50] sm:$0xf]  ;;  %v9348_v17 = vld [vmem:[#allocation2 + $0x58] sm:$0xff] }
 0x225   : > { %v9322_v31 = vadd.f32 %v9240_v25, %v3557_v38  ;;  %v3929_v38 = vld [vmem:[#allocation2 + $0x40] sm:$0xf] }
 0x226   : > { %v2719_v8 = vpop.f32.mrf.mxu2  ;;  %4977 = vmatmul.bf16.gmra.mxu0 %v4859_v59  ;;  %v9324_v47 = vpop.f32.mrf.mxu1  ;;  %v4463_v59 = vsel %vm10340_vm4, %v4458_v35, %v4462_v0  ;;  %v3961_v34 = vsel %vm10344_vm2, %v3929_v38, 0  ;;  %v9341_v23 = vrot.slane %v4837_v45, 1  ;;  %v10346_v35 = vld [vmem:[#allocation57_spill] sm:$0xff]  ;;  %vm10358_vm4 = vmmov %vm10347_vm3 }
 0x227   : > { %10338 = vst [vmem:[#allocation21_spill] sm:$0xff] %v9322_v31  ;;  %v2762_v4 = vadd.f32 %v2719_v8, %v2007_v14  ;;  %v9330_v14 = vld [vmem:[#allocation2 + $0x48] sm:$0xff]  ;;  %v4042_v38 = vunpack.c.l.b16 %v3961_v34  ;;  %v4468_v34 = vshll.u32 %v9348_v17, 16 }
 0x229   : > { %v3108_v13 = vadd.f32 %v9244_v62, %v2762_v4  ;;  %5463 = vmatmul.bf16.gmra.mxu1 %v5288_v63  ;;  %v9328_v12 = vpop.f32.mrf.mxu3  ;;  %v10342_v62 = vld [vmem:[#allocation59_spill] sm:$0xff]  ;;  %v5289_v4 = vshrl.u32 %v9288_v33, 16  ;;  %v4861_v33 = vsel %vm10347_vm3, %v9299_v57, %v9341_v23 }
 0x22a   : > { %v4280_v63 = vld [vmem:[#allocation2 + $0x54] sm:$0xf] }
 0x22b   : > { %4175 = vmatmul.bf16.gmra.mxu2 %v4067_v42  ;;  %v3558_v25 = vadd.f32 %v3515_v50, %v3108_v13  ;;  %v3520_v37 = vpop.f32.mrf.mxu0  ;;  %v3962_v50 = vsel %vm6745_vm8, %v3930_v16, 0  ;;  %v5293_v42 = vshll.u32 %v9330_v14, 16  ;;  %v10345_v13 = vld [vmem:[#allocation62_spill] sm:$0xff] }
 0x22c   : > { %v4043_v16 = vunpack.c.l.b16 %v3962_v50 }
 0x22d   : > { %v9334_v43 = vadd.f32 %v9259_v49, %v3558_v25  ;;  %v2012_v25 = vadd.f32 %v10346_v35, %v10345_v13  ;;  %v4464_v13 = vshrl.u32 %v9306_v46, 16 }
 0x22e   : > { %v2722_v10 = vpop.f32.mrf.mxu2  ;;  %v9343_v8 = vpop.f32.mrf.mxu1  ;;  %4635 = vmatmul.bf16.gmra.mxu3 %v4463_v59  ;;  %v10348_v59 = vld [vmem:[#allocation58_spill] sm:$0xff]  ;;  %v4068_v35 = vpack.c.b16 %v4043_v16, %v4042_v38 }
 0x22f   : > { %10341 = vst [vmem:[#allocation64_spill] sm:$0xff] %v9334_v43  ;;  %v2763_v41 = vadd.f32 %v2722_v10, %v10342_v62  ;;  %vm10349_vm9 = vnez %v10348_v59  ;;  %v10350_v43 = vld [vmem:[#allocation61_spill] sm:$0xff]  ;;  %v3932_v16 = vld [vmem:[#allocation2 + $0x4c] sm:$0xf] }
 0x230   : > { %v4730_v62 = vsel %vm10349_vm9, %v4279_v61, 0  ;;  %vm10351_vm14 = vnez %v10350_v43  ;;  %vm10365_vm9 = vmmov %vm10353_vm1 }
 0x231   : > { %v3109_v49 = vadd.f32 %v9268_v51, %v2763_v41  ;;  %v9352_v45 = vpop.f32.mrf.mxu3  ;;  %v5291_v51 = vor.u32 %v5289_v4, %v5287_v3  ;;  %v5295_v41 = vrot.slane %v5293_v42, 1  ;;  %v4731_v31 = vsel %vm10351_vm14, %v4280_v63, 0  ;;  %vm10366_vm14 = vmmov %vm10353_vm1 }
 0x232   : > { %v4813_v61 = vunpack.c.l.b16 %v4730_v62  ;;  %v4814_v3 = vunpack.c.l.b16 %v4731_v31  ;;  %v4466_v42 = vor.u32 %v4464_v13, %v4462_v0  ;;  %v4470_v63 = vrot.slane %v4468_v34, 1 }
 0x233   : > { %v3559_v10 = vadd.f32 %v3518_v58, %v3109_v49  ;;  %v3523_v21 = vpop.f32.mrf.mxu0  ;;  %v5296_v4 = vsel %vm10352_vm10, %v5291_v51, %v5295_v41  ;;  %v10356_v51 = vld [vmem:[#allocation27_spill] sm:$0xff] }
 0x234   : > { %v4838_v59 = vpack.c.b16 %v4814_v3, %v4813_v61  ;;  %vm10357_vm5 = vnez %v10356_v51  ;;  %v4281_v61 = vld [vmem:[#allocation2 + $0x58] sm:$0xf]  ;;  %v9390_v3 = vld [vmem:[#allocation2 + $0x60] sm:$0xff]  ;;  %v4472_v51 = vshrl.u32 %v9348_v17, 16 }
 0x235   : > { %v9364_v50 = vadd.f32 %v9282_v7, %v3559_v10  ;;  %v3931_v10 = vld [vmem:[#allocation2 + $0x48] sm:$0xf] }
 0x236   : > { %v2724_v58 = vpop.f32.mrf.mxu2  ;;  %4982 = vmatmul.bf16.gmra.mxu0 %v4861_v33  ;;  %v9366_v57 = vpop.f32.mrf.mxu1  ;;  %v4471_v33 = vsel %vm10353_vm1, %v4466_v42, %v4470_v63  ;;  %v3963_v13 = vsel %vm10357_vm5, %v3931_v10, 0  ;;  %v9383_v34 = vrot.slane %v4838_v59, 1  ;;  %vm10370_vm1 = vmmov %vm10358_vm4 }
 0x237   : > { %v2764_v49 = vadd.f32 %v2724_v58, %v2012_v25  ;;  %v9372_v25 = vld [vmem:[#allocation2 + $0x50] sm:$0xff] }
 0x238   : > { %v4863_v59 = vsel %vm10358_vm4, %v9341_v23, %v9383_v34  ;;  %v10364_v23 = vld [vmem:[#allocation70_spill] sm:$0xff] }
 0x239   : > { %v3110_v43 = vadd.f32 %v9286_v27, %v2764_v49  ;;  %5468 = vmatmul.bf16.gmra.mxu1 %v5296_v4  ;;  %v9370_v46 = vpop.f32.mrf.mxu3  ;;  %v10355_v27 = vld [vmem:[#allocation66_spill] sm:$0xff]  ;;  %v5297_v49 = vshrl.u32 %v9330_v14, 16  ;;  %v4282_v4 = vld [vmem:[#allocation2 + $0x5c] sm:$0xf] }
 0x23b   : > { %4180 = vmatmul.bf16.gmra.mxu2 %v4068_v35  ;;  %v3560_v7 = vadd.f32 %v3520_v37, %v3110_v43  ;;  %v3525_v38 = vpop.f32.mrf.mxu0  ;;  %v3964_v37 = vsel %vm6745_vm8, %v3932_v16, 0  ;;  %v5301_v35 = vshll.u32 %v9372_v25, 16  ;;  %v4044_v43 = vunpack.c.l.b16 %v3963_v13  ;;  %v10359_v16 = vld [vmem:[#allocation63_spill] sm:$0xff] }
 0x23c   : > { %v4045_v42 = vunpack.c.l.b16 %v3964_v37  ;;  %vm10360_vm2 = vnez %v10359_v16  ;;  %v4476_v13 = vshll.u32 %v9390_v3, 16 }
 0x23d   : > { %v9376_v31 = vadd.f32 %v9301_v2, %v3560_v7  ;;  %v4732_v14 = vsel %vm10360_vm2, %v4281_v61, 0  ;;  %vm10376_vm2 = vmmov %vm10365_vm9 }
 0x23e   : > { %v2727_v62 = vpop.f32.mrf.mxu2  ;;  %v9385_v58 = vpop.f32.mrf.mxu1  ;;  %4640 = vmatmul.bf16.gmra.mxu3 %v4471_v33  ;;  %v5299_v33 = vor.u32 %v5297_v49, %v5295_v41  ;;  %v4069_v49 = vpack.c.b16 %v4045_v42, %v4044_v43  ;;  %v9418_v43 = vld [vmem:[#allocation2 + $0x58] sm:$0xff] }
 0x23f   : > { %10354 = vst [vmem:[#allocation60_spill] sm:$0xff] %v9376_v31  ;;  %v2765_v0 = vadd.f32 %v2727_v62, %v10355_v27  ;;  %v5303_v62 = vrot.slane %v5301_v35, 1  ;;  %v10361_v27 = vld [vmem:[#allocation65_spill] sm:$0xff] }
 0x240   : > { %vm10362_vm3 = vnez %v10361_v27 }
 0x241   : > { %v3111_v2 = vadd.f32 %v9310_v1, %v2765_v0  ;;  %v9392_v7 = vpop.f32.mrf.mxu3  ;;  %v4733_v0 = vsel %vm10362_vm3, %v4282_v4, 0  ;;  %v5304_v17 = vsel %vm10365_vm9, %v5299_v33, %v5303_v62  ;;  %vm10377_vm3 = vmmov %vm10376_vm2 }
 0x242   : > { %v4816_v61 = vunpack.c.l.b16 %v4733_v0 }
 0x243   : > { %v3561_v10 = vadd.f32 %v3523_v21, %v3111_v2  ;;  %v3528_v1 = vpop.f32.mrf.mxu0  ;;  %v4815_v2 = vunpack.c.l.b16 %v4732_v14 }
 0x245   : > { %v9404_v37 = vadd.f32 %v9324_v47, %v3561_v10  ;;  %v4474_v47 = vor.u32 %v4472_v51, %v4470_v63  ;;  %v4478_v10 = vrot.slane %v4476_v13, 1  ;;  %v4839_v31 = vpack.c.b16 %v4816_v61, %v4815_v2  ;;  %v10367_v63 = vld [vmem:[#allocation76_spill] sm:$0xff]  ;;  %v10368_v51 = vld [vmem:[#allocation5_spill] sm:$0xff] }
 0x246   : > { %v2729_v21 = vpop.f32.mrf.mxu2  ;;  %4987 = vmatmul.bf16.gmra.mxu0 %v4863_v59  ;;  %v5434_v35 = vpop.f32.mrf.mxu1  ;;  %v3934_v59 = vld [vmem:[#allocation2 + $0x54] sm:$0xf]  ;;  %vm10369_vm10 = vnez %v10368_v51  ;;  %v4283_v2 = vld [vmem:[#allocation2 + $0x60] sm:$0xf] }
 0x247   : > { %10363 = vst [vmem:[#allocation67_spill] sm:$0xff] %v9404_v37  ;;  %v2766_v41 = vadd.f32 %v2729_v21, %v10364_v23  ;;  %v3933_v37 = vld [vmem:[#allocation2 + $0x50] sm:$0xf]  ;;  %v4479_v14 = vsel %vm10366_vm14, %v4474_v47, %v4478_v10  ;;  %v9429_v21 = vrot.slane %v4839_v31, 1  ;;  %vm10380_vm14 = vmmov %vm10370_vm1 }
 0x248   : > { %5514 = vst [vmem:[%s9410_s30] sm:$0xff] %v5434_v35  ;;  %v3965_v13 = vsel %vm10369_vm10, %v3933_v37, 0  ;;  %v9435_v35 = vld [vmem:[#allocation2 + $0x68] sm:$0xff] }
 0x249   : > { %v3112_v4 = vadd.f32 %v9328_v12, %v2766_v41  ;;  %5473 = vmatmul.bf16.gmra.mxu1 %v5304_v17  ;;  %v9416_v16 = vpop.f32.mrf.mxu3  ;;  %v5305_v41 = vshrl.u32 %v9372_v25, 16  ;;  %v4046_v61 = vunpack.c.l.b16 %v3965_v13  ;;  %v4865_v31 = vsel %vm10370_vm1, %v9383_v34, %v9429_v21  ;;  %vm10384_vm1 = vmmov %vm10376_vm2 }
 0x24b   : > { %4185 = vmatmul.bf16.gmra.mxu2 %v4069_v49  ;;  %v3562_v27 = vadd.f32 %v3525_v38, %v3112_v4  ;;  %v3530_v42 = vpop.f32.mrf.mxu0  ;;  %v3966_v38 = vsel %vm6745_vm8, %v3934_v59, 0  ;;  %v5309_v49 = vshll.u32 %v9418_v43, 16  ;;  %v4284_v4 = vld [vmem:[#allocation2 + $0x64] sm:$0xf] }
 0x24c   : > { %v4047_v17 = vunpack.c.l.b16 %v3966_v38  ;;  %v10375_v38 = vld [vmem:[#allocation77_spill] sm:$0xff] }
 0x24d   : > { %v9422_v33 = vadd.f32 %v9343_v8, %v3562_v27  ;;  %v5307_v27 = vor.u32 %v5305_v41, %v5303_v62  ;;  %v5311_v25 = vrot.slane %v5309_v49, 1 }
 0x24e   : > { %v2732_v12 = vpop.f32.mrf.mxu2  ;;  %v5436_v23 = vpop.f32.mrf.mxu1  ;;  %4645 = vmatmul.bf16.gmra.mxu3 %v4479_v14  ;;  %v10371_v14 = vld [vmem:[#allocation68_spill] sm:$0xff]  ;;  %v4070_v62 = vpack.c.b16 %v4047_v17, %v4046_v61  ;;  %v3935_v61 = vld [vmem:[#allocation2 + $0x58] sm:$0xf] }
 0x24f   : > { %v2767_v0 = vadd.f32 %v2732_v12, %v10367_v63  ;;  %5515 = vst [vmem:[%s9410_s30 + $0x8] sm:$0xff] %v5436_v23  ;;  %vm10372_vm5 = vnez %v10371_v14  ;;  %v4480_v12 = vshrl.u32 %v9390_v3, 16  ;;  %v4484_v63 = vshll.u32 %v9435_v35, 16  ;;  %v3936_v17 = vld [vmem:[#allocation2 + $0x5c] sm:$0xf] }
 0x250   : > { %v5312_v49 = vsel %vm10376_vm2, %v5307_v27, %v5311_v25 }
 0x251   : > { %v3113_v8 = vadd.f32 %v9352_v45, %v2767_v0  ;;  %v9437_v37 = vpop.f32.mrf.mxu3  ;;  %v4734_v45 = vsel %vm10372_vm5, %v4283_v2, 0  ;;  %v4482_v2 = vor.u32 %v4480_v12, %v4478_v10  ;;  %v4486_v14 = vrot.slane %v4484_v63, 1  ;;  %v10378_v12 = vld [vmem:[#allocation8_spill] sm:$0xff] }
 0x252   : > { %v4817_v41 = vunpack.c.l.b16 %v4734_v45  ;;  %vm10379_vm9 = vnez %v10378_v12 }
 0x253   : > { %v3563_v47 = vadd.f32 %v3528_v1, %v3113_v8  ;;  %v4953_v59 = vpop.f32.mrf.mxu0  ;;  %v10373_v1 = vld [vmem:[#allocation69_spill] sm:$0xff]  ;;  %v4487_v27 = vsel %vm10377_vm3, %v4482_v2, %v4486_v14  ;;  %v3967_v63 = vsel %vm10379_vm9, %v3935_v61, 0  ;;  %vm10393_vm9 = vmmov %vm10384_vm1 }
 0x254   : > { %vm10374_vm4 = vnez %v10373_v1 }
 0x255   : > { %v9447_v0 = vadd.f32 %v9366_v57, %v3563_v47  ;;  %v4735_v13 = vsel %vm10374_vm4, %v4284_v4, 0  ;;  %v9457_v4 = vld [vmem:[#allocation2 + $0x60] sm:$0xff]  ;;  %vm10388_vm4 = vmmov %vm10380_vm14 }
 0x256   : > { %v2734_v51 = vpop.f32.mrf.mxu2  ;;  %4992 = vmatmul.bf16.gmra.mxu0 %v4865_v31  ;;  %v5439_v23 = vpop.f32.mrf.mxu1  ;;  %v4818_v3 = vunpack.c.l.b16 %v4735_v13  ;;  %v5313_v13 = vshrl.u32 %v9418_v43, 16 }
 0x257   : > { %v2768_v34 = vadd.f32 %v2734_v51, %v10375_v38  ;;  %5516 = vst [vmem:[%s9410_s30 + $0x10] sm:$0xff] %v5439_v23  ;;  %v5317_v38 = vshll.u32 %v9457_v4, 16 }
 0x258   : > { %v4840_v31 = vpack.c.b16 %v4818_v3, %v4817_v41  ;;  %v4048_v41 = vunpack.c.l.b16 %v3967_v63  ;;  %v5315_v3 = vor.u32 %v5313_v13, %v5311_v25 }
 0x259   : > { %v3114_v8 = vadd.f32 %v9370_v46, %v2768_v34  ;;  %5478 = vmatmul.bf16.gmra.mxu1 %v5312_v49  ;;  %v9455_v57 = vpop.f32.mrf.mxu3 }
 0x25b   : > { %4190 = vmatmul.bf16.gmra.mxu2 %v4070_v62  ;;  %v3564_v47 = vadd.f32 %v3530_v42, %v3114_v8  ;;  %v4955_v51 = vpop.f32.mrf.mxu0  ;;  %v3968_v42 = vsel %vm6745_vm8, %v3936_v17, 0  ;;  %v9471_v62 = vrot.slane %v4840_v31, 1  ;;  %v4286_v8 = vld [vmem:[#allocation2 + $0x6c] sm:$0xf]  ;;  %v4488_v31 = vshrl.u32 %v9435_v35, 16 }
 0x25c   : > { %v4049_v49 = vunpack.c.l.b16 %v3968_v42 }
 0x25d   : > { %v9461_v46 = vadd.f32 %v9385_v58, %v3564_v47  ;;  %v9474_v58 = vld [vmem:[#allocation2 + $0x70] sm:$0xff]  ;;  %v4867_v47 = vsel %vm10380_vm14, %v9429_v21, %v9471_v62  ;;  %v4490_v35 = vor.u32 %v4488_v31, %v4486_v14  ;;  %v5321_v31 = vshrl.u32 %v9457_v4, 16  ;;  %vm10394_vm14 = vmmov %vm10384_vm1 }
 0x25e   : > { %v4151_v10 = vpop.f32.mrf.mxu2  ;;  %v5441_v1 = vpop.f32.mrf.mxu1  ;;  %4650 = vmatmul.bf16.gmra.mxu3 %v4487_v27  ;;  %v4071_v12 = vpack.c.b16 %v4049_v49, %v4048_v41  ;;  %v3937_v41 = vld [vmem:[#allocation2 + $0x60] sm:$0xf]  ;;  %v3938_v49 = vld [vmem:[#allocation2 + $0x64] sm:$0xf]  ;;  %v10386_v14 = vld [vmem:[#allocation10_spill] sm:$0xff] }
 0x25f   : > { %v4231_v45 = vadd.f32 %v4151_v10, %v8585_v6  ;;  %5517 = vst [vmem:[%s9410_s30 + $0x18] sm:$0xff] %v5441_v1  ;;  %v4285_v6 = vld [vmem:[#allocation2 + $0x68] sm:$0xf]  ;;  %v10382_v10 = vld [vmem:[#allocation74_spill] sm:$0xff]  ;;  %vm10387_vm5 = vnez %v10386_v14  ;;  %v3970_v61 = vsel %vm6745_vm8, %v3938_v49, 0 }
 0x260   : > { %v4736_v17 = vsel %vm8411_vm13, %v4285_v6, 0  ;;  %vm10383_vm10 = vnez %v10382_v10  ;;  %vm10385_vm13 = vmmov %vm10384_vm1 }
 0x261   : > { %v4681_v34 = vadd.f32 %v9392_v7, %v4231_v45  ;;  %v9482_v43 = vpop.f32.mrf.mxu3  ;;  %v5319_v7 = vrot.slane %v5317_v38, 1  ;;  %v4737_v45 = vsel %vm10383_vm10, %v4286_v8, 0  ;;  %v4819_v42 = vunpack.c.l.b16 %v4736_v17 }
 0x262   : > { %v4820_v13 = vunpack.c.l.b16 %v4737_v45  ;;  %v9515_v45 = vld [vmem:[#allocation2 + $0x78] sm:$0xff] }
 0x263   : > { %v5033_v23 = vadd.f32 %v4953_v59, %v4681_v34  ;;  %v4958_v2 = vpop.f32.mrf.mxu0  ;;  %v4492_v59 = vshll.u32 %v9474_v58, 16  ;;  %v5320_v21 = vsel %vm10384_vm1, %v5315_v3, %v5319_v7  ;;  %vm10397_vm1 = vmmov %vm10388_vm4 }
 0x264   : > { %v4841_v8 = vpack.c.b16 %v4820_v13, %v4819_v42 }
 0x265   : > { %5065 = vst [vmem:[%s9480_s9] sm:$0xff] %v5033_v23  ;;  %v4494_v38 = vrot.slane %v4492_v59, 1  ;;  %v9500_v23 = vld [vmem:[#allocation2 + $0x68] sm:$0xff] }
 0x266   : > { %v4153_v27 = vpop.f32.mrf.mxu2  ;;  %4997 = vmatmul.bf16.gmra.mxu0 %v4867_v47  ;;  %v5444_v63 = vpop.f32.mrf.mxu1  ;;  %v5325_v59 = vshll.u32 %v9500_v23, 16  ;;  %v9512_v10 = vrot.slane %v4841_v8, 1  ;;  %v10391_v8 = vld [vmem:[#allocation79_spill] sm:$0xff] }
 0x267   : > { %v4232_v25 = vadd.f32 %v4153_v27, %v8664_v52  ;;  %5518 = vst [vmem:[%s9410_s30 + $0x20] sm:$0xff] %v5444_v63  ;;  %v4495_v3 = vsel %vm10385_vm13, %v4490_v35, %v4494_v38  ;;  %v4051_v63 = vunpack.c.l.b16 %v3970_v61  ;;  %v10389_v35 = vld [vmem:[#allocation78_spill] sm:$0xff]  ;;  %vm10392_vm3 = vnez %v10391_v8 }
 0x268   : > { %v5327_v13 = vrot.slane %v5325_v59, 1  ;;  %vm10390_vm2 = vnez %v10389_v35  ;;  %v5329_v35 = vshrl.u32 %v9500_v23, 16  ;;  %vm10398_vm13 = vnez %v10195_v54 }
 0x269   : > { %v4682_v1 = vadd.f32 %v9416_v16, %v4232_v25  ;;  %5483 = vmatmul.bf16.gmra.mxu1 %v5320_v21  ;;  %v9498_v6 = vpop.f32.mrf.mxu3  ;;  %v4288_v21 = vld [vmem:[#allocation2 + $0x74] sm:$0xf] }
 0x26b   : > { %v5034_v34 = vadd.f32 %v4955_v51, %v4682_v1  ;;  %4195 = vmatmul.bf16.gmra.mxu2 %v4071_v12  ;;  %v4960_v52 = vpop.f32.mrf.mxu0  ;;  %v3969_v51 = vsel %vm10387_vm5, %v3937_v41, 0  ;;  %v5323_v1 = vor.u32 %v5321_v31, %v5319_v7  ;;  %v4496_v41 = vshrl.u32 %v9474_v58, 16  ;;  %vm10399_vm5 = vmmov %vm10393_vm9 }
 0x26c   : > { %v4050_v12 = vunpack.c.l.b16 %v3969_v51 }
 0x26d   : > { %5066 = vst [vmem:[%s9480_s9 + $0x8] sm:$0xff] %v5034_v34  ;;  %v4498_v58 = vor.u32 %v4496_v41, %v4494_v38  ;;  %v10395_v38 = vld [vmem:[#allocation12_spill] sm:$0xff] }
 0x26e   : > { %v4156_v16 = vpop.f32.mrf.mxu2  ;;  %v5446_v17 = vpop.f32.mrf.mxu1  ;;  %4655 = vmatmul.bf16.gmra.mxu3 %v4495_v3  ;;  %v4739_v3 = vsel %vm10392_vm3, %v4288_v21, 0  ;;  %vm10396_vm10 = vnez %v10395_v38  ;;  %v9570_v38 = vld [vmem:[#allocation2 + $0x78] sm:$0xff]  ;;  %vm10403_vm3 = vmmov %vm10399_vm5 }
 0x26f   : > { %v4233_v47 = vadd.f32 %v4156_v16, %v8705_v15  ;;  %5519 = vst [vmem:[%s9410_s30 + $0x28] sm:$0xff] %v5446_v17  ;;  %v4287_v15 = vld [vmem:[#allocation2 + $0x70] sm:$0xf]  ;;  %v4072_v16 = vpack.c.b16 %v4051_v63, %v4050_v12  ;;  %v4822_v61 = vunpack.c.l.b16 %v4739_v3 }
 0x270   : > { %v4738_v34 = vsel %vm10390_vm2, %v4287_v15, 0  ;;  %v3939_v15 = vld [vmem:[#allocation2 + $0x68] sm:$0xf]  ;;  %vm10402_vm2 = vmmov %vm10397_vm1 }
 0x271   : > { %v4683_v27 = vadd.f32 %v9437_v37, %v4233_v47  ;;  %v9517_v42 = vpop.f32.mrf.mxu3  ;;  %v4869_v37 = vsel %vm10388_vm4, %v9471_v62, %v9512_v10  ;;  %v4821_v14 = vunpack.c.l.b16 %v4738_v34  ;;  %v5328_v62 = vsel %vm10393_vm9, %v5323_v1, %v5327_v13  ;;  %vm10407_vm9 = vmmov %vm10397_vm1 }
 0x272   : > { %vm10401_vm4 = vnez %v10199_v48 }
 0x273   : > { %v5035_v25 = vadd.f32 %v4958_v2, %v4683_v27  ;;  %v4963_v4 = vpop.f32.mrf.mxu0  ;;  %v4500_v2 = vshll.u32 %v9515_v45, 16  ;;  %v9535_v27 = vld [vmem:[#allocation2 + $0x70] sm:$0xff]  ;;  %v4842_v12 = vpack.c.b16 %v4822_v61, %v4821_v14  ;;  %v5331_v14 = vor.u32 %v5329_v35, %v5327_v13 }
 0x274   : > { %v5333_v34 = vshll.u32 %v9535_v27, 16  ;;  %v4504_v61 = vshrl.u32 %v9515_v45, 16 }
 0x275   : > { %5067 = vst [vmem:[%s9480_s9 + $0x10] sm:$0xff] %v5035_v25  ;;  %v4502_v17 = vrot.slane %v4500_v2, 1  ;;  %v3940_v25 = vld [vmem:[#allocation2 + $0x6c] sm:$0xf]  ;;  %v9547_v2 = vrot.slane %v4842_v12, 1 }
 0x276   : > { %v4158_v49 = vpop.f32.mrf.mxu2  ;;  %5002 = vmatmul.bf16.gmra.mxu0 %v4869_v37  ;;  %v5449_v47 = vpop.f32.mrf.mxu1  ;;  %v3972_v1 = vsel %vm6745_vm8, %v3940_v25, 0 }
 0x277   : > { %v4234_v7 = vadd.f32 %v4158_v49, %v8786_v32  ;;  %5520 = vst [vmem:[%s9410_s30 + $0x30] sm:$0xff] %v5449_v47  ;;  %v4503_v63 = vsel %vm10394_vm14, %v4498_v58, %v4502_v17  ;;  %v9550_v49 = vld [vmem:[#allocation2 + $0x80] sm:$0xff]  ;;  %v4290_v47 = vld [vmem:[#allocation2 + $0x7c] sm:$0xf]  ;;  %v4506_v45 = vor.u32 %v4504_v61, %v4502_v17  ;;  %vm10408_vm14 = vmmov %vm10403_vm3 }
 0x278   : > { %v4292_v61 = vld [vmem:[#allocation2 + $0x84] sm:$0xf] }
 0x279   : > { %v4684_v51 = vadd.f32 %v9455_v57, %v4234_v7  ;;  %5488 = vmatmul.bf16.gmra.mxu1 %v5328_v62  ;;  %v9533_v59 = vpop.f32.mrf.mxu3  ;;  %v4053_v7 = vunpack.c.l.b16 %v3972_v1  ;;  %v5335_v62 = vrot.slane %v5333_v34, 1  ;;  %v3942_v1 = vld [vmem:[#allocation2 + $0x74] sm:$0xf] }
 0x27b   : > { %v5036_v31 = vadd.f32 %v4960_v52, %v4684_v51  ;;  %4200 = vmatmul.bf16.gmra.mxu2 %v4072_v16  ;;  %v4965_v32 = vpop.f32.mrf.mxu0  ;;  %v3971_v52 = vsel %vm10396_vm10, %v3939_v15, 0  ;;  %vm10412_vm10 = vmmov %vm10403_vm3 }
 0x27c   : > { %v4052_v3 = vunpack.c.l.b16 %v3971_v52  ;;  %v3941_v52 = vld [vmem:[#allocation2 + $0x70] sm:$0xf] }
 0x27d   : > { %5068 = vst [vmem:[%s9480_s9 + $0x18] sm:$0xff] %v5036_v31  ;;  %v4741_v31 = vsel %vm10398_vm13, %v4290_v47, 0  ;;  %v3973_v17 = vsel %vm10401_vm4, %v3941_v52, 0  ;;  %v9585_v47 = vld [vmem:[#allocation2 + $0x88] sm:$0xff]  ;;  %v9605_v52 = vld [vmem:[#allocation2 + $0x80] sm:$0xff]  ;;  %vm10414_vm13 = vmmov %vm10402_vm2 }
 0x27e   : > { %v4161_v57 = vpop.f32.mrf.mxu2  ;;  %v5451_v37 = vpop.f32.mrf.mxu1  ;;  %4660 = vmatmul.bf16.gmra.mxu3 %v4503_v63  ;;  %v4073_v15 = vpack.c.b16 %v4053_v7, %v4052_v3  ;;  %v4824_v63 = vunpack.c.l.b16 %v4741_v31 }
 0x27f   : > { %v4235_v21 = vadd.f32 %v4161_v57, %v8833_v19  ;;  %5521 = vst [vmem:[%s9410_s30 + $0x38] sm:$0xff] %v5451_v37  ;;  %v4289_v19 = vld [vmem:[#allocation2 + $0x78] sm:$0xf] }
 0x280   : > { %v4740_v51 = vsel %vm8639_vm12, %v4289_v19, 0  ;;  %vm10400_vm12 = vmmov %vm10399_vm5  ;;  %v5337_v19 = vshrl.u32 %v9535_v27, 16 }
 0x281   : > { %v4685_v41 = vadd.f32 %v9482_v43, %v4235_v21  ;;  %v9552_v16 = vpop.f32.mrf.mxu3  ;;  %v4871_v43 = vsel %vm10397_vm1, %v9512_v10, %v9547_v2  ;;  %v4823_v12 = vunpack.c.l.b16 %v4740_v51  ;;  %v5336_v10 = vsel %vm10399_vm5, %v5331_v14, %v5335_v62 }
 0x282   : > { %v4054_v14 = vunpack.c.l.b16 %v3973_v17  ;;  %v10405_v17 = vld [vmem:[#allocation16_spill] sm:$0xff] }
 0x283   : > { %v5037_v8 = vadd.f32 %v4963_v4, %v4685_v41  ;;  %v4968_v23 = vpop.f32.mrf.mxu0  ;;  %v4508_v4 = vshll.u32 %v9550_v49, 16  ;;  %v4843_v37 = vpack.c.b16 %v4824_v63, %v4823_v12 }
 0x285   : > { %5069 = vst [vmem:[%s9480_s9 + $0x20] sm:$0xff] %v5037_v8  ;;  %v4510_v57 = vrot.slane %v4508_v4, 1  ;;  %v5341_v8 = vshll.u32 %v9570_v38, 16  ;;  %v9582_v7 = vrot.slane %v4843_v37, 1  ;;  %v5339_v4 = vor.u32 %v5337_v19, %v5335_v62  ;;  %v3944_v37 = vld [vmem:[#allocation2 + $0x7c] sm:$0xf] }
 0x286   : > { %v4163_v58 = vpop.f32.mrf.mxu2  ;;  %5007 = vmatmul.bf16.gmra.mxu0 %v4871_v43  ;;  %v5454_v25 = vpop.f32.mrf.mxu1 }
 0x287   : > { %v4236_v13 = vadd.f32 %v4163_v58, %v8904_v44  ;;  %5522 = vst [vmem:[%s9410_s30 + $0x40] sm:$0xff] %v5454_v25  ;;  %v4511_v35 = vsel %vm10400_vm12, %v4506_v45, %v4510_v57  ;;  %v5343_v58 = vrot.slane %v5341_v8, 1  ;;  %v4743_v25 = vsel %vm8776_vm0, %v4292_v61, 0 }
 0x288   : > { %v4826_v63 = vunpack.c.l.b16 %v4743_v25  ;;  %vm10406_vm0 = vnez %v10405_v17  ;;  %v5345_v8 = vshrl.u32 %v9570_v38, 16  ;;  %v4520_v25 = vshrl.u32 %v9585_v47, 16 }
 0x289   : > { %v4686_v20 = vadd.f32 %v9498_v6, %v4236_v13  ;;  %5493 = vmatmul.bf16.gmra.mxu1 %v5336_v10  ;;  %v9568_v54 = vpop.f32.mrf.mxu3  ;;  %v4512_v13 = vshrl.u32 %v9550_v49, 16 }
 0x28b   : > { %v5038_v21 = vadd.f32 %v4965_v32, %v4686_v20  ;;  %4205 = vmatmul.bf16.gmra.mxu2 %v4073_v15  ;;  %v4970_v44 = vpop.f32.mrf.mxu0  ;;  %v3974_v32 = vsel %vm6745_vm8, %v3942_v1, 0  ;;  %v4514_v49 = vor.u32 %v4512_v13, %v4510_v57  ;;  %v3943_v1 = vld [vmem:[#allocation2 + $0x78] sm:$0xf]  ;;  %v5347_v13 = vor.u32 %v5345_v8, %v5343_v58 }
 0x28c   : > { %v4055_v43 = vunpack.c.l.b16 %v3974_v32  ;;  %v3975_v32 = vsel %vm10406_vm0, %v3943_v1, 0 }
 0x28d   : > { %5070 = vst [vmem:[%s9480_s9 + $0x28] sm:$0xff] %v5038_v21  ;;  %v4056_v61 = vunpack.c.l.b16 %v3975_v32  ;;  %v5353_v32 = vshrl.u32 %v9605_v52, 16 }
 0x28e   : > { %v4166_v6 = vpop.f32.mrf.mxu2  ;;  %v5456_v41 = vpop.f32.mrf.mxu1  ;;  %4665 = vmatmul.bf16.gmra.mxu3 %v4511_v35  ;;  %v4074_v12 = vpack.c.b16 %v4055_v43, %v4054_v14  ;;  %v4293_v14 = vld [vmem:[#allocation2 + $0x88] sm:$0xf] }
 0x28f   : > { %v4237_v34 = vadd.f32 %v4166_v6, %v8932_v60  ;;  %5523 = vst [vmem:[%s9410_s30 + $0x48] sm:$0xff] %v5456_v41  ;;  %v4291_v60 = vld [vmem:[#allocation2 + $0x80] sm:$0xf]  ;;  %v3976_v41 = vsel %vm6745_vm8, %v3944_v37, 0  ;;  %v4744_v38 = vsel %vm8881_vm6, %v4293_v14, 0  ;;  %vm10409_vm6 = vmmov %vm10403_vm3 }
 0x290   : > { %v4742_v31 = vsel %vm8756_vm7, %v4291_v60, 0  ;;  %vm10404_vm7 = vmmov %vm10403_vm3 }
 0x291   : > { %v4687_v3 = vadd.f32 %v9517_v42, %v4237_v34  ;;  %v9587_v51 = vpop.f32.mrf.mxu3  ;;  %v4873_v42 = vsel %vm10402_vm2, %v9547_v2, %v9582_v7  ;;  %v4825_v20 = vunpack.c.l.b16 %v4742_v31  ;;  %v5344_v2 = vsel %vm10403_vm3, %v5339_v4, %v5343_v58  ;;  %v9609_v34 = vld [vmem:[#allocation2 + $0x90] sm:$0x1]  ;;  %v4294_v31 = vld [vmem:[#allocation2 + $0x8c] sm:$0xf] }
 0x292   : > { %v4057_v4 = vunpack.c.l.b16 %v3976_v41 }
 0x293   : > { %v5039_v48 = vadd.f32 %v4968_v23, %v4687_v3  ;;  %v4973_v27 = vpop.f32.mrf.mxu0  ;;  %v4516_v23 = vshll.u32 %v9585_v47, 16  ;;  %v4844_v35 = vpack.c.b16 %v4826_v63, %v4825_v20  ;;  %v5349_v3 = vshll.u32 %v9605_v52, 16 }
 0x294   : > { %v4075_v20 = vpack.c.b16 %v4057_v4, %v4056_v61 }
 0x295   : > { %5071 = vst [vmem:[%s9480_s9 + $0x30] sm:$0xff] %v5039_v48  ;;  %v4518_v45 = vrot.slane %v4516_v23, 1  ;;  %v9620_v48 = vrot.slane %v4844_v35, 1  ;;  %v5351_v23 = vrot.slane %v5349_v3, 1  ;;  %v3945_v35 = vld [vmem:[#allocation2 + $0x80] sm:$0xf] }
 0x296   : > { %v4168_v15 = vpop.f32.mrf.mxu2  ;;  %5012 = vmatmul.bf16.gmra.mxu0 %v4873_v42  ;;  %v5459_v10 = vpop.f32.mrf.mxu1 }
 0x297   : > { %v4238_v62 = vadd.f32 %v4168_v15, %v8970_v40  ;;  %5524 = vst [vmem:[%s9410_s30 + $0x50] sm:$0xff] %v5459_v10  ;;  %v4519_v6 = vsel %vm10404_vm7, %v4514_v49, %v4518_v45  ;;  %v5129_v10 = vld [vmem:[#allocation2 + $0x88] sm:$0x1]  ;;  %v4522_v49 = vor.u32 %v4520_v25, %v4518_v45  ;;  %v3977_v45 = vsel %vm10237_vm15, %v3945_v35, 0 }
 0x298   : > { %v5211_v63 = vunpack.c.l.b16 %v5129_v10  ;;  %v5355_v9 = vor.u32 %v5353_v32, %v5351_v23  ;;  %vm10411_vm15 = vnez %v10247_v18  ;;  %v3947_v18 = vld [vmem:[#allocation2 + $0x88] sm:$0xf] }
 0x299   : > { %v4688_v5 = vadd.f32 %v9533_v59, %v4238_v62  ;;  %5498 = vmatmul.bf16.gmra.mxu1 %v5344_v2  ;;  %v9603_v55 = vpop.f32.mrf.mxu3 }
 0x29b   : > { %v5040_v21 = vadd.f32 %v4970_v44, %v4688_v5  ;;  %4210 = vmatmul.bf16.gmra.mxu2 %v4074_v12  ;;  %v4975_v40 = vpop.f32.mrf.mxu0  ;;  %v4378_v44 = vunpack.c.l.b16 %v9609_v34  ;;  %v4745_v12 = vsel %vm8895_vm11, %v4294_v31, 0  ;;  %v4827_v5 = vunpack.c.l.b16 %v4744_v38  ;;  %vm10410_vm11 = vmmov %vm10397_vm1 }
 0x29c   : > { %v4828_v47 = vunpack.c.l.b16 %v4745_v12  ;;  %vm10413_vm1 = vnez %v10243_v29 }
 0x29d   : > { %5072 = vst [vmem:[%s9480_s9 + $0x38] sm:$0xff] %v5040_v21  ;;  %v3979_v12 = vsel %vm10413_vm1, %v3947_v18, 0 }
 0x29e   : > { %v4171_v59 = vpop.f32.mrf.mxu2  ;;  %v5461_v19 = vpop.f32.mrf.mxu1  ;;  %4670 = vmatmul.bf16.gmra.mxu3 %v4519_v6  ;;  %v3946_v6 = vld [vmem:[#allocation2 + $0x84] sm:$0xf] }
 0x29f   : > { %v4239_v57 = vadd.f32 %v4171_v59, %v8991_v11  ;;  %5525 = vst [vmem:[%s9410_s30 + $0x58] sm:$0xff] %v5461_v19  ;;  %v4395_v11 = vpack.c.b16 %v4378_v44, %v4378_v44  ;;  %v4845_v59 = vpack.c.b16 %v4828_v47, %v4827_v5  ;;  %v4060_v5 = vunpack.c.l.b16 %v3979_v12 }
 0x2a1   : > { %v4689_v60 = vadd.f32 %v9552_v16, %v4239_v57  ;;  %v9623_v42 = vpop.f32.mrf.mxu3  ;;  %v4875_v16 = vsel %vm10407_vm9, %v9582_v7, %v9620_v48  ;;  %v5352_v7 = vsel %vm10408_vm14, %v5347_v13, %v5351_v23  ;;  %v4876_v8 = vrot.slane %v4845_v59, 1 }
 0x2a3   : > { %v5041_v43 = vadd.f32 %v4973_v27, %v4689_v60  ;;  %v4978_v15 = vpop.f32.mrf.mxu0  ;;  %v4524_v27 = vshll.u32 %v4395_v11, 16  ;;  %v4058_v60 = vunpack.c.l.b16 %v3977_v45  ;;  %v4877_v61 = vsel %vm10410_vm11, %v9620_v48, %v4876_v8 }
 0x2a5   : > { %5073 = vst [vmem:[%s9480_s9 + $0x40] sm:$0xff] %v5041_v43  ;;  %v4526_v21 = vrot.slane %v4524_v27, 1 }
 0x2a6   : > { %v4173_v62 = vpop.f32.mrf.mxu2  ;;  %5017 = vmatmul.bf16.gmra.mxu0 %v4875_v16  ;;  %v5464_v2 = vpop.f32.mrf.mxu1 }
 0x2a7   : > { %v4240_v58 = vadd.f32 %v4173_v62, %v9015_v39  ;;  %5526 = vst [vmem:[%s9410_s30 + $0x60] sm:$0xff] %v5464_v2  ;;  %v5228_v39 = vpack.c.b16 %v5211_v63, %v5211_v63  ;;  %v4527_v57 = vsel %vm10409_vm6, %v4522_v49, %v4526_v21 }
 0x2a9   : > { %v4690_v28 = vadd.f32 %v9568_v54, %v4240_v58  ;;  %5503 = vmatmul.bf16.gmra.mxu1 %v5352_v7  ;;  %v9638_v24 = vpop.f32.mrf.mxu3  ;;  %v5357_v41 = vshll.u32 %v5228_v39, 16 }
 0x2ab   : > { %v5042_v1 = vadd.f32 %v4975_v40, %v4690_v28  ;;  %4215 = vmatmul.bf16.gmra.mxu2 %v4075_v20  ;;  %v4980_v37 = vpop.f32.mrf.mxu0  ;;  %v3978_v40 = vsel %vm6745_vm8, %v3946_v6, 0  ;;  %v5359_v14 = vrot.slane %v5357_v41, 1 }
 0x2ad   : > { %5074 = vst [vmem:[%s9480_s9 + $0x48] sm:$0xff] %v5042_v1 }
 0x2ae   : > { %v4176_v44 = vpop.f32.mrf.mxu2  ;;  %v5466_v17 = vpop.f32.mrf.mxu1  ;;  %4675 = vmatmul.bf16.gmra.mxu3 %v4527_v57 }
 0x2af   : > { %v4241_v54 = vadd.f32 %v4176_v44, %v9030_v22  ;;  %5527 = vst [vmem:[%s9410_s30 + $0x68] sm:$0xff] %v5466_v17  ;;  %v4059_v22 = vunpack.c.l.b16 %v3978_v40 }
 0x2b1   : > { %v4691_v19 = vadd.f32 %v9587_v51, %v4241_v54  ;;  %v4636_v11 = vpop.f32.mrf.mxu3  ;;  %v4746_v51 = vsel %vm10411_vm15, %v9609_v34, 0  ;;  %v4076_v31 = vpack.c.b16 %v4059_v22, %v4058_v60  ;;  %v3948_v34 = vld [vmem:[#allocation2 + $0x8c] sm:$0xf] }
 0x2b2   : > { %v4829_v16 = vunpack.c.l.b16 %v4746_v51  ;;  %v10415_v54 = vld [vmem:[#allocation30_spill] sm:$0xff] }
 0x2b3   : > { %v5043_v3 = vadd.f32 %v4978_v15, %v4691_v19  ;;  %v4983_v43 = vpop.f32.mrf.mxu0  ;;  %v5360_v15 = vsel %vm10412_vm10, %v5355_v9, %v5359_v14  ;;  %v10416_v19 = vld [vmem:[#allocation31_spill] sm:$0xff] }
 0x2b5   : > { %5075 = vst [vmem:[%s9480_s9 + $0x50] sm:$0xff] %v5043_v3 }
 0x2b6   : > { %v4178_v4 = vpop.f32.mrf.mxu2  ;;  %5022 = vmatmul.bf16.gmra.mxu0 %v4877_v61  ;;  %v5469_v13 = vpop.f32.mrf.mxu1 }
 0x2b7   : > { %v4242_v52 = vadd.f32 %v4178_v4, %v9046_v53  ;;  %5528 = vst [vmem:[%s9410_s30 + $0x70] sm:$0xff] %v5469_v13  ;;  %v4846_v53 = vpack.c.b16 %v4829_v16, %v4829_v16 }
 0x2b9   : > { %v4692_v23 = vadd.f32 %v9603_v55, %v4242_v52  ;;  %5508 = vmatmul.bf16.gmra.mxu1 %v5360_v15  ;;  %v4638_v48 = vpop.f32.mrf.mxu3  ;;  %v3980_v55 = vsel %vm6745_vm8, %v3948_v34, 0  ;;  %v4878_v20 = vrot.slane %v4846_v53, 1 }
 0x2ba   : > { %v4061_v7 = vunpack.c.l.b16 %v3980_v55 }
 0x2bb   : > { %v5044_v38 = vadd.f32 %v4980_v37, %v4692_v23  ;;  %4220 = vmatmul.bf16.gmra.mxu2 %v4076_v31  ;;  %v4985_v25 = vpop.f32.mrf.mxu0  ;;  %v10418_v23 = vld [vmem:[#allocation14_spill] sm:$0xff] }
 0x2bc   : > { %v4077_v47 = vpack.c.b16 %v4061_v7, %v4060_v5  ;;  %v10420_v5 = vld [vmem:[#allocation4_spill] sm:$0xff] }
 0x2bd   : > { %5076 = vst [vmem:[%s9480_s9 + $0x58] sm:$0xff] %v5044_v38 }
 0x2be   : > { %v4181_v27 = vpop.f32.mrf.mxu2  ;;  %v5471_v10 = vpop.f32.mrf.mxu1 }
 0x2bf   : > { %v4243_v62 = vadd.f32 %v4181_v27, %v9069_v36  ;;  %5529 = vst [vmem:[%s9410_s30 + $0x78] sm:$0xff] %v5471_v10  ;;  %v4879_v36 = vsel %vm10414_vm13, %v4876_v8, %v4878_v20  ;;  %v10419_v27 = vld [vmem:[#allocation26_spill] sm:$0xff] }
 0x2c1   : > { %v4693_v58 = vadd.f32 %v9623_v42, %v4243_v62  ;;  %v4641_v63 = vpop.f32.mrf.mxu3 }
 0x2c3   : > { %v5045_v2 = vadd.f32 %v4983_v43, %v4693_v58  ;;  %v4988_v28 = vpop.f32.mrf.mxu0  ;;  %v10417_v43 = vld [vmem:[#allocation32_spill] sm:$0xff] }
 0x2c5   : > { %5077 = vst [vmem:[%s9480_s9 + $0x60] sm:$0xff] %v5045_v2 }
 0x2c6   : > { %v4183_v29 = vpop.f32.mrf.mxu2  ;;  %5027 = vmatmul.bf16.gmra.mxu0 %v4879_v36  ;;  %v5474_v42 = vpop.f32.mrf.mxu1 }
 0x2c7   : > { %v4244_v30 = vadd.f32 %v4183_v29, %v9084_v56  ;;  %5530 = vst [vmem:[%s9410_s30 + $0x80] sm:$0xff] %v5474_v42 }
 0x2c9   : > { %v4694_v49 = vadd.f32 %v9638_v24, %v4244_v30  ;;  %v4643_v1 = vpop.f32.mrf.mxu3 }
 0x2cb   : > { %v5046_v21 = vadd.f32 %v4985_v25, %v4694_v49  ;;  %4225 = vmatmul.bf16.gmra.mxu2 %v4077_v47  ;;  %v4990_v39 = vpop.f32.mrf.mxu0  ;;  %v10421_v47 = vld [vmem:[#allocation6_spill] sm:$0xff] }
 0x2cd   : > { %5078 = vst [vmem:[%s9480_s9 + $0x68] sm:$0xff] %v5046_v21 }
 0x2ce   : > { %v4186_v37 = vpop.f32.mrf.mxu2  ;;  %v5476_v6 = vpop.f32.mrf.mxu1 }
 0x2cf   : > { %v4245_v35 = vadd.f32 %v4186_v37, %v9111_v26  ;;  %5531 = vst [vmem:[%s9410_s30 + $0x88] sm:$0xff] %v5476_v6  ;;  %v10422_v6 = vld [vmem:[#allocation18_spill] sm:$0xff] }
 0x2d1   : > { %v4695_v59 = vadd.f32 %v4636_v11, %v4245_v35  ;;  %v4646_v24 = vpop.f32.mrf.mxu3 }
 0x2d3   : > { %v5047_v56 = vadd.f32 %v4988_v28, %v4695_v59  ;;  %v4993_v57 = vpop.f32.mrf.mxu0 }
 0x2d5   : > { %5079 = vst [vmem:[%s9480_s9 + $0x70] sm:$0xff] %v5047_v56 }
 0x2d6   : > { %v4188_v44 = vpop.f32.mrf.mxu2  ;;  %v5479_v40 = vpop.f32.mrf.mxu1 }
 0x2d7   : > { %v4246_v45 = vadd.f32 %v4188_v44, %v10415_v54  ;;  %5532 = vst [vmem:[%s9410_s30 + $0x90] sm:$0xff] %v5479_v40  ;;  %v10423_v40 = vld [vmem:[#allocation3_spill] sm:$0xff] }
 0x2d9   : > { %v4696_v17 = vadd.f32 %v4638_v48, %v4246_v45  ;;  %v4648_v3 = vpop.f32.mrf.mxu3 }
 0x2db   : > { %v5048_v32 = vadd.f32 %v4990_v39, %v4696_v17  ;;  %v4995_v41 = vpop.f32.mrf.mxu0 }
 0x2dd   : > { %5080 = vst [vmem:[%s9480_s9 + $0x78] sm:$0xff] %v5048_v32 }
 0x2de   : > { %v4191_v26 = vpop.f32.mrf.mxu2  ;;  %v5481_v60 = vpop.f32.mrf.mxu1 }
 0x2df   : > { %v4247_v8 = vadd.f32 %v4191_v26, %v10416_v19  ;;  %5533 = vst [vmem:[%s9410_s30 + $0x98] sm:$0xff] %v5481_v60  ;;  %v10424_v60 = vld [vmem:[#allocation21_spill] sm:$0xff] }
 0x2e1   : > { %v4697_v22 = vadd.f32 %v4641_v63, %v4247_v8  ;;  %v4651_v52 = vpop.f32.mrf.mxu3 }
 0x2e3   : > { %v5049_v11 = vadd.f32 %v4993_v57, %v4697_v22  ;;  %v4998_v9 = vpop.f32.mrf.mxu0 }
 0x2e5   : > { %5081 = vst [vmem:[%s9480_s9 + $0x80] sm:$0xff] %v5049_v11 }
 0x2e6   : > { %v4193_v14 = vpop.f32.mrf.mxu2  ;;  %v5484_v4 = vpop.f32.mrf.mxu1 }
 0x2e7   : > { %v4248_v61 = vadd.f32 %v4193_v14, %v10417_v43  ;;  %5534 = vst [vmem:[%s9410_s30 + $0xa0] sm:$0xff] %v5484_v4  ;;  %v10425_v4 = vld [vmem:[#allocation64_spill] sm:$0xff] }
 0x2e9   : > { %v4698_v51 = vadd.f32 %v4643_v1, %v4248_v61  ;;  %v4653_v18 = vpop.f32.mrf.mxu3 }
 0x2eb   : > { %v5050_v31 = vadd.f32 %v4995_v41, %v4698_v51  ;;  %v5000_v13 = vpop.f32.mrf.mxu0 }
 0x2ed   : > { %5082 = vst [vmem:[%s9480_s9 + $0x88] sm:$0xff] %v5050_v31 }
 0x2ee   : > { %v4196_v15 = vpop.f32.mrf.mxu2  ;;  %v5486_v38 = vpop.f32.mrf.mxu1 }
 0x2ef   : > { %v4249_v16 = vadd.f32 %v4196_v15, %v10418_v23  ;;  %5535 = vst [vmem:[%s9410_s30 + $0xa8] sm:$0xff] %v5486_v38 }
 0x2f1   : > { %v4699_v48 = vadd.f32 %v4646_v24, %v4249_v16  ;;  %v4656_v2 = vpop.f32.mrf.mxu3 }
 0x2f3   : > { %v5051_v25 = vadd.f32 %v4998_v9, %v4699_v48  ;;  %v5003_v34 = vpop.f32.mrf.mxu0 }
 0x2f5   : > { %5083 = vst [vmem:[%s9480_s9 + $0x90] sm:$0xff] %v5051_v25 }
 0x2f6   : > { %v4198_v53 = vpop.f32.mrf.mxu2  ;;  %v5489_v12 = vpop.f32.mrf.mxu1 }
 0x2f7   : > { %v4250_v62 = vadd.f32 %v4198_v53, %v10419_v27  ;;  %5536 = vst [vmem:[%s9410_s30 + $0xb0] sm:$0xff] %v5489_v12  ;;  %v10426_v27 = vld [vmem:[#allocation60_spill] sm:$0xff] }
 0x2f9   : > { %v4700_v55 = vadd.f32 %v4648_v3, %v4250_v62  ;;  %v4658_v49 = vpop.f32.mrf.mxu3 }
 0x2fb   : > { %v5052_v10 = vadd.f32 %v5000_v13, %v4700_v55  ;;  %v5005_v58 = vpop.f32.mrf.mxu0 }
 0x2fd   : > { %5084 = vst [vmem:[%s9480_s9 + $0x98] sm:$0xff] %v5052_v10 }
 0x2fe   : > { %v4201_v20 = vpop.f32.mrf.mxu2  ;;  %v5491_v63 = vpop.f32.mrf.mxu1 }
 0x2ff   : > { %v4251_v7 = vadd.f32 %v4201_v20, %v10420_v5  ;;  %5537 = vst [vmem:[%s9410_s30 + $0xb8] sm:$0xff] %v5491_v63 }
 0x301   : > { %v4701_v28 = vadd.f32 %v4651_v52, %v4251_v7  ;;  %v4661_v44 = vpop.f32.mrf.mxu3 }
 0x303   : > { %v5053_v36 = vadd.f32 %v5003_v34, %v4701_v28  ;;  %v5008_v29 = vpop.f32.mrf.mxu0 }
 0x305   : > { %5085 = vst [vmem:[%s9480_s9 + $0xa0] sm:$0xff] %v5053_v36 }
 0x306   : > { %v4203_v30 = vpop.f32.mrf.mxu2  ;;  %v5494_v21 = vpop.f32.mrf.mxu1 }
 0x307   : > { %v4252_v42 = vadd.f32 %v4203_v30, %v10421_v47  ;;  %5538 = vst [vmem:[%s9410_s30 + $0xc0] sm:$0xff] %v5494_v21 }
 0x309   : > { %v4702_v1 = vadd.f32 %v4653_v18, %v4252_v42  ;;  %v4663_v19 = vpop.f32.mrf.mxu3 }
 0x30b   : > { %v5054_v39 = vadd.f32 %v5005_v58, %v4702_v1  ;;  %v5010_v37 = vpop.f32.mrf.mxu0 }
 0x30d   : > { %5086 = vst [vmem:[%s9480_s9 + $0xa8] sm:$0xff] %v5054_v39 }
 0x30e   : > { %v4206_v35 = vpop.f32.mrf.mxu2  ;;  %v5496_v56 = vpop.f32.mrf.mxu1 }
 0x30f   : > { %v4253_v59 = vadd.f32 %v4206_v35, %v10422_v6  ;;  %5539 = vst [vmem:[%s9410_s30 + $0xc8] sm:$0xff] %v5496_v56 }
 0x311   : > { %v4703_v57 = vadd.f32 %v4656_v2, %v4253_v59  ;;  %v4666_v61 = vpop.f32.mrf.mxu3  ;;  %v10427_v2 = vld [vmem:[#allocation67_spill] sm:$0xff] }
 0x313   : > { %v5055_v24 = vadd.f32 %v5008_v29, %v4703_v57  ;;  %v5013_v54 = vpop.f32.mrf.mxu0 }
 0x315   : > { %5087 = vst [vmem:[%s9480_s9 + $0xb0] sm:$0xff] %v5055_v24 }
 0x316   : > { %v4208_v45 = vpop.f32.mrf.mxu2  ;;  %v5499_v32 = vpop.f32.mrf.mxu1 }
 0x317   : > { %v4254_v17 = vadd.f32 %v4208_v45, %v10423_v40  ;;  %5540 = vst [vmem:[%s9410_s30 + $0xd0] sm:$0xff] %v5499_v32 }
 0x319   : > { %v4704_v41 = vadd.f32 %v4658_v49, %v4254_v17  ;;  %v4668_v38 = vpop.f32.mrf.mxu3 }
 0x31b   : > { %v5056_v26 = vadd.f32 %v5010_v37, %v4704_v41  ;;  %v5015_v3 = vpop.f32.mrf.mxu0 }
 0x31d   : > { %5088 = vst [vmem:[%s9480_s9 + $0xb8] sm:$0xff] %v5056_v26 }
 0x31e   : > { %v4211_v8 = vpop.f32.mrf.mxu2  ;;  %v5501_v11 = vpop.f32.mrf.mxu1 }
 0x31f   : > { %v4255_v22 = vadd.f32 %v4211_v8, %v10424_v60  ;;  %5541 = vst [vmem:[%s9410_s30 + $0xd8] sm:$0xff] %v5501_v11 }
 0x321   : > { %v4705_v9 = vadd.f32 %v4661_v44, %v4255_v22  ;;  %v4671_v10 = vpop.f32.mrf.mxu3 }
 0x323   : > { %v5057_v14 = vadd.f32 %v5013_v54, %v4705_v9  ;;  %v5018_v52 = vpop.f32.mrf.mxu0 }
 0x325   : > { %5089 = vst [vmem:[%s9480_s9 + $0xc0] sm:$0xff] %v5057_v14 }
 0x326   : > { %v4213_v43 = vpop.f32.mrf.mxu2  ;;  %v5504_v31 = vpop.f32.mrf.mxu1 }
 0x327   : > { %v4256_v51 = vadd.f32 %v4213_v43, %v10425_v4  ;;  %5542 = vst [vmem:[%s9410_s30 + $0xe0] sm:$0xff] %v5504_v31 }
 0x329   : > { %v4706_v13 = vadd.f32 %v4663_v19, %v4256_v51  ;;  %v4673_v36 = vpop.f32.mrf.mxu3 }
 0x32b   : > { %v5058_v15 = vadd.f32 %v5015_v3, %v4706_v13  ;;  %v5020_v18 = vpop.f32.mrf.mxu0 }
 0x32d   : > { %5090 = vst [vmem:[%s9480_s9 + $0xc8] sm:$0xff] %v5058_v15 }
 0x32e   : > { %v4216_v23 = vpop.f32.mrf.mxu2  ;;  %v5506_v48 = vpop.f32.mrf.mxu1 }
 0x32f   : > { %v4257_v16 = vadd.f32 %v4216_v23, %v9364_v50  ;;  %5543 = vst [vmem:[%s9410_s30 + $0xe8] sm:$0xff] %v5506_v48 }
 0x331   : > { %v4707_v25 = vadd.f32 %v4666_v61, %v4257_v16  ;;  %v4676_v21 = vpop.f32.mrf.mxu3 }
 0x333   : > { %v5059_v34 = vadd.f32 %v5018_v52, %v4707_v25  ;;  %v5023_v50 = vpop.f32.mrf.mxu0 }
 0x335   : > { %5091 = vst [vmem:[%s9480_s9 + $0xd0] sm:$0xff] %v5059_v34 }
 0x336   : > { %v4218_v53 = vpop.f32.mrf.mxu2  ;;  %v5509_v12 = vpop.f32.mrf.mxu1 }
 0x337   : > { %v4258_v62 = vadd.f32 %v4218_v53, %v10426_v27  ;;  %5544 = vst [vmem:[%s9410_s30 + $0xf0] sm:$0xff] %v5509_v12 }
 0x339   : > { %v4708_v55 = vadd.f32 %v4668_v38, %v4258_v62  ;;  %v4678_v57 = vpop.f32.mrf.mxu3 }
 0x33b   : > { %v5060_v58 = vadd.f32 %v5020_v18, %v4708_v55  ;;  %v5025_v29 = vpop.f32.mrf.mxu0 }
 0x33d   : > { %5092 = vst [vmem:[%s9480_s9 + $0xd8] sm:$0xff] %v5060_v58 }
 0x33e   : > { %v4221_v20 = vpop.f32.mrf.mxu2  ;;  %v5511_v7 = vpop.f32.mrf.mxu1 }
 0x33f   : > { %v4259_v5 = vadd.f32 %v4221_v20, %v10427_v2  ;;  %5545 = vst [vmem:[%s9410_s30 + $0xf8] sm:$0xff] %v5511_v7 }
 0x341   : > { %v4709_v63 = vadd.f32 %v4671_v10, %v4259_v5 }
 0x343   : > { %v5061_v28 = vadd.f32 %v5023_v50, %v4709_v63  ;;  %v5028_v37 = vpop.f32.mrf.mxu0 }
 0x345   : > { %5093 = vst [vmem:[%s9480_s9 + $0xe0] sm:$0xff] %v5061_v28 }
 0x346   : > { %v4223_v30 = vpop.f32.mrf.mxu2 }
 0x347   : > { %v4260_v47 = vadd.f32 %v4223_v30, %v9422_v33 }
 0x349   : > { %v4710_v42 = vadd.f32 %v4673_v36, %v4260_v47 }
 0x34b   : > { %v5062_v49 = vadd.f32 %v5025_v29, %v4710_v42  ;;  %v5030_v24 = vpop.f32.mrf.mxu0 }
 0x34d   : > { %5094 = vst [vmem:[%s9480_s9 + $0xe8] sm:$0xff] %v5062_v49 }
 0x34e   : > { %v4226_v1 = vpop.f32.mrf.mxu2 }
 0x34f   : > { %v4261_v39 = vadd.f32 %v4226_v1, %v9447_v0 }
 0x351   : > { %v4711_v35 = vadd.f32 %v4676_v21, %v4261_v39 }
 0x353   : > { %v5063_v6 = vadd.f32 %v5028_v37, %v4711_v35 }
 0x355   : > { %5095 = vst [vmem:[%s9480_s9 + $0xf0] sm:$0xff] %v5063_v6 }
 0x356   : > { %v4228_v59 = vpop.f32.mrf.mxu2 }
 0x357   : > { %v4262_v56 = vadd.f32 %v4228_v59, %v9461_v46 }
 0x359   : > { %v4712_v44 = vadd.f32 %v4678_v57, %v4262_v56 }
 0x35b   : > { %v5064_v54 = vadd.f32 %v5030_v24, %v4712_v44 }
 0x35d   : > { %5096 = vst [vmem:[%s9480_s9 + $0xf8] sm:$0xff] %v5064_v54 }
 0x35e PF: > { %s17_s21 = sadd.s32 1, %s6558_s21  }
 0x35f   : > { %p14_p4 = scmp.ge.s32.totalorder %s17_s21, 4  }
 0x361   :  { %16 = sbr.rel (!%p14_p4) target bundleno = 1 (0x1), region = 90 }

</bundles_post_ra>
